<compile_context>
chip_gen: v6e
topology: v6e:2x2x1
jax: 0.10.0
libtpu: 0.0.40
codegen_flags: <defaults>
</compile_context>

<pallas_src>
import jax
import jax.numpy as jnp
from jax.experimental import pallas as pl
from jax.experimental.pallas import tpu as pltpu


# ----------------------------- Pallas kernels ------------------------------

def _mm_bias_kernel(a_ref, b_ref, bias_ref, o_ref, acc_ref):
    """out = A @ B + bias."""
    @pl.when(pl.program_id(2) == 0)
    def _():
        acc_ref[...] = jnp.zeros_like(acc_ref)

    acc_ref[...] += jnp.dot(a_ref[...], b_ref[...],
                            preferred_element_type=jnp.float32)

    @pl.when(pl.program_id(2) == pl.num_programs(2) - 1)
    def _():
        o_ref[...] = (acc_ref[...] + bias_ref[...]).astype(o_ref.dtype)


def _mm_bnrelu_kernel(a_ref, b_ref, scale_ref, shift_ref, o_ref, acc_ref):
    """out = relu((A @ B) * scale + shift)  (fused inference BN + ReLU)."""
    @pl.when(pl.program_id(2) == 0)
    def _():
        acc_ref[...] = jnp.zeros_like(acc_ref)

    acc_ref[...] += jnp.dot(a_ref[...], b_ref[...],
                            preferred_element_type=jnp.float32)

    @pl.when(pl.program_id(2) == pl.num_programs(2) - 1)
    def _():
        y = acc_ref[...] * scale_ref[...] + shift_ref[...]
        o_ref[...] = jnp.maximum(y, 0.0).astype(o_ref.dtype)


def _mm_resadd_kernel(a_ref, b_ref, res_ref, o_ref, acc_ref):
    """out = A @ B + residual  (fused shortcut add)."""
    @pl.when(pl.program_id(2) == 0)
    def _():
        acc_ref[...] = jnp.zeros_like(acc_ref)

    acc_ref[...] += jnp.dot(a_ref[...], b_ref[...],
                            preferred_element_type=jnp.float32)

    @pl.when(pl.program_id(2) == pl.num_programs(2) - 1)
    def _():
        o_ref[...] = (acc_ref[...] +
                      res_ref[...].astype(jnp.float32)).astype(o_ref.dtype)


def _mm_prologue_bias_kernel(a_ref, sin_ref, tin_ref, b_ref, bias_ref,
                             o_ref, acc_ref):
    """out = relu(A * in_scale + in_shift) @ B + bias.
    (BN+ReLU fused as a GEMM prologue; only valid when A has no zero-pad.)"""
    @pl.when(pl.program_id(2) == 0)
    def _():
        acc_ref[...] = jnp.zeros_like(acc_ref)

    a = a_ref[...].astype(jnp.float32)
    a = jnp.maximum(a * sin_ref[...] + tin_ref[...], 0.0).astype(jnp.bfloat16)
    acc_ref[...] += jnp.dot(a, b_ref[...],
                            preferred_element_type=jnp.float32)

    @pl.when(pl.program_id(2) == pl.num_programs(2) - 1)
    def _():
        o_ref[...] = (acc_ref[...] + bias_ref[...]).astype(o_ref.dtype)


def _bn_relu_kernel(x_ref, s_ref, b_ref, o_ref):
    x = x_ref[...].astype(jnp.float32)
    o_ref[...] = jnp.maximum(x * s_ref[...] + b_ref[...], 0.0).astype(o_ref.dtype)


def _tap_max_kernel(x_ref, o_ref):
    taps = x_ref.shape[0]
    r = x_ref[0]
    for t in range(1, taps):                 # VPU reduce over the taps
        r = jnp.maximum(r, x_ref[t])
    o_ref[...] = r.astype(o_ref.dtype)


def _tap_mean_kernel(x_ref, o_ref):
    taps = x_ref.shape[0]
    r = x_ref[0].astype(jnp.float32)
    for t in range(1, taps):
        r = r + x_ref[t].astype(jnp.float32)
    o_ref[...] = (r * (1.0 / taps)).astype(o_ref.dtype)


def _tail_kernel(x_ref, s_ref, t_ref, w_ref, bias_ref, o_ref):
    """Fused tail: relu(bn(x)) -> global avg pool -> FC."""
    x = x_ref[...].astype(jnp.float32)                  # (tb, HW, C)
    y = jnp.maximum(x * s_ref[...] + t_ref[...], 0.0)
    g = jnp.mean(y, axis=1).astype(jnp.bfloat16)        # (tb, C)
    o_ref[...] = (jnp.dot(g, w_ref[...], preferred_element_type=jnp.float32)
                  + bias_ref[...]).astype(o_ref.dtype)


# ----------------------------- Pallas wrappers -----------------------------

_VMEM_LIMIT = 32 * 1024 * 1024   # safe on v5e/v6e (128 MiB) and v7x (64 MiB)


def _pick_tiles(M, N, K):
    """Tile selection: 256-wide M/N when possible, full-dim blocks for small /
    unaligned dims (allowed by the 'block == full array dim' exception)."""
    tm = 256 if M >= 256 else M
    tn = 256 if N >= 256 else N
    if K % 256 == 0 and K > 2048:
        tk = 256
        for cand in (2048, 1024, 512, 256):
            if K % cand == 0:
                tk = cand
                break
    else:
        tk = K                              # single full-K step
    return tm, tn, tk


def pallas_matmul_fused(a, b, *, bias=None, scale=None, shift=None,
                        residual=None, in_scale=None, in_shift=None,
                        out_dtype=jnp.bfloat16):
    """C = A @ B with a fused epilogue (bias | BN+ReLU | residual add) and an
    optional fused BN+ReLU prologue on A.  bf16 MXU inputs, f32 accumulation."""
    M, K = a.shape
    K2, N = b.shape
    assert K == K2
    tm, tn, tk = _pick_tiles(M, N, K)
    grid = (pl.cdiv(M, tm), pl.cdiv(N, tn), pl.cdiv(K, tk))

    a = a.astype(jnp.bfloat16)
    b = b.astype(jnp.bfloat16)

    a_spec = pl.BlockSpec((tm, tk), lambda i, j, k: (i, k))
    b_spec = pl.BlockSpec((tk, tn), lambda i, j, k: (k, j))
    n_row_spec = pl.BlockSpec((1, tn), lambda i, j, k: (0, j))
    k_row_spec = pl.BlockSpec((1, tk), lambda i, j, k: (0, k))
    res_spec = pl.BlockSpec((tm, tn), lambda i, j, k: (i, j))

    if in_scale is not None:
        if bias is None:
            bias = jnp.zeros((N,), jnp.float32)
        kernel = _mm_prologue_bias_kernel
        operands = [a,
                    in_scale.reshape(1, K).astype(jnp.float32),
                    in_shift.reshape(1, K).astype(jnp.float32),
                    b,
                    bias.reshape(1, N).astype(jnp.float32)]
        in_specs = [a_spec, k_row_spec, k_row_spec, b_spec, n_row_spec]
    elif scale is not None:
        kernel = _mm_bnrelu_kernel
        operands = [a, b,
                    scale.reshape(1, N).astype(jnp.float32),
                    shift.reshape(1, N).astype(jnp.float32)]
        in_specs = [a_spec, b_spec, n_row_spec, n_row_spec]
    elif residual is not None:
        kernel = _mm_resadd_kernel
        operands = [a, b, residual.astype(jnp.bfloat16)]
        in_specs = [a_spec, b_spec, res_spec]
    else:
        if bias is None:
            bias = jnp.zeros((N,), jnp.float32)
        kernel = _mm_bias_kernel
        operands = [a, b, bias.reshape(1, N).astype(jnp.float32)]
        in_specs = [a_spec, b_spec, n_row_spec]

    return pl.pallas_call(
        kernel,
        out_shape=jax.ShapeDtypeStruct((M, N), out_dtype),
        grid_spec=pltpu.PrefetchScalarGridSpec(
            num_scalar_prefetch=0,
            grid=grid,
            in_specs=in_specs,
            out_specs=pl.BlockSpec((tm, tn), lambda i, j, k: (i, j)),
            scratch_shapes=[pltpu.VMEM((tm, tn), jnp.float32)],
        ),
        compiler_params=pltpu.CompilerParams(
            dimension_semantics=("parallel", "parallel", "arbitrary"),
            vmem_limit_bytes=_VMEM_LIMIT),
    )(*operands)


def bn_relu(x, scale, shift):
    """Standalone fused (inference) BatchNorm2d + ReLU on NHWC, gridded over rows."""
    N, H, W, C = x.shape
    M = N * H * W
    x2 = x.reshape(M, C)
    tr = 512 if M >= 512 else M
    out = pl.pallas_call(
        _bn_relu_kernel,
        out_shape=jax.ShapeDtypeStruct((M, C), x.dtype),
        grid_spec=pltpu.PrefetchScalarGridSpec(
            num_scalar_prefetch=0,
            grid=(pl.cdiv(M, tr),),
            in_specs=[pl.BlockSpec((tr, C), lambda i: (i, 0)),
                      pl.BlockSpec((1, C), lambda i: (0, 0)),
                      pl.BlockSpec((1, C), lambda i: (0, 0))],
            out_specs=pl.BlockSpec((tr, C), lambda i: (i, 0))),
        compiler_params=pltpu.CompilerParams(
            dimension_semantics=("parallel",),
            vmem_limit_bytes=_VMEM_LIMIT),
    )(x2, scale.reshape(1, C).astype(jnp.float32),
      shift.reshape(1, C).astype(jnp.float32))
    return out.reshape(N, H, W, C)


def _tap_reduce(stacked, kernel, out_dtype):
    """Reduce a (taps, rows, C) stack to (rows, C) with a lane-dense output."""
    taps, M, C = stacked.shape
    tr = 512 if M >= 512 else M
    return pl.pallas_call(
        kernel,
        out_shape=jax.ShapeDtypeStruct((M, C), out_dtype),
        grid_spec=pltpu.PrefetchScalarGridSpec(
            num_scalar_prefetch=0,
            grid=(pl.cdiv(M, tr),),
            in_specs=[pl.BlockSpec((taps, tr, C), lambda i: (0, i, 0))],
            out_specs=pl.BlockSpec((tr, C), lambda i: (i, 0))),
        compiler_params=pltpu.CompilerParams(
            dimension_semantics=("parallel",),
            vmem_limit_bytes=_VMEM_LIMIT),
    )(stacked)


def conv2d(x, w_mat, kh, kw, stride, padding, *, bias=None, scale=None,
           shift=None, residual=None, in_scale=None, in_shift=None,
           out_dtype=jnp.bfloat16):
    """NHWC conv via im2col (plain-JAX strided-slice glue) + fused Pallas GEMM.
    w_mat is the pre-transformed (kh*kw*Cin, Cout) bf16 matrix.
    in_scale/in_shift fuse BN+ReLU as a GEMM prologue (only valid w/ padding=0)."""
    N, H, W, Cin = x.shape
    Cout = w_mat.shape[1]
    Ho = (H + 2 * padding - kh) // stride + 1
    Wo = (W + 2 * padding - kw) // stride + 1
    if in_scale is not None:
        assert padding == 0                    # prologue BN would hit pad zeros
        in_scale = jnp.tile(in_scale, kh * kw)
        in_shift = jnp.tile(in_shift, kh * kw)
    if padding:
        x = jnp.pad(x, ((0, 0), (padding, padding), (padding, padding), (0, 0)))
    if kh == 1 and kw == 1 and stride == 1:
        A = x.reshape(N * Ho * Wo, Cin)
    else:
        cols = []
        for di in range(kh):
            for dj in range(kw):
                cols.append(jax.lax.slice(
                    x,
                    (0, di, dj, 0),
                    (N, di + stride * (Ho - 1) + 1,
                     dj + stride * (Wo - 1) + 1, Cin),
                    (1, stride, stride, 1)))
        A = jnp.concatenate(cols, axis=-1).reshape(N * Ho * Wo, kh * kw * Cin)
    res2 = None if residual is None else residual.reshape(N * Ho * Wo, Cout)
    out = pallas_matmul_fused(A, w_mat, bias=bias, scale=scale, shift=shift,
                              residual=res2, in_scale=in_scale,
                              in_shift=in_shift, out_dtype=out_dtype)
    return out.reshape(N, Ho, Wo, Cout)


def maxpool_3x3_s2_p1(x):
    """MaxPool2d(kernel=3, stride=2, padding=1) with dense (rows, C) output."""
    N, H, W, C = x.shape
    Ho = (H + 2 - 3) // 2 + 1
    Wo = (W + 2 - 3) // 2 + 1
    xp = jnp.pad(x, ((0, 0), (1, 1), (1, 1), (0, 0)),
                 constant_values=-jnp.inf)
    wins = []
    for di in range(3):
        for dj in range(3):
            win = jax.lax.slice(
                xp, (0, di, dj, 0),
                (N, di + 2 * (Ho - 1) + 1, dj + 2 * (Wo - 1) + 1, C),
                (1, 2, 2, 1))
            wins.append(win.reshape(1, N * Ho * Wo, C))
    stacked = jnp.concatenate(wins, axis=0)              # (9, rows, C)
    out = _tap_reduce(stacked, _tap_max_kernel, x.dtype)
    return out.reshape(N, Ho, Wo, C)


def avgpool_half(x):
    """adaptive_avg_pool2d to half spatial size (only case this net hits)."""
    N, H, W, C = x.shape
    Ho, Wo = H // 2, W // 2
    wins = []
    for di in range(2):
        for dj in range(2):
            win = jax.lax.slice(
                x, (0, di, dj, 0),
                (N, di + 2 * (Ho - 1) + 1, dj + 2 * (Wo - 1) + 1, C),
                (1, 2, 2, 1))
            wins.append(win.reshape(1, N * Ho * Wo, C))
    stacked = jnp.concatenate(wins, axis=0)              # (4, rows, C)
    out = _tap_reduce(stacked, _tap_mean_kernel, x.dtype)
    return out.reshape(N, Ho, Wo, C)


def bn_relu_gap_fc(x, scale, shift, fc_w, fc_b):
    """Fused tail: BN + ReLU + AdaptiveAvgPool2d((1,1)) + flatten + Linear."""
    N, H, W, C = x.shape
    HW = H * W
    num_classes = fc_w.shape[1]
    x3 = x.reshape(N, HW, C).astype(jnp.bfloat16)
    tb = N if N <= 64 else 64
    return pl.pallas_call(
        _tail_kernel,
        out_shape=jax.ShapeDtypeStruct((N, num_classes), jnp.float32),
        grid_spec=pltpu.PrefetchScalarGridSpec(
            num_scalar_prefetch=0,
            grid=(pl.cdiv(N, tb),),
            in_specs=[pl.BlockSpec((tb, HW, C), lambda i: (i, 0, 0)),
                      pl.BlockSpec((1, 1, C), lambda i: (0, 0, 0)),
                      pl.BlockSpec((1, 1, C), lambda i: (0, 0, 0)),
                      pl.BlockSpec((C, num_classes), lambda i: (0, 0)),
                      pl.BlockSpec((1, num_classes), lambda i: (0, 0))],
            out_specs=pl.BlockSpec((tb, num_classes), lambda i: (i, 0))),
        compiler_params=pltpu.CompilerParams(
            dimension_semantics=("parallel",),
            vmem_limit_bytes=_VMEM_LIMIT),
    )(x3,
      scale.reshape(1, 1, C).astype(jnp.float32),
      shift.reshape(1, 1, C).astype(jnp.float32),
      fc_w.astype(jnp.bfloat16),
      fc_b.reshape(1, num_classes).astype(jnp.float32))


# ----------------------------- parameter init ------------------------------

def _conv_w(key, cout, cin, kh, kw):
    fan_out = cout * kh * kw                 # kaiming_normal_, mode='fan_out'
    std = (2.0 / fan_out) ** 0.5
    return std * jax.random.normal(key, (cout, cin, kh, kw), jnp.float32)


def _linear_w(key, out_f, in_f):
    std = (2.0 / out_f) ** 0.5
    return std * jax.random.normal(key, (out_f, in_f), jnp.float32)


def _bn_params(c):
    return (jnp.ones((c,), jnp.float32),     # gamma
            jnp.zeros((c,), jnp.float32),    # beta
            jnp.zeros((c,), jnp.float32),    # running_mean
            jnp.ones((c,), jnp.float32))     # running_var


def init_params(key, layers=(1, 1, 1, 1), num_classes=10):
    keys = iter(jax.random.split(key, 64))
    params = {}
    params['conv1_w'] = _conv_w(next(keys), 64, 3, 7, 7)
    params['conv1_b'] = jnp.zeros((64,), jnp.float32)    # Conv2d default bias=True
    in_planes = 64
    plane_cfg = [(64, 1), (128, 2), (256, 2), (512, 2)]
    for li, ((planes, stride), nblocks) in enumerate(zip(plane_cfg, layers)):
        blocks = []
        for bi in range(nblocks):
            s = stride if bi == 0 else 1
            blk = {
                'bn1': _bn_params(in_planes),
                'conv1_w': _conv_w(next(keys), planes, in_planes, 3, 3),
                'bn2': _bn_params(planes),
                'conv2_w': _conv_w(next(keys), planes, planes, 3, 3),
            }
            if bi == 0 and (s != 1 or in_planes != planes):
                blk['shortcut'] = {
                    'bn': _bn_params(in_planes),
                    'conv_w': _conv_w(next(keys), planes, in_planes, 1, 1),
                    'conv_b': jnp.zeros((planes,), jnp.float32),
                }
            blocks.append(blk)
            in_planes = planes
        params[f'layer{li + 1}'] = blocks
    params['bn'] = _bn_params(512)
    params['fc_w'] = _linear_w(next(keys), num_classes, 512)
    params['fc_b'] = jnp.zeros((num_classes,), jnp.float32)
    return params


def _bn_scale_shift(bn, eps=1e-5):
    gamma, beta, mean, var = bn
    scale = gamma / jnp.sqrt(var + eps)
    shift = beta - mean * scale
    return scale, shift


def _prep_conv(w):
    """OIHW -> im2col (kh*kw*Cin, Cout) bf16, done once outside forward."""
    cout, cin, kh, kw = w.shape
    return jnp.transpose(w, (2, 3, 1, 0)).reshape(kh * kw * cin, cout).astype(jnp.bfloat16)


def prepare_params(raw, eps=1e-5):
    """One-time transform: im2col bf16 weights + folded BN (scale, shift)."""
    p = {'conv1_w': _prep_conv(raw['conv1_w']), 'conv1_b': raw['conv1_b']}
    for li in range(4):
        blks = []
        for blk in raw[f'layer{li + 1}']:
            nb = {
                'bn1': _bn_scale_shift(blk['bn1'], eps),
                'conv1_w': _prep_conv(blk['conv1_w']),
                'bn2': _bn_scale_shift(blk['bn2'], eps),
                'conv2_w': _prep_conv(blk['conv2_w']),
            }
            if 'shortcut' in blk:
                sc = blk['shortcut']
                nb['sc_bn'] = _bn_scale_shift(sc['bn'], eps)
                nb['sc_conv_w'] = _prep_conv(sc['conv_w'])
                nb['sc_conv_b'] = sc['conv_b']
            blks.append(nb)
        p[f'layer{li + 1}'] = blks
    p['bn'] = _bn_scale_shift(raw['bn'], eps)
    p['fc_w'] = jnp.transpose(raw['fc_w']).astype(jnp.bfloat16)   # (512, classes)
    p['fc_b'] = raw['fc_b']
    return p


# ------------------------------- forward -----------------------------------

def _preact_block(x, blk, stride):
    a1 = bn_relu(x, *blk['bn1'])                                  # pre-activation
    # conv1 (3x3, stride) with BN2+ReLU fused into the GEMM epilogue
    h = conv2d(a1, blk['conv1_w'], 3, 3, stride=stride, padding=1,
               scale=blk['bn2'][0], shift=blk['bn2'][1])
    # shortcut branch
    if 'sc_conv_w' in blk:                                        # ShortCutC(x, out)
        s = avgpool_half(x)                  # adaptive_avg_pool2d(x, out.shape[2:])
        # BN+ReLU fused as a prologue into the 1x1 conv GEMM (padding == 0)
        s = conv2d(s, blk['sc_conv_w'], 1, 1, stride=1, padding=0,
                   bias=blk['sc_conv_b'],
                   in_scale=blk['sc_bn'][0], in_shift=blk['sc_bn'][1])
    else:                                                         # ShortCut(x, out)
        s = x
    # conv2 (3x3) with the residual add fused into the GEMM epilogue
    return conv2d(h, blk['conv2_w'], 3, 3, stride=1, padding=1, residual=s)


def forward(p, x_nchw):
    x = jnp.transpose(x_nchw, (0, 2, 3, 1)).astype(jnp.bfloat16)  # NCHW -> NHWC bf16
    x = conv2d(x, p['conv1_w'], 7, 7, stride=2, padding=3, bias=p['conv1_b'])
    x = maxpool_3x3_s2_p1(x)
    layer_strides = (1, 2, 2, 2)
    for li in range(4):
        for bi, blk in enumerate(p[f'layer{li + 1}']):
            s = layer_strides[li] if bi == 0 else 1
            x = _preact_block(x, blk, s)
    # fused: bn + relu + global avg pool + flatten + fc   -> (N, classes) f32
    return bn_relu_gap_fc(x, p['bn'][0], p['bn'][1], p['fc_w'], p['fc_b'])


# --------------------------------- main -------------------------------------

if __name__ == "__main__":
    key = jax.random.PRNGKey(0)
    pkey, xkey = jax.random.split(key)
    raw = init_params(pkey, layers=(1, 1, 1, 1), num_classes=10)
    params = prepare_params(raw)                                  # one-time prep
    x = jax.random.normal(xkey, (2, 3, 32, 32), jnp.float32)      # small NCHW input

    fwd = jax.jit(forward)
    out = jax.block_until_ready(fwd(params, x))
    assert out.shape == (2, 10) and out.dtype == jnp.float32
    print("KERNEL_OK")
</pallas_src>

<mosaic_0001>
module attributes {stable_mosaic.version = 11 : i64} {
  func.func @_mm_bias_kernel(%arg0: i32, %arg1: i32, %arg2: i32, %arg3: memref<256x147xbf16, #tpu.memory_space<vmem>>, %arg4: memref<147x64xbf16, #tpu.memory_space<vmem>>, %arg5: memref<1x64xf32, #tpu.memory_space<vmem>>, %arg6: memref<256x64xbf16, #tpu.memory_space<vmem>>, %arg7: memref<256x64xf32, #tpu.memory_space<vmem>>) attributes {dimension_semantics = [#tpu.dimension_semantics<parallel>, #tpu.dimension_semantics<parallel>, #tpu.dimension_semantics<arbitrary>], iteration_bounds = array<i64: 2, 1, 1>, scalar_prefetch = 0 : i64, scratch_operands = 1 : i64, tpu.core_type = #tpu.core_type<tc>, window_params = [{transform_indices = @transform_0, window_bounds = array<i64: 256, 147>}, {transform_indices = @transform_1, window_bounds = array<i64: 147, 64>}, {transform_indices = @transform_2, window_bounds = array<i64: 1, 64>}, {transform_indices = @transform_3, window_bounds = array<i64: 256, 64>}]} {
    %c0_i32 = arith.constant 0 : i32
    %0 = arith.cmpi eq, %arg2, %c0_i32 : i32
    %1 = arith.extui %0 : i1 to i32
    %c0_i32_0 = arith.constant 0 : i32
    %2 = arith.cmpi ne, %1, %c0_i32_0 : i32
    scf.if %2 {
      %cst_10 = arith.constant 0.000000e+00 : f32
      %12 = vector.broadcast %cst_10 : f32 to vector<256x64xf32>
      %c0_11 = arith.constant 0 : index
      %c0_12 = arith.constant 0 : index
      %13 = vector.load %arg7[%c0_11, %c0_12] : memref<256x64xf32, #tpu.memory_space<vmem>>, vector<256x64xf32>
      tpu.vector_store %arg7[%c0_11, %c0_12], %12 {strides = array<i32>} : memref<256x64xf32, #tpu.memory_space<vmem>>, vector<256x64xf32>,
    } else {
    }
    %c0 = arith.constant 0 : index
    %c0_1 = arith.constant 0 : index
    %3 = vector.load %arg7[%c0, %c0_1] : memref<256x64xf32, #tpu.memory_space<vmem>>, vector<256x64xf32>
    %c0_2 = arith.constant 0 : index
    %c0_3 = arith.constant 0 : index
    %4 = vector.load %arg3[%c0_2, %c0_3] : memref<256x147xbf16, #tpu.memory_space<vmem>>, vector<256x147xbf16>
    %c0_4 = arith.constant 0 : index
    %c0_5 = arith.constant 0 : index
    %5 = vector.load %arg4[%c0_4, %c0_5] : memref<147x64xbf16, #tpu.memory_space<vmem>>, vector<147x64xbf16>
    %cst = arith.constant dense<0.000000e+00> : vector<256x64xf32>
    %6 = tpu.matmul %4, %5, %cst {dimension_numbers = #tpu.dot_dimension_numbers<[1], [0], [0], [1], [0, 0, 1, 1], [], []>} : vector<256x147xbf16>, vector<147x64xbf16>, vector<256x64xf32> -> vector<256x64xf32>
    %7 = arith.addf %3, %6 : vector<256x64xf32>
    %c0_6 = arith.constant 0 : index
    %c0_7 = arith.constant 0 : index
    %8 = vector.load %arg7[%c0_6, %c0_7] : memref<256x64xf32, #tpu.memory_space<vmem>>, vector<256x64xf32>
    tpu.vector_store %arg7[%c0_6, %c0_7], %7 {strides = array<i32>} : memref<256x64xf32, #tpu.memory_space<vmem>>, vector<256x64xf32>,
    %c0_i32_8 = arith.constant 0 : i32
    %9 = arith.cmpi eq, %arg2, %c0_i32_8 : i32
    %10 = arith.extui %9 : i1 to i32
    %c0_i32_9 = arith.constant 0 : i32
    %11 = arith.cmpi ne, %10, %c0_i32_9 : i32
    scf.if %11 {
      %c0_10 = arith.constant 0 : index
      %c0_11 = arith.constant 0 : index
      %12 = vector.load %arg7[%c0_10, %c0_11] : memref<256x64xf32, #tpu.memory_space<vmem>>, vector<256x64xf32>
      %c0_12 = arith.constant 0 : index
      %c0_13 = arith.constant 0 : index
      %13 = vector.load %arg5[%c0_12, %c0_13] : memref<1x64xf32, #tpu.memory_space<vmem>>, vector<1x64xf32>
      %14 = vector.broadcast %13 : vector<1x64xf32> to vector<256x64xf32>
      %15 = arith.addf %12, %14 : vector<256x64xf32>
      %16 = arith.truncf %15 : vector<256x64xf32> to vector<256x64xbf16>
      %c0_14 = arith.constant 0 : index
      %c0_15 = arith.constant 0 : index
      %17 = vector.load %arg6[%c0_14, %c0_15] : memref<256x64xbf16, #tpu.memory_space<vmem>>, vector<256x64xbf16>
      tpu.vector_store %arg6[%c0_14, %c0_15], %16 {strides = array<i32>} : memref<256x64xbf16, #tpu.memory_space<vmem>>, vector<256x64xbf16>,
    } else {
    }
    return
  }
  func.func @transform_0(%arg0: i32, %arg1: i32, %arg2: i32) -> (i32, i32) {
    %c0_i32 = arith.constant 0 : i32
    return %arg0, %arg2 : i32, i32
  }
  func.func @transform_1(%arg0: i32, %arg1: i32, %arg2: i32) -> (i32, i32) {
    %c0_i32 = arith.constant 0 : i32
    return %arg2, %arg1 : i32, i32
  }
  func.func @transform_2(%arg0: i32, %arg1: i32, %arg2: i32) -> (i32, i32) {
    %c0_i32 = arith.constant 0 : i32
    %c0_i32_0 = arith.constant 0 : i32
    return %c0_i32, %arg1 : i32, i32
  }
  func.func @transform_3(%arg0: i32, %arg1: i32, %arg2: i32) -> (i32, i32) {
    %c0_i32 = arith.constant 0 : i32
    return %arg0, %arg1 : i32, i32
  }
}

module attributes {stable_mosaic.version = 11 : i64} {
  func.func @_bn_relu_kernel(%arg0: i32, %arg1: memref<128x64xbf16, #tpu.memory_space<vmem>>, %arg2: memref<1x64xf32, #tpu.memory_space<vmem>>, %arg3: memref<1x64xf32, #tpu.memory_space<vmem>>, %arg4: memref<128x64xbf16, #tpu.memory_space<vmem>>) attributes {dimension_semantics = [#tpu.dimension_semantics<parallel>], iteration_bounds = array<i64: 1>, scalar_prefetch = 0 : i64, scratch_operands = 0 : i64, tpu.core_type = #tpu.core_type<tc>, window_params = [{transform_indices = @transform_0, window_bounds = array<i64: 128, 64>}, {pipeline_mode = #tpu.pipeline_mode<synchronous>, transform_indices = @transform_1, window_bounds = array<i64: 1, 64>}, {pipeline_mode = #tpu.pipeline_mode<synchronous>, transform_indices = @transform_2, window_bounds = array<i64: 1, 64>}, {transform_indices = @transform_3, window_bounds = array<i64: 128, 64>}]} {
    %c0 = arith.constant 0 : index
    %c0_0 = arith.constant 0 : index
    %0 = vector.load %arg1[%c0, %c0_0] : memref<128x64xbf16, #tpu.memory_space<vmem>>, vector<128x64xbf16>
    %1 = arith.extf %0 : vector<128x64xbf16> to vector<128x64xf32>
    %c0_1 = arith.constant 0 : index
    %c0_2 = arith.constant 0 : index
    %2 = vector.load %arg2[%c0_1, %c0_2] : memref<1x64xf32, #tpu.memory_space<vmem>>, vector<1x64xf32>
    %3 = vector.broadcast %2 : vector<1x64xf32> to vector<128x64xf32>
    %4 = arith.mulf %1, %3 : vector<128x64xf32>
    %c0_3 = arith.constant 0 : index
    %c0_4 = arith.constant 0 : index
    %5 = vector.load %arg3[%c0_3, %c0_4] : memref<1x64xf32, #tpu.memory_space<vmem>>, vector<1x64xf32>
    %6 = vector.broadcast %5 : vector<1x64xf32> to vector<128x64xf32>
    %7 = arith.addf %4, %6 : vector<128x64xf32>
    %cst = arith.constant 0.000000e+00 : f32
    %8 = vector.broadcast %cst : f32 to vector<128x64xf32>
    %9 = arith.maximumf %7, %8 : vector<128x64xf32>
    %10 = arith.truncf %9 : vector<128x64xf32> to vector<128x64xbf16>
    %c0_5 = arith.constant 0 : index
    %c0_6 = arith.constant 0 : index
    %11 = vector.load %arg4[%c0_5, %c0_6] : memref<128x64xbf16, #tpu.memory_space<vmem>>, vector<128x64xbf16>
    tpu.vector_store %arg4[%c0_5, %c0_6], %10 {strides = array<i32>} : memref<128x64xbf16, #tpu.memory_space<vmem>>, vector<128x64xbf16>,
    return
  }
  func.func @transform_0(%arg0: i32) -> (i32, i32) {
    %c0_i32 = arith.constant 0 : i32
    %c0_i32_0 = arith.constant 0 : i32
    return %arg0, %c0_i32 : i32, i32
  }
  func.func @transform_1(%arg0: i32) -> (i32, i32) {
    %c0_i32 = arith.constant 0 : i32
    %c0_i32_0 = arith.constant 0 : i32
    %c0_i32_1 = arith.constant 0 : i32
    return %c0_i32, %c0_i32_0 : i32, i32
  }
  func.func @transform_2(%arg0: i32) -> (i32, i32) {
    %c0_i32 = arith.constant 0 : i32
    %c0_i32_0 = arith.constant 0 : i32
    %c0_i32_1 = arith.constant 0 : i32
    return %c0_i32, %c0_i32_0 : i32, i32
  }
  func.func @transform_3(%arg0: i32) -> (i32, i32) {
    %c0_i32 = arith.constant 0 : i32
    %c0_i32_0 = arith.constant 0 : i32
    return %arg0, %c0_i32 : i32, i32
  }
}

module attributes {stable_mosaic.version = 11 : i64} {
  func.func @_tap_max_kernel(%arg0: i32, %arg1: memref<9x128x64xbf16, #tpu.memory_space<vmem>>, %arg2: memref<128x64xbf16, #tpu.memory_space<vmem>>) attributes {dimension_semantics = [#tpu.dimension_semantics<parallel>], iteration_bounds = array<i64: 1>, scalar_prefetch = 0 : i64, scratch_operands = 0 : i64, tpu.core_type = #tpu.core_type<tc>, window_params = [{transform_indices = @transform_0, window_bounds = array<i64: 9, 128, 64>}, {transform_indices = @transform_1, window_bounds = array<i64: 128, 64>}]} {
    %c0 = arith.constant 0 : index
    %c0_0 = arith.constant 0 : index
    %c0_1 = arith.constant 0 : index
    %0 = vector.load %arg1[%c0, %c0_0, %c0_1] : memref<9x128x64xbf16, #tpu.memory_space<vmem>>, vector<1x128x64xbf16>
    %1 = vector.shape_cast %0 : vector<1x128x64xbf16> to vector<128x64xbf16>
    %c1 = arith.constant 1 : index
    %c0_2 = arith.constant 0 : index
    %c0_3 = arith.constant 0 : index
    %2 = vector.load %arg1[%c1, %c0_2, %c0_3] : memref<9x128x64xbf16, #tpu.memory_space<vmem>>, vector<1x128x64xbf16>
    %3 = vector.shape_cast %2 : vector<1x128x64xbf16> to vector<128x64xbf16>
    %4 = arith.maximumf %1, %3 : vector<128x64xbf16>
    %c2 = arith.constant 2 : index
    %c0_4 = arith.constant 0 : index
    %c0_5 = arith.constant 0 : index
    %5 = vector.load %arg1[%c2, %c0_4, %c0_5] : memref<9x128x64xbf16, #tpu.memory_space<vmem>>, vector<1x128x64xbf16>
    %6 = vector.shape_cast %5 : vector<1x128x64xbf16> to vector<128x64xbf16>
    %7 = arith.maximumf %4, %6 : vector<128x64xbf16>
    %c3 = arith.constant 3 : index
    %c0_6 = arith.constant 0 : index
    %c0_7 = arith.constant 0 : index
    %8 = vector.load %arg1[%c3, %c0_6, %c0_7] : memref<9x128x64xbf16, #tpu.memory_space<vmem>>, vector<1x128x64xbf16>
    %9 = vector.shape_cast %8 : vector<1x128x64xbf16> to vector<128x64xbf16>
    %10 = arith.maximumf %7, %9 : vector<128x64xbf16>
    %c4 = arith.constant 4 : index
    %c0_8 = arith.constant 0 : index
    %c0_9 = arith.constant 0 : index
    %11 = vector.load %arg1[%c4, %c0_8, %c0_9] : memref<9x128x64xbf16, #tpu.memory_space<vmem>>, vector<1x128x64xbf16>
    %12 = vector.shape_cast %11 : vector<1x128x64xbf16> to vector<128x64xbf16>
    %13 = arith.maximumf %10, %12 : vector<128x64xbf16>
    %c5 = arith.constant 5 : index
    %c0_10 = arith.constant 0 : index
    %c0_11 = arith.constant 0 : index
    %14 = vector.load %arg1[%c5, %c0_10, %c0_11] : memref<9x128x64xbf16, #tpu.memory_space<vmem>>, vector<1x128x64xbf16>
    %15 = vector.shape_cast %14 : vector<1x128x64xbf16> to vector<128x64xbf16>
    %16 = arith.maximumf %13, %15 : vector<128x64xbf16>
    %c6 = arith.constant 6 : index
    %c0_12 = arith.constant 0 : index
    %c0_13 = arith.constant 0 : index
    %17 = vector.load %arg1[%c6, %c0_12, %c0_13] : memref<9x128x64xbf16, #tpu.memory_space<vmem>>, vector<1x128x64xbf16>
    %18 = vector.shape_cast %17 : vector<1x128x64xbf16> to vector<128x64xbf16>
    %19 = arith.maximumf %16, %18 : vector<128x64xbf16>
    %c7 = arith.constant 7 : index
    %c0_14 = arith.constant 0 : index
    %c0_15 = arith.constant 0 : index
    %20 = vector.load %arg1[%c7, %c0_14, %c0_15] : memref<9x128x64xbf16, #tpu.memory_space<vmem>>, vector<1x128x64xbf16>
    %21 = vector.shape_cast %20 : vector<1x128x64xbf16> to vector<128x64xbf16>
    %22 = arith.maximumf %19, %21 : vector<128x64xbf16>
    %c8 = arith.constant 8 : index
    %c0_16 = arith.constant 0 : index
    %c0_17 = arith.constant 0 : index
    %23 = vector.load %arg1[%c8, %c0_16, %c0_17] : memref<9x128x64xbf16, #tpu.memory_space<vmem>>, vector<1x128x64xbf16>
    %24 = vector.shape_cast %23 : vector<1x128x64xbf16> to vector<128x64xbf16>
    %25 = arith.maximumf %22, %24 : vector<128x64xbf16>
    %c0_18 = arith.constant 0 : index
    %c0_19 = arith.constant 0 : index
    %26 = vector.load %arg2[%c0_18, %c0_19] : memref<128x64xbf16, #tpu.memory_space<vmem>>, vector<128x64xbf16>
    tpu.vector_store %arg2[%c0_18, %c0_19], %25 {strides = array<i32>} : memref<128x64xbf16, #tpu.memory_space<vmem>>, vector<128x64xbf16>,
    return
  }
  func.func @transform_0(%arg0: i32) -> (i32, i32, i32) {
    %c0_i32 = arith.constant 0 : i32
    %c0_i32_0 = arith.constant 0 : i32
    %c0_i32_1 = arith.constant 0 : i32
    return %c0_i32, %arg0, %c0_i32_0 : i32, i32, i32
  }
  func.func @transform_1(%arg0: i32) -> (i32, i32) {
    %c0_i32 = arith.constant 0 : i32
    %c0_i32_0 = arith.constant 0 : i32
    return %arg0, %c0_i32 : i32, i32
  }
}

module attributes {stable_mosaic.version = 11 : i64} {
  func.func @_mm_bnrelu_kernel(%arg0: i32, %arg1: i32, %arg2: i32, %arg3: memref<128x576xbf16, #tpu.memory_space<vmem>>, %arg4: memref<576x64xbf16, #tpu.memory_space<vmem>>, %arg5: memref<1x64xf32, #tpu.memory_space<vmem>>, %arg6: memref<1x64xf32, #tpu.memory_space<vmem>>, %arg7: memref<128x64xbf16, #tpu.memory_space<vmem>>, %arg8: memref<128x64xf32, #tpu.memory_space<vmem>>) attributes {dimension_semantics = [#tpu.dimension_semantics<parallel>, #tpu.dimension_semantics<parallel>, #tpu.dimension_semantics<arbitrary>], iteration_bounds = array<i64: 1, 1, 1>, scalar_prefetch = 0 : i64, scratch_operands = 1 : i64, tpu.core_type = #tpu.core_type<tc>, window_params = [{transform_indices = @transform_0, window_bounds = array<i64: 128, 576>}, {transform_indices = @transform_1, window_bounds = array<i64: 576, 64>}, {transform_indices = @transform_2, window_bounds = array<i64: 1, 64>}, {transform_indices = @transform_3, window_bounds = array<i64: 1, 64>}, {transform_indices = @transform_4, window_bounds = array<i64: 128, 64>}]} {
    %c0_i32 = arith.constant 0 : i32
    %0 = arith.cmpi eq, %arg2, %c0_i32 : i32
    %1 = arith.extui %0 : i1 to i32
    %c0_i32_0 = arith.constant 0 : i32
    %2 = arith.cmpi ne, %1, %c0_i32_0 : i32
    scf.if %2 {
      %cst_10 = arith.constant 0.000000e+00 : f32
      %12 = vector.broadcast %cst_10 : f32 to vector<128x64xf32>
      %c0_11 = arith.constant 0 : index
      %c0_12 = arith.constant 0 : index
      %13 = vector.load %arg8[%c0_11, %c0_12] : memref<128x64xf32, #tpu.memory_space<vmem>>, vector<128x64xf32>
      tpu.vector_store %arg8[%c0_11, %c0_12], %12 {strides = array<i32>} : memref<128x64xf32, #tpu.memory_space<vmem>>, vector<128x64xf32>,
    } else {
    }
    %c0 = arith.constant 0 : index
    %c0_1 = arith.constant 0 : index
    %3 = vector.load %arg8[%c0, %c0_1] : memref<128x64xf32, #tpu.memory_space<vmem>>, vector<128x64xf32>
    %c0_2 = arith.constant 0 : index
    %c0_3 = arith.constant 0 : index
    %4 = vector.load %arg3[%c0_2, %c0_3] : memref<128x576xbf16, #tpu.memory_space<vmem>>, vector<128x576xbf16>
    %c0_4 = arith.constant 0 : index
    %c0_5 = arith.constant 0 : index
    %5 = vector.load %arg4[%c0_4, %c0_5] : memref<576x64xbf16, #tpu.memory_space<vmem>>, vector<576x64xbf16>
    %cst = arith.constant dense<0.000000e+00> : vector<128x64xf32>
    %6 = tpu.matmul %4, %5, %cst {dimension_numbers = #tpu.dot_dimension_numbers<[1], [0], [0], [1], [0, 0, 1, 1], [], []>} : vector<128x576xbf16>, vector<576x64xbf16>, vector<128x64xf32> -> vector<128x64xf32>
    %7 = arith.addf %3, %6 : vector<128x64xf32>
    %c0_6 = arith.constant 0 : index
    %c0_7 = arith.constant 0 : index
    %8 = vector.load %arg8[%c0_6, %c0_7] : memref<128x64xf32, #tpu.memory_space<vmem>>, vector<128x64xf32>
    tpu.vector_store %arg8[%c0_6, %c0_7], %7 {strides = array<i32>} : memref<128x64xf32, #tpu.memory_space<vmem>>, vector<128x64xf32>,
    %c0_i32_8 = arith.constant 0 : i32
    %9 = arith.cmpi eq, %arg2, %c0_i32_8 : i32
    %10 = arith.extui %9 : i1 to i32
    %c0_i32_9 = arith.constant 0 : i32
    %11 = arith.cmpi ne, %10, %c0_i32_9 : i32
    scf.if %11 {
      %c0_10 = arith.constant 0 : index
      %c0_11 = arith.constant 0 : index
      %12 = vector.load %arg8[%c0_10, %c0_11] : memref<128x64xf32, #tpu.memory_space<vmem>>, vector<128x64xf32>
      %c0_12 = arith.constant 0 : index
      %c0_13 = arith.constant 0 : index
      %13 = vector.load %arg5[%c0_12, %c0_13] : memref<1x64xf32, #tpu.memory_space<vmem>>, vector<1x64xf32>
      %14 = vector.broadcast %13 : vector<1x64xf32> to vector<128x64xf32>
      %15 = arith.mulf %12, %14 : vector<128x64xf32>
      %c0_14 = arith.constant 0 : index
      %c0_15 = arith.constant 0 : index
      %16 = vector.load %arg6[%c0_14, %c0_15] : memref<1x64xf32, #tpu.memory_space<vmem>>, vector<1x64xf32>
      %17 = vector.broadcast %16 : vector<1x64xf32> to vector<128x64xf32>
      %18 = arith.addf %15, %17 : vector<128x64xf32>
      %cst_16 = arith.constant 0.000000e+00 : f32
      %19 = vector.broadcast %cst_16 : f32 to vector<128x64xf32>
      %20 = arith.maximumf %18, %19 : vector<128x64xf32>
      %21 = arith.truncf %20 : vector<128x64xf32> to vector<128x64xbf16>
      %c0_17 = arith.constant 0 : index
      %c0_18 = arith.constant 0 : index
      %22 = vector.load %arg7[%c0_17, %c0_18] : memref<128x64xbf16, #tpu.memory_space<vmem>>, vector<128x64xbf16>
      tpu.vector_store %arg7[%c0_17, %c0_18], %21 {strides = array<i32>} : memref<128x64xbf16, #tpu.memory_space<vmem>>, vector<128x64xbf16>,
    } else {
    }
    return
  }
  func.func @transform_0(%arg0: i32, %arg1: i32, %arg2: i32) -> (i32, i32) {
    %c0_i32 = arith.constant 0 : i32
    return %arg0, %arg2 : i32, i32
  }
  func.func @transform_1(%arg0: i32, %arg1: i32, %arg2: i32) -> (i32, i32) {
    %c0_i32 = arith.constant 0 : i32
    return %arg2, %arg1 : i32, i32
  }
  func.func @transform_2(%arg0: i32, %arg1: i32, %arg2: i32) -> (i32, i32) {
    %c0_i32 = arith.constant 0 : i32
    %c0_i32_0 = arith.constant 0 : i32
    return %c0_i32, %arg1 : i32, i32
  }
  func.func @transform_3(%arg0: i32, %arg1: i32, %arg2: i32) -> (i32, i32) {
    %c0_i32 = arith.constant 0 : i32
    %c0_i32_0 = arith.constant 0 : i32
    return %c0_i32, %arg1 : i32, i32
  }
  func.func @transform_4(%arg0: i32, %arg1: i32, %arg2: i32) -> (i32, i32) {
    %c0_i32 = arith.constant 0 : i32
    return %arg0, %arg1 : i32, i32
  }
}

module attributes {stable_mosaic.version = 11 : i64} {
  func.func @_mm_resadd_kernel(%arg0: i32, %arg1: i32, %arg2: i32, %arg3: memref<128x576xbf16, #tpu.memory_space<vmem>>, %arg4: memref<576x64xbf16, #tpu.memory_space<vmem>>, %arg5: memref<128x64xbf16, #tpu.memory_space<vmem>>, %arg6: memref<128x64xbf16, #tpu.memory_space<vmem>>, %arg7: memref<128x64xf32, #tpu.memory_space<vmem>>) attributes {dimension_semantics = [#tpu.dimension_semantics<parallel>, #tpu.dimension_semantics<parallel>, #tpu.dimension_semantics<arbitrary>], iteration_bounds = array<i64: 1, 1, 1>, scalar_prefetch = 0 : i64, scratch_operands = 1 : i64, tpu.core_type = #tpu.core_type<tc>, window_params = [{transform_indices = @transform_0, window_bounds = array<i64: 128, 576>}, {transform_indices = @transform_1, window_bounds = array<i64: 576, 64>}, {transform_indices = @transform_2, window_bounds = array<i64: 128, 64>}, {transform_indices = @transform_3, window_bounds = array<i64: 128, 64>}]} {
    %c0_i32 = arith.constant 0 : i32
    %0 = arith.cmpi eq, %arg2, %c0_i32 : i32
    %1 = arith.extui %0 : i1 to i32
    %c0_i32_0 = arith.constant 0 : i32
    %2 = arith.cmpi ne, %1, %c0_i32_0 : i32
    scf.if %2 {
      %cst_10 = arith.constant 0.000000e+00 : f32
      %12 = vector.broadcast %cst_10 : f32 to vector<128x64xf32>
      %c0_11 = arith.constant 0 : index
      %c0_12 = arith.constant 0 : index
      %13 = vector.load %arg7[%c0_11, %c0_12] : memref<128x64xf32, #tpu.memory_space<vmem>>, vector<128x64xf32>
      tpu.vector_store %arg7[%c0_11, %c0_12], %12 {strides = array<i32>} : memref<128x64xf32, #tpu.memory_space<vmem>>, vector<128x64xf32>,
    } else {
    }
    %c0 = arith.constant 0 : index
    %c0_1 = arith.constant 0 : index
    %3 = vector.load %arg7[%c0, %c0_1] : memref<128x64xf32, #tpu.memory_space<vmem>>, vector<128x64xf32>
    %c0_2 = arith.constant 0 : index
    %c0_3 = arith.constant 0 : index
    %4 = vector.load %arg3[%c0_2, %c0_3] : memref<128x576xbf16, #tpu.memory_space<vmem>>, vector<128x576xbf16>
    %c0_4 = arith.constant 0 : index
    %c0_5 = arith.constant 0 : index
    %5 = vector.load %arg4[%c0_4, %c0_5] : memref<576x64xbf16, #tpu.memory_space<vmem>>, vector<576x64xbf16>
    %cst = arith.constant dense<0.000000e+00> : vector<128x64xf32>
    %6 = tpu.matmul %4, %5, %cst {dimension_numbers = #tpu.dot_dimension_numbers<[1], [0], [0], [1], [0, 0, 1, 1], [], []>} : vector<128x576xbf16>, vector<576x64xbf16>, vector<128x64xf32> -> vector<128x64xf32>
    %7 = arith.addf %3, %6 : vector<128x64xf32>
    %c0_6 = arith.constant 0 : index
    %c0_7 = arith.constant 0 : index
    %8 = vector.load %arg7[%c0_6, %c0_7] : memref<128x64xf32, #tpu.memory_space<vmem>>, vector<128x64xf32>
    tpu.vector_store %arg7[%c0_6, %c0_7], %7 {strides = array<i32>} : memref<128x64xf32, #tpu.memory_space<vmem>>, vector<128x64xf32>,
    %c0_i32_8 = arith.constant 0 : i32
    %9 = arith.cmpi eq, %arg2, %c0_i32_8 : i32
    %10 = arith.extui %9 : i1 to i32
    %c0_i32_9 = arith.constant 0 : i32
    %11 = arith.cmpi ne, %10, %c0_i32_9 : i32
    scf.if %11 {
      %c0_10 = arith.constant 0 : index
      %c0_11 = arith.constant 0 : index
      %12 = vector.load %arg7[%c0_10, %c0_11] : memref<128x64xf32, #tpu.memory_space<vmem>>, vector<128x64xf32>
      %c0_12 = arith.constant 0 : index
      %c0_13 = arith.constant 0 : index
      %13 = vector.load %arg5[%c0_12, %c0_13] : memref<128x64xbf16, #tpu.memory_space<vmem>>, vector<128x64xbf16>
      %14 = arith.extf %13 : vector<128x64xbf16> to vector<128x64xf32>
      %15 = arith.addf %12, %14 : vector<128x64xf32>
      %16 = arith.truncf %15 : vector<128x64xf32> to vector<128x64xbf16>
      %c0_14 = arith.constant 0 : index
      %c0_15 = arith.constant 0 : index
      %17 = vector.load %arg6[%c0_14, %c0_15] : memref<128x64xbf16, #tpu.memory_space<vmem>>, vector<128x64xbf16>
      tpu.vector_store %arg6[%c0_14, %c0_15], %16 {strides = array<i32>} : memref<128x64xbf16, #tpu.memory_space<vmem>>, vector<128x64xbf16>,
    } else {
    }
    return
  }
  func.func @transform_0(%arg0: i32, %arg1: i32, %arg2: i32) -> (i32, i32) {
    %c0_i32 = arith.constant 0 : i32
    return %arg0, %arg2 : i32, i32
  }
  func.func @transform_1(%arg0: i32, %arg1: i32, %arg2: i32) -> (i32, i32) {
    %c0_i32 = arith.constant 0 : i32
    return %arg2, %arg1 : i32, i32
  }
  func.func @transform_2(%arg0: i32, %arg1: i32, %arg2: i32) -> (i32, i32) {
    %c0_i32 = arith.constant 0 : i32
    return %arg0, %arg1 : i32, i32
  }
  func.func @transform_3(%arg0: i32, %arg1: i32, %arg2: i32) -> (i32, i32) {
    %c0_i32 = arith.constant 0 : i32
    return %arg0, %arg1 : i32, i32
  }
}

module attributes {stable_mosaic.version = 11 : i64} {
  func.func @_mm_prologue_bias_kernel(%arg0: i32, %arg1: i32, %arg2: i32, %arg3: memref<32x64xbf16, #tpu.memory_space<vmem>>, %arg4: memref<1x64xf32, #tpu.memory_space<vmem>>, %arg5: memref<1x64xf32, #tpu.memory_space<vmem>>, %arg6: memref<64x128xbf16, #tpu.memory_space<vmem>>, %arg7: memref<1x128xf32, #tpu.memory_space<vmem>>, %arg8: memref<32x128xbf16, #tpu.memory_space<vmem>>, %arg9: memref<32x128xf32, #tpu.memory_space<vmem>>) attributes {dimension_semantics = [#tpu.dimension_semantics<parallel>, #tpu.dimension_semantics<parallel>, #tpu.dimension_semantics<arbitrary>], iteration_bounds = array<i64: 1, 1, 1>, scalar_prefetch = 0 : i64, scratch_operands = 1 : i64, tpu.core_type = #tpu.core_type<tc>, window_params = [{transform_indices = @transform_0, window_bounds = array<i64: 32, 64>}, {transform_indices = @transform_1, window_bounds = array<i64: 1, 64>}, {transform_indices = @transform_2, window_bounds = array<i64: 1, 64>}, {transform_indices = @transform_3, window_bounds = array<i64: 64, 128>}, {transform_indices = @transform_4, window_bounds = array<i64: 1, 128>}, {transform_indices = @transform_5, window_bounds = array<i64: 32, 128>}]} {
    %c0_i32 = arith.constant 0 : i32
    %0 = arith.cmpi eq, %arg2, %c0_i32 : i32
    %1 = arith.extui %0 : i1 to i32
    %c0_i32_0 = arith.constant 0 : i32
    %2 = arith.cmpi ne, %1, %c0_i32_0 : i32
    scf.if %2 {
      %cst_15 = arith.constant 0.000000e+00 : f32
      %22 = vector.broadcast %cst_15 : f32 to vector<32x128xf32>
      %c0_16 = arith.constant 0 : index
      %c0_17 = arith.constant 0 : index
      %23 = vector.load %arg9[%c0_16, %c0_17] : memref<32x128xf32, #tpu.memory_space<vmem>>, vector<32x128xf32>
      tpu.vector_store %arg9[%c0_16, %c0_17], %22 {strides = array<i32>} : memref<32x128xf32, #tpu.memory_space<vmem>>, vector<32x128xf32>,
    } else {
    }
    %c0 = arith.constant 0 : index
    %c0_1 = arith.constant 0 : index
    %3 = vector.load %arg3[%c0, %c0_1] : memref<32x64xbf16, #tpu.memory_space<vmem>>, vector<32x64xbf16>
    %4 = arith.extf %3 : vector<32x64xbf16> to vector<32x64xf32>
    %c0_2 = arith.constant 0 : index
    %c0_3 = arith.constant 0 : index
    %5 = vector.load %arg4[%c0_2, %c0_3] : memref<1x64xf32, #tpu.memory_space<vmem>>, vector<1x64xf32>
    %6 = vector.broadcast %5 : vector<1x64xf32> to vector<32x64xf32>
    %7 = arith.mulf %4, %6 : vector<32x64xf32>
    %c0_4 = arith.constant 0 : index
    %c0_5 = arith.constant 0 : index
    %8 = vector.load %arg5[%c0_4, %c0_5] : memref<1x64xf32, #tpu.memory_space<vmem>>, vector<1x64xf32>
    %9 = vector.broadcast %8 : vector<1x64xf32> to vector<32x64xf32>
    %10 = arith.addf %7, %9 : vector<32x64xf32>
    %cst = arith.constant 0.000000e+00 : f32
    %11 = vector.broadcast %cst : f32 to vector<32x64xf32>
    %12 = arith.maximumf %10, %11 : vector<32x64xf32>
    %13 = arith.truncf %12 : vector<32x64xf32> to vector<32x64xbf16>
    %c0_6 = arith.constant 0 : index
    %c0_7 = arith.constant 0 : index
    %14 = vector.load %arg9[%c0_6, %c0_7] : memref<32x128xf32, #tpu.memory_space<vmem>>, vector<32x128xf32>
    %c0_8 = arith.constant 0 : index
    %c0_9 = arith.constant 0 : index
    %15 = vector.load %arg6[%c0_8, %c0_9] : memref<64x128xbf16, #tpu.memory_space<vmem>>, vector<64x128xbf16>
    %cst_10 = arith.constant dense<0.000000e+00> : vector<32x128xf32>
    %16 = tpu.matmul %13, %15, %cst_10 {dimension_numbers = #tpu.dot_dimension_numbers<[1], [0], [0], [1], [0, 0, 1, 1], [], []>} : vector<32x64xbf16>, vector<64x128xbf16>, vector<32x128xf32> -> vector<32x128xf32>
    %17 = arith.addf %14, %16 : vector<32x128xf32>
    %c0_11 = arith.constant 0 : index
    %c0_12 = arith.constant 0 : index
    %18 = vector.load %arg9[%c0_11, %c0_12] : memref<32x128xf32, #tpu.memory_space<vmem>>, vector<32x128xf32>
    tpu.vector_store %arg9[%c0_11, %c0_12], %17 {strides = array<i32>} : memref<32x128xf32, #tpu.memory_space<vmem>>, vector<32x128xf32>,
    %c0_i32_13 = arith.constant 0 : i32
    %19 = arith.cmpi eq, %arg2, %c0_i32_13 : i32
    %20 = arith.extui %19 : i1 to i32
    %c0_i32_14 = arith.constant 0 : i32
    %21 = arith.cmpi ne, %20, %c0_i32_14 : i32
    scf.if %21 {
      %c0_15 = arith.constant 0 : index
      %c0_16 = arith.constant 0 : index
      %22 = vector.load %arg9[%c0_15, %c0_16] : memref<32x128xf32, #tpu.memory_space<vmem>>, vector<32x128xf32>
      %c0_17 = arith.constant 0 : index
      %c0_18 = arith.constant 0 : index
      %23 = vector.load %arg7[%c0_17, %c0_18] : memref<1x128xf32, #tpu.memory_space<vmem>>, vector<1x128xf32>
      %24 = vector.broadcast %23 : vector<1x128xf32> to vector<32x128xf32>
      %25 = arith.addf %22, %24 : vector<32x128xf32>
      %26 = arith.truncf %25 : vector<32x128xf32> to vector<32x128xbf16>
      %c0_19 = arith.constant 0 : index
      %c0_20 = arith.constant 0 : index
      %27 = vector.load %arg8[%c0_19, %c0_20] : memref<32x128xbf16, #tpu.memory_space<vmem>>, vector<32x128xbf16>
      tpu.vector_store %arg8[%c0_19, %c0_20], %26 {strides = array<i32>} : memref<32x128xbf16, #tpu.memory_space<vmem>>, vector<32x128xbf16>,
    } else {
    }
    return
  }
  func.func @transform_0(%arg0: i32, %arg1: i32, %arg2: i32) -> (i32, i32) {
    %c0_i32 = arith.constant 0 : i32
    return %arg0, %arg2 : i32, i32
  }
  func.func @transform_1(%arg0: i32, %arg1: i32, %arg2: i32) -> (i32, i32) {
    %c0_i32 = arith.constant 0 : i32
    %c0_i32_0 = arith.constant 0 : i32
    return %c0_i32, %arg2 : i32, i32
  }
  func.func @transform_2(%arg0: i32, %arg1: i32, %arg2: i32) -> (i32, i32) {
    %c0_i32 = arith.constant 0 : i32
    %c0_i32_0 = arith.constant 0 : i32
    return %c0_i32, %arg2 : i32, i32
  }
  func.func @transform_3(%arg0: i32, %arg1: i32, %arg2: i32) -> (i32, i32) {
    %c0_i32 = arith.constant 0 : i32
    return %arg2, %arg1 : i32, i32
  }
  func.func @transform_4(%arg0: i32, %arg1: i32, %arg2: i32) -> (i32, i32) {
    %c0_i32 = arith.constant 0 : i32
    %c0_i32_0 = arith.constant 0 : i32
    return %c0_i32, %arg1 : i32, i32
  }
  func.func @transform_5(%arg0: i32, %arg1: i32, %arg2: i32) -> (i32, i32) {
    %c0_i32 = arith.constant 0 : i32
    return %arg0, %arg1 : i32, i32
  }
}

module attributes {stable_mosaic.version = 11 : i64} {
  func.func @_tap_mean_kernel(%arg0: i32, %arg1: memref<4x32x64xbf16, #tpu.memory_space<vmem>>, %arg2: memref<32x64xbf16, #tpu.memory_space<vmem>>) attributes {dimension_semantics = [#tpu.dimension_semantics<parallel>], iteration_bounds = array<i64: 1>, scalar_prefetch = 0 : i64, scratch_operands = 0 : i64, tpu.core_type = #tpu.core_type<tc>, window_params = [{transform_indices = @transform_0, window_bounds = array<i64: 4, 32, 64>}, {transform_indices = @transform_1, window_bounds = array<i64: 32, 64>}]} {
    %c0 = arith.constant 0 : index
    %c0_0 = arith.constant 0 : index
    %c0_1 = arith.constant 0 : index
    %0 = vector.load %arg1[%c0, %c0_0, %c0_1] : memref<4x32x64xbf16, #tpu.memory_space<vmem>>, vector<1x32x64xbf16>
    %1 = vector.shape_cast %0 : vector<1x32x64xbf16> to vector<32x64xbf16>
    %2 = arith.extf %1 : vector<32x64xbf16> to vector<32x64xf32>
    %c1 = arith.constant 1 : index
    %c0_2 = arith.constant 0 : index
    %c0_3 = arith.constant 0 : index
    %3 = vector.load %arg1[%c1, %c0_2, %c0_3] : memref<4x32x64xbf16, #tpu.memory_space<vmem>>, vector<1x32x64xbf16>
    %4 = vector.shape_cast %3 : vector<1x32x64xbf16> to vector<32x64xbf16>
    %5 = arith.extf %4 : vector<32x64xbf16> to vector<32x64xf32>
    %6 = arith.addf %2, %5 : vector<32x64xf32>
    %c2 = arith.constant 2 : index
    %c0_4 = arith.constant 0 : index
    %c0_5 = arith.constant 0 : index
    %7 = vector.load %arg1[%c2, %c0_4, %c0_5] : memref<4x32x64xbf16, #tpu.memory_space<vmem>>, vector<1x32x64xbf16>
    %8 = vector.shape_cast %7 : vector<1x32x64xbf16> to vector<32x64xbf16>
    %9 = arith.extf %8 : vector<32x64xbf16> to vector<32x64xf32>
    %10 = arith.addf %6, %9 : vector<32x64xf32>
    %c3 = arith.constant 3 : index
    %c0_6 = arith.constant 0 : index
    %c0_7 = arith.constant 0 : index
    %11 = vector.load %arg1[%c3, %c0_6, %c0_7] : memref<4x32x64xbf16, #tpu.memory_space<vmem>>, vector<1x32x64xbf16>
    %12 = vector.shape_cast %11 : vector<1x32x64xbf16> to vector<32x64xbf16>
    %13 = arith.extf %12 : vector<32x64xbf16> to vector<32x64xf32>
    %14 = arith.addf %10, %13 : vector<32x64xf32>
    %cst = arith.constant 2.500000e-01 : f32
    %15 = vector.broadcast %cst : f32 to vector<32x64xf32>
    %16 = arith.mulf %14, %15 : vector<32x64xf32>
    %17 = arith.truncf %16 : vector<32x64xf32> to vector<32x64xbf16>
    %c0_8 = arith.constant 0 : index
    %c0_9 = arith.constant 0 : index
    %18 = vector.load %arg2[%c0_8, %c0_9] : memref<32x64xbf16, #tpu.memory_space<vmem>>, vector<32x64xbf16>
    tpu.vector_store %arg2[%c0_8, %c0_9], %17 {strides = array<i32>} : memref<32x64xbf16, #tpu.memory_space<vmem>>, vector<32x64xbf16>,
    return
  }
  func.func @transform_0(%arg0: i32) -> (i32, i32, i32) {
    %c0_i32 = arith.constant 0 : i32
    %c0_i32_0 = arith.constant 0 : i32
    %c0_i32_1 = arith.constant 0 : i32
    return %c0_i32, %arg0, %c0_i32_0 : i32, i32, i32
  }
  func.func @transform_1(%arg0: i32) -> (i32, i32) {
    %c0_i32 = arith.constant 0 : i32
    %c0_i32_0 = arith.constant 0 : i32
    return %arg0, %c0_i32 : i32, i32
  }
}

module attributes {stable_mosaic.version = 11 : i64} {
  func.func @_mm_bnrelu_kernel(%arg0: i32, %arg1: i32, %arg2: i32, %arg3: memref<32x576xbf16, #tpu.memory_space<vmem>>, %arg4: memref<576x128xbf16, #tpu.memory_space<vmem>>, %arg5: memref<1x128xf32, #tpu.memory_space<vmem>>, %arg6: memref<1x128xf32, #tpu.memory_space<vmem>>, %arg7: memref<32x128xbf16, #tpu.memory_space<vmem>>, %arg8: memref<32x128xf32, #tpu.memory_space<vmem>>) attributes {dimension_semantics = [#tpu.dimension_semantics<parallel>, #tpu.dimension_semantics<parallel>, #tpu.dimension_semantics<arbitrary>], iteration_bounds = array<i64: 1, 1, 1>, scalar_prefetch = 0 : i64, scratch_operands = 1 : i64, tpu.core_type = #tpu.core_type<tc>, window_params = [{transform_indices = @transform_0, window_bounds = array<i64: 32, 576>}, {transform_indices = @transform_1, window_bounds = array<i64: 576, 128>}, {transform_indices = @transform_2, window_bounds = array<i64: 1, 128>}, {transform_indices = @transform_3, window_bounds = array<i64: 1, 128>}, {transform_indices = @transform_4, window_bounds = array<i64: 32, 128>}]} {
    %c0_i32 = arith.constant 0 : i32
    %0 = arith.cmpi eq, %arg2, %c0_i32 : i32
    %1 = arith.extui %0 : i1 to i32
    %c0_i32_0 = arith.constant 0 : i32
    %2 = arith.cmpi ne, %1, %c0_i32_0 : i32
    scf.if %2 {
      %cst_10 = arith.constant 0.000000e+00 : f32
      %12 = vector.broadcast %cst_10 : f32 to vector<32x128xf32>
      %c0_11 = arith.constant 0 : index
      %c0_12 = arith.constant 0 : index
      %13 = vector.load %arg8[%c0_11, %c0_12] : memref<32x128xf32, #tpu.memory_space<vmem>>, vector<32x128xf32>
      tpu.vector_store %arg8[%c0_11, %c0_12], %12 {strides = array<i32>} : memref<32x128xf32, #tpu.memory_space<vmem>>, vector<32x128xf32>,
    } else {
    }
    %c0 = arith.constant 0 : index
    %c0_1 = arith.constant 0 : index
    %3 = vector.load %arg8[%c0, %c0_1] : memref<32x128xf32, #tpu.memory_space<vmem>>, vector<32x128xf32>
    %c0_2 = arith.constant 0 : index
    %c0_3 = arith.constant 0 : index
    %4 = vector.load %arg3[%c0_2, %c0_3] : memref<32x576xbf16, #tpu.memory_space<vmem>>, vector<32x576xbf16>
    %c0_4 = arith.constant 0 : index
    %c0_5 = arith.constant 0 : index
    %5 = vector.load %arg4[%c0_4, %c0_5] : memref<576x128xbf16, #tpu.memory_space<vmem>>, vector<576x128xbf16>
    %cst = arith.constant dense<0.000000e+00> : vector<32x128xf32>
    %6 = tpu.matmul %4, %5, %cst {dimension_numbers = #tpu.dot_dimension_numbers<[1], [0], [0], [1], [0, 0, 1, 1], [], []>} : vector<32x576xbf16>, vector<576x128xbf16>, vector<32x128xf32> -> vector<32x128xf32>
    %7 = arith.addf %3, %6 : vector<32x128xf32>
    %c0_6 = arith.constant 0 : index
    %c0_7 = arith.constant 0 : index
    %8 = vector.load %arg8[%c0_6, %c0_7] : memref<32x128xf32, #tpu.memory_space<vmem>>, vector<32x128xf32>
    tpu.vector_store %arg8[%c0_6, %c0_7], %7 {strides = array<i32>} : memref<32x128xf32, #tpu.memory_space<vmem>>, vector<32x128xf32>,
    %c0_i32_8 = arith.constant 0 : i32
    %9 = arith.cmpi eq, %arg2, %c0_i32_8 : i32
    %10 = arith.extui %9 : i1 to i32
    %c0_i32_9 = arith.constant 0 : i32
    %11 = arith.cmpi ne, %10, %c0_i32_9 : i32
    scf.if %11 {
      %c0_10 = arith.constant 0 : index
      %c0_11 = arith.constant 0 : index
      %12 = vector.load %arg8[%c0_10, %c0_11] : memref<32x128xf32, #tpu.memory_space<vmem>>, vector<32x128xf32>
      %c0_12 = arith.constant 0 : index
      %c0_13 = arith.constant 0 : index
      %13 = vector.load %arg5[%c0_12, %c0_13] : memref<1x128xf32, #tpu.memory_space<vmem>>, vector<1x128xf32>
      %14 = vector.broadcast %13 : vector<1x128xf32> to vector<32x128xf32>
      %15 = arith.mulf %12, %14 : vector<32x128xf32>
      %c0_14 = arith.constant 0 : index
      %c0_15 = arith.constant 0 : index
      %16 = vector.load %arg6[%c0_14, %c0_15] : memref<1x128xf32, #tpu.memory_space<vmem>>, vector<1x128xf32>
      %17 = vector.broadcast %16 : vector<1x128xf32> to vector<32x128xf32>
      %18 = arith.addf %15, %17 : vector<32x128xf32>
      %cst_16 = arith.constant 0.000000e+00 : f32
      %19 = vector.broadcast %cst_16 : f32 to vector<32x128xf32>
      %20 = arith.maximumf %18, %19 : vector<32x128xf32>
      %21 = arith.truncf %20 : vector<32x128xf32> to vector<32x128xbf16>
      %c0_17 = arith.constant 0 : index
      %c0_18 = arith.constant 0 : index
      %22 = vector.load %arg7[%c0_17, %c0_18] : memref<32x128xbf16, #tpu.memory_space<vmem>>, vector<32x128xbf16>
      tpu.vector_store %arg7[%c0_17, %c0_18], %21 {strides = array<i32>} : memref<32x128xbf16, #tpu.memory_space<vmem>>, vector<32x128xbf16>,
    } else {
    }
    return
  }
  func.func @transform_0(%arg0: i32, %arg1: i32, %arg2: i32) -> (i32, i32) {
    %c0_i32 = arith.constant 0 : i32
    return %arg0, %arg2 : i32, i32
  }
  func.func @transform_1(%arg0: i32, %arg1: i32, %arg2: i32) -> (i32, i32) {
    %c0_i32 = arith.constant 0 : i32
    return %arg2, %arg1 : i32, i32
  }
  func.func @transform_2(%arg0: i32, %arg1: i32, %arg2: i32) -> (i32, i32) {
    %c0_i32 = arith.constant 0 : i32
    %c0_i32_0 = arith.constant 0 : i32
    return %c0_i32, %arg1 : i32, i32
  }
  func.func @transform_3(%arg0: i32, %arg1: i32, %arg2: i32) -> (i32, i32) {
    %c0_i32 = arith.constant 0 : i32
    %c0_i32_0 = arith.constant 0 : i32
    return %c0_i32, %arg1 : i32, i32
  }
  func.func @transform_4(%arg0: i32, %arg1: i32, %arg2: i32) -> (i32, i32) {
    %c0_i32 = arith.constant 0 : i32
    return %arg0, %arg1 : i32, i32
  }
}

module attributes {stable_mosaic.version = 11 : i64} {
  func.func @_mm_resadd_kernel(%arg0: i32, %arg1: i32, %arg2: i32, %arg3: memref<32x1152xbf16, #tpu.memory_space<vmem>>, %arg4: memref<1152x128xbf16, #tpu.memory_space<vmem>>, %arg5: memref<32x128xbf16, #tpu.memory_space<vmem>>, %arg6: memref<32x128xbf16, #tpu.memory_space<vmem>>, %arg7: memref<32x128xf32, #tpu.memory_space<vmem>>) attributes {dimension_semantics = [#tpu.dimension_semantics<parallel>, #tpu.dimension_semantics<parallel>, #tpu.dimension_semantics<arbitrary>], iteration_bounds = array<i64: 1, 1, 1>, scalar_prefetch = 0 : i64, scratch_operands = 1 : i64, tpu.core_type = #tpu.core_type<tc>, window_params = [{transform_indices = @transform_0, window_bounds = array<i64: 32, 1152>}, {transform_indices = @transform_1, window_bounds = array<i64: 1152, 128>}, {transform_indices = @transform_2, window_bounds = array<i64: 32, 128>}, {transform_indices = @transform_3, window_bounds = array<i64: 32, 128>}]} {
    %c0_i32 = arith.constant 0 : i32
    %0 = arith.cmpi eq, %arg2, %c0_i32 : i32
    %1 = arith.extui %0 : i1 to i32
    %c0_i32_0 = arith.constant 0 : i32
    %2 = arith.cmpi ne, %1, %c0_i32_0 : i32
    scf.if %2 {
      %cst_10 = arith.constant 0.000000e+00 : f32
      %12 = vector.broadcast %cst_10 : f32 to vector<32x128xf32>
      %c0_11 = arith.constant 0 : index
      %c0_12 = arith.constant 0 : index
      %13 = vector.load %arg7[%c0_11, %c0_12] : memref<32x128xf32, #tpu.memory_space<vmem>>, vector<32x128xf32>
      tpu.vector_store %arg7[%c0_11, %c0_12], %12 {strides = array<i32>} : memref<32x128xf32, #tpu.memory_space<vmem>>, vector<32x128xf32>,
    } else {
    }
    %c0 = arith.constant 0 : index
    %c0_1 = arith.constant 0 : index
    %3 = vector.load %arg7[%c0, %c0_1] : memref<32x128xf32, #tpu.memory_space<vmem>>, vector<32x128xf32>
    %c0_2 = arith.constant 0 : index
    %c0_3 = arith.constant 0 : index
    %4 = vector.load %arg3[%c0_2, %c0_3] : memref<32x1152xbf16, #tpu.memory_space<vmem>>, vector<32x1152xbf16>
    %c0_4 = arith.constant 0 : index
    %c0_5 = arith.constant 0 : index
    %5 = vector.load %arg4[%c0_4, %c0_5] : memref<1152x128xbf16, #tpu.memory_space<vmem>>, vector<1152x128xbf16>
    %cst = arith.constant dense<0.000000e+00> : vector<32x128xf32>
    %6 = tpu.matmul %4, %5, %cst {dimension_numbers = #tpu.dot_dimension_numbers<[1], [0], [0], [1], [0, 0, 1, 1], [], []>} : vector<32x1152xbf16>, vector<1152x128xbf16>, vector<32x128xf32> -> vector<32x128xf32>
    %7 = arith.addf %3, %6 : vector<32x128xf32>
    %c0_6 = arith.constant 0 : index
    %c0_7 = arith.constant 0 : index
    %8 = vector.load %arg7[%c0_6, %c0_7] : memref<32x128xf32, #tpu.memory_space<vmem>>, vector<32x128xf32>
    tpu.vector_store %arg7[%c0_6, %c0_7], %7 {strides = array<i32>} : memref<32x128xf32, #tpu.memory_space<vmem>>, vector<32x128xf32>,
    %c0_i32_8 = arith.constant 0 : i32
    %9 = arith.cmpi eq, %arg2, %c0_i32_8 : i32
    %10 = arith.extui %9 : i1 to i32
    %c0_i32_9 = arith.constant 0 : i32
    %11 = arith.cmpi ne, %10, %c0_i32_9 : i32
    scf.if %11 {
      %c0_10 = arith.constant 0 : index
      %c0_11 = arith.constant 0 : index
      %12 = vector.load %arg7[%c0_10, %c0_11] : memref<32x128xf32, #tpu.memory_space<vmem>>, vector<32x128xf32>
      %c0_12 = arith.constant 0 : index
      %c0_13 = arith.constant 0 : index
      %13 = vector.load %arg5[%c0_12, %c0_13] : memref<32x128xbf16, #tpu.memory_space<vmem>>, vector<32x128xbf16>
      %14 = arith.extf %13 : vector<32x128xbf16> to vector<32x128xf32>
      %15 = arith.addf %12, %14 : vector<32x128xf32>
      %16 = arith.truncf %15 : vector<32x128xf32> to vector<32x128xbf16>
      %c0_14 = arith.constant 0 : index
      %c0_15 = arith.constant 0 : index
      %17 = vector.load %arg6[%c0_14, %c0_15] : memref<32x128xbf16, #tpu.memory_space<vmem>>, vector<32x128xbf16>
      tpu.vector_store %arg6[%c0_14, %c0_15], %16 {strides = array<i32>} : memref<32x128xbf16, #tpu.memory_space<vmem>>, vector<32x128xbf16>,
    } else {
    }
    return
  }
  func.func @transform_0(%arg0: i32, %arg1: i32, %arg2: i32) -> (i32, i32) {
    %c0_i32 = arith.constant 0 : i32
    return %arg0, %arg2 : i32, i32
  }
  func.func @transform_1(%arg0: i32, %arg1: i32, %arg2: i32) -> (i32, i32) {
    %c0_i32 = arith.constant 0 : i32
    return %arg2, %arg1 : i32, i32
  }
  func.func @transform_2(%arg0: i32, %arg1: i32, %arg2: i32) -> (i32, i32) {
    %c0_i32 = arith.constant 0 : i32
    return %arg0, %arg1 : i32, i32
  }
  func.func @transform_3(%arg0: i32, %arg1: i32, %arg2: i32) -> (i32, i32) {
    %c0_i32 = arith.constant 0 : i32
    return %arg0, %arg1 : i32, i32
  }
}

module attributes {stable_mosaic.version = 11 : i64} {
  func.func @_mm_prologue_bias_kernel(%arg0: i32, %arg1: i32, %arg2: i32, %arg3: memref<8x128xbf16, #tpu.memory_space<vmem>>, %arg4: memref<1x128xf32, #tpu.memory_space<vmem>>, %arg5: memref<1x128xf32, #tpu.memory_space<vmem>>, %arg6: memref<128x256xbf16, #tpu.memory_space<vmem>>, %arg7: memref<1x256xf32, #tpu.memory_space<vmem>>, %arg8: memref<8x256xbf16, #tpu.memory_space<vmem>>, %arg9: memref<8x256xf32, #tpu.memory_space<vmem>>) attributes {dimension_semantics = [#tpu.dimension_semantics<parallel>, #tpu.dimension_semantics<parallel>, #tpu.dimension_semantics<arbitrary>], iteration_bounds = array<i64: 1, 1, 1>, scalar_prefetch = 0 : i64, scratch_operands = 1 : i64, tpu.core_type = #tpu.core_type<tc>, window_params = [{transform_indices = @transform_0, window_bounds = array<i64: 8, 128>}, {transform_indices = @transform_1, window_bounds = array<i64: 1, 128>}, {transform_indices = @transform_2, window_bounds = array<i64: 1, 128>}, {transform_indices = @transform_3, window_bounds = array<i64: 128, 256>}, {transform_indices = @transform_4, window_bounds = array<i64: 1, 256>}, {transform_indices = @transform_5, window_bounds = array<i64: 8, 256>}]} {
    %c0_i32 = arith.constant 0 : i32
    %0 = arith.cmpi eq, %arg2, %c0_i32 : i32
    %1 = arith.extui %0 : i1 to i32
    %c0_i32_0 = arith.constant 0 : i32
    %2 = arith.cmpi ne, %1, %c0_i32_0 : i32
    scf.if %2 {
      %cst_15 = arith.constant 0.000000e+00 : f32
      %22 = vector.broadcast %cst_15 : f32 to vector<8x256xf32>
      %c0_16 = arith.constant 0 : index
      %c0_17 = arith.constant 0 : index
      %23 = vector.load %arg9[%c0_16, %c0_17] : memref<8x256xf32, #tpu.memory_space<vmem>>, vector<8x256xf32>
      tpu.vector_store %arg9[%c0_16, %c0_17], %22 {strides = array<i32>} : memref<8x256xf32, #tpu.memory_space<vmem>>, vector<8x256xf32>,
    } else {
    }
    %c0 = arith.constant 0 : index
    %c0_1 = arith.constant 0 : index
    %3 = vector.load %arg3[%c0, %c0_1] : memref<8x128xbf16, #tpu.memory_space<vmem>>, vector<8x128xbf16>
    %4 = arith.extf %3 : vector<8x128xbf16> to vector<8x128xf32>
    %c0_2 = arith.constant 0 : index
    %c0_3 = arith.constant 0 : index
    %5 = vector.load %arg4[%c0_2, %c0_3] : memref<1x128xf32, #tpu.memory_space<vmem>>, vector<1x128xf32>
    %6 = vector.broadcast %5 : vector<1x128xf32> to vector<8x128xf32>
    %7 = arith.mulf %4, %6 : vector<8x128xf32>
    %c0_4 = arith.constant 0 : index
    %c0_5 = arith.constant 0 : index
    %8 = vector.load %arg5[%c0_4, %c0_5] : memref<1x128xf32, #tpu.memory_space<vmem>>, vector<1x128xf32>
    %9 = vector.broadcast %8 : vector<1x128xf32> to vector<8x128xf32>
    %10 = arith.addf %7, %9 : vector<8x128xf32>
    %cst = arith.constant 0.000000e+00 : f32
    %11 = vector.broadcast %cst : f32 to vector<8x128xf32>
    %12 = arith.maximumf %10, %11 : vector<8x128xf32>
    %13 = arith.truncf %12 : vector<8x128xf32> to vector<8x128xbf16>
    %c0_6 = arith.constant 0 : index
    %c0_7 = arith.constant 0 : index
    %14 = vector.load %arg9[%c0_6, %c0_7] : memref<8x256xf32, #tpu.memory_space<vmem>>, vector<8x256xf32>
    %c0_8 = arith.constant 0 : index
    %c0_9 = arith.constant 0 : index
    %15 = vector.load %arg6[%c0_8, %c0_9] : memref<128x256xbf16, #tpu.memory_space<vmem>>, vector<128x256xbf16>
    %cst_10 = arith.constant dense<0.000000e+00> : vector<8x256xf32>
    %16 = tpu.matmul %13, %15, %cst_10 {dimension_numbers = #tpu.dot_dimension_numbers<[1], [0], [0], [1], [0, 0, 1, 1], [], []>} : vector<8x128xbf16>, vector<128x256xbf16>, vector<8x256xf32> -> vector<8x256xf32>
    %17 = arith.addf %14, %16 : vector<8x256xf32>
    %c0_11 = arith.constant 0 : index
    %c0_12 = arith.constant 0 : index
    %18 = vector.load %arg9[%c0_11, %c0_12] : memref<8x256xf32, #tpu.memory_space<vmem>>, vector<8x256xf32>
    tpu.vector_store %arg9[%c0_11, %c0_12], %17 {strides = array<i32>} : memref<8x256xf32, #tpu.memory_space<vmem>>, vector<8x256xf32>,
    %c0_i32_13 = arith.constant 0 : i32
    %19 = arith.cmpi eq, %arg2, %c0_i32_13 : i32
    %20 = arith.extui %19 : i1 to i32
    %c0_i32_14 = arith.constant 0 : i32
    %21 = arith.cmpi ne, %20, %c0_i32_14 : i32
    scf.if %21 {
      %c0_15 = arith.constant 0 : index
      %c0_16 = arith.constant 0 : index
      %22 = vector.load %arg9[%c0_15, %c0_16] : memref<8x256xf32, #tpu.memory_space<vmem>>, vector<8x256xf32>
      %c0_17 = arith.constant 0 : index
      %c0_18 = arith.constant 0 : index
      %23 = vector.load %arg7[%c0_17, %c0_18] : memref<1x256xf32, #tpu.memory_space<vmem>>, vector<1x256xf32>
      %24 = vector.broadcast %23 : vector<1x256xf32> to vector<8x256xf32>
      %25 = arith.addf %22, %24 : vector<8x256xf32>
      %26 = arith.truncf %25 : vector<8x256xf32> to vector<8x256xbf16>
      %c0_19 = arith.constant 0 : index
      %c0_20 = arith.constant 0 : index
      %27 = vector.load %arg8[%c0_19, %c0_20] : memref<8x256xbf16, #tpu.memory_space<vmem>>, vector<8x256xbf16>
      tpu.vector_store %arg8[%c0_19, %c0_20], %26 {strides = array<i32>} : memref<8x256xbf16, #tpu.memory_space<vmem>>, vector<8x256xbf16>,
    } else {
    }
    return
  }
  func.func @transform_0(%arg0: i32, %arg1: i32, %arg2: i32) -> (i32, i32) {
    %c0_i32 = arith.constant 0 : i32
    return %arg0, %arg2 : i32, i32
  }
  func.func @transform_1(%arg0: i32, %arg1: i32, %arg2: i32) -> (i32, i32) {
    %c0_i32 = arith.constant 0 : i32
    %c0_i32_0 = arith.constant 0 : i32
    return %c0_i32, %arg2 : i32, i32
  }
  func.func @transform_2(%arg0: i32, %arg1: i32, %arg2: i32) -> (i32, i32) {
    %c0_i32 = arith.constant 0 : i32
    %c0_i32_0 = arith.constant 0 : i32
    return %c0_i32, %arg2 : i32, i32
  }
  func.func @transform_3(%arg0: i32, %arg1: i32, %arg2: i32) -> (i32, i32) {
    %c0_i32 = arith.constant 0 : i32
    return %arg2, %arg1 : i32, i32
  }
  func.func @transform_4(%arg0: i32, %arg1: i32, %arg2: i32) -> (i32, i32) {
    %c0_i32 = arith.constant 0 : i32
    %c0_i32_0 = arith.constant 0 : i32
    return %c0_i32, %arg1 : i32, i32
  }
  func.func @transform_5(%arg0: i32, %arg1: i32, %arg2: i32) -> (i32, i32) {
    %c0_i32 = arith.constant 0 : i32
    return %arg0, %arg1 : i32, i32
  }
}

module attributes {stable_mosaic.version = 11 : i64} {
  func.func @_tap_mean_kernel(%arg0: i32, %arg1: memref<4x8x128xbf16, #tpu.memory_space<vmem>>, %arg2: memref<8x128xbf16, #tpu.memory_space<vmem>>) attributes {dimension_semantics = [#tpu.dimension_semantics<parallel>], iteration_bounds = array<i64: 1>, scalar_prefetch = 0 : i64, scratch_operands = 0 : i64, tpu.core_type = #tpu.core_type<tc>, window_params = [{transform_indices = @transform_0, window_bounds = array<i64: 4, 8, 128>}, {transform_indices = @transform_1, window_bounds = array<i64: 8, 128>}]} {
    %c0 = arith.constant 0 : index
    %c0_0 = arith.constant 0 : index
    %c0_1 = arith.constant 0 : index
    %0 = vector.load %arg1[%c0, %c0_0, %c0_1] : memref<4x8x128xbf16, #tpu.memory_space<vmem>>, vector<1x8x128xbf16>
    %1 = vector.shape_cast %0 : vector<1x8x128xbf16> to vector<8x128xbf16>
    %2 = arith.extf %1 : vector<8x128xbf16> to vector<8x128xf32>
    %c1 = arith.constant 1 : index
    %c0_2 = arith.constant 0 : index
    %c0_3 = arith.constant 0 : index
    %3 = vector.load %arg1[%c1, %c0_2, %c0_3] : memref<4x8x128xbf16, #tpu.memory_space<vmem>>, vector<1x8x128xbf16>
    %4 = vector.shape_cast %3 : vector<1x8x128xbf16> to vector<8x128xbf16>
    %5 = arith.extf %4 : vector<8x128xbf16> to vector<8x128xf32>
    %6 = arith.addf %2, %5 : vector<8x128xf32>
    %c2 = arith.constant 2 : index
    %c0_4 = arith.constant 0 : index
    %c0_5 = arith.constant 0 : index
    %7 = vector.load %arg1[%c2, %c0_4, %c0_5] : memref<4x8x128xbf16, #tpu.memory_space<vmem>>, vector<1x8x128xbf16>
    %8 = vector.shape_cast %7 : vector<1x8x128xbf16> to vector<8x128xbf16>
    %9 = arith.extf %8 : vector<8x128xbf16> to vector<8x128xf32>
    %10 = arith.addf %6, %9 : vector<8x128xf32>
    %c3 = arith.constant 3 : index
    %c0_6 = arith.constant 0 : index
    %c0_7 = arith.constant 0 : index
    %11 = vector.load %arg1[%c3, %c0_6, %c0_7] : memref<4x8x128xbf16, #tpu.memory_space<vmem>>, vector<1x8x128xbf16>
    %12 = vector.shape_cast %11 : vector<1x8x128xbf16> to vector<8x128xbf16>
    %13 = arith.extf %12 : vector<8x128xbf16> to vector<8x128xf32>
    %14 = arith.addf %10, %13 : vector<8x128xf32>
    %cst = arith.constant 2.500000e-01 : f32
    %15 = vector.broadcast %cst : f32 to vector<8x128xf32>
    %16 = arith.mulf %14, %15 : vector<8x128xf32>
    %17 = arith.truncf %16 : vector<8x128xf32> to vector<8x128xbf16>
    %c0_8 = arith.constant 0 : index
    %c0_9 = arith.constant 0 : index
    %18 = vector.load %arg2[%c0_8, %c0_9] : memref<8x128xbf16, #tpu.memory_space<vmem>>, vector<8x128xbf16>
    tpu.vector_store %arg2[%c0_8, %c0_9], %17 {strides = array<i32>} : memref<8x128xbf16, #tpu.memory_space<vmem>>, vector<8x128xbf16>,
    return
  }
  func.func @transform_0(%arg0: i32) -> (i32, i32, i32) {
    %c0_i32 = arith.constant 0 : i32
    %c0_i32_0 = arith.constant 0 : i32
    %c0_i32_1 = arith.constant 0 : i32
    return %c0_i32, %arg0, %c0_i32_0 : i32, i32, i32
  }
  func.func @transform_1(%arg0: i32) -> (i32, i32) {
    %c0_i32 = arith.constant 0 : i32
    %c0_i32_0 = arith.constant 0 : i32
    return %arg0, %c0_i32 : i32, i32
  }
}

module attributes {stable_mosaic.version = 11 : i64} {
  func.func @_bn_relu_kernel(%arg0: i32, %arg1: memref<32x128xbf16, #tpu.memory_space<vmem>>, %arg2: memref<1x128xf32, #tpu.memory_space<vmem>>, %arg3: memref<1x128xf32, #tpu.memory_space<vmem>>, %arg4: memref<32x128xbf16, #tpu.memory_space<vmem>>) attributes {dimension_semantics = [#tpu.dimension_semantics<parallel>], iteration_bounds = array<i64: 1>, scalar_prefetch = 0 : i64, scratch_operands = 0 : i64, tpu.core_type = #tpu.core_type<tc>, window_params = [{transform_indices = @transform_0, window_bounds = array<i64: 32, 128>}, {pipeline_mode = #tpu.pipeline_mode<synchronous>, transform_indices = @transform_1, window_bounds = array<i64: 1, 128>}, {pipeline_mode = #tpu.pipeline_mode<synchronous>, transform_indices = @transform_2, window_bounds = array<i64: 1, 128>}, {transform_indices = @transform_3, window_bounds = array<i64: 32, 128>}]} {
    %c0 = arith.constant 0 : index
    %c0_0 = arith.constant 0 : index
    %0 = vector.load %arg1[%c0, %c0_0] : memref<32x128xbf16, #tpu.memory_space<vmem>>, vector<32x128xbf16>
    %1 = arith.extf %0 : vector<32x128xbf16> to vector<32x128xf32>
    %c0_1 = arith.constant 0 : index
    %c0_2 = arith.constant 0 : index
    %2 = vector.load %arg2[%c0_1, %c0_2] : memref<1x128xf32, #tpu.memory_space<vmem>>, vector<1x128xf32>
    %3 = vector.broadcast %2 : vector<1x128xf32> to vector<32x128xf32>
    %4 = arith.mulf %1, %3 : vector<32x128xf32>
    %c0_3 = arith.constant 0 : index
    %c0_4 = arith.constant 0 : index
    %5 = vector.load %arg3[%c0_3, %c0_4] : memref<1x128xf32, #tpu.memory_space<vmem>>, vector<1x128xf32>
    %6 = vector.broadcast %5 : vector<1x128xf32> to vector<32x128xf32>
    %7 = arith.addf %4, %6 : vector<32x128xf32>
    %cst = arith.constant 0.000000e+00 : f32
    %8 = vector.broadcast %cst : f32 to vector<32x128xf32>
    %9 = arith.maximumf %7, %8 : vector<32x128xf32>
    %10 = arith.truncf %9 : vector<32x128xf32> to vector<32x128xbf16>
    %c0_5 = arith.constant 0 : index
    %c0_6 = arith.constant 0 : index
    %11 = vector.load %arg4[%c0_5, %c0_6] : memref<32x128xbf16, #tpu.memory_space<vmem>>, vector<32x128xbf16>
    tpu.vector_store %arg4[%c0_5, %c0_6], %10 {strides = array<i32>} : memref<32x128xbf16, #tpu.memory_space<vmem>>, vector<32x128xbf16>,
    return
  }
  func.func @transform_0(%arg0: i32) -> (i32, i32) {
    %c0_i32 = arith.constant 0 : i32
    %c0_i32_0 = arith.constant 0 : i32
    return %arg0, %c0_i32 : i32, i32
  }
  func.func @transform_1(%arg0: i32) -> (i32, i32) {
    %c0_i32 = arith.constant 0 : i32
    %c0_i32_0 = arith.constant 0 : i32
    %c0_i32_1 = arith.constant 0 : i32
    return %c0_i32, %c0_i32_0 : i32, i32
  }
  func.func @transform_2(%arg0: i32) -> (i32, i32) {
    %c0_i32 = arith.constant 0 : i32
    %c0_i32_0 = arith.constant 0 : i32
    %c0_i32_1 = arith.constant 0 : i32
    return %c0_i32, %c0_i32_0 : i32, i32
  }
  func.func @transform_3(%arg0: i32) -> (i32, i32) {
    %c0_i32 = arith.constant 0 : i32
    %c0_i32_0 = arith.constant 0 : i32
    return %arg0, %c0_i32 : i32, i32
  }
}

module attributes {stable_mosaic.version = 11 : i64} {
  func.func @_mm_bnrelu_kernel(%arg0: i32, %arg1: i32, %arg2: i32, %arg3: memref<8x1152xbf16, #tpu.memory_space<vmem>>, %arg4: memref<1152x256xbf16, #tpu.memory_space<vmem>>, %arg5: memref<1x256xf32, #tpu.memory_space<vmem>>, %arg6: memref<1x256xf32, #tpu.memory_space<vmem>>, %arg7: memref<8x256xbf16, #tpu.memory_space<vmem>>, %arg8: memref<8x256xf32, #tpu.memory_space<vmem>>) attributes {dimension_semantics = [#tpu.dimension_semantics<parallel>, #tpu.dimension_semantics<parallel>, #tpu.dimension_semantics<arbitrary>], iteration_bounds = array<i64: 1, 1, 1>, scalar_prefetch = 0 : i64, scratch_operands = 1 : i64, tpu.core_type = #tpu.core_type<tc>, window_params = [{transform_indices = @transform_0, window_bounds = array<i64: 8, 1152>}, {transform_indices = @transform_1, window_bounds = array<i64: 1152, 256>}, {transform_indices = @transform_2, window_bounds = array<i64: 1, 256>}, {transform_indices = @transform_3, window_bounds = array<i64: 1, 256>}, {transform_indices = @transform_4, window_bounds = array<i64: 8, 256>}]} {
    %c0_i32 = arith.constant 0 : i32
    %0 = arith.cmpi eq, %arg2, %c0_i32 : i32
    %1 = arith.extui %0 : i1 to i32
    %c0_i32_0 = arith.constant 0 : i32
    %2 = arith.cmpi ne, %1, %c0_i32_0 : i32
    scf.if %2 {
      %cst_10 = arith.constant 0.000000e+00 : f32
      %12 = vector.broadcast %cst_10 : f32 to vector<8x256xf32>
      %c0_11 = arith.constant 0 : index
      %c0_12 = arith.constant 0 : index
      %13 = vector.load %arg8[%c0_11, %c0_12] : memref<8x256xf32, #tpu.memory_space<vmem>>, vector<8x256xf32>
      tpu.vector_store %arg8[%c0_11, %c0_12], %12 {strides = array<i32>} : memref<8x256xf32, #tpu.memory_space<vmem>>, vector<8x256xf32>,
    } else {
    }
    %c0 = arith.constant 0 : index
    %c0_1 = arith.constant 0 : index
    %3 = vector.load %arg8[%c0, %c0_1] : memref<8x256xf32, #tpu.memory_space<vmem>>, vector<8x256xf32>
    %c0_2 = arith.constant 0 : index
    %c0_3 = arith.constant 0 : index
    %4 = vector.load %arg3[%c0_2, %c0_3] : memref<8x1152xbf16, #tpu.memory_space<vmem>>, vector<8x1152xbf16>
    %c0_4 = arith.constant 0 : index
    %c0_5 = arith.constant 0 : index
    %5 = vector.load %arg4[%c0_4, %c0_5] : memref<1152x256xbf16, #tpu.memory_space<vmem>>, vector<1152x256xbf16>
    %cst = arith.constant dense<0.000000e+00> : vector<8x256xf32>
    %6 = tpu.matmul %4, %5, %cst {dimension_numbers = #tpu.dot_dimension_numbers<[1], [0], [0], [1], [0, 0, 1, 1], [], []>} : vector<8x1152xbf16>, vector<1152x256xbf16>, vector<8x256xf32> -> vector<8x256xf32>
    %7 = arith.addf %3, %6 : vector<8x256xf32>
    %c0_6 = arith.constant 0 : index
    %c0_7 = arith.constant 0 : index
    %8 = vector.load %arg8[%c0_6, %c0_7] : memref<8x256xf32, #tpu.memory_space<vmem>>, vector<8x256xf32>
    tpu.vector_store %arg8[%c0_6, %c0_7], %7 {strides = array<i32>} : memref<8x256xf32, #tpu.memory_space<vmem>>, vector<8x256xf32>,
    %c0_i32_8 = arith.constant 0 : i32
    %9 = arith.cmpi eq, %arg2, %c0_i32_8 : i32
    %10 = arith.extui %9 : i1 to i32
    %c0_i32_9 = arith.constant 0 : i32
    %11 = arith.cmpi ne, %10, %c0_i32_9 : i32
    scf.if %11 {
      %c0_10 = arith.constant 0 : index
      %c0_11 = arith.constant 0 : index
      %12 = vector.load %arg8[%c0_10, %c0_11] : memref<8x256xf32, #tpu.memory_space<vmem>>, vector<8x256xf32>
      %c0_12 = arith.constant 0 : index
      %c0_13 = arith.constant 0 : index
      %13 = vector.load %arg5[%c0_12, %c0_13] : memref<1x256xf32, #tpu.memory_space<vmem>>, vector<1x256xf32>
      %14 = vector.broadcast %13 : vector<1x256xf32> to vector<8x256xf32>
      %15 = arith.mulf %12, %14 : vector<8x256xf32>
      %c0_14 = arith.constant 0 : index
      %c0_15 = arith.constant 0 : index
      %16 = vector.load %arg6[%c0_14, %c0_15] : memref<1x256xf32, #tpu.memory_space<vmem>>, vector<1x256xf32>
      %17 = vector.broadcast %16 : vector<1x256xf32> to vector<8x256xf32>
      %18 = arith.addf %15, %17 : vector<8x256xf32>
      %cst_16 = arith.constant 0.000000e+00 : f32
      %19 = vector.broadcast %cst_16 : f32 to vector<8x256xf32>
      %20 = arith.maximumf %18, %19 : vector<8x256xf32>
      %21 = arith.truncf %20 : vector<8x256xf32> to vector<8x256xbf16>
      %c0_17 = arith.constant 0 : index
      %c0_18 = arith.constant 0 : index
      %22 = vector.load %arg7[%c0_17, %c0_18] : memref<8x256xbf16, #tpu.memory_space<vmem>>, vector<8x256xbf16>
      tpu.vector_store %arg7[%c0_17, %c0_18], %21 {strides = array<i32>} : memref<8x256xbf16, #tpu.memory_space<vmem>>, vector<8x256xbf16>,
    } else {
    }
    return
  }
  func.func @transform_0(%arg0: i32, %arg1: i32, %arg2: i32) -> (i32, i32) {
    %c0_i32 = arith.constant 0 : i32
    return %arg0, %arg2 : i32, i32
  }
  func.func @transform_1(%arg0: i32, %arg1: i32, %arg2: i32) -> (i32, i32) {
    %c0_i32 = arith.constant 0 : i32
    return %arg2, %arg1 : i32, i32
  }
  func.func @transform_2(%arg0: i32, %arg1: i32, %arg2: i32) -> (i32, i32) {
    %c0_i32 = arith.constant 0 : i32
    %c0_i32_0 = arith.constant 0 : i32
    return %c0_i32, %arg1 : i32, i32
  }
  func.func @transform_3(%arg0: i32, %arg1: i32, %arg2: i32) -> (i32, i32) {
    %c0_i32 = arith.constant 0 : i32
    %c0_i32_0 = arith.constant 0 : i32
    return %c0_i32, %arg1 : i32, i32
  }
  func.func @transform_4(%arg0: i32, %arg1: i32, %arg2: i32) -> (i32, i32) {
    %c0_i32 = arith.constant 0 : i32
    return %arg0, %arg1 : i32, i32
  }
}

module attributes {stable_mosaic.version = 11 : i64} {
  func.func @_mm_resadd_kernel(%arg0: i32, %arg1: i32, %arg2: i32, %arg3: memref<8x256xbf16, #tpu.memory_space<vmem>>, %arg4: memref<256x256xbf16, #tpu.memory_space<vmem>>, %arg5: memref<8x256xbf16, #tpu.memory_space<vmem>>, %arg6: memref<8x256xbf16, #tpu.memory_space<vmem>>, %arg7: memref<8x256xf32, #tpu.memory_space<vmem>>) attributes {dimension_semantics = [#tpu.dimension_semantics<parallel>, #tpu.dimension_semantics<parallel>, #tpu.dimension_semantics<arbitrary>], iteration_bounds = array<i64: 1, 1, 9>, scalar_prefetch = 0 : i64, scratch_operands = 1 : i64, tpu.core_type = #tpu.core_type<tc>, window_params = [{transform_indices = @transform_0, window_bounds = array<i64: 8, 256>}, {transform_indices = @transform_1, window_bounds = array<i64: 256, 256>}, {transform_indices = @transform_2, window_bounds = array<i64: 8, 256>}, {transform_indices = @transform_3, window_bounds = array<i64: 8, 256>}]} {
    %c0_i32 = arith.constant 0 : i32
    %0 = arith.cmpi eq, %arg2, %c0_i32 : i32
    %1 = arith.extui %0 : i1 to i32
    %c0_i32_0 = arith.constant 0 : i32
    %2 = arith.cmpi ne, %1, %c0_i32_0 : i32
    scf.if %2 {
      %cst_9 = arith.constant 0.000000e+00 : f32
      %12 = vector.broadcast %cst_9 : f32 to vector<8x256xf32>
      %c0_10 = arith.constant 0 : index
      %c0_11 = arith.constant 0 : index
      %13 = vector.load %arg7[%c0_10, %c0_11] : memref<8x256xf32, #tpu.memory_space<vmem>>, vector<8x256xf32>
      tpu.vector_store %arg7[%c0_10, %c0_11], %12 {strides = array<i32>} : memref<8x256xf32, #tpu.memory_space<vmem>>, vector<8x256xf32>,
    } else {
    }
    %c0 = arith.constant 0 : index
    %c0_1 = arith.constant 0 : index
    %3 = vector.load %arg7[%c0, %c0_1] : memref<8x256xf32, #tpu.memory_space<vmem>>, vector<8x256xf32>
    %c0_2 = arith.constant 0 : index
    %c0_3 = arith.constant 0 : index
    %4 = vector.load %arg3[%c0_2, %c0_3] : memref<8x256xbf16, #tpu.memory_space<vmem>>, vector<8x256xbf16>
    %c0_4 = arith.constant 0 : index
    %c0_5 = arith.constant 0 : index
    %5 = vector.load %arg4[%c0_4, %c0_5] : memref<256x256xbf16, #tpu.memory_space<vmem>>, vector<256x256xbf16>
    %cst = arith.constant dense<0.000000e+00> : vector<8x256xf32>
    %6 = tpu.matmul %4, %5, %cst {dimension_numbers = #tpu.dot_dimension_numbers<[1], [0], [0], [1], [0, 0, 1, 1], [], []>} : vector<8x256xbf16>, vector<256x256xbf16>, vector<8x256xf32> -> vector<8x256xf32>
    %7 = arith.addf %3, %6 : vector<8x256xf32>
    %c0_6 = arith.constant 0 : index
    %c0_7 = arith.constant 0 : index
    %8 = vector.load %arg7[%c0_6, %c0_7] : memref<8x256xf32, #tpu.memory_space<vmem>>, vector<8x256xf32>
    tpu.vector_store %arg7[%c0_6, %c0_7], %7 {strides = array<i32>} : memref<8x256xf32, #tpu.memory_space<vmem>>, vector<8x256xf32>,
    %c8_i32 = arith.constant 8 : i32
    %9 = arith.cmpi eq, %arg2, %c8_i32 : i32
    %10 = arith.extui %9 : i1 to i32
    %c0_i32_8 = arith.constant 0 : i32
    %11 = arith.cmpi ne, %10, %c0_i32_8 : i32
    scf.if %11 {
      %c0_9 = arith.constant 0 : index
      %c0_10 = arith.constant 0 : index
      %12 = vector.load %arg7[%c0_9, %c0_10] : memref<8x256xf32, #tpu.memory_space<vmem>>, vector<8x256xf32>
      %c0_11 = arith.constant 0 : index
      %c0_12 = arith.constant 0 : index
      %13 = vector.load %arg5[%c0_11, %c0_12] : memref<8x256xbf16, #tpu.memory_space<vmem>>, vector<8x256xbf16>
      %14 = arith.extf %13 : vector<8x256xbf16> to vector<8x256xf32>
      %15 = arith.addf %12, %14 : vector<8x256xf32>
      %16 = arith.truncf %15 : vector<8x256xf32> to vector<8x256xbf16>
      %c0_13 = arith.constant 0 : index
      %c0_14 = arith.constant 0 : index
      %17 = vector.load %arg6[%c0_13, %c0_14] : memref<8x256xbf16, #tpu.memory_space<vmem>>, vector<8x256xbf16>
      tpu.vector_store %arg6[%c0_13, %c0_14], %16 {strides = array<i32>} : memref<8x256xbf16, #tpu.memory_space<vmem>>, vector<8x256xbf16>,
    } else {
    }
    return
  }
  func.func @transform_0(%arg0: i32, %arg1: i32, %arg2: i32) -> (i32, i32) {
    %c0_i32 = arith.constant 0 : i32
    return %arg0, %arg2 : i32, i32
  }
  func.func @transform_1(%arg0: i32, %arg1: i32, %arg2: i32) -> (i32, i32) {
    %c0_i32 = arith.constant 0 : i32
    return %arg2, %arg1 : i32, i32
  }
  func.func @transform_2(%arg0: i32, %arg1: i32, %arg2: i32) -> (i32, i32) {
    %c0_i32 = arith.constant 0 : i32
    return %arg0, %arg1 : i32, i32
  }
  func.func @transform_3(%arg0: i32, %arg1: i32, %arg2: i32) -> (i32, i32) {
    %c0_i32 = arith.constant 0 : i32
    return %arg0, %arg1 : i32, i32
  }
}

module attributes {stable_mosaic.version = 11 : i64} {
  func.func @_tap_mean_kernel(%arg0: i32, %arg1: memref<4x2x256xbf16, #tpu.memory_space<vmem>>, %arg2: memref<2x256xbf16, #tpu.memory_space<vmem>>) attributes {dimension_semantics = [#tpu.dimension_semantics<parallel>], iteration_bounds = array<i64: 1>, scalar_prefetch = 0 : i64, scratch_operands = 0 : i64, tpu.core_type = #tpu.core_type<tc>, window_params = [{transform_indices = @transform_0, window_bounds = array<i64: 4, 2, 256>}, {transform_indices = @transform_1, window_bounds = array<i64: 2, 256>}]} {
    %c0 = arith.constant 0 : index
    %c0_0 = arith.constant 0 : index
    %c0_1 = arith.constant 0 : index
    %0 = vector.load %arg1[%c0, %c0_0, %c0_1] : memref<4x2x256xbf16, #tpu.memory_space<vmem>>, vector<1x2x256xbf16>
    %1 = vector.shape_cast %0 : vector<1x2x256xbf16> to vector<2x256xbf16>
    %2 = arith.extf %1 : vector<2x256xbf16> to vector<2x256xf32>
    %c1 = arith.constant 1 : index
    %c0_2 = arith.constant 0 : index
    %c0_3 = arith.constant 0 : index
    %3 = vector.load %arg1[%c1, %c0_2, %c0_3] : memref<4x2x256xbf16, #tpu.memory_space<vmem>>, vector<1x2x256xbf16>
    %4 = vector.shape_cast %3 : vector<1x2x256xbf16> to vector<2x256xbf16>
    %5 = arith.extf %4 : vector<2x256xbf16> to vector<2x256xf32>
    %6 = arith.addf %2, %5 : vector<2x256xf32>
    %c2 = arith.constant 2 : index
    %c0_4 = arith.constant 0 : index
    %c0_5 = arith.constant 0 : index
    %7 = vector.load %arg1[%c2, %c0_4, %c0_5] : memref<4x2x256xbf16, #tpu.memory_space<vmem>>, vector<1x2x256xbf16>
    %8 = vector.shape_cast %7 : vector<1x2x256xbf16> to vector<2x256xbf16>
    %9 = arith.extf %8 : vector<2x256xbf16> to vector<2x256xf32>
    %10 = arith.addf %6, %9 : vector<2x256xf32>
    %c3 = arith.constant 3 : index
    %c0_6 = arith.constant 0 : index
    %c0_7 = arith.constant 0 : index
    %11 = vector.load %arg1[%c3, %c0_6, %c0_7] : memref<4x2x256xbf16, #tpu.memory_space<vmem>>, vector<1x2x256xbf16>
    %12 = vector.shape_cast %11 : vector<1x2x256xbf16> to vector<2x256xbf16>
    %13 = arith.extf %12 : vector<2x256xbf16> to vector<2x256xf32>
    %14 = arith.addf %10, %13 : vector<2x256xf32>
    %cst = arith.constant 2.500000e-01 : f32
    %15 = vector.broadcast %cst : f32 to vector<2x256xf32>
    %16 = arith.mulf %14, %15 : vector<2x256xf32>
    %17 = arith.truncf %16 : vector<2x256xf32> to vector<2x256xbf16>
    %c0_8 = arith.constant 0 : index
    %c0_9 = arith.constant 0 : index
    %18 = vector.load %arg2[%c0_8, %c0_9] : memref<2x256xbf16, #tpu.memory_space<vmem>>, vector<2x256xbf16>
    tpu.vector_store %arg2[%c0_8, %c0_9], %17 {strides = array<i32>} : memref<2x256xbf16, #tpu.memory_space<vmem>>, vector<2x256xbf16>,
    return
  }
  func.func @transform_0(%arg0: i32) -> (i32, i32, i32) {
    %c0_i32 = arith.constant 0 : i32
    %c0_i32_0 = arith.constant 0 : i32
    %c0_i32_1 = arith.constant 0 : i32
    return %c0_i32, %arg0, %c0_i32_0 : i32, i32, i32
  }
  func.func @transform_1(%arg0: i32) -> (i32, i32) {
    %c0_i32 = arith.constant 0 : i32
    %c0_i32_0 = arith.constant 0 : i32
    return %arg0, %c0_i32 : i32, i32
  }
}

module attributes {stable_mosaic.version = 11 : i64} {
  func.func @_mm_prologue_bias_kernel(%arg0: i32, %arg1: i32, %arg2: i32, %arg3: memref<2x256xbf16, #tpu.memory_space<vmem>>, %arg4: memref<1x256xf32, #tpu.memory_space<vmem>>, %arg5: memref<1x256xf32, #tpu.memory_space<vmem>>, %arg6: memref<256x256xbf16, #tpu.memory_space<vmem>>, %arg7: memref<1x256xf32, #tpu.memory_space<vmem>>, %arg8: memref<2x256xbf16, #tpu.memory_space<vmem>>, %arg9: memref<2x256xf32, #tpu.memory_space<vmem>>) attributes {dimension_semantics = [#tpu.dimension_semantics<parallel>, #tpu.dimension_semantics<parallel>, #tpu.dimension_semantics<arbitrary>], iteration_bounds = array<i64: 1, 2, 1>, scalar_prefetch = 0 : i64, scratch_operands = 1 : i64, tpu.core_type = #tpu.core_type<tc>, window_params = [{transform_indices = @transform_0, window_bounds = array<i64: 2, 256>}, {transform_indices = @transform_1, window_bounds = array<i64: 1, 256>}, {transform_indices = @transform_2, window_bounds = array<i64: 1, 256>}, {transform_indices = @transform_3, window_bounds = array<i64: 256, 256>}, {transform_indices = @transform_4, window_bounds = array<i64: 1, 256>}, {transform_indices = @transform_5, window_bounds = array<i64: 2, 256>}]} {
    %c0_i32 = arith.constant 0 : i32
    %0 = arith.cmpi eq, %arg2, %c0_i32 : i32
    %1 = arith.extui %0 : i1 to i32
    %c0_i32_0 = arith.constant 0 : i32
    %2 = arith.cmpi ne, %1, %c0_i32_0 : i32
    scf.if %2 {
      %cst_15 = arith.constant 0.000000e+00 : f32
      %22 = vector.broadcast %cst_15 : f32 to vector<2x256xf32>
      %c0_16 = arith.constant 0 : index
      %c0_17 = arith.constant 0 : index
      %23 = vector.load %arg9[%c0_16, %c0_17] : memref<2x256xf32, #tpu.memory_space<vmem>>, vector<2x256xf32>
      tpu.vector_store %arg9[%c0_16, %c0_17], %22 {strides = array<i32>} : memref<2x256xf32, #tpu.memory_space<vmem>>, vector<2x256xf32>,
    } else {
    }
    %c0 = arith.constant 0 : index
    %c0_1 = arith.constant 0 : index
    %3 = vector.load %arg3[%c0, %c0_1] : memref<2x256xbf16, #tpu.memory_space<vmem>>, vector<2x256xbf16>
    %4 = arith.extf %3 : vector<2x256xbf16> to vector<2x256xf32>
    %c0_2 = arith.constant 0 : index
    %c0_3 = arith.constant 0 : index
    %5 = vector.load %arg4[%c0_2, %c0_3] : memref<1x256xf32, #tpu.memory_space<vmem>>, vector<1x256xf32>
    %6 = vector.broadcast %5 : vector<1x256xf32> to vector<2x256xf32>
    %7 = arith.mulf %4, %6 : vector<2x256xf32>
    %c0_4 = arith.constant 0 : index
    %c0_5 = arith.constant 0 : index
    %8 = vector.load %arg5[%c0_4, %c0_5] : memref<1x256xf32, #tpu.memory_space<vmem>>, vector<1x256xf32>
    %9 = vector.broadcast %8 : vector<1x256xf32> to vector<2x256xf32>
    %10 = arith.addf %7, %9 : vector<2x256xf32>
    %cst = arith.constant 0.000000e+00 : f32
    %11 = vector.broadcast %cst : f32 to vector<2x256xf32>
    %12 = arith.maximumf %10, %11 : vector<2x256xf32>
    %13 = arith.truncf %12 : vector<2x256xf32> to vector<2x256xbf16>
    %c0_6 = arith.constant 0 : index
    %c0_7 = arith.constant 0 : index
    %14 = vector.load %arg9[%c0_6, %c0_7] : memref<2x256xf32, #tpu.memory_space<vmem>>, vector<2x256xf32>
    %c0_8 = arith.constant 0 : index
    %c0_9 = arith.constant 0 : index
    %15 = vector.load %arg6[%c0_8, %c0_9] : memref<256x256xbf16, #tpu.memory_space<vmem>>, vector<256x256xbf16>
    %cst_10 = arith.constant dense<0.000000e+00> : vector<2x256xf32>
    %16 = tpu.matmul %13, %15, %cst_10 {dimension_numbers = #tpu.dot_dimension_numbers<[1], [0], [0], [1], [0, 0, 1, 1], [], []>} : vector<2x256xbf16>, vector<256x256xbf16>, vector<2x256xf32> -> vector<2x256xf32>
    %17 = arith.addf %14, %16 : vector<2x256xf32>
    %c0_11 = arith.constant 0 : index
    %c0_12 = arith.constant 0 : index
    %18 = vector.load %arg9[%c0_11, %c0_12] : memref<2x256xf32, #tpu.memory_space<vmem>>, vector<2x256xf32>
    tpu.vector_store %arg9[%c0_11, %c0_12], %17 {strides = array<i32>} : memref<2x256xf32, #tpu.memory_space<vmem>>, vector<2x256xf32>,
    %c0_i32_13 = arith.constant 0 : i32
    %19 = arith.cmpi eq, %arg2, %c0_i32_13 : i32
    %20 = arith.extui %19 : i1 to i32
    %c0_i32_14 = arith.constant 0 : i32
    %21 = arith.cmpi ne, %20, %c0_i32_14 : i32
    scf.if %21 {
      %c0_15 = arith.constant 0 : index
      %c0_16 = arith.constant 0 : index
      %22 = vector.load %arg9[%c0_15, %c0_16] : memref<2x256xf32, #tpu.memory_space<vmem>>, vector<2x256xf32>
      %c0_17 = arith.constant 0 : index
      %c0_18 = arith.constant 0 : index
      %23 = vector.load %arg7[%c0_17, %c0_18] : memref<1x256xf32, #tpu.memory_space<vmem>>, vector<1x256xf32>
      %24 = vector.broadcast %23 : vector<1x256xf32> to vector<2x256xf32>
      %25 = arith.addf %22, %24 : vector<2x256xf32>
      %26 = arith.truncf %25 : vector<2x256xf32> to vector<2x256xbf16>
      %c0_19 = arith.constant 0 : index
      %c0_20 = arith.constant 0 : index
      %27 = vector.load %arg8[%c0_19, %c0_20] : memref<2x256xbf16, #tpu.memory_space<vmem>>, vector<2x256xbf16>
      tpu.vector_store %arg8[%c0_19, %c0_20], %26 {strides = array<i32>} : memref<2x256xbf16, #tpu.memory_space<vmem>>, vector<2x256xbf16>,
    } else {
    }
    return
  }
  func.func @transform_0(%arg0: i32, %arg1: i32, %arg2: i32) -> (i32, i32) {
    %c0_i32 = arith.constant 0 : i32
    return %arg0, %arg2 : i32, i32
  }
  func.func @transform_1(%arg0: i32, %arg1: i32, %arg2: i32) -> (i32, i32) {
    %c0_i32 = arith.constant 0 : i32
    %c0_i32_0 = arith.constant 0 : i32
    return %c0_i32, %arg2 : i32, i32
  }
  func.func @transform_2(%arg0: i32, %arg1: i32, %arg2: i32) -> (i32, i32) {
    %c0_i32 = arith.constant 0 : i32
    %c0_i32_0 = arith.constant 0 : i32
    return %c0_i32, %arg2 : i32, i32
  }
  func.func @transform_3(%arg0: i32, %arg1: i32, %arg2: i32) -> (i32, i32) {
    %c0_i32 = arith.constant 0 : i32
    return %arg2, %arg1 : i32, i32
  }
  func.func @transform_4(%arg0: i32, %arg1: i32, %arg2: i32) -> (i32, i32) {
    %c0_i32 = arith.constant 0 : i32
    %c0_i32_0 = arith.constant 0 : i32
    return %c0_i32, %arg1 : i32, i32
  }
  func.func @transform_5(%arg0: i32, %arg1: i32, %arg2: i32) -> (i32, i32) {
    %c0_i32 = arith.constant 0 : i32
    return %arg0, %arg1 : i32, i32
  }
}

module attributes {stable_mosaic.version = 11 : i64} {
  func.func @_bn_relu_kernel(%arg0: i32, %arg1: memref<8x256xbf16, #tpu.memory_space<vmem>>, %arg2: memref<1x256xf32, #tpu.memory_space<vmem>>, %arg3: memref<1x256xf32, #tpu.memory_space<vmem>>, %arg4: memref<8x256xbf16, #tpu.memory_space<vmem>>) attributes {dimension_semantics = [#tpu.dimension_semantics<parallel>], iteration_bounds = array<i64: 1>, scalar_prefetch = 0 : i64, scratch_operands = 0 : i64, tpu.core_type = #tpu.core_type<tc>, window_params = [{transform_indices = @transform_0, window_bounds = array<i64: 8, 256>}, {pipeline_mode = #tpu.pipeline_mode<synchronous>, transform_indices = @transform_1, window_bounds = array<i64: 1, 256>}, {pipeline_mode = #tpu.pipeline_mode<synchronous>, transform_indices = @transform_2, window_bounds = array<i64: 1, 256>}, {transform_indices = @transform_3, window_bounds = array<i64: 8, 256>}]} {
    %c0 = arith.constant 0 : index
    %c0_0 = arith.constant 0 : index
    %0 = vector.load %arg1[%c0, %c0_0] : memref<8x256xbf16, #tpu.memory_space<vmem>>, vector<8x256xbf16>
    %1 = arith.extf %0 : vector<8x256xbf16> to vector<8x256xf32>
    %c0_1 = arith.constant 0 : index
    %c0_2 = arith.constant 0 : index
    %2 = vector.load %arg2[%c0_1, %c0_2] : memref<1x256xf32, #tpu.memory_space<vmem>>, vector<1x256xf32>
    %3 = vector.broadcast %2 : vector<1x256xf32> to vector<8x256xf32>
    %4 = arith.mulf %1, %3 : vector<8x256xf32>
    %c0_3 = arith.constant 0 : index
    %c0_4 = arith.constant 0 : index
    %5 = vector.load %arg3[%c0_3, %c0_4] : memref<1x256xf32, #tpu.memory_space<vmem>>, vector<1x256xf32>
    %6 = vector.broadcast %5 : vector<1x256xf32> to vector<8x256xf32>
    %7 = arith.addf %4, %6 : vector<8x256xf32>
    %cst = arith.constant 0.000000e+00 : f32
    %8 = vector.broadcast %cst : f32 to vector<8x256xf32>
    %9 = arith.maximumf %7, %8 : vector<8x256xf32>
    %10 = arith.truncf %9 : vector<8x256xf32> to vector<8x256xbf16>
    %c0_5 = arith.constant 0 : index
    %c0_6 = arith.constant 0 : index
    %11 = vector.load %arg4[%c0_5, %c0_6] : memref<8x256xbf16, #tpu.memory_space<vmem>>, vector<8x256xbf16>
    tpu.vector_store %arg4[%c0_5, %c0_6], %10 {strides = array<i32>} : memref<8x256xbf16, #tpu.memory_space<vmem>>, vector<8x256xbf16>,
    return
  }
  func.func @transform_0(%arg0: i32) -> (i32, i32) {
    %c0_i32 = arith.constant 0 : i32
    %c0_i32_0 = arith.constant 0 : i32
    return %arg0, %c0_i32 : i32, i32
  }
  func.func @transform_1(%arg0: i32) -> (i32, i32) {
    %c0_i32 = arith.constant 0 : i32
    %c0_i32_0 = arith.constant 0 : i32
    %c0_i32_1 = arith.constant 0 : i32
    return %c0_i32, %c0_i32_0 : i32, i32
  }
  func.func @transform_2(%arg0: i32) -> (i32, i32) {
    %c0_i32 = arith.constant 0 : i32
    %c0_i32_0 = arith.constant 0 : i32
    %c0_i32_1 = arith.constant 0 : i32
    return %c0_i32, %c0_i32_0 : i32, i32
  }
  func.func @transform_3(%arg0: i32) -> (i32, i32) {
    %c0_i32 = arith.constant 0 : i32
    %c0_i32_0 = arith.constant 0 : i32
    return %arg0, %c0_i32 : i32, i32
  }
}

module attributes {stable_mosaic.version = 11 : i64} {
  func.func @_mm_bnrelu_kernel(%arg0: i32, %arg1: i32, %arg2: i32, %arg3: memref<2x256xbf16, #tpu.memory_space<vmem>>, %arg4: memref<256x256xbf16, #tpu.memory_space<vmem>>, %arg5: memref<1x256xf32, #tpu.memory_space<vmem>>, %arg6: memref<1x256xf32, #tpu.memory_space<vmem>>, %arg7: memref<2x256xbf16, #tpu.memory_space<vmem>>, %arg8: memref<2x256xf32, #tpu.memory_space<vmem>>) attributes {dimension_semantics = [#tpu.dimension_semantics<parallel>, #tpu.dimension_semantics<parallel>, #tpu.dimension_semantics<arbitrary>], iteration_bounds = array<i64: 1, 2, 9>, scalar_prefetch = 0 : i64, scratch_operands = 1 : i64, tpu.core_type = #tpu.core_type<tc>, window_params = [{transform_indices = @transform_0, window_bounds = array<i64: 2, 256>}, {transform_indices = @transform_1, window_bounds = array<i64: 256, 256>}, {transform_indices = @transform_2, window_bounds = array<i64: 1, 256>}, {transform_indices = @transform_3, window_bounds = array<i64: 1, 256>}, {transform_indices = @transform_4, window_bounds = array<i64: 2, 256>}]} {
    %c0_i32 = arith.constant 0 : i32
    %0 = arith.cmpi eq, %arg2, %c0_i32 : i32
    %1 = arith.extui %0 : i1 to i32
    %c0_i32_0 = arith.constant 0 : i32
    %2 = arith.cmpi ne, %1, %c0_i32_0 : i32
    scf.if %2 {
      %cst_9 = arith.constant 0.000000e+00 : f32
      %12 = vector.broadcast %cst_9 : f32 to vector<2x256xf32>
      %c0_10 = arith.constant 0 : index
      %c0_11 = arith.constant 0 : index
      %13 = vector.load %arg8[%c0_10, %c0_11] : memref<2x256xf32, #tpu.memory_space<vmem>>, vector<2x256xf32>
      tpu.vector_store %arg8[%c0_10, %c0_11], %12 {strides = array<i32>} : memref<2x256xf32, #tpu.memory_space<vmem>>, vector<2x256xf32>,
    } else {
    }
    %c0 = arith.constant 0 : index
    %c0_1 = arith.constant 0 : index
    %3 = vector.load %arg8[%c0, %c0_1] : memref<2x256xf32, #tpu.memory_space<vmem>>, vector<2x256xf32>
    %c0_2 = arith.constant 0 : index
    %c0_3 = arith.constant 0 : index
    %4 = vector.load %arg3[%c0_2, %c0_3] : memref<2x256xbf16, #tpu.memory_space<vmem>>, vector<2x256xbf16>
    %c0_4 = arith.constant 0 : index
    %c0_5 = arith.constant 0 : index
    %5 = vector.load %arg4[%c0_4, %c0_5] : memref<256x256xbf16, #tpu.memory_space<vmem>>, vector<256x256xbf16>
    %cst = arith.constant dense<0.000000e+00> : vector<2x256xf32>
    %6 = tpu.matmul %4, %5, %cst {dimension_numbers = #tpu.dot_dimension_numbers<[1], [0], [0], [1], [0, 0, 1, 1], [], []>} : vector<2x256xbf16>, vector<256x256xbf16>, vector<2x256xf32> -> vector<2x256xf32>
    %7 = arith.addf %3, %6 : vector<2x256xf32>
    %c0_6 = arith.constant 0 : index
    %c0_7 = arith.constant 0 : index
    %8 = vector.load %arg8[%c0_6, %c0_7] : memref<2x256xf32, #tpu.memory_space<vmem>>, vector<2x256xf32>
    tpu.vector_store %arg8[%c0_6, %c0_7], %7 {strides = array<i32>} : memref<2x256xf32, #tpu.memory_space<vmem>>, vector<2x256xf32>,
    %c8_i32 = arith.constant 8 : i32
    %9 = arith.cmpi eq, %arg2, %c8_i32 : i32
    %10 = arith.extui %9 : i1 to i32
    %c0_i32_8 = arith.constant 0 : i32
    %11 = arith.cmpi ne, %10, %c0_i32_8 : i32
    scf.if %11 {
      %c0_9 = arith.constant 0 : index
      %c0_10 = arith.constant 0 : index
      %12 = vector.load %arg8[%c0_9, %c0_10] : memref<2x256xf32, #tpu.memory_space<vmem>>, vector<2x256xf32>
      %c0_11 = arith.constant 0 : index
      %c0_12 = arith.constant 0 : index
      %13 = vector.load %arg5[%c0_11, %c0_12] : memref<1x256xf32, #tpu.memory_space<vmem>>, vector<1x256xf32>
      %14 = vector.broadcast %13 : vector<1x256xf32> to vector<2x256xf32>
      %15 = arith.mulf %12, %14 : vector<2x256xf32>
      %c0_13 = arith.constant 0 : index
      %c0_14 = arith.constant 0 : index
      %16 = vector.load %arg6[%c0_13, %c0_14] : memref<1x256xf32, #tpu.memory_space<vmem>>, vector<1x256xf32>
      %17 = vector.broadcast %16 : vector<1x256xf32> to vector<2x256xf32>
      %18 = arith.addf %15, %17 : vector<2x256xf32>
      %cst_15 = arith.constant 0.000000e+00 : f32
      %19 = vector.broadcast %cst_15 : f32 to vector<2x256xf32>
      %20 = arith.maximumf %18, %19 : vector<2x256xf32>
      %21 = arith.truncf %20 : vector<2x256xf32> to vector<2x256xbf16>
      %c0_16 = arith.constant 0 : index
      %c0_17 = arith.constant 0 : index
      %22 = vector.load %arg7[%c0_16, %c0_17] : memref<2x256xbf16, #tpu.memory_space<vmem>>, vector<2x256xbf16>
      tpu.vector_store %arg7[%c0_16, %c0_17], %21 {strides = array<i32>} : memref<2x256xbf16, #tpu.memory_space<vmem>>, vector<2x256xbf16>,
    } else {
    }
    return
  }
  func.func @transform_0(%arg0: i32, %arg1: i32, %arg2: i32) -> (i32, i32) {
    %c0_i32 = arith.constant 0 : i32
    return %arg0, %arg2 : i32, i32
  }
  func.func @transform_1(%arg0: i32, %arg1: i32, %arg2: i32) -> (i32, i32) {
    %c0_i32 = arith.constant 0 : i32
    return %arg2, %arg1 : i32, i32
  }
  func.func @transform_2(%arg0: i32, %arg1: i32, %arg2: i32) -> (i32, i32) {
    %c0_i32 = arith.constant 0 : i32
    %c0_i32_0 = arith.constant 0 : i32
    return %c0_i32, %arg1 : i32, i32
  }
  func.func @transform_3(%arg0: i32, %arg1: i32, %arg2: i32) -> (i32, i32) {
    %c0_i32 = arith.constant 0 : i32
    %c0_i32_0 = arith.constant 0 : i32
    return %c0_i32, %arg1 : i32, i32
  }
  func.func @transform_4(%arg0: i32, %arg1: i32, %arg2: i32) -> (i32, i32) {
    %c0_i32 = arith.constant 0 : i32
    return %arg0, %arg1 : i32, i32
  }
}

module attributes {stable_mosaic.version = 11 : i64} {
  func.func @_mm_resadd_kernel(%arg0: i32, %arg1: i32, %arg2: i32, %arg3: memref<2x512xbf16, #tpu.memory_space<vmem>>, %arg4: memref<512x256xbf16, #tpu.memory_space<vmem>>, %arg5: memref<2x256xbf16, #tpu.memory_space<vmem>>, %arg6: memref<2x256xbf16, #tpu.memory_space<vmem>>, %arg7: memref<2x256xf32, #tpu.memory_space<vmem>>) attributes {dimension_semantics = [#tpu.dimension_semantics<parallel>, #tpu.dimension_semantics<parallel>, #tpu.dimension_semantics<arbitrary>], iteration_bounds = array<i64: 1, 2, 9>, scalar_prefetch = 0 : i64, scratch_operands = 1 : i64, tpu.core_type = #tpu.core_type<tc>, window_params = [{transform_indices = @transform_0, window_bounds = array<i64: 2, 512>}, {transform_indices = @transform_1, window_bounds = array<i64: 512, 256>}, {transform_indices = @transform_2, window_bounds = array<i64: 2, 256>}, {transform_indices = @transform_3, window_bounds = array<i64: 2, 256>}]} {
    %c0_i32 = arith.constant 0 : i32
    %0 = arith.cmpi eq, %arg2, %c0_i32 : i32
    %1 = arith.extui %0 : i1 to i32
    %c0_i32_0 = arith.constant 0 : i32
    %2 = arith.cmpi ne, %1, %c0_i32_0 : i32
    scf.if %2 {
      %cst_9 = arith.constant 0.000000e+00 : f32
      %12 = vector.broadcast %cst_9 : f32 to vector<2x256xf32>
      %c0_10 = arith.constant 0 : index
      %c0_11 = arith.constant 0 : index
      %13 = vector.load %arg7[%c0_10, %c0_11] : memref<2x256xf32, #tpu.memory_space<vmem>>, vector<2x256xf32>
      tpu.vector_store %arg7[%c0_10, %c0_11], %12 {strides = array<i32>} : memref<2x256xf32, #tpu.memory_space<vmem>>, vector<2x256xf32>,
    } else {
    }
    %c0 = arith.constant 0 : index
    %c0_1 = arith.constant 0 : index
    %3 = vector.load %arg7[%c0, %c0_1] : memref<2x256xf32, #tpu.memory_space<vmem>>, vector<2x256xf32>
    %c0_2 = arith.constant 0 : index
    %c0_3 = arith.constant 0 : index
    %4 = vector.load %arg3[%c0_2, %c0_3] : memref<2x512xbf16, #tpu.memory_space<vmem>>, vector<2x512xbf16>
    %c0_4 = arith.constant 0 : index
    %c0_5 = arith.constant 0 : index
    %5 = vector.load %arg4[%c0_4, %c0_5] : memref<512x256xbf16, #tpu.memory_space<vmem>>, vector<512x256xbf16>
    %cst = arith.constant dense<0.000000e+00> : vector<2x256xf32>
    %6 = tpu.matmul %4, %5, %cst {dimension_numbers = #tpu.dot_dimension_numbers<[1], [0], [0], [1], [0, 0, 1, 1], [], []>} : vector<2x512xbf16>, vector<512x256xbf16>, vector<2x256xf32> -> vector<2x256xf32>
    %7 = arith.addf %3, %6 : vector<2x256xf32>
    %c0_6 = arith.constant 0 : index
    %c0_7 = arith.constant 0 : index
    %8 = vector.load %arg7[%c0_6, %c0_7] : memref<2x256xf32, #tpu.memory_space<vmem>>, vector<2x256xf32>
    tpu.vector_store %arg7[%c0_6, %c0_7], %7 {strides = array<i32>} : memref<2x256xf32, #tpu.memory_space<vmem>>, vector<2x256xf32>,
    %c8_i32 = arith.constant 8 : i32
    %9 = arith.cmpi eq, %arg2, %c8_i32 : i32
    %10 = arith.extui %9 : i1 to i32
    %c0_i32_8 = arith.constant 0 : i32
    %11 = arith.cmpi ne, %10, %c0_i32_8 : i32
    scf.if %11 {
      %c0_9 = arith.constant 0 : index
      %c0_10 = arith.constant 0 : index
      %12 = vector.load %arg7[%c0_9, %c0_10] : memref<2x256xf32, #tpu.memory_space<vmem>>, vector<2x256xf32>
      %c0_11 = arith.constant 0 : index
      %c0_12 = arith.constant 0 : index
      %13 = vector.load %arg5[%c0_11, %c0_12] : memref<2x256xbf16, #tpu.memory_space<vmem>>, vector<2x256xbf16>
      %14 = arith.extf %13 : vector<2x256xbf16> to vector<2x256xf32>
      %15 = arith.addf %12, %14 : vector<2x256xf32>
      %16 = arith.truncf %15 : vector<2x256xf32> to vector<2x256xbf16>
      %c0_13 = arith.constant 0 : index
      %c0_14 = arith.constant 0 : index
      %17 = vector.load %arg6[%c0_13, %c0_14] : memref<2x256xbf16, #tpu.memory_space<vmem>>, vector<2x256xbf16>
      tpu.vector_store %arg6[%c0_13, %c0_14], %16 {strides = array<i32>} : memref<2x256xbf16, #tpu.memory_space<vmem>>, vector<2x256xbf16>,
    } else {
    }
    return
  }
  func.func @transform_0(%arg0: i32, %arg1: i32, %arg2: i32) -> (i32, i32) {
    %c0_i32 = arith.constant 0 : i32
    return %arg0, %arg2 : i32, i32
  }
  func.func @transform_1(%arg0: i32, %arg1: i32, %arg2: i32) -> (i32, i32) {
    %c0_i32 = arith.constant 0 : i32
    return %arg2, %arg1 : i32, i32
  }
  func.func @transform_2(%arg0: i32, %arg1: i32, %arg2: i32) -> (i32, i32) {
    %c0_i32 = arith.constant 0 : i32
    return %arg0, %arg1 : i32, i32
  }
  func.func @transform_3(%arg0: i32, %arg1: i32, %arg2: i32) -> (i32, i32) {
    %c0_i32 = arith.constant 0 : i32
    return %arg0, %arg1 : i32, i32
  }
}

module attributes {stable_mosaic.version = 11 : i64} {
  func.func @_tail_kernel(%arg0: i32, %arg1: memref<2x1x512xbf16, #tpu.memory_space<vmem>>, %arg2: memref<1x1x512xf32, #tpu.memory_space<vmem>>, %arg3: memref<1x1x512xf32, #tpu.memory_space<vmem>>, %arg4: memref<512x10xbf16, #tpu.memory_space<vmem>>, %arg5: memref<1x10xf32, #tpu.memory_space<vmem>>, %arg6: memref<2x10xf32, #tpu.memory_space<vmem>>) attributes {dimension_semantics = [#tpu.dimension_semantics<parallel>], iteration_bounds = array<i64: 1>, scalar_prefetch = 0 : i64, scratch_operands = 0 : i64, tpu.core_type = #tpu.core_type<tc>, window_params = [{transform_indices = @transform_0, window_bounds = array<i64: 2, 1, 512>}, {pipeline_mode = #tpu.pipeline_mode<synchronous>, transform_indices = @transform_1, window_bounds = array<i64: 1, 1, 512>}, {pipeline_mode = #tpu.pipeline_mode<synchronous>, transform_indices = @transform_2, window_bounds = array<i64: 1, 1, 512>}, {pipeline_mode = #tpu.pipeline_mode<synchronous>, transform_indices = @transform_3, window_bounds = array<i64: 512, 10>}, {pipeline_mode = #tpu.pipeline_mode<synchronous>, transform_indices = @transform_4, window_bounds = array<i64: 1, 10>}, {transform_indices = @transform_5, window_bounds = array<i64: 2, 10>}]} {
    %c0 = arith.constant 0 : index
    %c0_0 = arith.constant 0 : index
    %c0_1 = arith.constant 0 : index
    %0 = vector.load %arg1[%c0, %c0_0, %c0_1] : memref<2x1x512xbf16, #tpu.memory_space<vmem>>, vector<2x1x512xbf16>
    %1 = arith.extf %0 : vector<2x1x512xbf16> to vector<2x1x512xf32>
    %c0_2 = arith.constant 0 : index
    %c0_3 = arith.constant 0 : index
    %c0_4 = arith.constant 0 : index
    %2 = vector.load %arg2[%c0_2, %c0_3, %c0_4] : memref<1x1x512xf32, #tpu.memory_space<vmem>>, vector<1x1x512xf32>
    %3 = vector.broadcast %2 : vector<1x1x512xf32> to vector<2x1x512xf32>
    %4 = arith.mulf %1, %3 : vector<2x1x512xf32>
    %c0_5 = arith.constant 0 : index
    %c0_6 = arith.constant 0 : index
    %c0_7 = arith.constant 0 : index
    %5 = vector.load %arg3[%c0_5, %c0_6, %c0_7] : memref<1x1x512xf32, #tpu.memory_space<vmem>>, vector<1x1x512xf32>
    %6 = vector.broadcast %5 : vector<1x1x512xf32> to vector<2x1x512xf32>
    %7 = arith.addf %4, %6 : vector<2x1x512xf32>
    %cst = arith.constant 0.000000e+00 : f32
    %8 = vector.broadcast %cst : f32 to vector<2x1x512xf32>
    %9 = arith.maximumf %7, %8 : vector<2x1x512xf32>
    %cst_8 = arith.constant dense<0.000000e+00> : vector<2x512xf32>
    %10 = vector.multi_reduction <add>, %9, %cst_8 [1] : vector<2x1x512xf32> to vector<2x512xf32>
    %cst_9 = arith.constant 1.000000e+00 : f32
    %11 = vector.broadcast %cst_9 : f32 to vector<2x512xf32>
    %12 = arith.divf %10, %11 : vector<2x512xf32>
    %13 = arith.truncf %12 : vector<2x512xf32> to vector<2x512xbf16>
    %c0_10 = arith.constant 0 : index
    %c0_11 = arith.constant 0 : index
    %14 = vector.load %arg4[%c0_10, %c0_11] : memref<512x10xbf16, #tpu.memory_space<vmem>>, vector<512x10xbf16>
    %cst_12 = arith.constant dense<0.000000e+00> : vector<2x10xf32>
    %15 = tpu.matmul %13, %14, %cst_12 {dimension_numbers = #tpu.dot_dimension_numbers<[1], [0], [0], [1], [0, 0, 1, 1], [], []>} : vector<2x512xbf16>, vector<512x10xbf16>, vector<2x10xf32> -> vector<2x10xf32>
    %c0_13 = arith.constant 0 : index
    %c0_14 = arith.constant 0 : index
    %16 = vector.load %arg5[%c0_13, %c0_14] : memref<1x10xf32, #tpu.memory_space<vmem>>, vector<1x10xf32>
    %17 = vector.broadcast %16 : vector<1x10xf32> to vector<2x10xf32>
    %18 = arith.addf %15, %17 : vector<2x10xf32>
    %c0_15 = arith.constant 0 : index
    %c0_16 = arith.constant 0 : index
    %19 = vector.load %arg6[%c0_15, %c0_16] : memref<2x10xf32, #tpu.memory_space<vmem>>, vector<2x10xf32>
    tpu.vector_store %arg6[%c0_15, %c0_16], %18 {strides = array<i32>} : memref<2x10xf32, #tpu.memory_space<vmem>>, vector<2x10xf32>,
    return
  }
  func.func @transform_0(%arg0: i32) -> (i32, i32, i32) {
    %c0_i32 = arith.constant 0 : i32
    %c0_i32_0 = arith.constant 0 : i32
    %c0_i32_1 = arith.constant 0 : i32
    return %arg0, %c0_i32, %c0_i32_0 : i32, i32, i32
  }
  func.func @transform_1(%arg0: i32) -> (i32, i32, i32) {
    %c0_i32 = arith.constant 0 : i32
    %c0_i32_0 = arith.constant 0 : i32
    %c0_i32_1 = arith.constant 0 : i32
    %c0_i32_2 = arith.constant 0 : i32
    return %c0_i32, %c0_i32_0, %c0_i32_1 : i32, i32, i32
  }
  func.func @transform_2(%arg0: i32) -> (i32, i32, i32) {
    %c0_i32 = arith.constant 0 : i32
    %c0_i32_0 = arith.constant 0 : i32
    %c0_i32_1 = arith.constant 0 : i32
    %c0_i32_2 = arith.constant 0 : i32
    return %c0_i32, %c0_i32_0, %c0_i32_1 : i32, i32, i32
  }
  func.func @transform_3(%arg0: i32) -> (i32, i32) {
    %c0_i32 = arith.constant 0 : i32
    %c0_i32_0 = arith.constant 0 : i32
    %c0_i32_1 = arith.constant 0 : i32
    return %c0_i32, %c0_i32_0 : i32, i32
  }
  func.func @transform_4(%arg0: i32) -> (i32, i32) {
    %c0_i32 = arith.constant 0 : i32
    %c0_i32_0 = arith.constant 0 : i32
    %c0_i32_1 = arith.constant 0 : i32
    return %c0_i32, %c0_i32_0 : i32, i32
  }
  func.func @transform_5(%arg0: i32) -> (i32, i32) {
    %c0_i32 = arith.constant 0 : i32
    %c0_i32_0 = arith.constant 0 : i32
    return %arg0, %c0_i32 : i32, i32
  }
}

</mosaic_0001>

<bundles_post_ra>
// kernel: forward.23
= control target key start
LH: loop header
LB: loop body
LE: loop exit
PB: predicated region body
PF: predicated region fallthrough
CT: control target
= control target key end

     0   :  { %vm172_vm0 = vcmask 519168   ;;  %s416_s0 = inlined_call_operand.vmem [shape: bf16[128,64], index: 0, kind: input, shape index: {}]   ;;  %s417_s1 = inlined_call_operand.vmem [shape: f32[1,64], index: 1, kind: input, shape index: {}]   ;;  %s418_s2 = inlined_call_operand.vmem [shape: f32[1,64], index: 2, kind: input, shape index: {}]   ;;  %s419_s3 = inlined_call_operand.vmem [shape: bf16[128,64], index: 3, kind: output, shape index: {}]  }
   0x1   :  { %v228_v0 = vld [vmem:[%s416_s0] sm:$0xff]   ;;  %v259_v4 = vld [vmem:[%s416_s0 + $0x8] sm:$0xff]   ;;  %v260_v5 = vld [vmem:[%s416_s0 + $0x10] sm:$0xff]  }
   0x2   :  { %v292_v1 = vld [vmem:[%s417_s1] ss:$0 sm:$0xff]  ;;  %v229_v2 = vunpack.c.l.bf16 %v228_v0  ;;  %v230_v3 = vunpack.c.h.bf16 %v228_v0  ;;  %v261_v6 = vld [vmem:[%s416_s0 + $0x18] sm:$0xff]   ;;  %v233_v8 = vunpack.c.l.bf16 %v259_v4  ;;  %v234_v9 = vunpack.c.h.bf16 %v259_v4  ;;  %v263_v41 = vld [vmem:[%s416_s0 + $0x28] sm:$0xff]  }
   0x3   :  { %v306_v7 = vld [vmem:[%s418_s2] ss:$0 sm:$0xff]  ;;  %v237_v10 = vunpack.c.l.bf16 %v260_v5  ;;  %v238_v11 = vunpack.c.h.bf16 %v260_v5  ;;  %v241_v14 = vunpack.c.l.bf16 %v261_v6  ;;  %v242_v15 = vunpack.c.h.bf16 %v261_v6  ;;  %v264_v42 = vld [vmem:[%s416_s0 + $0x30] sm:$0xff]   ;;  %v265_v47 = vld [vmem:[%s416_s0 + $0x38] sm:$0xff]  }
   0x4   :  { %v53_v12 = vmul.f32 %v229_v2, %v292_v1  ;;  %v54_v13 = vmul.f32 %v230_v3, %v292_v1  ;;  %v55_v16 = vmul.f32 %v233_v8, %v292_v1  ;;  %v56_v17 = vmul.f32 %v234_v9, %v292_v1  ;;  %v262_v36 = vld [vmem:[%s416_s0 + $0x20] sm:$0xff]  }
   0x5   :  { %v57_v18 = vmul.f32 %v237_v10, %v292_v1  ;;  %v58_v19 = vmul.f32 %v238_v11, %v292_v1  ;;  %v59_v22 = vmul.f32 %v241_v14, %v292_v1  ;;  %v60_v23 = vmul.f32 %v242_v15, %v292_v1 }
   0x6   :  { %v76_v20 = vadd.f32 %v306_v7, %v53_v12  ;;  %v77_v21 = vadd.f32 %v306_v7, %v54_v13  ;;  %v78_v24 = vadd.f32 %v306_v7, %v55_v16  ;;  %v79_v25 = vadd.f32 %v306_v7, %v56_v17 }
   0x7   :  { %v80_v26 = vadd.f32 %v306_v7, %v57_v18  ;;  %v81_v27 = vadd.f32 %v306_v7, %v58_v19  ;;  %v82_v30 = vadd.f32 %v306_v7, %v59_v22  ;;  %v83_v31 = vadd.f32 %v306_v7, %v60_v23 }
   0x8   :  { %v92_v28 = vmax.f32 %v76_v20, 0.0  ;;  %v93_v29 = vmax.f32 %v77_v21, 0.0  ;;  %v94_v32 = vmax.f32 %v78_v24, 0.0  ;;  %v95_v33 = vmax.f32 %v79_v25, 0.0 }
   0x9   :  { %v96_v34 = vmax.f32 %v80_v26, 0.0  ;;  %v97_v35 = vmax.f32 %v81_v27, 0.0  ;;  %v98_v39 = vmax.f32 %v82_v30, 0.0  ;;  %v99_v40 = vmax.f32 %v83_v31, 0.0 }
   0xa   :  { %v211_v37 = vpack.c.bf16 %v92_v28, %v92_v28  ;;  %v212_v38 = vpack.c.bf16 %v93_v29, %v93_v29  ;;  %v213_v43 = vpack.c.bf16 %v94_v32, %v94_v32  ;;  %v214_v44 = vpack.c.bf16 %v95_v33, %v95_v33 }
   0xb   :  { %v215_v45 = vpack.c.bf16 %v96_v34, %v96_v34  ;;  %v216_v46 = vpack.c.bf16 %v97_v35, %v97_v35  ;;  %v217_v48 = vpack.c.bf16 %v98_v39, %v98_v39  ;;  %v218_v49 = vpack.c.bf16 %v99_v40, %v99_v40 }
   0xc   :  { %173 = vst.msk [vmem:[%s419_s3] sm:$0xf] %vm172_vm0, %v211_v37  ;;  %174 = vst.msk [vmem:[%s419_s3 + $0x4] sm:$0xf] %vm172_vm0, %v212_v38  ;;  %v245_v50 = vunpack.c.l.bf16 %v262_v36  ;;  %v246_v51 = vunpack.c.h.bf16 %v262_v36  ;;  %v249_v52 = vunpack.c.l.bf16 %v263_v41  ;;  %v250_v53 = vunpack.c.h.bf16 %v263_v41 }
   0xd   :  { %175 = vst.msk [vmem:[%s419_s3 + $0x8] sm:$0xf] %vm172_vm0, %v213_v43  ;;  %176 = vst.msk [vmem:[%s419_s3 + $0xc] sm:$0xf] %vm172_vm0, %v214_v44  ;;  %v253_v54 = vunpack.c.l.bf16 %v264_v42  ;;  %v254_v55 = vunpack.c.h.bf16 %v264_v42  ;;  %v257_v58 = vunpack.c.l.bf16 %v265_v47  ;;  %v258_v59 = vunpack.c.h.bf16 %v265_v47 }
   0xe   :  { %177 = vst.msk [vmem:[%s419_s3 + $0x10] sm:$0xf] %vm172_vm0, %v215_v45  ;;  %178 = vst.msk [vmem:[%s419_s3 + $0x14] sm:$0xf] %vm172_vm0, %v216_v46  ;;  %v61_v56 = vmul.f32 %v245_v50, %v292_v1  ;;  %v62_v57 = vmul.f32 %v246_v51, %v292_v1  ;;  %v63_v60 = vmul.f32 %v249_v52, %v292_v1 }
   0xf   :  { %179 = vst.msk [vmem:[%s419_s3 + $0x18] sm:$0xf] %vm172_vm0, %v217_v48  ;;  %180 = vst.msk [vmem:[%s419_s3 + $0x1c] sm:$0xf] %vm172_vm0, %v218_v49  ;;  %v64_v61 = vmul.f32 %v250_v53, %v292_v1  ;;  %v65_v62 = vmul.f32 %v253_v54, %v292_v1  ;;  %v66_v63 = vmul.f32 %v254_v55, %v292_v1 }
  0x10   :  { %v84_v0 = vadd.f32 %v306_v7, %v61_v56  ;;  %v85_v2 = vadd.f32 %v306_v7, %v62_v57  ;;  %v67_v3 = vmul.f32 %v257_v58, %v292_v1  ;;  %v68_v4 = vmul.f32 %v258_v59, %v292_v1 }
  0x11   :  { %v86_v5 = vadd.f32 %v306_v7, %v63_v60  ;;  %v87_v6 = vadd.f32 %v306_v7, %v64_v61  ;;  %v88_v8 = vadd.f32 %v306_v7, %v65_v62  ;;  %v89_v9 = vadd.f32 %v306_v7, %v66_v63 }
  0x12   :  { %v100_v10 = vmax.f32 %v84_v0, 0.0  ;;  %v101_v11 = vmax.f32 %v85_v2, 0.0  ;;  %v90_v12 = vadd.f32 %v306_v7, %v67_v3  ;;  %v91_v13 = vadd.f32 %v306_v7, %v68_v4 }
  0x13   :  { %v102_v14 = vmax.f32 %v86_v5, 0.0  ;;  %v103_v15 = vmax.f32 %v87_v6, 0.0  ;;  %v104_v16 = vmax.f32 %v88_v8, 0.0  ;;  %v105_v17 = vmax.f32 %v89_v9, 0.0 }
  0x14   :  { %v219_v18 = vpack.c.bf16 %v100_v10, %v100_v10  ;;  %v220_v1 = vpack.c.bf16 %v101_v11, %v101_v11  ;;  %v106_v19 = vmax.f32 %v90_v12, 0.0  ;;  %v107_v20 = vmax.f32 %v91_v13, 0.0 }
  0x15   :  { %v221_v21 = vpack.c.bf16 %v102_v14, %v102_v14  ;;  %v222_v22 = vpack.c.bf16 %v103_v15, %v103_v15  ;;  %v223_v23 = vpack.c.bf16 %v104_v16, %v104_v16  ;;  %v224_v24 = vpack.c.bf16 %v105_v17, %v105_v17 }
  0x16   :  { %181 = vst.msk [vmem:[%s419_s3 + $0x20] sm:$0xf] %vm172_vm0, %v219_v18  ;;  %182 = vst.msk [vmem:[%s419_s3 + $0x24] sm:$0xf] %vm172_vm0, %v220_v1  ;;  %v225_v7 = vpack.c.bf16 %v106_v19, %v106_v19  ;;  %v226_v25 = vpack.c.bf16 %v107_v20, %v107_v20 }
  0x17   :  { %183 = vst.msk [vmem:[%s419_s3 + $0x28] sm:$0xf] %vm172_vm0, %v221_v21  ;;  %184 = vst.msk [vmem:[%s419_s3 + $0x2c] sm:$0xf] %vm172_vm0, %v222_v22 }
  0x18   :  { %185 = vst.msk [vmem:[%s419_s3 + $0x30] sm:$0xf] %vm172_vm0, %v223_v23  ;;  %186 = vst.msk [vmem:[%s419_s3 + $0x34] sm:$0xf] %vm172_vm0, %v224_v24 }
  0x19   :  { %187 = vst.msk [vmem:[%s419_s3 + $0x38] sm:$0xf] %vm172_vm0, %v225_v7  ;;  %188 = vst.msk [vmem:[%s419_s3 + $0x3c] sm:$0xf] %vm172_vm0, %v226_v25 }

// kernel: forward.21
= control target key start
LH: loop header
LB: loop body
LE: loop exit
PB: predicated region body
PF: predicated region fallthrough
CT: control target
= control target key end

     0   :  { %s1510_s12 = smov 0   ;;  %s1512_s13 = smov 0   ;;  %s1816_s0 = inlined_call_operand.vmem [shape: bf16[512,147], index: 0, kind: input, shape index: {}]   ;;  %s1817_s1 = inlined_call_operand.vmem [shape: bf16[147,64], index: 1, kind: input, shape index: {}]   ;;  %s1818_s2 = inlined_call_operand.vmem [shape: f32[1,64], index: 2, kind: input, shape index: {}]   ;;  %s1819_s3 = inlined_call_operand.vmem [shape: bf16[512,64], index: 3, kind: output, shape index: {}]  }
   0x1   :  { %s1514_s14 = smov 0  }
   0x2 LB: > { %s32_s15 = sadd.s32 1, %s1481_s13  ;;  %p1226_p0 = scmp.ge.s32.totalorder %s1485_s14, 1  ;;  %s1485_s14 = sphi %s1514_s14, %s13_s14   ;;  %s1481_s13 = sphi %s1512_s13, %s1821_s13   ;;  %s1477_s12 = sphi %s1510_s12, %s1820_s12  }
   0x3   : > { %p34_p1 = scmp.ge.s32.totalorder %s32_s15, 2  ;;  %p191_p2 = scmp.lt.s32.totalorder %s1485_s14, 3 }
   0x5   : > { %s1823_s15 = smov (%p34_p1, %s32_s15), 0  ;;  %p192_p3 = pnand %p1226_p0, %p191_p2 }
   0x6   : > { %s1227_s22 = sshll.u32 (!%p192_p3), %s1477_s12, 5 }
   0x7   : > { %195 = sbr.rel (%p192_p3) target bundleno = 324 (0x144), region = 32  ;;  %p236_p4 = scmp.lt.s32.totalorder (!%p192_p3), %s1227_s22, 63 }
   0xc   : > { %v1405_v0 = vld [vmem:[%s1817_s1 + $0x38] sm:$0xff]   ;;  %v1487_v1 = vmov 0   ;;  %v1406_v2 = vld [vmem:[%s1817_s1 + $0x30] sm:$0xff]   ;;  %v1407_v3 = vld [vmem:[%s1817_s1 + $0x28] sm:$0xff]   ;;  %s1825_s22 = smov (!%p236_p4, %s1227_s22), 63  ;;  %vm272_vm0 = vcmask 523264  }
   0xd   : > { %645 = vmatprep.subr.bf16.mxu0 %v1487_v1  ;;  %1358 = vmatprep.subr.bf16.mxu1 %v1487_v1  ;;  %v1408_v4 = vld [vmem:[%s1817_s1 + $0x20] sm:$0xff]   ;;  %s1325_s25 = sshll.u32 %s1825_s22, 3  ;;  %v1488_v5 = vmov 0.0   ;;  %v1409_v6 = vld [vmem:[%s1817_s1 + $0x18] sm:$0xff]   ;;  %vm589_vm1 = vcmask 154624   ;;  %v1410_v9 = vld [vmem:[%s1817_s1 + $0x10] sm:$0xff]  }
   0xe   : > { %646 = vmatpush1.bf16.msra.mxu0 %v1405_v0  ;;  %1368 = vmatpush1.bf16.msra.mxu1 %v1405_v0  ;;  %273 = vst.msk [vmem:[#allocation2] sm:$0xff] %vm272_vm0, %v1488_v5  ;;  %274 = vst.msk [vmem:[#allocation2 + $0x8] sm:$0xff] %vm272_vm0, %v1488_v5  ;;  %s1588_s28 = scalar_lea.vmem %s1816_s0, %s1325_s25  ;;  %vm638_vm2 = vcmask 1040384   ;;  %v1411_v10 = vld [vmem:[%s1817_s1 + $0x8] sm:$0xff]   ;;  %vm639_vm3 = vcmask 1041408   ;;  %v1489_v11 = vmov 65535  }
   0xf   : > { %647 = vmatprep.subr.bf16.mxu0 %v1487_v1  ;;  %1359 = vmatprep.subr.bf16.mxu1 %v1487_v1  ;;  %275 = vst.msk [vmem:[#allocation2 + $0x10] sm:$0xff] %vm272_vm0, %v1488_v5  ;;  %276 = vst.msk [vmem:[#allocation2 + $0x18] sm:$0xff] %vm272_vm0, %v1488_v5  ;;  %v1417_v7 = vld [vmem:[%s1588_s28 + $0x4] ss:$8 sps:$4 sm:$0xff]   ;;  %v640_v12 = vsel %vm638_vm2, 4294967295, %v1489_v11  ;;  %s1231_s19 = sshll.u32 %s1825_s22, 2 }
  0x10   : > { %277 = vst.msk [vmem:[#allocation2 + $0x20] sm:$0xff] %vm272_vm0, %v1488_v5  ;;  %278 = vst.msk [vmem:[#allocation2 + $0x28] sm:$0xff] %vm272_vm0, %v1488_v5  ;;  %v1420_v8 = vld [vmem:[%s1588_s28 + $0x84] ss:$8 sps:$4 sm:$0xff]   ;;  %1274 = vmatprep.mubr.msk.bf16.mxu0 %vm589_vm1, %v1417_v7  ;;  %v641_v15 = vsel %vm639_vm3, %v640_v12, 0  ;;  %s1685_s22 = scalar_lea.vmem %s1819_s3, %s1231_s19  ;;  %vm1073_vm4 = vcmask 519168  }
  0x11   : > { %279 = vst.msk [vmem:[#allocation2 + $0x30] sm:$0xff] %vm272_vm0, %v1488_v5  ;;  %280 = vst.msk [vmem:[#allocation2 + $0x38] sm:$0xff] %vm272_vm0, %v1488_v5  ;;  %1282 = vmatprep.mubr.msk.bf16.mxu1 %vm589_vm1, %v1420_v8  ;;  %v1412_v13 = vld [vmem:[%s1817_s1] sm:$0xff]   ;;  %v1413_v14 = vld [vmem:[%s1817_s1 + $0x48] ss:$0 sps:$4 sm:$0x33]  }
  0x12   : > { %648 = vmatpush1.bf16.msra.mxu0 %v1406_v2  ;;  %1369 = vmatpush1.bf16.msra.mxu1 %v1406_v2  ;;  %281 = vst.msk [vmem:[#allocation2 + $0x40] sm:$0xff] %vm272_vm0, %v1488_v5  ;;  %282 = vst.msk [vmem:[#allocation2 + $0x48] sm:$0xff] %vm272_vm0, %v1488_v5  ;;  %v643_v16 = vand.u32 %v1413_v14, %v641_v15  ;;  %v1414_v17 = vld [vmem:[%s1817_s1 + $0x40] sm:$0xff]   ;;  %v1421_v20 = vld [vmem:[%s1588_s28 + $0x14] ss:$8 sps:$4 sm:$0xff]  }
  0x13   : > { %649 = vmatprep.subr.bf16.mxu0 %v1487_v1  ;;  %1360 = vmatprep.subr.bf16.mxu1 %v1487_v1  ;;  %283 = vst.msk [vmem:[#allocation2 + $0x50] sm:$0xff] %vm272_vm0, %v1488_v5  ;;  %284 = vst.msk [vmem:[#allocation2 + $0x58] sm:$0xff] %vm272_vm0, %v1488_v5  ;;  %v1415_v18 = vld [vmem:[%s1588_s28] ss:$8 sps:$4 sm:$0xff]   ;;  %v1423_v21 = vld [vmem:[%s1588_s28 + $0x94] ss:$8 sps:$4 sm:$0xff]  }
  0x14   : > { %285 = vst.msk [vmem:[#allocation2 + $0x60] sm:$0xff] %vm272_vm0, %v1488_v5  ;;  %286 = vst.msk [vmem:[#allocation2 + $0x68] sm:$0xff] %vm272_vm0, %v1488_v5  ;;  %v1418_v19 = vld [vmem:[%s1588_s28 + $0x80] ss:$8 sps:$4 sm:$0xff]   ;;  %v1425_v22 = vld [vmem:[%s1588_s28 + $0x10] ss:$8 sps:$4 sm:$0xff]  }
  0x15   : > { %287 = vst.msk [vmem:[#allocation2 + $0x70] sm:$0xff] %vm272_vm0, %v1488_v5  ;;  %288 = vst.msk [vmem:[#allocation2 + $0x78] sm:$0xff] %vm272_vm0, %v1488_v5  ;;  %v1426_v23 = vld [vmem:[%s1588_s28 + $0x90] ss:$8 sps:$4 sm:$0xff]   ;;  %v1427_v24 = vld [vmem:[%s1588_s28 + $0x24] ss:$8 sps:$4 sm:$0xff]  }
  0x16   : > { %650 = vmatpush1.bf16.msra.mxu0 %v1407_v3  ;;  %1370 = vmatpush1.bf16.msra.mxu1 %v1407_v3  ;;  %289 = vst.msk [vmem:[#allocation2 + $0x80] sm:$0xff] %vm272_vm0, %v1488_v5  ;;  %290 = vst.msk [vmem:[#allocation2 + $0x88] sm:$0xff] %vm272_vm0, %v1488_v5  ;;  %v1429_v25 = vld [vmem:[%s1588_s28 + $0xa4] ss:$8 sps:$4 sm:$0xff]   ;;  %v1431_v26 = vld [vmem:[%s1588_s28 + $0x20] ss:$8 sps:$4 sm:$0xff]  }
  0x17   : > { %651 = vmatprep.subr.bf16.mxu0 %v1487_v1  ;;  %1361 = vmatprep.subr.bf16.mxu1 %v1487_v1  ;;  %291 = vst.msk [vmem:[#allocation2 + $0x90] sm:$0xff] %vm272_vm0, %v1488_v5  ;;  %292 = vst.msk [vmem:[#allocation2 + $0x98] sm:$0xff] %vm272_vm0, %v1488_v5  ;;  %v1432_v27 = vld [vmem:[%s1588_s28 + $0xa0] ss:$8 sps:$4 sm:$0xff]   ;;  %v1433_v28 = vld [vmem:[%s1588_s28 + $0x34] ss:$8 sps:$4 sm:$0xff]  }
  0x18   : > { %293 = vst.msk [vmem:[#allocation2 + $0xa0] sm:$0xff] %vm272_vm0, %v1488_v5  ;;  %294 = vst.msk [vmem:[#allocation2 + $0xa8] sm:$0xff] %vm272_vm0, %v1488_v5  ;;  %v1435_v29 = vld [vmem:[%s1588_s28 + $0xb4] ss:$8 sps:$4 sm:$0xff]   ;;  %v1437_v30 = vld [vmem:[%s1588_s28 + $0x30] ss:$8 sps:$4 sm:$0xff]  }
  0x19   : > { %295 = vst.msk [vmem:[#allocation2 + $0xb0] sm:$0xff] %vm272_vm0, %v1488_v5  ;;  %296 = vst.msk [vmem:[#allocation2 + $0xb8] sm:$0xff] %vm272_vm0, %v1488_v5  ;;  %v1438_v31 = vld [vmem:[%s1588_s28 + $0xb0] ss:$8 sps:$4 sm:$0xff]   ;;  %v1439_v32 = vld [vmem:[%s1588_s28 + $0x44] ss:$8 sps:$4 sm:$0xff]  }
  0x1a   : > { %297 = vst.msk [vmem:[#allocation2 + $0xc0] sm:$0xff] %vm272_vm0, %v1488_v5  ;;  %298 = vst.msk [vmem:[#allocation2 + $0xc8] sm:$0xff] %vm272_vm0, %v1488_v5  ;;  %652 = vmatpush1.bf16.msra.mxu0 %v1408_v4  ;;  %1371 = vmatpush1.bf16.msra.mxu1 %v1408_v4  ;;  %v1441_v33 = vld [vmem:[%s1588_s28 + $0xc4] ss:$8 sps:$4 sm:$0xff]   ;;  %v1443_v34 = vld [vmem:[%s1588_s28 + $0x40] ss:$8 sps:$4 sm:$0xff]  }
  0x1b   : > { %299 = vst.msk [vmem:[#allocation2 + $0xd0] sm:$0xff] %vm272_vm0, %v1488_v5  ;;  %300 = vst.msk [vmem:[#allocation2 + $0xd8] sm:$0xff] %vm272_vm0, %v1488_v5  ;;  %653 = vmatprep.subr.bf16.mxu0 %v1487_v1  ;;  %1362 = vmatprep.subr.bf16.mxu1 %v1487_v1  ;;  %v1444_v35 = vld [vmem:[%s1588_s28 + $0xc0] ss:$8 sps:$4 sm:$0xff]   ;;  %v1445_v36 = vld [vmem:[%s1588_s28 + $0x54] ss:$8 sps:$4 sm:$0xff]  }
  0x1c   : > { %301 = vst.msk [vmem:[#allocation2 + $0xe0] sm:$0xff] %vm272_vm0, %v1488_v5  ;;  %302 = vst.msk [vmem:[#allocation2 + $0xe8] sm:$0xff] %vm272_vm0, %v1488_v5  ;;  %v1447_v37 = vld [vmem:[%s1588_s28 + $0xd4] ss:$8 sps:$4 sm:$0xff]   ;;  %v1449_v38 = vld [vmem:[%s1588_s28 + $0x50] ss:$8 sps:$4 sm:$0xff]  }
  0x1d   : > { %303 = vst.msk [vmem:[#allocation2 + $0xf0] sm:$0xff] %vm272_vm0, %v1488_v5  ;;  %304 = vst.msk [vmem:[#allocation2 + $0xf8] sm:$0xff] %vm272_vm0, %v1488_v5  ;;  %v1450_v39 = vld [vmem:[%s1588_s28 + $0xd0] ss:$8 sps:$4 sm:$0xff]   ;;  %v1451_v40 = vld [vmem:[%s1588_s28 + $0x64] ss:$8 sps:$4 sm:$0xff]  }
  0x1e   : > { %654 = vmatpush1.bf16.msra.mxu0 %v1409_v6  ;;  %1372 = vmatpush1.bf16.msra.mxu1 %v1409_v6  ;;  %v1453_v41 = vld [vmem:[%s1588_s28 + $0xe4] ss:$8 sps:$4 sm:$0xff]   ;;  %v1455_v42 = vld [vmem:[%s1588_s28 + $0x60] ss:$8 sps:$4 sm:$0xff]   ;;  %v1457_v44 = vld [vmem:[%s1588_s28 + $0x74] ss:$8 sps:$4 sm:$0xff]  }
  0x1f   : > { %655 = vmatprep.subr.bf16.mxu0 %v1487_v1  ;;  %1363 = vmatprep.subr.bf16.mxu1 %v1487_v1  ;;  %v1456_v43 = vld [vmem:[%s1588_s28 + $0xe0] ss:$8 sps:$4 sm:$0xff]   ;;  %v1459_v45 = vld [vmem:[%s1588_s28 + $0xf4] ss:$8 sps:$4 sm:$0xff]   ;;  %v1461_v46 = vld [vmem:[%s1588_s28 + $0x70] ss:$8 sps:$4 sm:$0xff]  }
  0x20   : > { %v1462_v47 = vld [vmem:[%s1588_s28 + $0xf0] ss:$8 sps:$4 sm:$0xff]   ;;  %v305_v48 = vld [vmem:[#allocation2] sm:$0xff]  ;;  %v306_v56 = vld [vmem:[#allocation2 + $0x8] sm:$0xff] }
  0x21   : > { %v321_v49 = vld [vmem:[#allocation2 + $0x80] sm:$0xff]  ;;  %v322_v57 = vld [vmem:[#allocation2 + $0x88] sm:$0xff]  ;;  %v307_v0 = vld [vmem:[#allocation2 + $0x10] sm:$0xff] }
  0x22   : > { %656 = vmatpush1.bf16.msra.mxu0 %v1410_v9  ;;  %1373 = vmatpush1.bf16.msra.mxu1 %v1410_v9  ;;  %v1675_v2 = vld [vmem:[%s1818_s2] ss:$0 sm:$0xff]  ;;  %v308_v7 = vld [vmem:[#allocation2 + $0x18] sm:$0xff] }
  0x23   : > { %657 = vmatprep.subr.bf16.mxu0 %v1487_v1  ;;  %1364 = vmatprep.subr.bf16.mxu1 %v1487_v1  ;;  %v324_v12 = vld [vmem:[#allocation2 + $0x98] sm:$0xff] }
  0x26   : > { %658 = vmatpush1.bf16.msra.mxu0 %v1411_v10  ;;  %1374 = vmatpush1.bf16.msra.mxu1 %v1411_v10 }
  0x27   : > { %659 = vmatprep.subr.bf16.mxu0 %v1487_v1  ;;  %1365 = vmatprep.subr.bf16.mxu1 %v1487_v1 }
  0x2a   : > { %660 = vmatpush1.bf16.msra.mxu0 %v1412_v13  ;;  %1375 = vmatpush1.bf16.msra.mxu1 %v1412_v13 }
  0x2b   : > { %673 = vmatprep.subr.bf16.mxu0 %v1487_v1  ;;  %1366 = vmatprep.subr.bf16.mxu1 %v1487_v1 }
  0x2e   : > { %674 = vmatpush2.bf16.msra.mxu0 %v643_v16  ;;  %1376 = vmatpush2.bf16.msra.mxu1 %v643_v16 }
  0x2f   : > { %675 = vmatprep.subr.bf16.mxu0 %v1487_v1  ;;  %1367 = vmatprep.subr.bf16.mxu1 %v1487_v1  ;;  %v323_v1 = vld [vmem:[#allocation2 + $0x90] sm:$0xff] }
  0x32   : > { %676 = vmatpush2.bf16.msra.mxu0 %v1414_v17  ;;  %1377 = vmatpush2.bf16.msra.mxu1 %v1414_v17 }
  0x35   : > { %678 = vmatmul.mubr.bf16.vlgmr.msra.gmra.mxu0 %v1415_v18  ;;  %742 = vmatmul.mubr.bf16.vlgmr.msra.gmra.mxu1 %v1418_v19 }
  0x36   : > { %1275 = vmatprep.mubr.msk.bf16.mxu0 %vm589_vm1, %v1421_v20  ;;  %1283 = vmatprep.mubr.msk.bf16.mxu1 %vm589_vm1, %v1423_v21  ;;  %v309_v21 = vld [vmem:[#allocation2 + $0x20] sm:$0xff] }
  0x3d   : > { %686 = vmatmul.mubr.bf16.gmra.mxu0 %v1425_v22  ;;  %750 = vmatmul.mubr.bf16.gmra.mxu1 %v1426_v23 }
  0x3e   : > { %1276 = vmatprep.mubr.msk.bf16.mxu0 %vm589_vm1, %v1427_v24  ;;  %1284 = vmatprep.mubr.msk.bf16.mxu1 %vm589_vm1, %v1429_v25 }
  0x45   : > { %694 = vmatmul.mubr.bf16.gmra.mxu0 %v1431_v26  ;;  %758 = vmatmul.mubr.bf16.gmra.mxu1 %v1432_v27  ;;  %v325_v26 = vld [vmem:[#allocation2 + $0xa0] sm:$0xff] }
  0x46   : > { %1277 = vmatprep.mubr.msk.bf16.mxu0 %vm589_vm1, %v1433_v28  ;;  %1285 = vmatprep.mubr.msk.bf16.mxu1 %vm589_vm1, %v1435_v29 }
  0x4d   : > { %702 = vmatmul.mubr.bf16.gmra.mxu0 %v1437_v30  ;;  %766 = vmatmul.mubr.bf16.gmra.mxu1 %v1438_v31 }
  0x4e   : > { %1278 = vmatprep.mubr.msk.bf16.mxu0 %vm589_vm1, %v1439_v32  ;;  %1286 = vmatprep.mubr.msk.bf16.mxu1 %vm589_vm1, %v1441_v33 }
  0x55   : > { %710 = vmatmul.mubr.bf16.gmra.mxu0 %v1443_v34  ;;  %774 = vmatmul.mubr.bf16.gmra.mxu1 %v1444_v35  ;;  %v310_v35 = vld [vmem:[#allocation2 + $0x28] sm:$0xff] }
  0x56   : > { %1279 = vmatprep.mubr.msk.bf16.mxu0 %vm589_vm1, %v1445_v36  ;;  %1287 = vmatprep.mubr.msk.bf16.mxu1 %vm589_vm1, %v1447_v37 }
  0x5d   : > { %718 = vmatmul.mubr.bf16.gmra.mxu0 %v1449_v38  ;;  %782 = vmatmul.mubr.bf16.gmra.mxu1 %v1450_v39 }
  0x5e   : > { %1280 = vmatprep.mubr.msk.bf16.mxu0 %vm589_vm1, %v1451_v40  ;;  %1288 = vmatprep.mubr.msk.bf16.mxu1 %vm589_vm1, %v1453_v41  ;;  %v326_v40 = vld [vmem:[#allocation2 + $0xa8] sm:$0xff] }
  0x65   : > { %726 = vmatmul.mubr.bf16.gmra.mxu0 %v1455_v42  ;;  %790 = vmatmul.mubr.bf16.gmra.mxu1 %v1456_v43 }
  0x66   : > { %1281 = vmatprep.mubr.msk.bf16.mxu0 %vm589_vm1, %v1457_v44  ;;  %1289 = vmatprep.mubr.msk.bf16.mxu1 %vm589_vm1, %v1459_v45 }
  0x6d   : > { %734 = vmatmul.mubr.bf16.gmra.mxu0 %v1461_v46  ;;  %798 = vmatmul.mubr.bf16.gmra.mxu1 %v1462_v47 }
  0xf5   : > { %v679_v50 = vpop.f32.mrf.mxu0  ;;  %v743_v51 = vpop.f32.mrf.mxu1 }
  0xf6   : > { %v806_v52 = vadd.f32 %v679_v50, %v305_v48  ;;  %v822_v53 = vadd.f32 %v743_v51, %v321_v49  ;;  %v311_v49 = vld [vmem:[#allocation2 + $0x30] sm:$0xff] }
  0xf7   : > { %v681_v54 = vpop.f32.mrf.mxu0  ;;  %v745_v55 = vpop.f32.mrf.mxu1 }
  0xf8   : > { %839 = vst.msk [vmem:[#allocation2] sm:$0xff] %vm272_vm0, %v806_v52  ;;  %855 = vst.msk [vmem:[#allocation2 + $0x80] sm:$0xff] %vm272_vm0, %v822_v53  ;;  %v327_v54 = vld [vmem:[#allocation2 + $0xb0] sm:$0xff] }
  0xf9   : > { %v682_v58 = vpop.f32.mrf.mxu0  ;;  %v746_v59 = vpop.f32.mrf.mxu1 }
  0xfa   : > { %v807_v60 = vadd.f32 %v682_v58, %v306_v56  ;;  %v823_v61 = vadd.f32 %v746_v59, %v322_v57 }
  0xfb   : > { %v684_v62 = vpop.f32.mrf.mxu0  ;;  %v748_v63 = vpop.f32.mrf.mxu1 }
  0xfc   : > { %840 = vst.msk [vmem:[#allocation2 + $0x8] sm:$0xff] %vm272_vm0, %v807_v60  ;;  %856 = vst.msk [vmem:[#allocation2 + $0x88] sm:$0xff] %vm272_vm0, %v823_v61  ;;  %v312_v63 = vld [vmem:[#allocation2 + $0x38] sm:$0xff] }
  0xfd   : > { %v687_v3 = vpop.f32.mrf.mxu0  ;;  %v751_v4 = vpop.f32.mrf.mxu1 }
  0xfe   : > { %v808_v5 = vadd.f32 %v687_v3, %v307_v0  ;;  %v824_v6 = vadd.f32 %v751_v4, %v323_v1 }
  0xff   : > { %v874_v8 = vld [vmem:[#allocation2] sm:$0xff]  ;;  %v689_v10 = vpop.f32.mrf.mxu0  ;;  %v753_v11 = vpop.f32.mrf.mxu1 }
 0x100   : > { %v890_v9 = vld [vmem:[#allocation2 + $0x80] sm:$0xff]  ;;  %v913_v13 = vadd.f32 %v1675_v2, %v874_v8  ;;  %841 = vst.msk [vmem:[#allocation2 + $0x10] sm:$0xff] %vm272_vm0, %v808_v5  ;;  %857 = vst.msk [vmem:[#allocation2 + $0x90] sm:$0xff] %vm272_vm0, %v824_v6  ;;  %v328_v5 = vld [vmem:[#allocation2 + $0xb8] sm:$0xff] }
 0x101   : > { %v929_v14 = vadd.f32 %v1675_v2, %v890_v9  ;;  %v690_v15 = vpop.f32.mrf.mxu0  ;;  %v754_v16 = vpop.f32.mrf.mxu1 }
 0x102   : > { %v1326_v17 = vpack.c.bf16 %v913_v13, %v913_v13  ;;  %v809_v19 = vadd.f32 %v690_v15, %v308_v7  ;;  %v825_v20 = vadd.f32 %v754_v16, %v324_v12 }
 0x103   : > { %v1342_v18 = vpack.c.bf16 %v929_v14, %v929_v14  ;;  %v875_v22 = vld [vmem:[#allocation2 + $0x8] sm:$0xff]  ;;  %v692_v24 = vpop.f32.mrf.mxu0  ;;  %v756_v25 = vpop.f32.mrf.mxu1  ;;  %v313_v14 = vld [vmem:[#allocation2 + $0x40] sm:$0xff] }
 0x104   : > { %v891_v23 = vld [vmem:[#allocation2 + $0x88] sm:$0xff]  ;;  %1074 = vst.msk [vmem:[%s1685_s22] sm:$0xf] %vm1073_vm4, %v1326_v17  ;;  %v914_v27 = vadd.f32 %v1675_v2, %v875_v22 }
 0x105   : > { %1090 = vst.msk [vmem:[%s1685_s22 + $0x40] sm:$0xf] %vm1073_vm4, %v1342_v18  ;;  %v930_v28 = vadd.f32 %v1675_v2, %v891_v23  ;;  %v695_v29 = vpop.f32.mrf.mxu0  ;;  %v759_v30 = vpop.f32.mrf.mxu1 }
 0x106   : > { %842 = vst.msk [vmem:[#allocation2 + $0x18] sm:$0xff] %vm272_vm0, %v809_v19  ;;  %858 = vst.msk [vmem:[#allocation2 + $0x98] sm:$0xff] %vm272_vm0, %v825_v20  ;;  %v1327_v31 = vpack.c.bf16 %v914_v27, %v914_v27  ;;  %v810_v33 = vadd.f32 %v695_v29, %v309_v21  ;;  %v826_v34 = vadd.f32 %v759_v30, %v325_v26  ;;  %v329_v19 = vld [vmem:[#allocation2 + $0xc0] sm:$0xff] }
 0x107   : > { %v1343_v32 = vpack.c.bf16 %v930_v28, %v930_v28  ;;  %v876_v36 = vld [vmem:[#allocation2 + $0x10] sm:$0xff]  ;;  %v697_v38 = vpop.f32.mrf.mxu0  ;;  %v761_v39 = vpop.f32.mrf.mxu1  ;;  %v314_v28 = vld [vmem:[#allocation2 + $0x48] sm:$0xff] }
 0x108   : > { %v892_v37 = vld [vmem:[#allocation2 + $0x90] sm:$0xff]  ;;  %1075 = vst.msk [vmem:[%s1685_s22 + $0x4] sm:$0xf] %vm1073_vm4, %v1327_v31  ;;  %v915_v41 = vadd.f32 %v1675_v2, %v876_v36 }
 0x109   : > { %1091 = vst.msk [vmem:[%s1685_s22 + $0x44] sm:$0xf] %vm1073_vm4, %v1343_v32  ;;  %v931_v42 = vadd.f32 %v1675_v2, %v892_v37  ;;  %v698_v43 = vpop.f32.mrf.mxu0  ;;  %v762_v44 = vpop.f32.mrf.mxu1 }
 0x10a   : > { %843 = vst.msk [vmem:[#allocation2 + $0x20] sm:$0xff] %vm272_vm0, %v810_v33  ;;  %859 = vst.msk [vmem:[#allocation2 + $0xa0] sm:$0xff] %vm272_vm0, %v826_v34  ;;  %v1328_v45 = vpack.c.bf16 %v915_v41, %v915_v41  ;;  %v811_v47 = vadd.f32 %v698_v43, %v310_v35  ;;  %v827_v48 = vadd.f32 %v762_v44, %v326_v40  ;;  %v330_v33 = vld [vmem:[#allocation2 + $0xc8] sm:$0xff] }
 0x10b   : > { %v1344_v46 = vpack.c.bf16 %v931_v42, %v931_v42  ;;  %v700_v52 = vpop.f32.mrf.mxu0  ;;  %v764_v53 = vpop.f32.mrf.mxu1  ;;  %v315_v42 = vld [vmem:[#allocation2 + $0x50] sm:$0xff] }
 0x10c   : > { %1076 = vst.msk [vmem:[%s1685_s22 + $0x8] sm:$0xf] %vm1073_vm4, %v1328_v45 }
 0x10d   : > { %v877_v50 = vld [vmem:[#allocation2 + $0x18] sm:$0xff]  ;;  %1092 = vst.msk [vmem:[%s1685_s22 + $0x48] sm:$0xf] %vm1073_vm4, %v1344_v46  ;;  %v703_v57 = vpop.f32.mrf.mxu0  ;;  %v767_v58 = vpop.f32.mrf.mxu1 }
 0x10e   : > { %v893_v51 = vld [vmem:[#allocation2 + $0x98] sm:$0xff]  ;;  %v916_v55 = vadd.f32 %v1675_v2, %v877_v50  ;;  %844 = vst.msk [vmem:[#allocation2 + $0x28] sm:$0xff] %vm272_vm0, %v811_v47  ;;  %860 = vst.msk [vmem:[#allocation2 + $0xa8] sm:$0xff] %vm272_vm0, %v827_v48  ;;  %v812_v61 = vadd.f32 %v703_v57, %v311_v49  ;;  %v828_v62 = vadd.f32 %v767_v58, %v327_v54  ;;  %v331_v47 = vld [vmem:[#allocation2 + $0xd0] sm:$0xff] }
 0x10f   : > { %v932_v56 = vadd.f32 %v1675_v2, %v893_v51  ;;  %v705_v3 = vpop.f32.mrf.mxu0  ;;  %v769_v4 = vpop.f32.mrf.mxu1 }
 0x110   : > { %v1329_v59 = vpack.c.bf16 %v916_v55, %v916_v55  ;;  %845 = vst.msk [vmem:[#allocation2 + $0x30] sm:$0xff] %vm272_vm0, %v812_v61  ;;  %861 = vst.msk [vmem:[#allocation2 + $0xb0] sm:$0xff] %vm272_vm0, %v828_v62  ;;  %v332_v61 = vld [vmem:[#allocation2 + $0xd8] sm:$0xff] }
 0x111   : > { %v1345_v60 = vpack.c.bf16 %v932_v56, %v932_v56  ;;  %v878_v0 = vld [vmem:[#allocation2 + $0x20] sm:$0xff]  ;;  %v706_v8 = vpop.f32.mrf.mxu0  ;;  %v770_v9 = vpop.f32.mrf.mxu1  ;;  %v316_v56 = vld [vmem:[#allocation2 + $0x58] sm:$0xff] }
 0x112   : > { %v894_v1 = vld [vmem:[#allocation2 + $0xa0] sm:$0xff]  ;;  %1077 = vst.msk [vmem:[%s1685_s22 + $0xc] sm:$0xf] %vm1073_vm4, %v1329_v59  ;;  %v917_v6 = vadd.f32 %v1675_v2, %v878_v0  ;;  %v813_v12 = vadd.f32 %v706_v8, %v312_v63  ;;  %v829_v13 = vadd.f32 %v770_v9, %v328_v5 }
 0x113   : > { %1093 = vst.msk [vmem:[%s1685_s22 + $0x4c] sm:$0xf] %vm1073_vm4, %v1345_v60  ;;  %v933_v7 = vadd.f32 %v1675_v2, %v894_v1  ;;  %v708_v17 = vpop.f32.mrf.mxu0  ;;  %v772_v18 = vpop.f32.mrf.mxu1 }
 0x114   : > { %v1330_v10 = vpack.c.bf16 %v917_v6, %v917_v6  ;;  %846 = vst.msk [vmem:[#allocation2 + $0x38] sm:$0xff] %vm272_vm0, %v813_v12  ;;  %862 = vst.msk [vmem:[#allocation2 + $0xb8] sm:$0xff] %vm272_vm0, %v829_v13  ;;  %v333_v12 = vld [vmem:[#allocation2 + $0xe0] sm:$0xff] }
 0x115   : > { %v1346_v11 = vpack.c.bf16 %v933_v7, %v933_v7  ;;  %v879_v15 = vld [vmem:[#allocation2 + $0x28] sm:$0xff]  ;;  %v711_v22 = vpop.f32.mrf.mxu0  ;;  %v775_v23 = vpop.f32.mrf.mxu1  ;;  %v317_v7 = vld [vmem:[#allocation2 + $0x60] sm:$0xff] }
 0x116   : > { %v895_v16 = vld [vmem:[#allocation2 + $0xa8] sm:$0xff]  ;;  %1078 = vst.msk [vmem:[%s1685_s22 + $0x10] sm:$0xf] %vm1073_vm4, %v1330_v10  ;;  %v918_v20 = vadd.f32 %v1675_v2, %v879_v15  ;;  %v814_v26 = vadd.f32 %v711_v22, %v313_v14  ;;  %v830_v27 = vadd.f32 %v775_v23, %v329_v19 }
 0x117   : > { %1094 = vst.msk [vmem:[%s1685_s22 + $0x50] sm:$0xf] %vm1073_vm4, %v1346_v11  ;;  %v934_v21 = vadd.f32 %v1675_v2, %v895_v16  ;;  %v880_v29 = vld [vmem:[#allocation2 + $0x30] sm:$0xff]  ;;  %v713_v31 = vpop.f32.mrf.mxu0  ;;  %v777_v32 = vpop.f32.mrf.mxu1 }
 0x118   : > { %v1331_v24 = vpack.c.bf16 %v918_v20, %v918_v20  ;;  %v896_v30 = vld [vmem:[#allocation2 + $0xb0] sm:$0xff]  ;;  %v919_v34 = vadd.f32 %v1675_v2, %v880_v29  ;;  %847 = vst.msk [vmem:[#allocation2 + $0x40] sm:$0xff] %vm272_vm0, %v814_v26  ;;  %863 = vst.msk [vmem:[#allocation2 + $0xc0] sm:$0xff] %vm272_vm0, %v830_v27  ;;  %v334_v26 = vld [vmem:[#allocation2 + $0xe8] sm:$0xff] }
 0x119   : > { %v1347_v25 = vpack.c.bf16 %v934_v21, %v934_v21  ;;  %v935_v35 = vadd.f32 %v1675_v2, %v896_v30  ;;  %v714_v36 = vpop.f32.mrf.mxu0  ;;  %v778_v37 = vpop.f32.mrf.mxu1  ;;  %v318_v21 = vld [vmem:[#allocation2 + $0x68] sm:$0xff] }
 0x11a   : > { %1079 = vst.msk [vmem:[%s1685_s22 + $0x14] sm:$0xf] %vm1073_vm4, %v1331_v24  ;;  %v1332_v38 = vpack.c.bf16 %v919_v34, %v919_v34  ;;  %v815_v40 = vadd.f32 %v714_v36, %v314_v28  ;;  %v831_v41 = vadd.f32 %v778_v37, %v330_v33 }
 0x11b   : > { %1095 = vst.msk [vmem:[%s1685_s22 + $0x54] sm:$0xf] %vm1073_vm4, %v1347_v25  ;;  %v1348_v39 = vpack.c.bf16 %v935_v35, %v935_v35  ;;  %v881_v43 = vld [vmem:[#allocation2 + $0x38] sm:$0xff]  ;;  %v716_v45 = vpop.f32.mrf.mxu0  ;;  %v780_v46 = vpop.f32.mrf.mxu1  ;;  %v319_v35 = vld [vmem:[#allocation2 + $0x70] sm:$0xff] }
 0x11c   : > { %v897_v44 = vld [vmem:[#allocation2 + $0xb8] sm:$0xff]  ;;  %1080 = vst.msk [vmem:[%s1685_s22 + $0x18] sm:$0xf] %vm1073_vm4, %v1332_v38  ;;  %v920_v48 = vadd.f32 %v1675_v2, %v881_v43 }
 0x11d   : > { %1096 = vst.msk [vmem:[%s1685_s22 + $0x58] sm:$0xf] %vm1073_vm4, %v1348_v39  ;;  %v936_v49 = vadd.f32 %v1675_v2, %v897_v44  ;;  %v719_v50 = vpop.f32.mrf.mxu0  ;;  %v783_v51 = vpop.f32.mrf.mxu1 }
 0x11e   : > { %848 = vst.msk [vmem:[#allocation2 + $0x48] sm:$0xff] %vm272_vm0, %v815_v40  ;;  %864 = vst.msk [vmem:[#allocation2 + $0xc8] sm:$0xff] %vm272_vm0, %v831_v41  ;;  %v1333_v52 = vpack.c.bf16 %v920_v48, %v920_v48  ;;  %v816_v54 = vadd.f32 %v719_v50, %v315_v42  ;;  %v832_v55 = vadd.f32 %v783_v51, %v331_v47  ;;  %v335_v40 = vld [vmem:[#allocation2 + $0xf0] sm:$0xff] }
 0x11f   : > { %v1349_v53 = vpack.c.bf16 %v936_v49, %v936_v49  ;;  %v882_v57 = vld [vmem:[#allocation2 + $0x40] sm:$0xff]  ;;  %v721_v59 = vpop.f32.mrf.mxu0  ;;  %v785_v60 = vpop.f32.mrf.mxu1  ;;  %v320_v49 = vld [vmem:[#allocation2 + $0x78] sm:$0xff] }
 0x120   : > { %v898_v58 = vld [vmem:[#allocation2 + $0xc0] sm:$0xff]  ;;  %1081 = vst.msk [vmem:[%s1685_s22 + $0x1c] sm:$0xf] %vm1073_vm4, %v1333_v52  ;;  %v921_v62 = vadd.f32 %v1675_v2, %v882_v57 }
 0x121   : > { %1097 = vst.msk [vmem:[%s1685_s22 + $0x5c] sm:$0xf] %vm1073_vm4, %v1349_v53  ;;  %v937_v63 = vadd.f32 %v1675_v2, %v898_v58  ;;  %v722_v0 = vpop.f32.mrf.mxu0  ;;  %v786_v1 = vpop.f32.mrf.mxu1 }
 0x122   : > { %849 = vst.msk [vmem:[#allocation2 + $0x50] sm:$0xff] %vm272_vm0, %v816_v54  ;;  %865 = vst.msk [vmem:[#allocation2 + $0xd0] sm:$0xff] %vm272_vm0, %v832_v55  ;;  %v1334_v3 = vpack.c.bf16 %v921_v62, %v921_v62  ;;  %v817_v5 = vadd.f32 %v722_v0, %v316_v56  ;;  %v833_v6 = vadd.f32 %v786_v1, %v332_v61  ;;  %v336_v54 = vld [vmem:[#allocation2 + $0xf8] sm:$0xff] }
 0x123   : > { %v1350_v4 = vpack.c.bf16 %v937_v63, %v937_v63  ;;  %v724_v10 = vpop.f32.mrf.mxu0  ;;  %v788_v11 = vpop.f32.mrf.mxu1 }
 0x124   : > { %1082 = vst.msk [vmem:[%s1685_s22 + $0x20] sm:$0xf] %vm1073_vm4, %v1334_v3 }
 0x125   : > { %v883_v8 = vld [vmem:[#allocation2 + $0x48] sm:$0xff]  ;;  %1098 = vst.msk [vmem:[%s1685_s22 + $0x60] sm:$0xf] %vm1073_vm4, %v1350_v4  ;;  %v727_v15 = vpop.f32.mrf.mxu0  ;;  %v791_v16 = vpop.f32.mrf.mxu1 }
 0x126   : > { %v899_v9 = vld [vmem:[#allocation2 + $0xc8] sm:$0xff]  ;;  %v922_v13 = vadd.f32 %v1675_v2, %v883_v8  ;;  %850 = vst.msk [vmem:[#allocation2 + $0x58] sm:$0xff] %vm272_vm0, %v817_v5  ;;  %866 = vst.msk [vmem:[#allocation2 + $0xd8] sm:$0xff] %vm272_vm0, %v833_v6  ;;  %v818_v19 = vadd.f32 %v727_v15, %v317_v7  ;;  %v834_v20 = vadd.f32 %v791_v16, %v333_v12 }
 0x127   : > { %v938_v14 = vadd.f32 %v1675_v2, %v899_v9  ;;  %v729_v24 = vpop.f32.mrf.mxu0  ;;  %v793_v25 = vpop.f32.mrf.mxu1 }
 0x128   : > { %v1335_v17 = vpack.c.bf16 %v922_v13, %v922_v13  ;;  %851 = vst.msk [vmem:[#allocation2 + $0x60] sm:$0xff] %vm272_vm0, %v818_v19  ;;  %867 = vst.msk [vmem:[#allocation2 + $0xe0] sm:$0xff] %vm272_vm0, %v834_v20 }
 0x129   : > { %v1351_v18 = vpack.c.bf16 %v938_v14, %v938_v14  ;;  %v884_v22 = vld [vmem:[#allocation2 + $0x50] sm:$0xff]  ;;  %v730_v29 = vpop.f32.mrf.mxu0  ;;  %v794_v30 = vpop.f32.mrf.mxu1 }
 0x12a   : > { %v900_v23 = vld [vmem:[#allocation2 + $0xd0] sm:$0xff]  ;;  %1083 = vst.msk [vmem:[%s1685_s22 + $0x24] sm:$0xf] %vm1073_vm4, %v1335_v17  ;;  %v923_v27 = vadd.f32 %v1675_v2, %v884_v22  ;;  %v819_v33 = vadd.f32 %v730_v29, %v318_v21  ;;  %v835_v34 = vadd.f32 %v794_v30, %v334_v26 }
 0x12b   : > { %1099 = vst.msk [vmem:[%s1685_s22 + $0x64] sm:$0xf] %vm1073_vm4, %v1351_v18  ;;  %v939_v28 = vadd.f32 %v1675_v2, %v900_v23  ;;  %v732_v38 = vpop.f32.mrf.mxu0  ;;  %v796_v39 = vpop.f32.mrf.mxu1 }
 0x12c   : > { %v1336_v31 = vpack.c.bf16 %v923_v27, %v923_v27  ;;  %852 = vst.msk [vmem:[#allocation2 + $0x68] sm:$0xff] %vm272_vm0, %v819_v33  ;;  %868 = vst.msk [vmem:[#allocation2 + $0xe8] sm:$0xff] %vm272_vm0, %v835_v34 }
 0x12d   : > { %v1352_v32 = vpack.c.bf16 %v939_v28, %v939_v28  ;;  %v885_v36 = vld [vmem:[#allocation2 + $0x58] sm:$0xff]  ;;  %v735_v43 = vpop.f32.mrf.mxu0  ;;  %v799_v44 = vpop.f32.mrf.mxu1 }
 0x12e   : > { %v901_v37 = vld [vmem:[#allocation2 + $0xd8] sm:$0xff]  ;;  %1084 = vst.msk [vmem:[%s1685_s22 + $0x28] sm:$0xf] %vm1073_vm4, %v1336_v31  ;;  %v924_v41 = vadd.f32 %v1675_v2, %v885_v36  ;;  %v820_v47 = vadd.f32 %v735_v43, %v319_v35  ;;  %v836_v48 = vadd.f32 %v799_v44, %v335_v40 }
 0x12f   : > { %1100 = vst.msk [vmem:[%s1685_s22 + $0x68] sm:$0xf] %vm1073_vm4, %v1352_v32  ;;  %v940_v42 = vadd.f32 %v1675_v2, %v901_v37  ;;  %v886_v50 = vld [vmem:[#allocation2 + $0x60] sm:$0xff]  ;;  %v737_v52 = vpop.f32.mrf.mxu0  ;;  %v801_v53 = vpop.f32.mrf.mxu1 }
 0x130   : > { %v1337_v45 = vpack.c.bf16 %v924_v41, %v924_v41  ;;  %v902_v51 = vld [vmem:[#allocation2 + $0xe0] sm:$0xff]  ;;  %v925_v55 = vadd.f32 %v1675_v2, %v886_v50  ;;  %853 = vst.msk [vmem:[#allocation2 + $0x70] sm:$0xff] %vm272_vm0, %v820_v47  ;;  %869 = vst.msk [vmem:[#allocation2 + $0xf0] sm:$0xff] %vm272_vm0, %v836_v48 }
 0x131   : > { %v1353_v46 = vpack.c.bf16 %v940_v42, %v940_v42  ;;  %v941_v56 = vadd.f32 %v1675_v2, %v902_v51  ;;  %v738_v57 = vpop.f32.mrf.mxu0  ;;  %v802_v58 = vpop.f32.mrf.mxu1 }
 0x132   : > { %1085 = vst.msk [vmem:[%s1685_s22 + $0x2c] sm:$0xf] %vm1073_vm4, %v1337_v45  ;;  %v1338_v59 = vpack.c.bf16 %v925_v55, %v925_v55  ;;  %v821_v61 = vadd.f32 %v738_v57, %v320_v49  ;;  %v837_v62 = vadd.f32 %v802_v58, %v336_v54 }
 0x133   : > { %1101 = vst.msk [vmem:[%s1685_s22 + $0x6c] sm:$0xf] %vm1073_vm4, %v1353_v46  ;;  %v1354_v60 = vpack.c.bf16 %v941_v56, %v941_v56  ;;  %v887_v63 = vld [vmem:[#allocation2 + $0x68] sm:$0xff]  ;;  %v740_v1 = vpop.f32.mrf.mxu0  ;;  %v804_v3 = vpop.f32.mrf.mxu1 }
 0x134   : > { %v903_v0 = vld [vmem:[#allocation2 + $0xe8] sm:$0xff]  ;;  %1086 = vst.msk [vmem:[%s1685_s22 + $0x30] sm:$0xf] %vm1073_vm4, %v1338_v59  ;;  %v926_v4 = vadd.f32 %v1675_v2, %v887_v63 }
 0x135   : > { %1102 = vst.msk [vmem:[%s1685_s22 + $0x70] sm:$0xf] %vm1073_vm4, %v1354_v60  ;;  %v942_v5 = vadd.f32 %v1675_v2, %v903_v0 }
 0x136   : > { %854 = vst.msk [vmem:[#allocation2 + $0x78] sm:$0xff] %vm272_vm0, %v821_v61  ;;  %870 = vst.msk [vmem:[#allocation2 + $0xf8] sm:$0xff] %vm272_vm0, %v837_v62  ;;  %v1339_v6 = vpack.c.bf16 %v926_v4, %v926_v4 }
 0x137   : > { %v1355_v7 = vpack.c.bf16 %v942_v5, %v942_v5  ;;  %v888_v8 = vld [vmem:[#allocation2 + $0x70] sm:$0xff] }
 0x138   : > { %v904_v9 = vld [vmem:[#allocation2 + $0xf0] sm:$0xff]  ;;  %1087 = vst.msk [vmem:[%s1685_s22 + $0x34] sm:$0xf] %vm1073_vm4, %v1339_v6  ;;  %v927_v10 = vadd.f32 %v1675_v2, %v888_v8 }
 0x139   : > { %1103 = vst.msk [vmem:[%s1685_s22 + $0x74] sm:$0xf] %vm1073_vm4, %v1355_v7  ;;  %v943_v11 = vadd.f32 %v1675_v2, %v904_v9 }
 0x13a   : > { %v1340_v12 = vpack.c.bf16 %v927_v10, %v927_v10 }
 0x13b   : > { %v1356_v13 = vpack.c.bf16 %v943_v11, %v943_v11 }
 0x13c   : > { %1088 = vst.msk [vmem:[%s1685_s22 + $0x38] sm:$0xf] %vm1073_vm4, %v1340_v12 }
 0x13d   : > { %v889_v14 = vld [vmem:[#allocation2 + $0x78] sm:$0xff]  ;;  %1104 = vst.msk [vmem:[%s1685_s22 + $0x78] sm:$0xf] %vm1073_vm4, %v1356_v13 }
 0x13e   : > { %v905_v15 = vld [vmem:[#allocation2 + $0xf8] sm:$0xff]  ;;  %v928_v16 = vadd.f32 %v1675_v2, %v889_v14 }
 0x13f   : > { %v944_v17 = vadd.f32 %v1675_v2, %v905_v15 }
 0x140   : > { %v1341_v18 = vpack.c.bf16 %v928_v16, %v928_v16 }
 0x141   : > { %v1357_v19 = vpack.c.bf16 %v944_v17, %v944_v17 }
 0x142   : > { %1089 = vst.msk [vmem:[%s1685_s22 + $0x3c] sm:$0xf] %vm1073_vm4, %v1341_v18 }
 0x143   : > { %1105 = vst.msk [vmem:[%s1685_s22 + $0x7c] sm:$0xf] %vm1073_vm4, %v1357_v19 }
 0x144 PF: > { %s13_s14 = sadd.s32 1, %s1485_s14   ;;  %s1820_s12 = smov %s1481_s13 }
 0x145   : > { %p10_p5 = scmp.ge.s32.totalorder %s13_s14, 4   ;;  %s1821_s13 = smov %s1823_s15 }
 0x147   :  { %12 = sbr.rel (!%p10_p5) target bundleno = 2 (0x2), region = 76 }

// kernel: forward.22
= control target key start
LH: loop header
LB: loop body
LE: loop exit
PB: predicated region body
PF: predicated region fallthrough
CT: control target
= control target key end

     0   :  { %vm288_vm0 = vcmask 519168   ;;  %s943_s0 = inlined_call_operand.vmem [shape: bf16[9,128,64], index: 0, kind: input, shape index: {}]   ;;  %s944_s1 = inlined_call_operand.vmem [shape: bf16[128,64], index: 1, kind: output, shape index: {}]  }
   0x1   :  { %v8_v0 = vld [vmem:[%s943_s0] sm:$0xf]  ;;  %v9_v6 = vld [vmem:[%s943_s0 + $0x4] sm:$0xf]  ;;  %v10_v15 = vld [vmem:[%s943_s0 + $0x8] sm:$0xf] }
   0x2   :  { %v309_v1 = vld [vmem:[%s943_s0 + $0x40] sm:$0xf]  ;;  %v310_v7 = vld [vmem:[%s943_s0 + $0x44] sm:$0xf]  ;;  %v311_v16 = vld [vmem:[%s943_s0 + $0x48] sm:$0xf] }
   0x3   :  { %v325_v2 = vld [vmem:[%s943_s0 + $0x80] sm:$0xf]  ;;  %v41_v3 = vmax.bf16 %v309_v1, %v8_v0  ;;  %v326_v8 = vld [vmem:[%s943_s0 + $0x84] sm:$0xf]  ;;  %v42_v10 = vmax.bf16 %v310_v7, %v9_v6  ;;  %v327_v17 = vld [vmem:[%s943_s0 + $0x88] sm:$0xf]  ;;  %v43_v20 = vmax.bf16 %v311_v16, %v10_v15 }
   0x4   :  { %v341_v4 = vld [vmem:[%s943_s0 + $0xc0] sm:$0xf]  ;;  %v342_v13 = vld [vmem:[%s943_s0 + $0xc4] sm:$0xf]  ;;  %v343_v24 = vld [vmem:[%s943_s0 + $0xc8] sm:$0xf] }
   0x5   :  { %v74_v5 = vmax.bf16 %v325_v2, %v41_v3  ;;  %v357_v9 = vld [vmem:[%s943_s0 + $0x100] sm:$0xf]  ;;  %v75_v14 = vmax.bf16 %v326_v8, %v42_v10  ;;  %v358_v19 = vld [vmem:[%s943_s0 + $0x104] sm:$0xf]  ;;  %v76_v26 = vmax.bf16 %v327_v17, %v43_v20  ;;  %v11_v27 = vld [vmem:[%s943_s0 + $0xc] sm:$0xf] }
   0x6   :  { %v373_v12 = vld [vmem:[%s943_s0 + $0x140] sm:$0xf]  ;;  %v374_v23 = vld [vmem:[%s943_s0 + $0x144] sm:$0xf]  ;;  %v312_v28 = vld [vmem:[%s943_s0 + $0x4c] sm:$0xf] }
   0x7   :  { %v107_v11 = vmax.bf16 %v341_v4, %v74_v5  ;;  %v389_v21 = vld [vmem:[%s943_s0 + $0x180] sm:$0xf]  ;;  %v108_v22 = vmax.bf16 %v342_v13, %v75_v14  ;;  %v328_v29 = vld [vmem:[%s943_s0 + $0x8c] sm:$0xf]  ;;  %v359_v33 = vld [vmem:[%s943_s0 + $0x108] sm:$0xf]  ;;  %v44_v34 = vmax.bf16 %v312_v28, %v11_v27  ;;  %v109_v37 = vmax.bf16 %v343_v24, %v76_v26 }
   0x8   :  { %v405_v30 = vld [vmem:[%s943_s0 + $0x1c0] sm:$0xf]  ;;  %v390_v36 = vld [vmem:[%s943_s0 + $0x184] sm:$0xf]  ;;  %v375_v38 = vld [vmem:[%s943_s0 + $0x148] sm:$0xf] }
   0x9   :  { %v140_v18 = vmax.bf16 %v357_v9, %v107_v11  ;;  %v421_v31 = vld [vmem:[%s943_s0 + $0x200] sm:$0xf]  ;;  %v141_v32 = vmax.bf16 %v358_v19, %v108_v22  ;;  %v344_v39 = vld [vmem:[%s943_s0 + $0xcc] sm:$0xf]  ;;  %v77_v41 = vmax.bf16 %v328_v29, %v44_v34  ;;  %v12_v42 = vld [vmem:[%s943_s0 + $0x10] sm:$0xf]  ;;  %v142_v48 = vmax.bf16 %v359_v33, %v109_v37 }
   0xa   :  { %v313_v43 = vld [vmem:[%s943_s0 + $0x50] sm:$0xf]  ;;  %v406_v46 = vld [vmem:[%s943_s0 + $0x1c4] sm:$0xf]  ;;  %v360_v49 = vld [vmem:[%s943_s0 + $0x10c] sm:$0xf] }
   0xb   :  { %v173_v25 = vmax.bf16 %v373_v12, %v140_v18  ;;  %v174_v40 = vmax.bf16 %v374_v23, %v141_v32  ;;  %v329_v44 = vld [vmem:[%s943_s0 + $0x90] sm:$0xf]  ;;  %v422_v47 = vld [vmem:[%s943_s0 + $0x204] sm:$0xf]  ;;  %v45_v50 = vmax.bf16 %v313_v43, %v12_v42  ;;  %v391_v52 = vld [vmem:[%s943_s0 + $0x188] sm:$0xf]  ;;  %v110_v53 = vmax.bf16 %v344_v39, %v77_v41 }
   0xc   :  { %v376_v54 = vld [vmem:[%s943_s0 + $0x14c] sm:$0xf]  ;;  %v345_v55 = vld [vmem:[%s943_s0 + $0xd0] sm:$0xf]  ;;  %v175_v57 = vmax.bf16 %v375_v38, %v142_v48  ;;  %v13_v59 = vld [vmem:[%s943_s0 + $0x14] sm:$0xf] }
   0xd   :  { %v206_v35 = vmax.bf16 %v389_v21, %v173_v25  ;;  %v207_v51 = vmax.bf16 %v390_v36, %v174_v40  ;;  %v78_v58 = vmax.bf16 %v329_v44, %v45_v50  ;;  %v314_v60 = vld [vmem:[%s943_s0 + $0x54] sm:$0xf]  ;;  %v407_v63 = vld [vmem:[%s943_s0 + $0x1c8] sm:$0xf]  ;;  %v143_v1 = vmax.bf16 %v360_v49, %v110_v53  ;;  %v361_v2 = vld [vmem:[%s943_s0 + $0x110] sm:$0xf] }
   0xe   :  { %v330_v61 = vld [vmem:[%s943_s0 + $0x94] sm:$0xf]  ;;  %v423_v0 = vld [vmem:[%s943_s0 + $0x208] sm:$0xf]  ;;  %v46_v3 = vmax.bf16 %v314_v60, %v13_v59  ;;  %v208_v4 = vmax.bf16 %v391_v52, %v175_v57  ;;  %v392_v5 = vld [vmem:[%s943_s0 + $0x18c] sm:$0xf] }
   0xf   :  { %v239_v45 = vmax.bf16 %v405_v30, %v206_v35  ;;  %v240_v62 = vmax.bf16 %v406_v46, %v207_v51  ;;  %v111_v6 = vmax.bf16 %v345_v55, %v78_v58  ;;  %v377_v7 = vld [vmem:[%s943_s0 + $0x150] sm:$0xf]  ;;  %v346_v8 = vld [vmem:[%s943_s0 + $0xd4] sm:$0xf]  ;;  %v176_v10 = vmax.bf16 %v376_v54, %v143_v1  ;;  %v14_v12 = vld [vmem:[%s943_s0 + $0x18] sm:$0xf] }
  0x10   :  { %v79_v11 = vmax.bf16 %v330_v61, %v46_v3  ;;  %v315_v13 = vld [vmem:[%s943_s0 + $0x58] sm:$0xf]  ;;  %v241_v15 = vmax.bf16 %v407_v63, %v208_v4  ;;  %v408_v16 = vld [vmem:[%s943_s0 + $0x1cc] sm:$0xf]  ;;  %v362_v19 = vld [vmem:[%s943_s0 + $0x114] sm:$0xf] }
  0x11   :  { %v272_v56 = vmax.bf16 %v421_v31, %v239_v45  ;;  %v273_v9 = vmax.bf16 %v422_v47, %v240_v62  ;;  %v331_v14 = vld [vmem:[%s943_s0 + $0x98] sm:$0xf]  ;;  %v424_v17 = vld [vmem:[%s943_s0 + $0x20c] sm:$0xf]  ;;  %v144_v18 = vmax.bf16 %v361_v2, %v111_v6  ;;  %v47_v20 = vmax.bf16 %v315_v13, %v14_v12  ;;  %v393_v22 = vld [vmem:[%s943_s0 + $0x190] sm:$0xf] }
  0x12   :  { %v209_v21 = vmax.bf16 %v392_v5, %v176_v10  ;;  %v112_v23 = vmax.bf16 %v346_v8, %v79_v11  ;;  %v378_v24 = vld [vmem:[%s943_s0 + $0x154] sm:$0xf]  ;;  %v347_v25 = vld [vmem:[%s943_s0 + $0xd8] sm:$0xf]  ;;  %v274_v26 = vmax.bf16 %v423_v0, %v241_v15  ;;  %v15_v29 = vld [vmem:[%s943_s0 + $0x1c] sm:$0xf] }
  0x13   :  { %289 = vst.msk [vmem:[%s944_s1] sm:$0xf] %vm288_vm0, %v272_v56  ;;  %290 = vst.msk [vmem:[%s944_s1 + $0x4] sm:$0xf] %vm288_vm0, %v273_v9  ;;  %v177_v27 = vmax.bf16 %v377_v7, %v144_v18  ;;  %v80_v28 = vmax.bf16 %v331_v14, %v47_v20  ;;  %v316_v30 = vld [vmem:[%s943_s0 + $0x5c] sm:$0xf] }
  0x14   :  { %v332_v31 = vld [vmem:[%s943_s0 + $0x9c] sm:$0xf]  ;;  %v242_v32 = vmax.bf16 %v408_v16, %v209_v21  ;;  %v409_v33 = vld [vmem:[%s943_s0 + $0x1d0] sm:$0xf]  ;;  %v145_v35 = vmax.bf16 %v362_v19, %v112_v23  ;;  %v363_v36 = vld [vmem:[%s943_s0 + $0x118] sm:$0xf]  ;;  %v48_v37 = vmax.bf16 %v316_v30, %v15_v29 }
  0x15   :  { %v425_v34 = vld [vmem:[%s943_s0 + $0x210] sm:$0xf]  ;;  %291 = vst.msk [vmem:[%s944_s1 + $0x8] sm:$0xf] %vm288_vm0, %v274_v26  ;;  %v210_v38 = vmax.bf16 %v393_v22, %v177_v27  ;;  %v394_v39 = vld [vmem:[%s943_s0 + $0x194] sm:$0xf]  ;;  %v113_v40 = vmax.bf16 %v347_v25, %v80_v28 }
  0x16   :  { %v379_v41 = vld [vmem:[%s943_s0 + $0x158] sm:$0xf]  ;;  %v348_v42 = vld [vmem:[%s943_s0 + $0xdc] sm:$0xf]  ;;  %v275_v43 = vmax.bf16 %v424_v17, %v242_v32  ;;  %v178_v44 = vmax.bf16 %v378_v24, %v145_v35  ;;  %v81_v45 = vmax.bf16 %v332_v31, %v48_v37  ;;  %v16_v46 = vld [vmem:[%s943_s0 + $0x20] sm:$0xf] }
  0x17   :  { %v317_v47 = vld [vmem:[%s943_s0 + $0x60] sm:$0xf]  ;;  %v243_v49 = vmax.bf16 %v409_v33, %v210_v38  ;;  %v410_v50 = vld [vmem:[%s943_s0 + $0x1d4] sm:$0xf]  ;;  %v146_v52 = vmax.bf16 %v363_v36, %v113_v40  ;;  %v364_v53 = vld [vmem:[%s943_s0 + $0x11c] sm:$0xf] }
  0x18   :  { %v333_v48 = vld [vmem:[%s943_s0 + $0xa0] sm:$0xf]  ;;  %v426_v51 = vld [vmem:[%s943_s0 + $0x214] sm:$0xf]  ;;  %v49_v54 = vmax.bf16 %v317_v47, %v16_v46  ;;  %292 = vst.msk [vmem:[%s944_s1 + $0xc] sm:$0xf] %vm288_vm0, %v275_v43  ;;  %v211_v55 = vmax.bf16 %v394_v39, %v178_v44  ;;  %v114_v57 = vmax.bf16 %v348_v42, %v81_v45 }
  0x19   :  { %v395_v56 = vld [vmem:[%s943_s0 + $0x198] sm:$0xf]  ;;  %v380_v58 = vld [vmem:[%s943_s0 + $0x15c] sm:$0xf]  ;;  %v349_v59 = vld [vmem:[%s943_s0 + $0xe0] sm:$0xf]  ;;  %v276_v60 = vmax.bf16 %v425_v34, %v243_v49  ;;  %v179_v61 = vmax.bf16 %v379_v41, %v146_v52 }
  0x1a   :  { %v82_v62 = vmax.bf16 %v333_v48, %v49_v54  ;;  %v17_v63 = vld [vmem:[%s943_s0 + $0x24] sm:$0xf]  ;;  %v244_v2 = vmax.bf16 %v410_v50, %v211_v55  ;;  %v411_v3 = vld [vmem:[%s943_s0 + $0x1d8] sm:$0xf]  ;;  %v147_v5 = vmax.bf16 %v364_v53, %v114_v57  ;;  %v365_v6 = vld [vmem:[%s943_s0 + $0x120] sm:$0xf] }
  0x1b   :  { %v318_v0 = vld [vmem:[%s943_s0 + $0x64] sm:$0xf]  ;;  %v427_v4 = vld [vmem:[%s943_s0 + $0x218] sm:$0xf]  ;;  %293 = vst.msk [vmem:[%s944_s1 + $0x10] sm:$0xf] %vm288_vm0, %v276_v60  ;;  %v212_v8 = vmax.bf16 %v395_v56, %v179_v61 }
  0x1c   :  { %v334_v1 = vld [vmem:[%s943_s0 + $0xa4] sm:$0xf]  ;;  %v50_v7 = vmax.bf16 %v318_v0, %v17_v63  ;;  %v396_v9 = vld [vmem:[%s943_s0 + $0x19c] sm:$0xf]  ;;  %v115_v10 = vmax.bf16 %v349_v59, %v82_v62  ;;  %v381_v11 = vld [vmem:[%s943_s0 + $0x160] sm:$0xf]  ;;  %v277_v13 = vmax.bf16 %v426_v51, %v244_v2  ;;  %v180_v14 = vmax.bf16 %v380_v58, %v147_v5 }
  0x1d   :  { %v350_v12 = vld [vmem:[%s943_s0 + $0xe4] sm:$0xf]  ;;  %v18_v16 = vld [vmem:[%s943_s0 + $0x28] sm:$0xf]  ;;  %v245_v19 = vmax.bf16 %v411_v3, %v212_v8  ;;  %v412_v20 = vld [vmem:[%s943_s0 + $0x1dc] sm:$0xf] }
  0x1e   :  { %v83_v15 = vmax.bf16 %v334_v1, %v50_v7  ;;  %v319_v17 = vld [vmem:[%s943_s0 + $0x68] sm:$0xf]  ;;  %v428_v21 = vld [vmem:[%s943_s0 + $0x21c] sm:$0xf]  ;;  %v148_v22 = vmax.bf16 %v365_v6, %v115_v10  ;;  %v366_v23 = vld [vmem:[%s943_s0 + $0x124] sm:$0xf]  ;;  %v213_v25 = vmax.bf16 %v396_v9, %v180_v14 }
  0x1f   :  { %v335_v18 = vld [vmem:[%s943_s0 + $0xa8] sm:$0xf]  ;;  %v51_v24 = vmax.bf16 %v319_v17, %v18_v16  ;;  %294 = vst.msk [vmem:[%s944_s1 + $0x14] sm:$0xf] %vm288_vm0, %v277_v13  ;;  %v397_v26 = vld [vmem:[%s943_s0 + $0x1a0] sm:$0xf]  ;;  %v278_v30 = vmax.bf16 %v427_v4, %v245_v19 }
  0x20   :  { %v116_v27 = vmax.bf16 %v350_v12, %v83_v15  ;;  %v382_v28 = vld [vmem:[%s943_s0 + $0x164] sm:$0xf]  ;;  %v351_v29 = vld [vmem:[%s943_s0 + $0xe8] sm:$0xf]  ;;  %v181_v31 = vmax.bf16 %v381_v11, %v148_v22  ;;  %v19_v33 = vld [vmem:[%s943_s0 + $0x2c] sm:$0xf]  ;;  %v246_v36 = vmax.bf16 %v412_v20, %v213_v25 }
  0x21   :  { %v84_v32 = vmax.bf16 %v335_v18, %v51_v24  ;;  %v320_v34 = vld [vmem:[%s943_s0 + $0x6c] sm:$0xf]  ;;  %v413_v37 = vld [vmem:[%s943_s0 + $0x1e0] sm:$0xf]  ;;  %v367_v40 = vld [vmem:[%s943_s0 + $0x128] sm:$0xf] }
  0x22   :  { %v336_v35 = vld [vmem:[%s943_s0 + $0xac] sm:$0xf]  ;;  %v429_v38 = vld [vmem:[%s943_s0 + $0x220] sm:$0xf]  ;;  %v149_v39 = vmax.bf16 %v366_v23, %v116_v27  ;;  %v52_v41 = vmax.bf16 %v320_v34, %v19_v33  ;;  %295 = vst.msk [vmem:[%s944_s1 + $0x18] sm:$0xf] %vm288_vm0, %v278_v30  ;;  %v214_v42 = vmax.bf16 %v397_v26, %v181_v31  ;;  %v279_v47 = vmax.bf16 %v428_v21, %v246_v36 }
  0x23   :  { %v398_v43 = vld [vmem:[%s943_s0 + $0x1a4] sm:$0xf]  ;;  %v117_v44 = vmax.bf16 %v351_v29, %v84_v32  ;;  %v383_v45 = vld [vmem:[%s943_s0 + $0x168] sm:$0xf]  ;;  %v352_v46 = vld [vmem:[%s943_s0 + $0xec] sm:$0xf] }
  0x24   :  { %v182_v48 = vmax.bf16 %v382_v28, %v149_v39  ;;  %v85_v49 = vmax.bf16 %v336_v35, %v52_v41  ;;  %v20_v50 = vld [vmem:[%s943_s0 + $0x30] sm:$0xf]  ;;  %v247_v53 = vmax.bf16 %v413_v37, %v214_v42  ;;  %v414_v54 = vld [vmem:[%s943_s0 + $0x1e4] sm:$0xf]  ;;  %v368_v57 = vld [vmem:[%s943_s0 + $0x12c] sm:$0xf] }
  0x25   :  { %v321_v51 = vld [vmem:[%s943_s0 + $0x70] sm:$0xf]  ;;  %v430_v55 = vld [vmem:[%s943_s0 + $0x224] sm:$0xf]  ;;  %v150_v56 = vmax.bf16 %v367_v40, %v117_v44  ;;  %296 = vst.msk [vmem:[%s944_s1 + $0x1c] sm:$0xf] %vm288_vm0, %v279_v47 }
  0x26   :  { %v337_v52 = vld [vmem:[%s943_s0 + $0xb0] sm:$0xf]  ;;  %v53_v58 = vmax.bf16 %v321_v51, %v20_v50  ;;  %v215_v59 = vmax.bf16 %v398_v43, %v182_v48  ;;  %v399_v60 = vld [vmem:[%s943_s0 + $0x1a8] sm:$0xf]  ;;  %v118_v61 = vmax.bf16 %v352_v46, %v85_v49  ;;  %v384_v62 = vld [vmem:[%s943_s0 + $0x16c] sm:$0xf]  ;;  %v280_v0 = vmax.bf16 %v429_v38, %v247_v53 }
  0x27   :  { %v353_v63 = vld [vmem:[%s943_s0 + $0xf0] sm:$0xf]  ;;  %v183_v1 = vmax.bf16 %v383_v45, %v150_v56  ;;  %v21_v3 = vld [vmem:[%s943_s0 + $0x34] sm:$0xf]  ;;  %v415_v7 = vld [vmem:[%s943_s0 + $0x1e8] sm:$0xf] }
  0x28   :  { %v86_v2 = vmax.bf16 %v337_v52, %v53_v58  ;;  %v322_v4 = vld [vmem:[%s943_s0 + $0x74] sm:$0xf]  ;;  %v248_v6 = vmax.bf16 %v414_v54, %v215_v59  ;;  %v431_v8 = vld [vmem:[%s943_s0 + $0x228] sm:$0xf]  ;;  %v151_v9 = vmax.bf16 %v368_v57, %v118_v61  ;;  %v369_v10 = vld [vmem:[%s943_s0 + $0x130] sm:$0xf] }
  0x29   :  { %v338_v5 = vld [vmem:[%s943_s0 + $0xb4] sm:$0xf]  ;;  %v54_v11 = vmax.bf16 %v322_v4, %v21_v3  ;;  %297 = vst.msk [vmem:[%s944_s1 + $0x20] sm:$0xf] %vm288_vm0, %v280_v0  ;;  %v216_v12 = vmax.bf16 %v399_v60, %v183_v1  ;;  %v400_v13 = vld [vmem:[%s943_s0 + $0x1ac] sm:$0xf] }
  0x2a   :  { %v119_v14 = vmax.bf16 %v353_v63, %v86_v2  ;;  %v385_v15 = vld [vmem:[%s943_s0 + $0x170] sm:$0xf]  ;;  %v354_v16 = vld [vmem:[%s943_s0 + $0xf4] sm:$0xf]  ;;  %v281_v17 = vmax.bf16 %v430_v55, %v248_v6  ;;  %v184_v18 = vmax.bf16 %v384_v62, %v151_v9  ;;  %v22_v20 = vld [vmem:[%s943_s0 + $0x38] sm:$0xf] }
  0x2b   :  { %v87_v19 = vmax.bf16 %v338_v5, %v54_v11  ;;  %v323_v21 = vld [vmem:[%s943_s0 + $0x78] sm:$0xf]  ;;  %v249_v23 = vmax.bf16 %v415_v7, %v216_v12  ;;  %v416_v24 = vld [vmem:[%s943_s0 + $0x1ec] sm:$0xf]  ;;  %v370_v27 = vld [vmem:[%s943_s0 + $0x134] sm:$0xf] }
  0x2c   :  { %v339_v22 = vld [vmem:[%s943_s0 + $0xb8] sm:$0xf]  ;;  %v432_v25 = vld [vmem:[%s943_s0 + $0x22c] sm:$0xf]  ;;  %v152_v26 = vmax.bf16 %v369_v10, %v119_v14  ;;  %v55_v28 = vmax.bf16 %v323_v21, %v22_v20  ;;  %298 = vst.msk [vmem:[%s944_s1 + $0x24] sm:$0xf] %vm288_vm0, %v281_v17  ;;  %v217_v29 = vmax.bf16 %v400_v13, %v184_v18 }
  0x2d   :  { %v401_v30 = vld [vmem:[%s943_s0 + $0x1b0] sm:$0xf]  ;;  %v120_v31 = vmax.bf16 %v354_v16, %v87_v19  ;;  %v386_v32 = vld [vmem:[%s943_s0 + $0x174] sm:$0xf]  ;;  %v355_v33 = vld [vmem:[%s943_s0 + $0xf8] sm:$0xf]  ;;  %v282_v34 = vmax.bf16 %v431_v8, %v249_v23 }
  0x2e   :  { %v185_v35 = vmax.bf16 %v385_v15, %v152_v26  ;;  %v88_v36 = vmax.bf16 %v339_v22, %v55_v28  ;;  %v23_v37 = vld [vmem:[%s943_s0 + $0x3c] sm:$0xf]  ;;  %v250_v40 = vmax.bf16 %v416_v24, %v217_v29  ;;  %v417_v41 = vld [vmem:[%s943_s0 + $0x1f0] sm:$0xf]  ;;  %v371_v43 = vld [vmem:[%s943_s0 + $0x138] sm:$0xf] }
  0x2f   :  { %v324_v38 = vld [vmem:[%s943_s0 + $0x7c] sm:$0xf]  ;;  %v153_v42 = vmax.bf16 %v370_v27, %v120_v31  ;;  %299 = vst.msk [vmem:[%s944_s1 + $0x28] sm:$0xf] %vm288_vm0, %v282_v34  ;;  %v402_v46 = vld [vmem:[%s943_s0 + $0x1b4] sm:$0xf] }
  0x30   :  { %v340_v39 = vld [vmem:[%s943_s0 + $0xbc] sm:$0xf]  ;;  %v56_v44 = vmax.bf16 %v324_v38, %v23_v37  ;;  %v218_v45 = vmax.bf16 %v401_v30, %v185_v35  ;;  %v121_v47 = vmax.bf16 %v355_v33, %v88_v36  ;;  %v283_v49 = vmax.bf16 %v432_v25, %v250_v40  ;;  %v433_v50 = vld [vmem:[%s943_s0 + $0x230] sm:$0xf]  ;;  %v387_v52 = vld [vmem:[%s943_s0 + $0x178] sm:$0xf] }
  0x31   :  { %v356_v48 = vld [vmem:[%s943_s0 + $0xfc] sm:$0xf]  ;;  %v186_v51 = vmax.bf16 %v386_v32, %v153_v42  ;;  %v418_v55 = vld [vmem:[%s943_s0 + $0x1f4] sm:$0xf]  ;;  %v403_v59 = vld [vmem:[%s943_s0 + $0x1b8] sm:$0xf] }
  0x32   :  { %v89_v53 = vmax.bf16 %v340_v39, %v56_v44  ;;  %v251_v54 = vmax.bf16 %v417_v41, %v218_v45  ;;  %v154_v56 = vmax.bf16 %v371_v43, %v121_v47  ;;  %v372_v57 = vld [vmem:[%s943_s0 + $0x13c] sm:$0xf]  ;;  %300 = vst.msk [vmem:[%s944_s1 + $0x2c] sm:$0xf] %vm288_vm0, %v283_v49  ;;  %v434_v62 = vld [vmem:[%s943_s0 + $0x234] sm:$0xf] }
  0x33   :  { %v219_v58 = vmax.bf16 %v402_v46, %v186_v51  ;;  %v388_v0 = vld [vmem:[%s943_s0 + $0x17c] sm:$0xf]  ;;  %v419_v2 = vld [vmem:[%s943_s0 + $0x1f8] sm:$0xf] }
  0x34   :  { %v122_v60 = vmax.bf16 %v356_v48, %v89_v53  ;;  %v284_v61 = vmax.bf16 %v433_v50, %v251_v54  ;;  %v187_v63 = vmax.bf16 %v387_v52, %v154_v56  ;;  %v404_v5 = vld [vmem:[%s943_s0 + $0x1bc] sm:$0xf]  ;;  %v435_v7 = vld [vmem:[%s943_s0 + $0x238] sm:$0xf] }
  0x35   :  { %v252_v1 = vmax.bf16 %v418_v55, %v219_v58  ;;  %v420_v10 = vld [vmem:[%s943_s0 + $0x1fc] sm:$0xf] }
  0x36   :  { %v155_v3 = vmax.bf16 %v372_v57, %v122_v60  ;;  %301 = vst.msk [vmem:[%s944_s1 + $0x30] sm:$0xf] %vm288_vm0, %v284_v61  ;;  %v220_v4 = vmax.bf16 %v403_v59, %v187_v63  ;;  %v436_v13 = vld [vmem:[%s943_s0 + $0x23c] sm:$0xf] }
  0x37   :  { %v285_v6 = vmax.bf16 %v434_v62, %v252_v1 }
  0x38   :  { %v188_v8 = vmax.bf16 %v388_v0, %v155_v3  ;;  %v253_v9 = vmax.bf16 %v419_v2, %v220_v4 }
  0x39   :  { %302 = vst.msk [vmem:[%s944_s1 + $0x34] sm:$0xf] %vm288_vm0, %v285_v6 }
  0x3a   :  { %v221_v11 = vmax.bf16 %v404_v5, %v188_v8  ;;  %v286_v12 = vmax.bf16 %v435_v7, %v253_v9 }
  0x3c   :  { %v254_v14 = vmax.bf16 %v420_v10, %v221_v11  ;;  %303 = vst.msk [vmem:[%s944_s1 + $0x38] sm:$0xf] %vm288_vm0, %v286_v12 }
  0x3e   :  { %v287_v15 = vmax.bf16 %v436_v13, %v254_v14 }
  0x40   :  { %304 = vst.msk [vmem:[%s944_s1 + $0x3c] sm:$0xf] %vm288_vm0, %v287_v15 }

// kernel: forward.24
= control target key start
LH: loop header
LB: loop body
LE: loop exit
PB: predicated region body
PF: predicated region fallthrough
CT: control target
= control target key end

     0   :  { %vm22_vm0 = vcmask 523264   ;;  %vm1084_vm1 = vcmask 519168   ;;  %s1939_s1 = inlined_call_operand.vmem [shape: bf16[576,64], index: 1, kind: input, shape index: {}]   ;;  %s1940_s0 = inlined_call_operand.vmem [shape: bf16[128,576], index: 0, kind: input, shape index: {}]   ;;  %s1941_s2 = inlined_call_operand.vmem [shape: f32[1,64], index: 2, kind: input, shape index: {}]   ;;  %s1942_s3 = inlined_call_operand.vmem [shape: f32[1,64], index: 3, kind: input, shape index: {}]   ;;  %s1943_s4 = inlined_call_operand.vmem [shape: bf16[128,64], index: 4, kind: output, shape index: {}]  }
   0x1   :  { %v1396_v0 = vld [vmem:[%s1939_s1 + $0x78] sm:$0xff]   ;;  %v1400_v4 = vld [vmem:[%s1939_s1 + $0x70] sm:$0xff]   ;;  %v1404_v8 = vld [vmem:[%s1939_s1 + $0x68] sm:$0xff]  }
   0x2   :  { %v1397_v1 = vld [vmem:[%s1939_s1 + $0xf8] sm:$0xff]   ;;  %1223 = vmatprep.subr.bf16.mxu0 %v1396_v0  ;;  %v1401_v5 = vld [vmem:[%s1939_s1 + $0xf0] sm:$0xff]   ;;  %v1405_v9 = vld [vmem:[%s1939_s1 + $0xe8] sm:$0xff]  }
   0x3   :  { %v1398_v2 = vld [vmem:[%s1939_s1 + $0x38] sm:$0xff]   ;;  %1287 = vmatprep.subr.bf16.mxu1 %v1397_v1  ;;  %v1402_v6 = vld [vmem:[%s1939_s1 + $0x30] sm:$0xff]   ;;  %v1406_v10 = vld [vmem:[%s1939_s1 + $0x28] sm:$0xff]  }
   0x4   :  { %v1399_v3 = vld [vmem:[%s1939_s1 + $0xb8] sm:$0xff]   ;;  %1224 = vmatpush3.bf16.msra.mxu0 %v1398_v2  ;;  %v1403_v7 = vld [vmem:[%s1939_s1 + $0xb0] sm:$0xff]   ;;  %v1407_v11 = vld [vmem:[%s1939_s1 + $0xa8] sm:$0xff]  }
   0x5   :  { %1288 = vmatpush3.bf16.msra.mxu1 %v1399_v3  ;;  %1225 = vmatprep.subr.bf16.mxu0 %v1400_v4  ;;  %v1408_v12 = vld [vmem:[%s1939_s1 + $0x60] sm:$0xff]   ;;  %v1412_v16 = vld [vmem:[%s1939_s1 + $0x58] sm:$0xff]   ;;  %v1416_v20 = vld [vmem:[%s1939_s1 + $0x50] sm:$0xff]  }
   0x6   :  { %1289 = vmatprep.subr.bf16.mxu1 %v1401_v5  ;;  %v1409_v13 = vld [vmem:[%s1939_s1 + $0xe0] sm:$0xff]   ;;  %v1413_v17 = vld [vmem:[%s1939_s1 + $0xd8] sm:$0xff]   ;;  %v1417_v21 = vld [vmem:[%s1939_s1 + $0xd0] sm:$0xff]  }
   0x7   :  { %v1410_v14 = vld [vmem:[%s1939_s1 + $0x20] sm:$0xff]   ;;  %v1414_v18 = vld [vmem:[%s1939_s1 + $0x18] sm:$0xff]   ;;  %v1418_v22 = vld [vmem:[%s1939_s1 + $0x10] sm:$0xff]  }
   0x8   :  { %1226 = vmatpush3.bf16.msra.mxu0 %v1402_v6  ;;  %v1411_v15 = vld [vmem:[%s1939_s1 + $0xa0] sm:$0xff]   ;;  %v1415_v19 = vld [vmem:[%s1939_s1 + $0x98] sm:$0xff]   ;;  %v1419_v23 = vld [vmem:[%s1939_s1 + $0x90] sm:$0xff]  }
   0x9   :  { %1290 = vmatpush3.bf16.msra.mxu1 %v1403_v7  ;;  %1227 = vmatprep.subr.bf16.mxu0 %v1404_v8  ;;  %v1420_v24 = vld [vmem:[%s1939_s1 + $0x48] sm:$0xff]   ;;  %v1424_v28 = vld [vmem:[%s1939_s1 + $0x40] sm:$0xff]   ;;  %v1434_v36 = vld [vmem:[%s1939_s1 + $0x118] sm:$0xff]  }
   0xa   :  { %1291 = vmatprep.subr.bf16.mxu1 %v1405_v9  ;;  %v1421_v25 = vld [vmem:[%s1939_s1 + $0xc8] sm:$0xff]   ;;  %v1425_v29 = vld [vmem:[%s1939_s1 + $0xc0] sm:$0xff]   ;;  %v1447_v42 = vld [vmem:[%s1939_s1 + $0x110] sm:$0xff]  }
   0xb   :  { %v1422_v26 = vld [vmem:[%s1939_s1 + $0x8] sm:$0xff]   ;;  %v1426_v30 = vld [vmem:[%s1939_s1] sm:$0xff]   ;;  %v1443_v43 = vld [vmem:[%s1940_s0 + $0x5c] ss:$20 sps:$4 sm:$0xff]  }
   0xc   :  { %1228 = vmatpush3.bf16.msra.mxu0 %v1406_v10  ;;  %v1423_v27 = vld [vmem:[%s1939_s1 + $0x88] sm:$0xff]   ;;  %v1427_v31 = vld [vmem:[%s1939_s1 + $0x80] sm:$0xff]   ;;  %v1448_v47 = vld [vmem:[%s1940_s0 + $0x7c] ss:$20 sps:$4 sm:$0xff]  }
   0xd   :  { %1292 = vmatpush3.bf16.msra.mxu1 %v1407_v11  ;;  %1229 = vmatprep.subr.bf16.mxu0 %v1408_v12  ;;  %v1428_v32 = vld [vmem:[%s1940_s0] ss:$20 sps:$4 sm:$0xff]   ;;  %v1430_v33 = vld [vmem:[%s1940_s0 + $0x4] ss:$20 sps:$4 sm:$0xff]   ;;  %v1431_v34 = vld [vmem:[%s1940_s0 + $0x8] ss:$20 sps:$4 sm:$0xff]  }
   0xe   :  { %1293 = vmatprep.subr.bf16.mxu1 %v1409_v13  ;;  %v1433_v35 = vld [vmem:[%s1940_s0 + $0xc] ss:$20 sps:$4 sm:$0xff]   ;;  %648 = vmatprep.mubr.bf16.mxu0 %v1430_v33  ;;  %v1437_v38 = vld [vmem:[%s1940_s0 + $0x34] ss:$20 sps:$4 sm:$0xff]   ;;  %v1440_v40 = vld [vmem:[%s1940_s0 + $0x30] ss:$20 sps:$4 sm:$0xff]  }
   0xf   :  { %745 = vmatprep.mubr.bf16.mxu1 %v1433_v35  ;;  %v1435_v37 = vld [vmem:[%s1940_s0 + $0x2c] ss:$20 sps:$4 sm:$0xff]   ;;  %v1439_v39 = vld [vmem:[%s1940_s0 + $0x28] ss:$20 sps:$4 sm:$0xff]   ;;  %v1445_v44 = vld [vmem:[%s1940_s0 + $0x50] ss:$20 sps:$4 sm:$0xff]  }
  0x10   :  { %1230 = vmatpush3.bf16.msra.mxu0 %v1410_v14  ;;  %v1441_v41 = vld [vmem:[%s1940_s0 + $0x54] ss:$20 sps:$4 sm:$0xff]   ;;  %v1446_v45 = vld [vmem:[%s1940_s0 + $0x58] ss:$20 sps:$4 sm:$0xff]   ;;  %v1473_v49 = vld [vmem:[%s1939_s1 + $0x100] sm:$0xff]   ;;  %v1488_v12 = vmov 0.0  }
  0x11   :  { %1294 = vmatpush3.bf16.msra.mxu1 %v1411_v15  ;;  %1231 = vmatprep.subr.bf16.mxu0 %v1412_v16  ;;  %v1460_v46 = vld [vmem:[%s1939_s1 + $0x108] sm:$0xff]   ;;  %v1450_v48 = vld [vmem:[%s1940_s0 + $0x84] ss:$20 sps:$4 sm:$0xff]   ;;  %v1453_v51 = vld [vmem:[%s1940_s0 + $0x80] ss:$20 sps:$4 sm:$0xff]   ;;  %25 = vst.msk [vmem:[#allocation2 + $0x10] sm:$0xff] %vm22_vm0, %v1488_v12 }
  0x12   :  { %1295 = vmatprep.subr.bf16.mxu1 %v1413_v17  ;;  %v1452_v50 = vld [vmem:[%s1940_s0 + $0x78] ss:$20 sps:$4 sm:$0xff]   ;;  %v1458_v54 = vld [vmem:[%s1940_s0 + $0xa0] ss:$20 sps:$4 sm:$0xff]   ;;  %v1459_v55 = vld [vmem:[%s1940_s0 + $0xa8] ss:$20 sps:$4 sm:$0xff]  }
  0x13   :  { %v1454_v52 = vld [vmem:[%s1940_s0 + $0xa4] ss:$20 sps:$4 sm:$0xff]   ;;  %v1456_v53 = vld [vmem:[%s1940_s0 + $0xac] ss:$20 sps:$4 sm:$0xff]   ;;  %v1463_v57 = vld [vmem:[%s1940_s0 + $0xd4] ss:$20 sps:$4 sm:$0xff]  }
  0x14   :  { %1232 = vmatpush3.bf16.msra.mxu0 %v1414_v18  ;;  %v1461_v56 = vld [vmem:[%s1940_s0 + $0xcc] ss:$20 sps:$4 sm:$0xff]   ;;  %v1465_v58 = vld [vmem:[%s1940_s0 + $0xc8] ss:$20 sps:$4 sm:$0xff]   ;;  %v1466_v59 = vld [vmem:[%s1940_s0 + $0xd0] ss:$20 sps:$4 sm:$0xff]  }
  0x15   :  { %1296 = vmatpush3.bf16.msra.mxu1 %v1415_v19  ;;  %1233 = vmatprep.subr.bf16.mxu0 %v1416_v20  ;;  %v1467_v60 = vld [vmem:[%s1940_s0 + $0xf4] ss:$20 sps:$4 sm:$0xff]   ;;  %v1469_v61 = vld [vmem:[%s1940_s0 + $0xfc] ss:$20 sps:$4 sm:$0xff]   ;;  %v1472_v63 = vld [vmem:[%s1940_s0 + $0xf8] ss:$20 sps:$4 sm:$0xff]  }
  0x16   :  { %1297 = vmatprep.subr.bf16.mxu1 %v1417_v21  ;;  %v1471_v62 = vld [vmem:[%s1940_s0 + $0xf0] ss:$20 sps:$4 sm:$0xff]   ;;  %v1478_v2 = vld [vmem:[%s1940_s0 + $0x118] ss:$20 sps:$4 sm:$0xff]   ;;  %v1479_v3 = vld [vmem:[%s1940_s0 + $0x120] ss:$20 sps:$4 sm:$0xff]  }
  0x17   :  { %v1474_v0 = vld [vmem:[%s1940_s0 + $0x11c] ss:$20 sps:$4 sm:$0xff]   ;;  %v1476_v1 = vld [vmem:[%s1940_s0 + $0x124] ss:$20 sps:$4 sm:$0xff]   ;;  %v1484_v8 = vld [vmem:[%s1940_s0 + $0x60] ss:$20 sps:$4 sm:$0xff]  }
  0x18   :  { %1234 = vmatpush3.bf16.msra.mxu0 %v1418_v22  ;;  %v1480_v4 = vld [vmem:[%s1940_s0 + $0x10] ss:$20 sps:$4 sm:$0xff]   ;;  %v1482_v6 = vld [vmem:[%s1940_s0 + $0x38] ss:$20 sps:$4 sm:$0xff]   ;;  %v1485_v9 = vld [vmem:[%s1940_s0 + $0x100] ss:$20 sps:$4 sm:$0xff]  }
  0x19   :  { %1298 = vmatpush3.bf16.msra.mxu1 %v1419_v23  ;;  %1235 = vmatprep.subr.bf16.mxu0 %v1420_v24  ;;  %v1481_v5 = vld [vmem:[%s1940_s0 + $0xb0] ss:$20 sps:$4 sm:$0xff]   ;;  %v1483_v7 = vld [vmem:[%s1940_s0 + $0xd8] ss:$20 sps:$4 sm:$0xff]   ;;  %v1486_v10 = vld [vmem:[%s1940_s0 + $0x88] ss:$20 sps:$4 sm:$0xff]  }
  0x1a   :  { %1299 = vmatprep.subr.bf16.mxu1 %v1421_v25  ;;  %v1487_v11 = vld [vmem:[%s1940_s0 + $0x128] ss:$20 sps:$4 sm:$0xff]   ;;  %23 = vst.msk [vmem:[#allocation2] sm:$0xff] %vm22_vm0, %v1488_v12  ;;  %24 = vst.msk [vmem:[#allocation2 + $0x8] sm:$0xff] %vm22_vm0, %v1488_v12 }
  0x1b   :  { %26 = vst.msk [vmem:[#allocation2 + $0x18] sm:$0xff] %vm22_vm0, %v1488_v12  ;;  %27 = vst.msk [vmem:[#allocation2 + $0x20] sm:$0xff] %vm22_vm0, %v1488_v12 }
  0x1c   :  { %1236 = vmatpush3.bf16.msra.mxu0 %v1422_v26  ;;  %28 = vst.msk [vmem:[#allocation2 + $0x28] sm:$0xff] %vm22_vm0, %v1488_v12  ;;  %29 = vst.msk [vmem:[#allocation2 + $0x30] sm:$0xff] %vm22_vm0, %v1488_v12 }
  0x1d   :  { %1300 = vmatpush3.bf16.msra.mxu1 %v1423_v27  ;;  %1237 = vmatprep.subr.bf16.mxu0 %v1424_v28  ;;  %30 = vst.msk [vmem:[#allocation2 + $0x38] sm:$0xff] %vm22_vm0, %v1488_v12  ;;  %31 = vst.msk [vmem:[#allocation2 + $0x40] sm:$0xff] %vm22_vm0, %v1488_v12 }
  0x1e   :  { %1301 = vmatprep.subr.bf16.mxu1 %v1425_v29  ;;  %32 = vst.msk [vmem:[#allocation2 + $0x48] sm:$0xff] %vm22_vm0, %v1488_v12  ;;  %33 = vst.msk [vmem:[#allocation2 + $0x50] sm:$0xff] %vm22_vm0, %v1488_v12 }
  0x1f   :  { %34 = vst.msk [vmem:[#allocation2 + $0x58] sm:$0xff] %vm22_vm0, %v1488_v12  ;;  %35 = vst.msk [vmem:[#allocation2 + $0x60] sm:$0xff] %vm22_vm0, %v1488_v12 }
  0x20   :  { %1238 = vmatpush3.bf16.msra.mxu0 %v1426_v30  ;;  %36 = vst.msk [vmem:[#allocation2 + $0x68] sm:$0xff] %vm22_vm0, %v1488_v12  ;;  %37 = vst.msk [vmem:[#allocation2 + $0x70] sm:$0xff] %vm22_vm0, %v1488_v12 }
  0x21   :  { %1302 = vmatpush3.bf16.msra.mxu1 %v1427_v31  ;;  %1363 = vmatprep.subr.bf16.mxu0 %v1434_v36  ;;  %38 = vst.msk [vmem:[#allocation2 + $0x78] sm:$0xff] %vm22_vm0, %v1488_v12 }
  0x22   :  { %1387 = vmatprep.subr.bf16.mxu1 %v1434_v36 }
  0x23   :  { %649 = vmatmul.mubr.bf16.vlgmr.msra.gmra.mxu0 %v1428_v32 }
  0x24   :  { %746 = vmatmul.mubr.bf16.vlgmr.msra.gmra.mxu1 %v1431_v34  ;;  %1364 = vmatpush3.bf16.msra.mxu0 %v1434_v36 }
  0x25   :  { %1391 = vmatpush3.bf16.msra.mxu1 %v1434_v36  ;;  %656 = vmatprep.mubr.bf16.mxu0 %v1435_v37 }
  0x26   :  { %753 = vmatprep.mubr.bf16.mxu1 %v1437_v38  ;;  %1365 = vmatprep.subr.bf16.mxu0 %v1447_v42 }
  0x27   :  { %1388 = vmatprep.subr.bf16.mxu1 %v1447_v42 }
  0x28   :  { %1366 = vmatpush3.bf16.msra.mxu0 %v1447_v42 }
  0x29   :  { %1392 = vmatpush3.bf16.msra.mxu1 %v1447_v42  ;;  %1367 = vmatprep.subr.bf16.mxu0 %v1460_v46 }
  0x2a   :  { %1389 = vmatprep.subr.bf16.mxu1 %v1460_v46 }
  0x2b   :  { %657 = vmatmul.mubr.bf16.gmra.mxu0 %v1439_v39 }
  0x2c   :  { %754 = vmatmul.mubr.bf16.gmra.mxu1 %v1440_v40  ;;  %664 = vmatprep.mubr.bf16.mxu0 %v1441_v41 }
  0x2d   :  { %761 = vmatprep.mubr.bf16.mxu1 %v1443_v43  ;;  %1368 = vmatpush3.bf16.msra.mxu0 %v1460_v46 }
  0x2e   :  { %1393 = vmatpush3.bf16.msra.mxu1 %v1460_v46  ;;  %1369 = vmatprep.subr.bf16.mxu0 %v1473_v49 }
  0x2f   :  { %1390 = vmatprep.subr.bf16.mxu1 %v1473_v49 }
  0x31   :  { %1370 = vmatpush3.bf16.msra.mxu0 %v1473_v49 }
  0x32   :  { %1394 = vmatpush3.bf16.msra.mxu1 %v1473_v49 }
  0x33   :  { %665 = vmatmul.mubr.bf16.gmra.mxu0 %v1445_v44 }
  0x34   :  { %762 = vmatmul.mubr.bf16.gmra.mxu1 %v1446_v45  ;;  %672 = vmatprep.mubr.bf16.mxu0 %v1448_v47 }
  0x35   :  { %769 = vmatprep.mubr.bf16.mxu1 %v1450_v48 }
  0x3b   :  { %673 = vmatmul.mubr.bf16.gmra.mxu0 %v1452_v50 }
  0x3c   :  { %770 = vmatmul.mubr.bf16.gmra.mxu1 %v1453_v51  ;;  %680 = vmatprep.mubr.bf16.mxu0 %v1454_v52 }
  0x3d   :  { %777 = vmatprep.mubr.bf16.mxu1 %v1456_v53 }
  0x43   :  { %681 = vmatmul.mubr.bf16.gmra.mxu0 %v1458_v54 }
  0x44   :  { %778 = vmatmul.mubr.bf16.gmra.mxu1 %v1459_v55  ;;  %688 = vmatprep.mubr.bf16.mxu0 %v1461_v56 }
  0x45   :  { %785 = vmatprep.mubr.bf16.mxu1 %v1463_v57 }
  0x4b   :  { %689 = vmatmul.mubr.bf16.gmra.mxu0 %v1465_v58 }
  0x4c   :  { %786 = vmatmul.mubr.bf16.gmra.mxu1 %v1466_v59  ;;  %696 = vmatprep.mubr.bf16.mxu0 %v1467_v60 }
  0x4d   :  { %793 = vmatprep.mubr.bf16.mxu1 %v1469_v61 }
  0x53   :  { %697 = vmatmul.mubr.bf16.gmra.mxu0 %v1471_v62 }
  0x54   :  { %794 = vmatmul.mubr.bf16.gmra.mxu1 %v1472_v63  ;;  %704 = vmatprep.mubr.bf16.mxu0 %v1474_v0 }
  0x55   :  { %801 = vmatprep.mubr.bf16.mxu1 %v1476_v1 }
  0x5b   :  { %705 = vmatmul.mubr.bf16.gmra.mxu0 %v1478_v2 }
  0x5c   :  { %802 = vmatmul.mubr.bf16.gmra.mxu1 %v1479_v3  ;;  %1371 = vmatprep.mubr.msk.bf16.mxu0 %vm22_vm0, %v1480_v4 }
  0x5d   :  { %1379 = vmatprep.mubr.msk.bf16.mxu1 %vm22_vm0, %v1481_v5 }
  0x63   :  { %1372 = vmatmul.mubr.msk.bf16.vlgmr.msra.gmra.mxu0 %vm22_vm0, %v1482_v6 }
  0x64   :  { %1380 = vmatmul.mubr.msk.bf16.vlgmr.msra.gmra.mxu1 %vm22_vm0, %v1483_v7  ;;  %1375 = vmatprep.mubr.msk.bf16.mxu0 %vm22_vm0, %v1484_v8 }
  0x65   :  { %1383 = vmatprep.mubr.msk.bf16.mxu1 %vm22_vm0, %v1485_v9 }
  0x6b   :  { %1376 = vmatmul.mubr.msk.bf16.gmra.mxu0 %vm22_vm0, %v1486_v10 }
  0x6c   :  { %1384 = vmatmul.mubr.msk.bf16.gmra.mxu1 %vm22_vm0, %v1487_v11 }
  0xe3   :  { %v1239_v13 = vpop.f32.mrf.mxu0 }
  0xe4   :  { %v1303_v14 = vpop.f32.mrf.mxu1 }
  0xe5   :  { %v1240_v15 = vpop.f32.mrf.mxu0 }
  0xe6   :  { %v1304_v16 = vpop.f32.mrf.mxu1  ;;  %v1241_v7 = vadd.f32 %v1240_v15, %v1239_v13 }
  0xe7   :  { %v1242_v17 = vpop.f32.mrf.mxu0  ;;  %v1305_v8 = vadd.f32 %v1304_v16, %v1303_v14 }
  0xe8   :  { %v1306_v18 = vpop.f32.mrf.mxu1 }
  0xe9   :  { %v1243_v19 = vpop.f32.mrf.mxu0  ;;  %v748_v16 = vadd.f32 %v1305_v8, %v1241_v7 }
  0xea   :  { %v1307_v20 = vpop.f32.mrf.mxu1  ;;  %v1244_v10 = vadd.f32 %v1243_v19, %v1242_v17 }
  0xeb   :  { %v1245_v21 = vpop.f32.mrf.mxu0  ;;  %v1308_v11 = vadd.f32 %v1307_v20, %v1306_v18 }
  0xec   :  { %v1309_v22 = vpop.f32.mrf.mxu1 }
  0xed   :  { %v1246_v23 = vpop.f32.mrf.mxu0  ;;  %v751_v17 = vadd.f32 %v1308_v11, %v1244_v10 }
  0xee   :  { %v1310_v24 = vpop.f32.mrf.mxu1  ;;  %v1247_v12 = vadd.f32 %v1246_v23, %v1245_v21  ;;  %v41_v21 = vld [vmem:[#allocation2 + $0x10] sm:$0xff] }
  0xef   :  { %v1248_v25 = vpop.f32.mrf.mxu0 }
  0xf0   :  { %v1312_v26 = vpop.f32.mrf.mxu1 }
  0xf1   :  { %v1249_v27 = vpop.f32.mrf.mxu0 }
  0xf2   :  { %v1313_v28 = vpop.f32.mrf.mxu1 }
  0xf3   :  { %v1251_v29 = vpop.f32.mrf.mxu0 }
  0xf4   :  { %v1315_v30 = vpop.f32.mrf.mxu1 }
  0xf5   :  { %v1252_v31 = vpop.f32.mrf.mxu0 }
  0xf6   :  { %v1316_v32 = vpop.f32.mrf.mxu1 }
  0xf7   :  { %v1766_v33 = vpop.f32.mrf.mxu0 }
  0xf8   :  { %v1768_v34 = vpop.f32.mrf.mxu1 }
  0xf9   :  { %1944 = vst [vmem:[#allocation3_spill] sm:$0xff] %v1768_v34  ;;  %v1770_v35 = vpop.f32.mrf.mxu0 }
  0xfa   :  { %1945 = vst [vmem:[#allocation4_spill] sm:$0xff] %v1770_v35  ;;  %v1772_v36 = vpop.f32.mrf.mxu1 }
  0xfb   :  { %1946 = vst [vmem:[#allocation5_spill] sm:$0xff] %v1772_v36  ;;  %v1257_v37 = vpop.f32.mrf.mxu0  ;;  %v1311_v36 = vadd.f32 %v1310_v24, %v1309_v22 }
  0xfc   :  { %v1321_v38 = vpop.f32.mrf.mxu1 }
  0xfd   :  { %v1258_v39 = vpop.f32.mrf.mxu0  ;;  %v756_v15 = vadd.f32 %v1311_v36, %v1247_v12 }
  0xfe   :  { %v1322_v40 = vpop.f32.mrf.mxu1  ;;  %v1259_v13 = vadd.f32 %v1258_v39, %v1257_v37  ;;  %v39_v37 = vld [vmem:[#allocation2] sm:$0xff] }
  0xff   :  { %v1774_v41 = vpop.f32.mrf.mxu0  ;;  %v1323_v18 = vadd.f32 %v1322_v40, %v1321_v38 }
 0x100   :  { %1947 = vst [vmem:[#allocation6_spill] sm:$0xff] %v1774_v41  ;;  %v1776_v42 = vpop.f32.mrf.mxu1  ;;  %v1253_v41 = vadd.f32 %v1252_v31, %v1251_v29 }
 0x101   :  { %1948 = vst [vmem:[#allocation7_spill] sm:$0xff] %v1776_v42  ;;  %v1778_v43 = vpop.f32.mrf.mxu0  ;;  %v1957_v24 = vld [vmem:[#allocation4_spill] sm:$0xff] }
 0x102   :  { %1949 = vst [vmem:[#allocation8_spill] sm:$0xff] %v1778_v43  ;;  %v1780_v44 = vpop.f32.mrf.mxu1 }
 0x103   :  { %1950 = vst [vmem:[#allocation9_spill] sm:$0xff] %v1780_v44  ;;  %v1263_v45 = vpop.f32.mrf.mxu0 }
 0x104   :  { %v1327_v46 = vpop.f32.mrf.mxu1 }
 0x105   :  { %v1264_v47 = vpop.f32.mrf.mxu0 }
 0x106   :  { %v1328_v48 = vpop.f32.mrf.mxu1 }
 0x107   :  { %v1266_v49 = vpop.f32.mrf.mxu0 }
 0x108   :  { %v1330_v50 = vpop.f32.mrf.mxu1 }
 0x109   :  { %v1267_v51 = vpop.f32.mrf.mxu0 }
 0x10a   :  { %v1331_v52 = vpop.f32.mrf.mxu1  ;;  %v1268_v31 = vadd.f32 %v1267_v51, %v1266_v49 }
 0x10b   :  { %v1269_v53 = vpop.f32.mrf.mxu0 }
 0x10c   :  { %v1333_v54 = vpop.f32.mrf.mxu1 }
 0x10d   :  { %v1270_v55 = vpop.f32.mrf.mxu0 }
 0x10e   :  { %v1334_v56 = vpop.f32.mrf.mxu1  ;;  %v1271_v44 = vadd.f32 %v1270_v55, %v1269_v53  ;;  %v42_v53 = vld [vmem:[#allocation2 + $0x18] sm:$0xff] }
 0x10f   :  { %v1272_v57 = vpop.f32.mrf.mxu0  ;;  %v1335_v42 = vadd.f32 %v1334_v56, %v1333_v54  ;;  %v772_v56 = vadd.f32 %v1323_v18, %v1259_v13  ;;  %v45_v18 = vld [vmem:[#allocation2 + $0x30] sm:$0xff] }
 0x110   :  { %v1336_v58 = vpop.f32.mrf.mxu1 }
 0x111   :  { %v1273_v59 = vpop.f32.mrf.mxu0  ;;  %v788_v23 = vadd.f32 %v1335_v42, %v1271_v44  ;;  %v47_v44 = vld [vmem:[#allocation2 + $0x40] sm:$0xff] }
 0x112   :  { %v1337_v60 = vpop.f32.mrf.mxu1  ;;  %v1274_v19 = vadd.f32 %v1273_v59, %v1272_v57  ;;  %v1960_v59 = vld [vmem:[#allocation6_spill] sm:$0xff] }
 0x113   :  { %v1782_v61 = vpop.f32.mrf.mxu0  ;;  %v1338_v20 = vadd.f32 %v1337_v60, %v1336_v58  ;;  %v50_v58 = vld [vmem:[#allocation2 + $0x58] sm:$0xff]  ;;  %v1961_v60 = vld [vmem:[#allocation8_spill] sm:$0xff] }
 0x114   :  { %1951 = vst [vmem:[#allocation10_spill] sm:$0xff] %v1782_v61  ;;  %v1784_v62 = vpop.f32.mrf.mxu1  ;;  %v1329_v61 = vadd.f32 %v1328_v48, %v1327_v46 }
 0x115   :  { %1952 = vst [vmem:[#allocation11_spill] sm:$0xff] %v1784_v62  ;;  %v1276_v63 = vpop.f32.mrf.mxu0  ;;  %v791_v55 = vadd.f32 %v1338_v20, %v1274_v19  ;;  %v1964_v20 = vld [vmem:[#allocation3_spill] sm:$0xff] }
 0x116   :  { %v1340_v0 = vpop.f32.mrf.mxu1 }
 0x117   :  { %v1786_v1 = vpop.f32.mrf.mxu0 }
 0x118   :  { %1953 = vst [vmem:[#allocation12_spill] sm:$0xff] %v1786_v1  ;;  %v1788_v2 = vpop.f32.mrf.mxu1  ;;  %v1250_v1 = vadd.f32 %v1249_v27, %v1248_v25  ;;  %v1798_v25 = vadd.f32 %v1957_v24, %v1766_v33  ;;  %v49_v27 = vld [vmem:[#allocation2 + $0x50] sm:$0xff] }
 0x119   :  { %1954 = vst [vmem:[#allocation13_spill] sm:$0xff] %v1788_v2  ;;  %v1790_v3 = vpop.f32.mrf.mxu0  ;;  %v1314_v2 = vadd.f32 %v1313_v28, %v1312_v26 }
 0x11a   :  { %1955 = vst [vmem:[#allocation14_spill] sm:$0xff] %v1790_v3  ;;  %v1792_v4 = vpop.f32.mrf.mxu1  ;;  %v1317_v3 = vadd.f32 %v1316_v32, %v1315_v30  ;;  %v1332_v32 = vadd.f32 %v1331_v52, %v1330_v50 }
 0x11b   :  { %1956 = vst [vmem:[#allocation15_spill] sm:$0xff] %v1792_v4  ;;  %v1281_v5 = vpop.f32.mrf.mxu0  ;;  %v1265_v4 = vadd.f32 %v1264_v47, %v1263_v45  ;;  %v759_v29 = vadd.f32 %v1314_v2, %v1250_v1 }
 0x11c   :  { %v1345_v6 = vpop.f32.mrf.mxu1  ;;  %v1800_v30 = vadd.f32 %v1317_v3, %v1253_v41  ;;  %v1958_v41 = vld [vmem:[#allocation10_spill] sm:$0xff]  ;;  %v1959_v49 = vld [vmem:[#allocation11_spill] sm:$0xff]  ;;  %v40_v3 = vld [vmem:[#allocation2 + $0x8] sm:$0xff] }
 0x11d   :  { %v1282_v9 = vpop.f32.mrf.mxu0  ;;  %v780_v39 = vadd.f32 %v1329_v61, %v1265_v4  ;;  %v1277_v57 = vadd.f32 %v1276_v63, %v1958_v41  ;;  %v1341_v50 = vadd.f32 %v1340_v0, %v1959_v49  ;;  %v1262_v61 = vadd.f32 %v1961_v60, %v1960_v59  ;;  %v1963_v63 = vld [vmem:[#allocation9_spill] sm:$0xff]  ;;  %v54_v49 = vld [vmem:[#allocation2 + $0x78] sm:$0xff]  ;;  %v44_v60 = vld [vmem:[#allocation2 + $0x28] sm:$0xff] }
 0x11e   :  { %v1346_v34 = vpop.f32.mrf.mxu1  ;;  %v1283_v40 = vadd.f32 %v1282_v9, %v1281_v5  ;;  %v783_v5 = vadd.f32 %v1332_v32, %v1268_v31  ;;  %v48_v9 = vld [vmem:[#allocation2 + $0x48] sm:$0xff]  ;;  %v1823_v31 = vld [vmem:[%s1941_s2] ss:$0 sm:$0xff] }
 0x11f   :  { %v1794_v43 = vpop.f32.mrf.mxu0  ;;  %v1347_v45 = vadd.f32 %v1346_v34, %v1345_v6  ;;  %v1962_v6 = vld [vmem:[#allocation7_spill] sm:$0xff] }
 0x120   :  { %v1348_v62 = vpop.f32.mrf.mxu1  ;;  %v1326_v7 = vadd.f32 %v1963_v63, %v1962_v6 }
 0x121   :  { %v1285_v35 = vpop.f32.mrf.mxu0  ;;  %v804_v11 = vadd.f32 %v1347_v45, %v1283_v40  ;;  %v51_v45 = vld [vmem:[#allocation2 + $0x60] sm:$0xff] }
 0x122   :  { %v1349_v14 = vpop.f32.mrf.mxu1  ;;  %v1286_v12 = vadd.f32 %v1285_v35, %v1794_v43  ;;  %v1968_v43 = vld [vmem:[#allocation13_spill] sm:$0xff] }
 0x123   :  { %v1373_v22 = vpop.f32.mrf.mxu0  ;;  %v1350_v13 = vadd.f32 %v1349_v14, %v1348_v62  ;;  %v1969_v62 = vld [vmem:[#allocation15_spill] sm:$0xff] }
 0x124   :  { %v853_v26 = vadd.f32 %v1373_v22, %v756_v15  ;;  %v1381_v28 = vpop.f32.mrf.mxu1  ;;  %v1344_v14 = vadd.f32 %v1969_v62, %v1968_v43 }
 0x125   :  { %v885_v36 = vadd.f32 %v1381_v28, %v788_v23  ;;  %v844_v38 = vpop.f32.mrf.mxu0  ;;  %v1966_v28 = vld [vmem:[#allocation12_spill] sm:$0xff] }
 0x126   :  { %v909_v46 = vadd.f32 %v853_v26, %v41_v21  ;;  %v845_v42 = vadd.f32 %v844_v38, %v748_v16  ;;  %v876_v47 = vpop.f32.mrf.mxu1  ;;  %v1965_v21 = vld [vmem:[#allocation5_spill] sm:$0xff] }
 0x127   :  { %v917_v33 = vadd.f32 %v885_v36, %v49_v27  ;;  %v877_v48 = vadd.f32 %v876_v47, %v780_v39  ;;  %v1374_v54 = vpop.f32.mrf.mxu0  ;;  %v1320_v22 = vadd.f32 %v1965_v21, %v1964_v20  ;;  %v796_v27 = vadd.f32 %v1341_v50, %v1277_v57  ;;  %v1831_v47 = vld [vmem:[%s1942_s3] ss:$0 sm:$0xff] }
 0x128   :  { %925 = vst.msk [vmem:[#allocation2 + $0x10] sm:$0xff] %vm22_vm0, %v909_v46  ;;  %v907_v51 = vadd.f32 %v845_v42, %v39_v37  ;;  %v856_v52 = vadd.f32 %v1374_v54, %v759_v29  ;;  %v1382_v34 = vpop.f32.mrf.mxu1  ;;  %v1967_v29 = vld [vmem:[#allocation14_spill] sm:$0xff]  ;;  %v43_v37 = vld [vmem:[#allocation2 + $0x20] sm:$0xff]  ;;  %v775_v42 = vadd.f32 %v1326_v7, %v1262_v61 }
 0x129   :  { %933 = vst.msk [vmem:[#allocation2 + $0x50] sm:$0xff] %vm22_vm0, %v917_v33  ;;  %v915_v1 = vadd.f32 %v877_v48, %v47_v44  ;;  %v888_v2 = vadd.f32 %v1382_v34, %v791_v55  ;;  %v847_v4 = vpop.f32.mrf.mxu0  ;;  %v1280_v35 = vadd.f32 %v1967_v29, %v1966_v28  ;;  %v807_v55 = vadd.f32 %v1350_v13, %v1286_v12 }
 0x12a   :  { %923 = vst.msk [vmem:[#allocation2] sm:$0xff] %vm22_vm0, %v907_v51  ;;  %v910_v0 = vadd.f32 %v856_v52, %v42_v53  ;;  %v848_v8 = vadd.f32 %v847_v4, %v751_v17  ;;  %v879_v10 = vpop.f32.mrf.mxu1  ;;  %v53_v17 = vld [vmem:[#allocation2 + $0x70] sm:$0xff]  ;;  %v46_v53 = vld [vmem:[#allocation2 + $0x38] sm:$0xff]  ;;  %v767_v51 = vadd.f32 %v1320_v22, %v1798_v25  ;;  %v52_v25 = vld [vmem:[#allocation2 + $0x68] sm:$0xff] }
 0x12b   :  { %931 = vst.msk [vmem:[#allocation2 + $0x40] sm:$0xff] %vm22_vm0, %v915_v1  ;;  %v918_v15 = vadd.f32 %v888_v2, %v50_v58  ;;  %v880_v16 = vadd.f32 %v879_v10, %v783_v5  ;;  %v1377_v19 = vpop.f32.mrf.mxu0  ;;  %v799_v1 = vadd.f32 %v1344_v14, %v1280_v35 }
 0x12c   :  { %926 = vst.msk [vmem:[#allocation2 + $0x18] sm:$0xff] %vm22_vm0, %v910_v0  ;;  %v908_v23 = vadd.f32 %v848_v8, %v40_v3  ;;  %v869_v24 = vadd.f32 %v1377_v19, %v772_v56  ;;  %v1385_v26 = vpop.f32.mrf.mxu1 }
 0x12d   :  { %934 = vst.msk [vmem:[#allocation2 + $0x58] sm:$0xff] %vm22_vm0, %v918_v15  ;;  %v916_v32 = vadd.f32 %v880_v16, %v48_v9  ;;  %v901_v36 = vadd.f32 %v1385_v26, %v804_v11  ;;  %v860_v38 = vpop.f32.mrf.mxu0 }
 0x12e   :  { %924 = vst.msk [vmem:[#allocation2 + $0x8] sm:$0xff] %vm22_vm0, %v908_v23  ;;  %v913_v39 = vadd.f32 %v869_v24, %v45_v18  ;;  %v861_v40 = vadd.f32 %v860_v38, %v1800_v30  ;;  %v892_v46 = vpop.f32.mrf.mxu1 }
 0x12f   :  { %v944_v44 = vld [vmem:[#allocation2 + $0x10] sm:$0xff]  ;;  %932 = vst.msk [vmem:[#allocation2 + $0x48] sm:$0xff] %vm22_vm0, %v916_v32  ;;  %v921_v33 = vadd.f32 %v901_v36, %v53_v17  ;;  %v893_v48 = vadd.f32 %v892_v46, %v796_v27  ;;  %v1378_v54 = vpop.f32.mrf.mxu0 }
 0x130   :  { %v967_v56 = vmul.f32 %v1823_v31, %v944_v44  ;;  %v952_v30 = vld [vmem:[#allocation2 + $0x50] sm:$0xff]  ;;  %929 = vst.msk [vmem:[#allocation2 + $0x30] sm:$0xff] %vm22_vm0, %v913_v39  ;;  %v911_v41 = vadd.f32 %v861_v40, %v43_v37  ;;  %v872_v57 = vadd.f32 %v1378_v54, %v775_v42  ;;  %v1386_v50 = vpop.f32.mrf.mxu1 }
 0x131   :  { %v975_v52 = vmul.f32 %v1823_v31, %v952_v30  ;;  %v942_v58 = vld [vmem:[#allocation2] sm:$0xff]  ;;  %937 = vst.msk [vmem:[#allocation2 + $0x70] sm:$0xff] %vm22_vm0, %v921_v33  ;;  %v919_v34 = vadd.f32 %v893_v48, %v51_v45  ;;  %v904_v59 = vadd.f32 %v1386_v50, %v807_v55  ;;  %v863_v61 = vpop.f32.mrf.mxu0 }
 0x132   :  { %v990_v2 = vadd.f32 %v1831_v47, %v967_v56  ;;  %v965_v3 = vmul.f32 %v1823_v31, %v942_v58  ;;  %v950_v4 = vld [vmem:[#allocation2 + $0x40] sm:$0xff]  ;;  %927 = vst.msk [vmem:[#allocation2 + $0x20] sm:$0xff] %vm22_vm0, %v911_v41  ;;  %v914_v5 = vadd.f32 %v872_v57, %v46_v53  ;;  %v864_v6 = vadd.f32 %v863_v61, %v767_v51  ;;  %v895_v63 = vpop.f32.mrf.mxu1 }
 0x133   :  { %v998_v7 = vadd.f32 %v1831_v47, %v975_v52  ;;  %v973_v0 = vmul.f32 %v1823_v31, %v950_v4  ;;  %v945_v8 = vld [vmem:[#allocation2 + $0x18] sm:$0xff]  ;;  %935 = vst.msk [vmem:[#allocation2 + $0x60] sm:$0xff] %vm22_vm0, %v919_v34  ;;  %v922_v9 = vadd.f32 %v904_v59, %v54_v49  ;;  %v896_v10 = vadd.f32 %v895_v63, %v799_v1 }
 0x134   :  { %v1006_v11 = vmax.f32 %v990_v2, 0.0  ;;  %v988_v12 = vadd.f32 %v1831_v47, %v965_v3  ;;  %v968_v13 = vmul.f32 %v1823_v31, %v945_v8  ;;  %v953_v15 = vld [vmem:[#allocation2 + $0x58] sm:$0xff]  ;;  %930 = vst.msk [vmem:[#allocation2 + $0x38] sm:$0xff] %vm22_vm0, %v914_v5  ;;  %v912_v16 = vadd.f32 %v864_v6, %v44_v60 }
 0x135   :  { %v1014_v18 = vmax.f32 %v998_v7, 0.0  ;;  %v996_v19 = vadd.f32 %v1831_v47, %v973_v0  ;;  %v976_v20 = vmul.f32 %v1823_v31, %v953_v15  ;;  %v943_v21 = vld [vmem:[#allocation2 + $0x8] sm:$0xff]  ;;  %938 = vst.msk [vmem:[#allocation2 + $0x78] sm:$0xff] %vm22_vm0, %v922_v9  ;;  %v920_v22 = vadd.f32 %v896_v10, %v52_v25 }
 0x136   :  { %v1209_v23 = vpack.c.bf16 %v1006_v11, %v1006_v11  ;;  %v1004_v24 = vmax.f32 %v988_v12, 0.0  ;;  %v991_v17 = vadd.f32 %v1831_v47, %v968_v13  ;;  %v966_v26 = vmul.f32 %v1823_v31, %v943_v21  ;;  %v951_v27 = vld [vmem:[#allocation2 + $0x48] sm:$0xff]  ;;  %928 = vst.msk [vmem:[#allocation2 + $0x28] sm:$0xff] %vm22_vm0, %v912_v16 }
 0x137   :  { %v1217_v28 = vpack.c.bf16 %v1014_v18, %v1014_v18  ;;  %v1012_v29 = vmax.f32 %v996_v19, 0.0  ;;  %v999_v35 = vadd.f32 %v1831_v47, %v976_v20  ;;  %v974_v43 = vmul.f32 %v1823_v31, %v951_v27  ;;  %v948_v62 = vld [vmem:[#allocation2 + $0x30] sm:$0xff]  ;;  %936 = vst.msk [vmem:[#allocation2 + $0x68] sm:$0xff] %vm22_vm0, %v920_v22 }
 0x138   :  { %1087 = vst.msk [vmem:[%s1943_s4 + $0x8] sm:$0xf] %vm1084_vm1, %v1209_v23  ;;  %v1207_v14 = vpack.c.bf16 %v1004_v24, %v1004_v24  ;;  %v1007_v32 = vmax.f32 %v991_v17, 0.0  ;;  %v989_v36 = vadd.f32 %v1831_v47, %v966_v26  ;;  %v971_v37 = vmul.f32 %v1823_v31, %v948_v62  ;;  %v956_v38 = vld [vmem:[#allocation2 + $0x70] sm:$0xff] }
 0x139   :  { %1095 = vst.msk [vmem:[%s1943_s4 + $0x28] sm:$0xf] %vm1084_vm1, %v1217_v28  ;;  %v1215_v39 = vpack.c.bf16 %v1012_v29, %v1012_v29  ;;  %v1015_v40 = vmax.f32 %v999_v35, 0.0  ;;  %v997_v45 = vadd.f32 %v1831_v47, %v974_v43  ;;  %v979_v46 = vmul.f32 %v1823_v31, %v956_v38  ;;  %v946_v42 = vld [vmem:[#allocation2 + $0x20] sm:$0xff] }
 0x13a   :  { %1085 = vst.msk [vmem:[%s1943_s4] sm:$0xf] %vm1084_vm1, %v1207_v14  ;;  %v1210_v44 = vpack.c.bf16 %v1007_v32, %v1007_v32  ;;  %v1005_v33 = vmax.f32 %v989_v36, 0.0  ;;  %v994_v48 = vadd.f32 %v1831_v47, %v971_v37  ;;  %v969_v53 = vmul.f32 %v1823_v31, %v946_v42  ;;  %v954_v54 = vld [vmem:[#allocation2 + $0x60] sm:$0xff] }
 0x13b   :  { %1093 = vst.msk [vmem:[%s1943_s4 + $0x20] sm:$0xf] %vm1084_vm1, %v1215_v39  ;;  %v1218_v55 = vpack.c.bf16 %v1015_v40, %v1015_v40  ;;  %v1013_v56 = vmax.f32 %v997_v45, 0.0  ;;  %v1002_v30 = vadd.f32 %v1831_v47, %v979_v46  ;;  %v977_v41 = vmul.f32 %v1823_v31, %v954_v54  ;;  %v949_v57 = vld [vmem:[#allocation2 + $0x38] sm:$0xff] }
 0x13c   :  { %1088 = vst.msk [vmem:[%s1943_s4 + $0xc] sm:$0xf] %vm1084_vm1, %v1210_v44  ;;  %v1208_v49 = vpack.c.bf16 %v1005_v33, %v1005_v33  ;;  %v1010_v50 = vmax.f32 %v994_v48, 0.0  ;;  %v992_v51 = vadd.f32 %v1831_v47, %v969_v53  ;;  %v972_v52 = vmul.f32 %v1823_v31, %v949_v57  ;;  %v957_v58 = vld [vmem:[#allocation2 + $0x78] sm:$0xff] }
 0x13d   :  { %1096 = vst.msk [vmem:[%s1943_s4 + $0x2c] sm:$0xf] %vm1084_vm1, %v1218_v55  ;;  %v1216_v34 = vpack.c.bf16 %v1013_v56, %v1013_v56  ;;  %v1018_v59 = vmax.f32 %v1002_v30, 0.0  ;;  %v1000_v60 = vadd.f32 %v1831_v47, %v977_v41  ;;  %v980_v61 = vmul.f32 %v1823_v31, %v957_v58  ;;  %v947_v1 = vld [vmem:[#allocation2 + $0x28] sm:$0xff] }
 0x13e   :  { %1086 = vst.msk [vmem:[%s1943_s4 + $0x4] sm:$0xf] %vm1084_vm1, %v1208_v49  ;;  %v1213_v2 = vpack.c.bf16 %v1010_v50, %v1010_v50  ;;  %v1008_v3 = vmax.f32 %v992_v51, 0.0  ;;  %v995_v4 = vadd.f32 %v1831_v47, %v972_v52  ;;  %v970_v5 = vmul.f32 %v1823_v31, %v947_v1  ;;  %v955_v6 = vld [vmem:[#allocation2 + $0x68] sm:$0xff] }
 0x13f   :  { %1094 = vst.msk [vmem:[%s1943_s4 + $0x24] sm:$0xf] %vm1084_vm1, %v1216_v34  ;;  %v1221_v25 = vpack.c.bf16 %v1018_v59, %v1018_v59  ;;  %v1016_v63 = vmax.f32 %v1000_v60, 0.0  ;;  %v1003_v7 = vadd.f32 %v1831_v47, %v980_v61  ;;  %v978_v0 = vmul.f32 %v1823_v31, %v955_v6 }
 0x140   :  { %1091 = vst.msk [vmem:[%s1943_s4 + $0x18] sm:$0xf] %vm1084_vm1, %v1213_v2  ;;  %v1211_v8 = vpack.c.bf16 %v1008_v3, %v1008_v3  ;;  %v1011_v9 = vmax.f32 %v995_v4, 0.0  ;;  %v993_v10 = vadd.f32 %v1831_v47, %v970_v5 }
 0x141   :  { %1099 = vst.msk [vmem:[%s1943_s4 + $0x38] sm:$0xf] %vm1084_vm1, %v1221_v25  ;;  %v1219_v11 = vpack.c.bf16 %v1016_v63, %v1016_v63  ;;  %v1019_v12 = vmax.f32 %v1003_v7, 0.0  ;;  %v1001_v13 = vadd.f32 %v1831_v47, %v978_v0 }
 0x142   :  { %1089 = vst.msk [vmem:[%s1943_s4 + $0x10] sm:$0xf] %vm1084_vm1, %v1211_v8  ;;  %v1214_v31 = vpack.c.bf16 %v1011_v9, %v1011_v9  ;;  %v1009_v15 = vmax.f32 %v993_v10, 0.0 }
 0x143   :  { %1097 = vst.msk [vmem:[%s1943_s4 + $0x30] sm:$0xf] %vm1084_vm1, %v1219_v11  ;;  %v1222_v16 = vpack.c.bf16 %v1019_v12, %v1019_v12  ;;  %v1017_v18 = vmax.f32 %v1001_v13, 0.0 }
 0x144   :  { %1092 = vst.msk [vmem:[%s1943_s4 + $0x1c] sm:$0xf] %vm1084_vm1, %v1214_v31  ;;  %v1212_v47 = vpack.c.bf16 %v1009_v15, %v1009_v15 }
 0x145   :  { %1100 = vst.msk [vmem:[%s1943_s4 + $0x3c] sm:$0xf] %vm1084_vm1, %v1222_v16  ;;  %v1220_v19 = vpack.c.bf16 %v1017_v18, %v1017_v18 }
 0x146   :  { %1090 = vst.msk [vmem:[%s1943_s4 + $0x14] sm:$0xf] %vm1084_vm1, %v1212_v47 }
 0x147   :  { %1098 = vst.msk [vmem:[%s1943_s4 + $0x34] sm:$0xf] %vm1084_vm1, %v1220_v19 }

// kernel: forward.25
= control target key start
LH: loop header
LB: loop body
LE: loop exit
PB: predicated region body
PF: predicated region fallthrough
CT: control target
= control target key end

     0   :  { %vm19_vm0 = vcmask 523264   ;;  %vm1067_vm1 = vcmask 519168   ;;  %s2036_s1 = inlined_call_operand.vmem [shape: bf16[576,64], index: 1, kind: input, shape index: {}]   ;;  %s2037_s0 = inlined_call_operand.vmem [shape: bf16[128,576], index: 0, kind: input, shape index: {}]   ;;  %s2038_s2 = inlined_call_operand.vmem [shape: bf16[128,64], index: 2, kind: input, shape index: {}]   ;;  %s2039_s3 = inlined_call_operand.vmem [shape: bf16[128,64], index: 3, kind: output, shape index: {}]  }
   0x1   :  { %v1416_v0 = vld [vmem:[%s2036_s1 + $0x78] sm:$0xff]   ;;  %v1420_v4 = vld [vmem:[%s2036_s1 + $0x70] sm:$0xff]   ;;  %v1424_v8 = vld [vmem:[%s2036_s1 + $0x68] sm:$0xff]  }
   0x2   :  { %v1417_v1 = vld [vmem:[%s2036_s1 + $0xf8] sm:$0xff]   ;;  %1243 = vmatprep.subr.bf16.mxu0 %v1416_v0  ;;  %v1421_v5 = vld [vmem:[%s2036_s1 + $0xf0] sm:$0xff]   ;;  %v1425_v9 = vld [vmem:[%s2036_s1 + $0xe8] sm:$0xff]  }
   0x3   :  { %v1418_v2 = vld [vmem:[%s2036_s1 + $0x38] sm:$0xff]   ;;  %1307 = vmatprep.subr.bf16.mxu1 %v1417_v1  ;;  %v1422_v6 = vld [vmem:[%s2036_s1 + $0x30] sm:$0xff]   ;;  %v1426_v10 = vld [vmem:[%s2036_s1 + $0x28] sm:$0xff]  }
   0x4   :  { %v1419_v3 = vld [vmem:[%s2036_s1 + $0xb8] sm:$0xff]   ;;  %1244 = vmatpush3.bf16.msra.mxu0 %v1418_v2  ;;  %v1423_v7 = vld [vmem:[%s2036_s1 + $0xb0] sm:$0xff]   ;;  %v1427_v11 = vld [vmem:[%s2036_s1 + $0xa8] sm:$0xff]  }
   0x5   :  { %1308 = vmatpush3.bf16.msra.mxu1 %v1419_v3  ;;  %1245 = vmatprep.subr.bf16.mxu0 %v1420_v4  ;;  %v1428_v12 = vld [vmem:[%s2036_s1 + $0x60] sm:$0xff]   ;;  %v1432_v16 = vld [vmem:[%s2036_s1 + $0x58] sm:$0xff]   ;;  %v1436_v20 = vld [vmem:[%s2036_s1 + $0x50] sm:$0xff]  }
   0x6   :  { %1309 = vmatprep.subr.bf16.mxu1 %v1421_v5  ;;  %v1429_v13 = vld [vmem:[%s2036_s1 + $0xe0] sm:$0xff]   ;;  %v1433_v17 = vld [vmem:[%s2036_s1 + $0xd8] sm:$0xff]   ;;  %v1437_v21 = vld [vmem:[%s2036_s1 + $0xd0] sm:$0xff]  }
   0x7   :  { %v1430_v14 = vld [vmem:[%s2036_s1 + $0x20] sm:$0xff]   ;;  %v1434_v18 = vld [vmem:[%s2036_s1 + $0x18] sm:$0xff]   ;;  %v1438_v22 = vld [vmem:[%s2036_s1 + $0x10] sm:$0xff]  }
   0x8   :  { %1246 = vmatpush3.bf16.msra.mxu0 %v1422_v6  ;;  %v1431_v15 = vld [vmem:[%s2036_s1 + $0xa0] sm:$0xff]   ;;  %v1435_v19 = vld [vmem:[%s2036_s1 + $0x98] sm:$0xff]   ;;  %v1439_v23 = vld [vmem:[%s2036_s1 + $0x90] sm:$0xff]  }
   0x9   :  { %1310 = vmatpush3.bf16.msra.mxu1 %v1423_v7  ;;  %1247 = vmatprep.subr.bf16.mxu0 %v1424_v8  ;;  %v1440_v24 = vld [vmem:[%s2036_s1 + $0x48] sm:$0xff]   ;;  %v1444_v28 = vld [vmem:[%s2036_s1 + $0x40] sm:$0xff]   ;;  %v1454_v36 = vld [vmem:[%s2036_s1 + $0x118] sm:$0xff]  }
   0xa   :  { %1311 = vmatprep.subr.bf16.mxu1 %v1425_v9  ;;  %v1441_v25 = vld [vmem:[%s2036_s1 + $0xc8] sm:$0xff]   ;;  %v1445_v29 = vld [vmem:[%s2036_s1 + $0xc0] sm:$0xff]   ;;  %v1467_v42 = vld [vmem:[%s2036_s1 + $0x110] sm:$0xff]  }
   0xb   :  { %v1442_v26 = vld [vmem:[%s2036_s1 + $0x8] sm:$0xff]   ;;  %v1446_v30 = vld [vmem:[%s2036_s1] sm:$0xff]   ;;  %v1463_v43 = vld [vmem:[%s2037_s0 + $0x5c] ss:$20 sps:$4 sm:$0xff]  }
   0xc   :  { %1248 = vmatpush3.bf16.msra.mxu0 %v1426_v10  ;;  %v1443_v27 = vld [vmem:[%s2036_s1 + $0x88] sm:$0xff]   ;;  %v1447_v31 = vld [vmem:[%s2036_s1 + $0x80] sm:$0xff]   ;;  %v1468_v47 = vld [vmem:[%s2037_s0 + $0x7c] ss:$20 sps:$4 sm:$0xff]  }
   0xd   :  { %1312 = vmatpush3.bf16.msra.mxu1 %v1427_v11  ;;  %1249 = vmatprep.subr.bf16.mxu0 %v1428_v12  ;;  %v1448_v32 = vld [vmem:[%s2037_s0] ss:$20 sps:$4 sm:$0xff]   ;;  %v1450_v33 = vld [vmem:[%s2037_s0 + $0x4] ss:$20 sps:$4 sm:$0xff]   ;;  %v1451_v34 = vld [vmem:[%s2037_s0 + $0x8] ss:$20 sps:$4 sm:$0xff]  }
   0xe   :  { %1313 = vmatprep.subr.bf16.mxu1 %v1429_v13  ;;  %v1453_v35 = vld [vmem:[%s2037_s0 + $0xc] ss:$20 sps:$4 sm:$0xff]   ;;  %645 = vmatprep.mubr.bf16.mxu0 %v1450_v33  ;;  %v1457_v38 = vld [vmem:[%s2037_s0 + $0x34] ss:$20 sps:$4 sm:$0xff]   ;;  %v1460_v40 = vld [vmem:[%s2037_s0 + $0x30] ss:$20 sps:$4 sm:$0xff]  }
   0xf   :  { %742 = vmatprep.mubr.bf16.mxu1 %v1453_v35  ;;  %v1455_v37 = vld [vmem:[%s2037_s0 + $0x2c] ss:$20 sps:$4 sm:$0xff]   ;;  %v1459_v39 = vld [vmem:[%s2037_s0 + $0x28] ss:$20 sps:$4 sm:$0xff]   ;;  %v1465_v44 = vld [vmem:[%s2037_s0 + $0x50] ss:$20 sps:$4 sm:$0xff]  }
  0x10   :  { %1250 = vmatpush3.bf16.msra.mxu0 %v1430_v14  ;;  %v1461_v41 = vld [vmem:[%s2037_s0 + $0x54] ss:$20 sps:$4 sm:$0xff]   ;;  %v1466_v45 = vld [vmem:[%s2037_s0 + $0x58] ss:$20 sps:$4 sm:$0xff]   ;;  %v1493_v49 = vld [vmem:[%s2036_s1 + $0x100] sm:$0xff]   ;;  %v1508_v12 = vmov 0.0  }
  0x11   :  { %1314 = vmatpush3.bf16.msra.mxu1 %v1431_v15  ;;  %1251 = vmatprep.subr.bf16.mxu0 %v1432_v16  ;;  %v1480_v46 = vld [vmem:[%s2036_s1 + $0x108] sm:$0xff]   ;;  %v1470_v48 = vld [vmem:[%s2037_s0 + $0x84] ss:$20 sps:$4 sm:$0xff]   ;;  %v1473_v51 = vld [vmem:[%s2037_s0 + $0x80] ss:$20 sps:$4 sm:$0xff]   ;;  %22 = vst.msk [vmem:[#allocation2 + $0x10] sm:$0xff] %vm19_vm0, %v1508_v12 }
  0x12   :  { %1315 = vmatprep.subr.bf16.mxu1 %v1433_v17  ;;  %v1472_v50 = vld [vmem:[%s2037_s0 + $0x78] ss:$20 sps:$4 sm:$0xff]   ;;  %v1478_v54 = vld [vmem:[%s2037_s0 + $0xa0] ss:$20 sps:$4 sm:$0xff]   ;;  %v1479_v55 = vld [vmem:[%s2037_s0 + $0xa8] ss:$20 sps:$4 sm:$0xff]  }
  0x13   :  { %v1474_v52 = vld [vmem:[%s2037_s0 + $0xa4] ss:$20 sps:$4 sm:$0xff]   ;;  %v1476_v53 = vld [vmem:[%s2037_s0 + $0xac] ss:$20 sps:$4 sm:$0xff]   ;;  %v1483_v57 = vld [vmem:[%s2037_s0 + $0xd4] ss:$20 sps:$4 sm:$0xff]  }
  0x14   :  { %1252 = vmatpush3.bf16.msra.mxu0 %v1434_v18  ;;  %v1481_v56 = vld [vmem:[%s2037_s0 + $0xcc] ss:$20 sps:$4 sm:$0xff]   ;;  %v1485_v58 = vld [vmem:[%s2037_s0 + $0xc8] ss:$20 sps:$4 sm:$0xff]   ;;  %v1486_v59 = vld [vmem:[%s2037_s0 + $0xd0] ss:$20 sps:$4 sm:$0xff]  }
  0x15   :  { %1316 = vmatpush3.bf16.msra.mxu1 %v1435_v19  ;;  %1253 = vmatprep.subr.bf16.mxu0 %v1436_v20  ;;  %v1487_v60 = vld [vmem:[%s2037_s0 + $0xf4] ss:$20 sps:$4 sm:$0xff]   ;;  %v1489_v61 = vld [vmem:[%s2037_s0 + $0xfc] ss:$20 sps:$4 sm:$0xff]   ;;  %v1492_v63 = vld [vmem:[%s2037_s0 + $0xf8] ss:$20 sps:$4 sm:$0xff]  }
  0x16   :  { %1317 = vmatprep.subr.bf16.mxu1 %v1437_v21  ;;  %v1491_v62 = vld [vmem:[%s2037_s0 + $0xf0] ss:$20 sps:$4 sm:$0xff]   ;;  %v1498_v2 = vld [vmem:[%s2037_s0 + $0x118] ss:$20 sps:$4 sm:$0xff]   ;;  %v1499_v3 = vld [vmem:[%s2037_s0 + $0x120] ss:$20 sps:$4 sm:$0xff]  }
  0x17   :  { %v1494_v0 = vld [vmem:[%s2037_s0 + $0x11c] ss:$20 sps:$4 sm:$0xff]   ;;  %v1496_v1 = vld [vmem:[%s2037_s0 + $0x124] ss:$20 sps:$4 sm:$0xff]   ;;  %v1504_v8 = vld [vmem:[%s2037_s0 + $0x60] ss:$20 sps:$4 sm:$0xff]  }
  0x18   :  { %1254 = vmatpush3.bf16.msra.mxu0 %v1438_v22  ;;  %v1500_v4 = vld [vmem:[%s2037_s0 + $0x10] ss:$20 sps:$4 sm:$0xff]   ;;  %v1502_v6 = vld [vmem:[%s2037_s0 + $0x38] ss:$20 sps:$4 sm:$0xff]   ;;  %v1505_v9 = vld [vmem:[%s2037_s0 + $0x100] ss:$20 sps:$4 sm:$0xff]  }
  0x19   :  { %1318 = vmatpush3.bf16.msra.mxu1 %v1439_v23  ;;  %1255 = vmatprep.subr.bf16.mxu0 %v1440_v24  ;;  %v1501_v5 = vld [vmem:[%s2037_s0 + $0xb0] ss:$20 sps:$4 sm:$0xff]   ;;  %v1503_v7 = vld [vmem:[%s2037_s0 + $0xd8] ss:$20 sps:$4 sm:$0xff]   ;;  %v1506_v10 = vld [vmem:[%s2037_s0 + $0x88] ss:$20 sps:$4 sm:$0xff]  }
  0x1a   :  { %1319 = vmatprep.subr.bf16.mxu1 %v1441_v25  ;;  %v1507_v11 = vld [vmem:[%s2037_s0 + $0x128] ss:$20 sps:$4 sm:$0xff]   ;;  %20 = vst.msk [vmem:[#allocation2] sm:$0xff] %vm19_vm0, %v1508_v12  ;;  %21 = vst.msk [vmem:[#allocation2 + $0x8] sm:$0xff] %vm19_vm0, %v1508_v12 }
  0x1b   :  { %23 = vst.msk [vmem:[#allocation2 + $0x18] sm:$0xff] %vm19_vm0, %v1508_v12  ;;  %24 = vst.msk [vmem:[#allocation2 + $0x20] sm:$0xff] %vm19_vm0, %v1508_v12 }
  0x1c   :  { %1256 = vmatpush3.bf16.msra.mxu0 %v1442_v26  ;;  %25 = vst.msk [vmem:[#allocation2 + $0x28] sm:$0xff] %vm19_vm0, %v1508_v12  ;;  %26 = vst.msk [vmem:[#allocation2 + $0x30] sm:$0xff] %vm19_vm0, %v1508_v12 }
  0x1d   :  { %1320 = vmatpush3.bf16.msra.mxu1 %v1443_v27  ;;  %1257 = vmatprep.subr.bf16.mxu0 %v1444_v28  ;;  %27 = vst.msk [vmem:[#allocation2 + $0x38] sm:$0xff] %vm19_vm0, %v1508_v12  ;;  %28 = vst.msk [vmem:[#allocation2 + $0x40] sm:$0xff] %vm19_vm0, %v1508_v12 }
  0x1e   :  { %1321 = vmatprep.subr.bf16.mxu1 %v1445_v29  ;;  %29 = vst.msk [vmem:[#allocation2 + $0x48] sm:$0xff] %vm19_vm0, %v1508_v12  ;;  %30 = vst.msk [vmem:[#allocation2 + $0x50] sm:$0xff] %vm19_vm0, %v1508_v12 }
  0x1f   :  { %31 = vst.msk [vmem:[#allocation2 + $0x58] sm:$0xff] %vm19_vm0, %v1508_v12  ;;  %32 = vst.msk [vmem:[#allocation2 + $0x60] sm:$0xff] %vm19_vm0, %v1508_v12 }
  0x20   :  { %1258 = vmatpush3.bf16.msra.mxu0 %v1446_v30  ;;  %33 = vst.msk [vmem:[#allocation2 + $0x68] sm:$0xff] %vm19_vm0, %v1508_v12  ;;  %34 = vst.msk [vmem:[#allocation2 + $0x70] sm:$0xff] %vm19_vm0, %v1508_v12 }
  0x21   :  { %1322 = vmatpush3.bf16.msra.mxu1 %v1447_v31  ;;  %1383 = vmatprep.subr.bf16.mxu0 %v1454_v36  ;;  %35 = vst.msk [vmem:[#allocation2 + $0x78] sm:$0xff] %vm19_vm0, %v1508_v12 }
  0x22   :  { %1407 = vmatprep.subr.bf16.mxu1 %v1454_v36 }
  0x23   :  { %646 = vmatmul.mubr.bf16.vlgmr.msra.gmra.mxu0 %v1448_v32 }
  0x24   :  { %743 = vmatmul.mubr.bf16.vlgmr.msra.gmra.mxu1 %v1451_v34  ;;  %1384 = vmatpush3.bf16.msra.mxu0 %v1454_v36 }
  0x25   :  { %1411 = vmatpush3.bf16.msra.mxu1 %v1454_v36  ;;  %653 = vmatprep.mubr.bf16.mxu0 %v1455_v37 }
  0x26   :  { %750 = vmatprep.mubr.bf16.mxu1 %v1457_v38  ;;  %1385 = vmatprep.subr.bf16.mxu0 %v1467_v42 }
  0x27   :  { %1408 = vmatprep.subr.bf16.mxu1 %v1467_v42 }
  0x28   :  { %1386 = vmatpush3.bf16.msra.mxu0 %v1467_v42 }
  0x29   :  { %1412 = vmatpush3.bf16.msra.mxu1 %v1467_v42  ;;  %1387 = vmatprep.subr.bf16.mxu0 %v1480_v46 }
  0x2a   :  { %1409 = vmatprep.subr.bf16.mxu1 %v1480_v46 }
  0x2b   :  { %654 = vmatmul.mubr.bf16.gmra.mxu0 %v1459_v39 }
  0x2c   :  { %751 = vmatmul.mubr.bf16.gmra.mxu1 %v1460_v40  ;;  %661 = vmatprep.mubr.bf16.mxu0 %v1461_v41 }
  0x2d   :  { %758 = vmatprep.mubr.bf16.mxu1 %v1463_v43  ;;  %1388 = vmatpush3.bf16.msra.mxu0 %v1480_v46 }
  0x2e   :  { %1413 = vmatpush3.bf16.msra.mxu1 %v1480_v46  ;;  %1389 = vmatprep.subr.bf16.mxu0 %v1493_v49 }
  0x2f   :  { %1410 = vmatprep.subr.bf16.mxu1 %v1493_v49 }
  0x31   :  { %1390 = vmatpush3.bf16.msra.mxu0 %v1493_v49 }
  0x32   :  { %1414 = vmatpush3.bf16.msra.mxu1 %v1493_v49 }
  0x33   :  { %662 = vmatmul.mubr.bf16.gmra.mxu0 %v1465_v44 }
  0x34   :  { %759 = vmatmul.mubr.bf16.gmra.mxu1 %v1466_v45  ;;  %669 = vmatprep.mubr.bf16.mxu0 %v1468_v47 }
  0x35   :  { %766 = vmatprep.mubr.bf16.mxu1 %v1470_v48 }
  0x3b   :  { %670 = vmatmul.mubr.bf16.gmra.mxu0 %v1472_v50 }
  0x3c   :  { %767 = vmatmul.mubr.bf16.gmra.mxu1 %v1473_v51  ;;  %677 = vmatprep.mubr.bf16.mxu0 %v1474_v52 }
  0x3d   :  { %774 = vmatprep.mubr.bf16.mxu1 %v1476_v53 }
  0x43   :  { %678 = vmatmul.mubr.bf16.gmra.mxu0 %v1478_v54 }
  0x44   :  { %775 = vmatmul.mubr.bf16.gmra.mxu1 %v1479_v55  ;;  %685 = vmatprep.mubr.bf16.mxu0 %v1481_v56 }
  0x45   :  { %782 = vmatprep.mubr.bf16.mxu1 %v1483_v57 }
  0x4b   :  { %686 = vmatmul.mubr.bf16.gmra.mxu0 %v1485_v58 }
  0x4c   :  { %783 = vmatmul.mubr.bf16.gmra.mxu1 %v1486_v59  ;;  %693 = vmatprep.mubr.bf16.mxu0 %v1487_v60 }
  0x4d   :  { %790 = vmatprep.mubr.bf16.mxu1 %v1489_v61 }
  0x53   :  { %694 = vmatmul.mubr.bf16.gmra.mxu0 %v1491_v62 }
  0x54   :  { %791 = vmatmul.mubr.bf16.gmra.mxu1 %v1492_v63  ;;  %701 = vmatprep.mubr.bf16.mxu0 %v1494_v0 }
  0x55   :  { %798 = vmatprep.mubr.bf16.mxu1 %v1496_v1 }
  0x5b   :  { %702 = vmatmul.mubr.bf16.gmra.mxu0 %v1498_v2 }
  0x5c   :  { %799 = vmatmul.mubr.bf16.gmra.mxu1 %v1499_v3  ;;  %1391 = vmatprep.mubr.msk.bf16.mxu0 %vm19_vm0, %v1500_v4 }
  0x5d   :  { %1399 = vmatprep.mubr.msk.bf16.mxu1 %vm19_vm0, %v1501_v5  ;;  %v1850_v5 = vld [vmem:[%s2038_s2 + $0x8] sm:$0xff]  }
  0x63   :  { %1392 = vmatmul.mubr.msk.bf16.vlgmr.msra.gmra.mxu0 %vm19_vm0, %v1502_v6  ;;  %v1855_v6 = vld [vmem:[%s2038_s2 + $0x28] sm:$0xff]  }
  0x64   :  { %1400 = vmatmul.mubr.msk.bf16.vlgmr.msra.gmra.mxu1 %vm19_vm0, %v1503_v7  ;;  %1395 = vmatprep.mubr.msk.bf16.mxu0 %vm19_vm0, %v1504_v8 }
  0x65   :  { %1403 = vmatprep.mubr.msk.bf16.mxu1 %vm19_vm0, %v1505_v9  ;;  %v1860_v9 = vld [vmem:[%s2038_s2] sm:$0xff]  }
  0x6b   :  { %1396 = vmatmul.mubr.msk.bf16.gmra.mxu0 %vm19_vm0, %v1506_v10  ;;  %v1865_v10 = vld [vmem:[%s2038_s2 + $0x20] sm:$0xff]  }
  0x6c   :  { %1404 = vmatmul.mubr.msk.bf16.gmra.mxu1 %vm19_vm0, %v1507_v11 }
  0xe3   :  { %v1781_v13 = vpop.f32.mrf.mxu0 }
  0xe4   :  { %v1783_v14 = vpop.f32.mrf.mxu1 }
  0xe5   :  { %v1260_v15 = vpop.f32.mrf.mxu0 }
  0xe6   :  { %v1324_v16 = vpop.f32.mrf.mxu1  ;;  %v1261_v11 = vadd.f32 %v1260_v15, %v1781_v13  ;;  %v1206_v13 = vunpack.c.l.bf16 %v1860_v9 }
  0xe7   :  { %v1785_v17 = vpop.f32.mrf.mxu0  ;;  %v1325_v12 = vadd.f32 %v1324_v16, %v1783_v14  ;;  %v1222_v14 = vunpack.c.l.bf16 %v1865_v10 }
  0xe8   :  { %v1787_v18 = vpop.f32.mrf.mxu1 }
  0xe9   :  { %v1263_v19 = vpop.f32.mrf.mxu0 }
  0xea   :  { %v1327_v20 = vpop.f32.mrf.mxu1 }
  0xeb   :  { %v1265_v21 = vpop.f32.mrf.mxu0 }
  0xec   :  { %v1329_v22 = vpop.f32.mrf.mxu1 }
  0xed   :  { %v1266_v23 = vpop.f32.mrf.mxu0 }
  0xee   :  { %v1330_v24 = vpop.f32.mrf.mxu1 }
  0xef   :  { %v1789_v25 = vpop.f32.mrf.mxu0 }
  0xf0   :  { %v1791_v26 = vpop.f32.mrf.mxu1 }
  0xf1   :  { %v1793_v27 = vpop.f32.mrf.mxu0 }
  0xf2   :  { %v1795_v28 = vpop.f32.mrf.mxu1  ;;  %v1270_v15 = vadd.f32 %v1793_v27, %v1789_v25  ;;  %v745_v27 = vadd.f32 %v1325_v12, %v1261_v11 }
  0xf3   :  { %v1797_v29 = vpop.f32.mrf.mxu0  ;;  %v1334_v16 = vadd.f32 %v1795_v28, %v1791_v26 }
  0xf4   :  { %v1799_v30 = vpop.f32.mrf.mxu1 }
  0xf5   :  { %v1272_v31 = vpop.f32.mrf.mxu0 }
  0xf6   :  { %v1336_v32 = vpop.f32.mrf.mxu1 }
  0xf7   :  { %v1801_v33 = vpop.f32.mrf.mxu0 }
  0xf8   :  { %v1803_v34 = vpop.f32.mrf.mxu1 }
  0xf9   :  { %2040 = vst [vmem:[#allocation3_spill] sm:$0xff] %v1803_v34  ;;  %v1805_v35 = vpop.f32.mrf.mxu0  ;;  %v1267_v34 = vadd.f32 %v1266_v23, %v1265_v21  ;;  %v1211_v23 = vunpack.c.h.bf16 %v1850_v5 }
  0xfa   :  { %v1807_v36 = vpop.f32.mrf.mxu1 }
  0xfb   :  { %2041 = vst [vmem:[#allocation4_spill] sm:$0xff] %v1807_v36  ;;  %v1809_v37 = vpop.f32.mrf.mxu0  ;;  %v1328_v36 = vadd.f32 %v1327_v20, %v1787_v18  ;;  %v1337_v18 = vadd.f32 %v1336_v32, %v1799_v30  ;;  %v38_v30 = vld [vmem:[#allocation2 + $0x10] sm:$0xff] }
  0xfc   :  { %v1811_v38 = vpop.f32.mrf.mxu1 }
  0xfd   :  { %v1278_v39 = vpop.f32.mrf.mxu0 }
  0xfe   :  { %v1813_v40 = vpop.f32.mrf.mxu1 }
  0xff   :  { %v1815_v41 = vpop.f32.mrf.mxu0  ;;  %v1343_v26 = vadd.f32 %v1813_v40, %v1811_v38  ;;  %v36_v40 = vld [vmem:[#allocation2] sm:$0xff] }
 0x100   :  { %2042 = vst [vmem:[#allocation5_spill] sm:$0xff] %v1815_v41  ;;  %v1817_v42 = vpop.f32.mrf.mxu1 }
 0x101   :  { %2043 = vst [vmem:[#allocation6_spill] sm:$0xff] %v1817_v42  ;;  %v1819_v43 = vpop.f32.mrf.mxu0 }
 0x102   :  { %2044 = vst [vmem:[#allocation7_spill] sm:$0xff] %v1819_v43  ;;  %v1821_v44 = vpop.f32.mrf.mxu1 }
 0x103   :  { %2045 = vst [vmem:[#allocation8_spill] sm:$0xff] %v1821_v44  ;;  %v1283_v45 = vpop.f32.mrf.mxu0  ;;  %v1331_v44 = vadd.f32 %v1330_v24, %v1329_v22  ;;  %v1227_v24 = vunpack.c.h.bf16 %v1855_v6 }
 0x104   :  { %v1347_v46 = vpop.f32.mrf.mxu1 }
 0x105   :  { %v1284_v47 = vpop.f32.mrf.mxu0  ;;  %v753_v25 = vadd.f32 %v1331_v44, %v1267_v34 }
 0x106   :  { %v1348_v48 = vpop.f32.mrf.mxu1  ;;  %v1285_v20 = vadd.f32 %v1284_v47, %v1283_v45  ;;  %v1892_v45 = vadd.f32 %v1805_v35, %v1801_v33  ;;  %v46_v47 = vld [vmem:[#allocation2 + $0x50] sm:$0xff] }
 0x107   :  { %v1823_v49 = vpop.f32.mrf.mxu0  ;;  %v1349_v21 = vadd.f32 %v1348_v48, %v1347_v46 }
 0x108   :  { %v1825_v50 = vpop.f32.mrf.mxu1 }
 0x109   :  { %v1827_v51 = vpop.f32.mrf.mxu0 }
 0x10a   :  { %v1829_v52 = vpop.f32.mrf.mxu1  ;;  %v1288_v34 = vadd.f32 %v1827_v51, %v1823_v49 }
 0x10b   :  { %v1289_v53 = vpop.f32.mrf.mxu0 }
 0x10c   :  { %v1353_v54 = vpop.f32.mrf.mxu1 }
 0x10d   :  { %v1290_v55 = vpop.f32.mrf.mxu0 }
 0x10e   :  { %v1354_v56 = vpop.f32.mrf.mxu1  ;;  %v1291_v43 = vadd.f32 %v1290_v55, %v1289_v53  ;;  %v1279_v53 = vadd.f32 %v1278_v39, %v1809_v37  ;;  %v756_v37 = vadd.f32 %v1334_v16, %v1270_v15  ;;  %v2053_v16 = vld [vmem:[#allocation7_spill] sm:$0xff] }
 0x10f   :  { %v1292_v57 = vpop.f32.mrf.mxu0  ;;  %v1355_v41 = vadd.f32 %v1354_v56, %v1353_v54 }
 0x110   :  { %v1356_v58 = vpop.f32.mrf.mxu1  ;;  %v769_v15 = vadd.f32 %v1343_v26, %v1279_v53 }
 0x111   :  { %v1293_v59 = vpop.f32.mrf.mxu0  ;;  %v785_v32 = vadd.f32 %v1355_v41, %v1291_v43  ;;  %v777_v41 = vadd.f32 %v1349_v21, %v1285_v20  ;;  %v37_v21 = vld [vmem:[#allocation2 + $0x8] sm:$0xff] }
 0x112   :  { %v1357_v60 = vpop.f32.mrf.mxu1  ;;  %v1294_v28 = vadd.f32 %v1293_v59, %v1292_v57  ;;  %v44_v57 = vld [vmem:[#allocation2 + $0x40] sm:$0xff] }
 0x113   :  { %v1831_v61 = vpop.f32.mrf.mxu0 }
 0x114   :  { %v1833_v62 = vpop.f32.mrf.mxu1 }
 0x115   :  { %v1835_v63 = vpop.f32.mrf.mxu0 }
 0x116   :  { %v1837_v0 = vpop.f32.mrf.mxu1  ;;  %v1297_v49 = vadd.f32 %v1835_v63, %v1831_v61  ;;  %v2054_v63 = vld [vmem:[#allocation6_spill] sm:$0xff] }
 0x117   :  { %2046 = vst [vmem:[#allocation9_spill] sm:$0xff] %v1837_v0  ;;  %v1839_v1 = vpop.f32.mrf.mxu0 }
 0x118   :  { %2047 = vst [vmem:[#allocation10_spill] sm:$0xff] %v1839_v1  ;;  %v1841_v2 = vpop.f32.mrf.mxu1  ;;  %v1264_v1 = vadd.f32 %v1263_v19, %v1785_v17  ;;  %v1273_v17 = vadd.f32 %v1272_v31, %v1797_v29  ;;  %v1358_v29 = vadd.f32 %v1357_v60, %v1356_v58 }
 0x119   :  { %2048 = vst [vmem:[#allocation11_spill] sm:$0xff] %v1841_v2  ;;  %v1843_v3 = vpop.f32.mrf.mxu0  ;;  %v1210_v2 = vunpack.c.l.bf16 %v1850_v5 }
 0x11a   :  { %2049 = vst [vmem:[#allocation12_spill] sm:$0xff] %v1843_v3  ;;  %v1845_v4 = vpop.f32.mrf.mxu1  ;;  %v1226_v3 = vunpack.c.l.bf16 %v1855_v6  ;;  %v748_v55 = vadd.f32 %v1328_v36, %v1264_v1  ;;  %v1894_v39 = vadd.f32 %v1337_v18, %v1273_v17  ;;  %v1352_v36 = vadd.f32 %v1829_v52, %v1825_v50  ;;  %v39_v1 = vld [vmem:[#allocation2 + $0x18] sm:$0xff] }
 0x11b   :  { %2050 = vst [vmem:[#allocation13_spill] sm:$0xff] %v1845_v4  ;;  %v1301_v7 = vpop.f32.mrf.mxu0  ;;  %v788_v12 = vadd.f32 %v1358_v29, %v1294_v28  ;;  %v45_v28 = vld [vmem:[#allocation2 + $0x48] sm:$0xff] }
 0x11c   :  { %v1365_v8 = vpop.f32.mrf.mxu1  ;;  %v780_v61 = vadd.f32 %v1352_v36, %v1288_v34  ;;  %v2056_v34 = vld [vmem:[#allocation3_spill] sm:$0xff]  ;;  %v2057_v36 = vld [vmem:[#allocation4_spill] sm:$0xff] }
 0x11d   :  { %v1302_v4 = vpop.f32.mrf.mxu0 }
 0x11e   :  { %v1366_v42 = vpop.f32.mrf.mxu1  ;;  %v1303_v43 = vadd.f32 %v1302_v4, %v1301_v7  ;;  %v2051_v50 = vld [vmem:[#allocation9_spill] sm:$0xff]  ;;  %v47_v4 = vld [vmem:[#allocation2 + $0x58] sm:$0xff] }
 0x11f   :  { %v1873_v0 = vpop.f32.mrf.mxu0  ;;  %v1367_v56 = vadd.f32 %v1366_v42, %v1365_v8  ;;  %v1361_v51 = vadd.f32 %v2051_v50, %v1833_v62  ;;  %v2052_v8 = vld [vmem:[#allocation5_spill] sm:$0xff] }
 0x120   :  { %v1883_v19 = vpop.f32.mrf.mxu1  ;;  %v1282_v17 = vadd.f32 %v2053_v16, %v2052_v8 }
 0x121   :  { %v1305_v22 = vpop.f32.mrf.mxu0 }
 0x122   :  { %v1369_v54 = vpop.f32.mrf.mxu1 }
 0x123   :  { %v1393_v31 = vpop.f32.mrf.mxu0 }
 0x124   :  { %v850_v46 = vadd.f32 %v1393_v31, %v753_v25  ;;  %v1401_v48 = vpop.f32.mrf.mxu1  ;;  %v2055_v25 = vld [vmem:[#allocation8_spill] sm:$0xff]  ;;  %v1306_v31 = vadd.f32 %v1305_v22, %v1873_v0 }
 0x125   :  { %v882_v38 = vadd.f32 %v1401_v48, %v785_v32  ;;  %v841_v44 = vpop.f32.mrf.mxu0  ;;  %v1346_v62 = vadd.f32 %v2055_v25, %v2054_v63  ;;  %v1370_v32 = vadd.f32 %v1369_v54, %v1883_v19  ;;  %v42_v48 = vld [vmem:[#allocation2 + $0x30] sm:$0xff]  ;;  %v2059_v0 = vld [vmem:[#allocation12_spill] sm:$0xff]  ;;  %v2060_v19 = vld [vmem:[#allocation11_spill] sm:$0xff] }
 0x126   :  { %v906_v33 = vadd.f32 %v850_v46, %v38_v30  ;;  %v842_v35 = vadd.f32 %v841_v44, %v745_v27  ;;  %v873_v58 = vpop.f32.mrf.mxu1  ;;  %v801_v30 = vadd.f32 %v1367_v56, %v1303_v43  ;;  %v50_v44 = vld [vmem:[#allocation2 + $0x70] sm:$0xff]  ;;  %v793_v43 = vadd.f32 %v1361_v51, %v1297_v49  ;;  %v2058_v56 = vld [vmem:[#allocation10_spill] sm:$0xff] }
 0x127   :  { %v914_v59 = vadd.f32 %v882_v38, %v46_v47  ;;  %v874_v60 = vadd.f32 %v873_v58, %v777_v41  ;;  %v1394_v11 = vpop.f32.mrf.mxu0  ;;  %v1340_v38 = vadd.f32 %v2057_v36, %v2056_v34  ;;  %v1300_v22 = vadd.f32 %v2059_v0, %v2058_v56  ;;  %v2061_v54 = vld [vmem:[#allocation13_spill] sm:$0xff]  ;;  %v40_v58 = vld [vmem:[#allocation2 + $0x20] sm:$0xff]  ;;  %v1936_v25 = vld [vmem:[%s2038_s2 + $0x18] sm:$0xff]  }
 0x128   :  { %922 = vst.msk [vmem:[#allocation2 + $0x10] sm:$0xff] %vm19_vm0, %v906_v33  ;;  %v904_v52 = vadd.f32 %v842_v35, %v36_v40  ;;  %v853_v42 = vadd.f32 %v1394_v11, %v756_v37  ;;  %v1402_v7 = vpop.f32.mrf.mxu1  ;;  %v1364_v33 = vadd.f32 %v2061_v54, %v2060_v19  ;;  %v772_v49 = vadd.f32 %v1346_v62, %v1282_v17 }
 0x129   :  { %930 = vst.msk [vmem:[#allocation2 + $0x50] sm:$0xff] %vm19_vm0, %v914_v59  ;;  %v912_v18 = vadd.f32 %v874_v60, %v44_v57  ;;  %v885_v20 = vadd.f32 %v1402_v7, %v788_v12  ;;  %v844_v53 = vpop.f32.mrf.mxu0  ;;  %v1207_v60 = vunpack.c.h.bf16 %v1860_v9  ;;  %v48_v12 = vld [vmem:[#allocation2 + $0x60] sm:$0xff]  ;;  %v1223_v51 = vunpack.c.h.bf16 %v1865_v10 }
 0x12a   :  { %920 = vst.msk [vmem:[#allocation2] sm:$0xff] %vm19_vm0, %v904_v52  ;;  %v907_v27 = vadd.f32 %v853_v42, %v39_v1  ;;  %v845_v26 = vadd.f32 %v844_v53, %v748_v55  ;;  %v876_v29 = vpop.f32.mrf.mxu1  ;;  %v804_v8 = vadd.f32 %v1370_v32, %v1306_v31  ;;  %v764_v53 = vadd.f32 %v1340_v38, %v1892_v45 }
 0x12b   :  { %928 = vst.msk [vmem:[#allocation2 + $0x40] sm:$0xff] %vm19_vm0, %v912_v18  ;;  %v915_v46 = vadd.f32 %v885_v20, %v47_v4  ;;  %v877_v47 = vadd.f32 %v876_v29, %v780_v61  ;;  %v1397_v37 = vpop.f32.mrf.mxu0  ;;  %v43_v4 = vld [vmem:[#allocation2 + $0x38] sm:$0xff] }
 0x12c   :  { %923 = vst.msk [vmem:[#allocation2 + $0x18] sm:$0xff] %vm19_vm0, %v907_v27  ;;  %v905_v40 = vadd.f32 %v845_v26, %v37_v21  ;;  %v866_v55 = vadd.f32 %v1397_v37, %v769_v15  ;;  %v1405_v41 = vpop.f32.mrf.mxu1  ;;  %v51_v21 = vld [vmem:[#allocation2 + $0x78] sm:$0xff]  ;;  %v41_v27 = vld [vmem:[#allocation2 + $0x28] sm:$0xff] }
 0x12d   :  { %931 = vst.msk [vmem:[#allocation2 + $0x58] sm:$0xff] %vm19_vm0, %v915_v46  ;;  %v913_v35 = vadd.f32 %v877_v47, %v45_v28  ;;  %v898_v57 = vadd.f32 %v1405_v41, %v801_v30  ;;  %v857_v59 = vpop.f32.mrf.mxu0  ;;  %v796_v28 = vadd.f32 %v1364_v33, %v1300_v22  ;;  %v49_v46 = vld [vmem:[#allocation2 + $0x68] sm:$0xff]  ;;  %v1241_v41 = vld [vmem:[%s2038_s2 + $0x30] sm:$0xff]  }
 0x12e   :  { %921 = vst.msk [vmem:[#allocation2 + $0x8] sm:$0xff] %vm19_vm0, %v905_v40  ;;  %v910_v1 = vadd.f32 %v866_v55, %v42_v48  ;;  %v858_v11 = vadd.f32 %v857_v59, %v1894_v39  ;;  %v889_v15 = vpop.f32.mrf.mxu1 }
 0x12f   :  { %v941_v50 = vld [vmem:[#allocation2 + $0x10] sm:$0xff]  ;;  %929 = vst.msk [vmem:[#allocation2 + $0x48] sm:$0xff] %vm19_vm0, %v913_v35  ;;  %v918_v52 = vadd.f32 %v898_v57, %v50_v44  ;;  %v890_v42 = vadd.f32 %v889_v15, %v793_v43  ;;  %v1398_v7 = vpop.f32.mrf.mxu0 }
 0x130   :  { %v989_v16 = vadd.f32 %v1210_v2, %v941_v50  ;;  %v949_v18 = vld [vmem:[#allocation2 + $0x50] sm:$0xff]  ;;  %926 = vst.msk [vmem:[#allocation2 + $0x30] sm:$0xff] %vm19_vm0, %v910_v1  ;;  %v908_v39 = vadd.f32 %v858_v11, %v40_v58  ;;  %v869_v20 = vadd.f32 %v1398_v7, %v772_v49  ;;  %v1406_v17 = vpop.f32.mrf.mxu1  ;;  %v1230_v58 = vunpack.c.l.bf16 %v1241_v41 }
 0x131   :  { %v997_v61 = vadd.f32 %v1226_v3, %v949_v18  ;;  %v939_v63 = vld [vmem:[#allocation2] sm:$0xff]  ;;  %934 = vst.msk [vmem:[#allocation2 + $0x70] sm:$0xff] %vm19_vm0, %v918_v52  ;;  %v916_v2 = vadd.f32 %v890_v42, %v48_v12  ;;  %v901_v62 = vadd.f32 %v1406_v17, %v804_v8  ;;  %v860_v26 = vpop.f32.mrf.mxu0  ;;  %v1944_v3 = vld [vmem:[%s2038_s2 + $0x38] sm:$0xff]   ;;  %v1219_v1 = vunpack.c.h.bf16 %v1936_v25 }
 0x132   :  { %v1190_v29 = vpack.c.bf16 %v989_v16, %v989_v16  ;;  %v987_v45 = vadd.f32 %v1206_v13, %v939_v63  ;;  %v947_v30 = vld [vmem:[#allocation2 + $0x40] sm:$0xff]  ;;  %924 = vst.msk [vmem:[#allocation2 + $0x20] sm:$0xff] %vm19_vm0, %v908_v39  ;;  %v911_v31 = vadd.f32 %v869_v20, %v43_v4  ;;  %v861_v32 = vadd.f32 %v860_v26, %v764_v53  ;;  %v892_v47 = vpop.f32.mrf.mxu1  ;;  %v1237_v13 = vld [vmem:[%s2038_s2 + $0x10] sm:$0xff]  }
 0x133   :  { %v1198_v48 = vpack.c.bf16 %v997_v61, %v997_v61  ;;  %v995_v37 = vadd.f32 %v1222_v14, %v947_v30  ;;  %v942_v34 = vld [vmem:[#allocation2 + $0x18] sm:$0xff]  ;;  %932 = vst.msk [vmem:[#allocation2 + $0x60] sm:$0xff] %vm19_vm0, %v916_v2  ;;  %v919_v36 = vadd.f32 %v901_v62, %v51_v21  ;;  %v893_v38 = vadd.f32 %v892_v47, %v796_v28 }
 0x134   :  { %1070 = vst.msk [vmem:[%s2039_s3 + $0x8] sm:$0xf] %vm1067_vm1, %v1190_v29  ;;  %v1188_v40 = vpack.c.bf16 %v987_v45, %v987_v45  ;;  %v990_v55 = vadd.f32 %v1211_v23, %v942_v34  ;;  %v950_v44 = vld [vmem:[#allocation2 + $0x58] sm:$0xff]  ;;  %v1218_v14 = vunpack.c.l.bf16 %v1936_v25  ;;  %v909_v43 = vadd.f32 %v861_v32, %v41_v27 }
 0x135   :  { %927 = vst.msk [vmem:[#allocation2 + $0x38] sm:$0xff] %vm19_vm0, %v911_v31  ;;  %v1196_v56 = vpack.c.bf16 %v995_v37, %v995_v37  ;;  %v998_v5 = vadd.f32 %v1227_v24, %v950_v44  ;;  %v940_v23 = vld [vmem:[#allocation2 + $0x8] sm:$0xff]  ;;  %v1234_v0 = vunpack.c.l.bf16 %v1944_v3  ;;  %935 = vst.msk [vmem:[#allocation2 + $0x78] sm:$0xff] %vm19_vm0, %v919_v36  ;;  %v917_v22 = vadd.f32 %v893_v38, %v49_v46 }
 0x136   :  { %1078 = vst.msk [vmem:[%s2039_s3 + $0x28] sm:$0xf] %vm1067_vm1, %v1198_v48  ;;  %1068 = vst.msk [vmem:[%s2039_s3] sm:$0xf] %vm1067_vm1, %v1188_v40  ;;  %v1191_v19 = vpack.c.bf16 %v990_v55, %v990_v55  ;;  %v988_v54 = vadd.f32 %v1207_v60, %v940_v23  ;;  %v948_v33 = vld [vmem:[#allocation2 + $0x48] sm:$0xff]  ;;  %v1214_v35 = vunpack.c.l.bf16 %v1237_v13  ;;  %v1235_v15 = vunpack.c.h.bf16 %v1944_v3 }
 0x137   :  { %925 = vst.msk [vmem:[#allocation2 + $0x28] sm:$0xff] %vm19_vm0, %v909_v43  ;;  %v1199_v6 = vpack.c.bf16 %v998_v5, %v998_v5  ;;  %v996_v24 = vadd.f32 %v1223_v51, %v948_v33  ;;  %v945_v57 = vld [vmem:[#allocation2 + $0x30] sm:$0xff]  ;;  %933 = vst.msk [vmem:[#allocation2 + $0x68] sm:$0xff] %vm19_vm0, %v917_v22  ;;  %v1215_v52 = vunpack.c.h.bf16 %v1237_v13  ;;  %v1231_v8 = vunpack.c.h.bf16 %v1241_v41 }
 0x138   :  { %1076 = vst.msk [vmem:[%s2039_s3 + $0x20] sm:$0xf] %vm1067_vm1, %v1196_v56  ;;  %1071 = vst.msk [vmem:[%s2039_s3 + $0xc] sm:$0xf] %vm1067_vm1, %v1191_v19  ;;  %v1189_v9 = vpack.c.bf16 %v988_v54, %v988_v54  ;;  %v993_v59 = vadd.f32 %v1218_v14, %v945_v57  ;;  %v953_v60 = vld [vmem:[#allocation2 + $0x70] sm:$0xff] }
 0x139   :  { %1079 = vst.msk [vmem:[%s2039_s3 + $0x2c] sm:$0xf] %vm1067_vm1, %v1199_v6  ;;  %v1197_v10 = vpack.c.bf16 %v996_v24, %v996_v24  ;;  %v1001_v11 = vadd.f32 %v1234_v0, %v953_v60  ;;  %v943_v12 = vld [vmem:[#allocation2 + $0x20] sm:$0xff] }
 0x13a   :  { %1069 = vst.msk [vmem:[%s2039_s3 + $0x4] sm:$0xf] %vm1067_vm1, %v1189_v9  ;;  %v1194_v49 = vpack.c.bf16 %v993_v59, %v993_v59  ;;  %v991_v50 = vadd.f32 %v1214_v35, %v943_v12  ;;  %v951_v51 = vld [vmem:[#allocation2 + $0x60] sm:$0xff] }
 0x13b   :  { %1077 = vst.msk [vmem:[%s2039_s3 + $0x24] sm:$0xf] %vm1067_vm1, %v1197_v10  ;;  %v1202_v42 = vpack.c.bf16 %v1001_v11, %v1001_v11  ;;  %v999_v4 = vadd.f32 %v1230_v58, %v951_v51 }
 0x13c   :  { %v946_v7 = vld [vmem:[#allocation2 + $0x38] sm:$0xff]  ;;  %1074 = vst.msk [vmem:[%s2039_s3 + $0x18] sm:$0xf] %vm1067_vm1, %v1194_v49  ;;  %v1192_v16 = vpack.c.bf16 %v991_v50, %v991_v50 }
 0x13d   :  { %v994_v18 = vadd.f32 %v1219_v1, %v946_v7  ;;  %v954_v39 = vld [vmem:[#allocation2 + $0x78] sm:$0xff]  ;;  %1082 = vst.msk [vmem:[%s2039_s3 + $0x38] sm:$0xf] %vm1067_vm1, %v1202_v42  ;;  %v1200_v20 = vpack.c.bf16 %v999_v4, %v999_v4 }
 0x13e   :  { %v1002_v21 = vadd.f32 %v1235_v15, %v954_v39  ;;  %v944_v17 = vld [vmem:[#allocation2 + $0x28] sm:$0xff]  ;;  %1072 = vst.msk [vmem:[%s2039_s3 + $0x10] sm:$0xf] %vm1067_vm1, %v1192_v16 }
 0x13f   :  { %v1195_v53 = vpack.c.bf16 %v994_v18, %v994_v18  ;;  %v992_v61 = vadd.f32 %v1215_v52, %v944_v17  ;;  %v952_v63 = vld [vmem:[#allocation2 + $0x68] sm:$0xff]  ;;  %1080 = vst.msk [vmem:[%s2039_s3 + $0x30] sm:$0xf] %vm1067_vm1, %v1200_v20 }
 0x140   :  { %v1203_v25 = vpack.c.bf16 %v1002_v21, %v1002_v21  ;;  %v1000_v2 = vadd.f32 %v1231_v8, %v952_v63 }
 0x141   :  { %1075 = vst.msk [vmem:[%s2039_s3 + $0x1c] sm:$0xf] %vm1067_vm1, %v1195_v53  ;;  %v1193_v62 = vpack.c.bf16 %v992_v61, %v992_v61 }
 0x142   :  { %1083 = vst.msk [vmem:[%s2039_s3 + $0x3c] sm:$0xf] %vm1067_vm1, %v1203_v25  ;;  %v1201_v27 = vpack.c.bf16 %v1000_v2, %v1000_v2 }
 0x143   :  { %1073 = vst.msk [vmem:[%s2039_s3 + $0x14] sm:$0xf] %vm1067_vm1, %v1193_v62 }
 0x144   :  { %1081 = vst.msk [vmem:[%s2039_s3 + $0x34] sm:$0xf] %vm1067_vm1, %v1201_v27 }

// kernel: forward.29
= control target key start
LH: loop header
LB: loop body
LE: loop exit
PB: predicated region body
PF: predicated region fallthrough
CT: control target
= control target key end

     0   :  { %vm101_vm0 = vcmask 523264   ;;  %s329_s3 = inlined_call_operand.vmem [shape: bf16[64,128], index: 3, kind: input, shape index: {}]   ;;  %s330_s0 = inlined_call_operand.vmem [shape: bf16[32,64], index: 0, kind: input, shape index: {}]   ;;  %s331_s1 = inlined_call_operand.vmem [shape: f32[1,64], index: 1, kind: input, shape index: {}]   ;;  %s332_s2 = inlined_call_operand.vmem [shape: f32[1,64], index: 2, kind: input, shape index: {}]   ;;  %s333_s4 = inlined_call_operand.vmem [shape: f32[1,128], index: 4, kind: input, shape index: {}]   ;;  %s334_s5 = inlined_call_operand.vmem [shape: bf16[32,128], index: 5, kind: output, shape index: {}]  }
   0x1   :  { %v262_v0 = vld [vmem:[%s329_s3 + $0x18] sm:$0xff]   ;;  %v263_v1 = vld [vmem:[%s329_s3 + $0x10] sm:$0xff]   ;;  %v264_v2 = vld [vmem:[%s329_s3 + $0x8] sm:$0xff]  }
   0x2   :  { %250 = vmatprep.subr.bf16.mxu0 %v262_v0  ;;  %v225_v3 = vld [vmem:[%s330_s0] sm:$0xff]   ;;  %v242_v4 = vld [vmem:[%s330_s0 + $0x8] sm:$0xff]  }
   0x3   :  { %251 = vmatpush3.bf16.msra.mxu0 %v262_v0  ;;  %v207_v5 = vld [vmem:[%s331_s1] ss:$0 sm:$0xff]  ;;  %v226_v6 = vunpack.c.l.bf16 %v225_v3  ;;  %v227_v7 = vunpack.c.h.bf16 %v225_v3  ;;  %v230_v8 = vunpack.c.l.bf16 %v242_v4  ;;  %v231_v9 = vunpack.c.h.bf16 %v242_v4 }
   0x4   :  { %252 = vmatprep.subr.bf16.mxu0 %v263_v1  ;;  %v208_v10 = vld [vmem:[%s332_s2] ss:$0 sm:$0xff] }
   0x5   :  { %v44_v11 = vmul.f32 %v226_v6, %v207_v5  ;;  %v45_v12 = vmul.f32 %v227_v7, %v207_v5  ;;  %v46_v13 = vmul.f32 %v230_v8, %v207_v5  ;;  %v47_v14 = vmul.f32 %v231_v9, %v207_v5  ;;  %v265_v15 = vld [vmem:[%s329_s3] sm:$0xff]  }
   0x6   :  { %v215_v27 = vld [vmem:[%s333_s4] ss:$0 sm:$0xff] }
   0x7   :  { %253 = vmatpush3.bf16.msra.mxu0 %v263_v1  ;;  %v55_v16 = vadd.f32 %v208_v10, %v44_v11  ;;  %v56_v17 = vadd.f32 %v208_v10, %v45_v12  ;;  %v57_v18 = vadd.f32 %v208_v10, %v46_v13  ;;  %v58_v19 = vadd.f32 %v208_v10, %v47_v14 }
   0x8   :  { %254 = vmatprep.subr.bf16.mxu0 %v264_v2 }
   0x9   :  { %v59_v20 = vmax.f32 %v55_v16, 0.0  ;;  %v60_v21 = vmax.f32 %v56_v17, 0.0  ;;  %v61_v22 = vmax.f32 %v57_v18, 0.0  ;;  %v62_v23 = vmax.f32 %v58_v19, 0.0 }
   0xb   :  { %255 = vmatpush3.bf16.msra.mxu0 %v264_v2  ;;  %v63_v24 = vpack.c.bf16 %v60_v21, %v59_v20  ;;  %v64_v25 = vpack.c.bf16 %v62_v23, %v61_v22 }
   0xc   :  { %256 = vmatprep.subr.bf16.mxu0 %v265_v15 }
   0xd   :  { %258 = vmatprep.mubr.msk.bf16.mxu0 %vm101_vm0, %v63_v24 }
   0xf   :  { %257 = vmatpush3.bf16.msra.mxu0 %v265_v15 }
  0x12   :  { %259 = vmatmul.mubr.msk.bf16.vlgmr.msra.gmra.mxu0 %vm101_vm0, %v64_v25 }
  0xd2   :  { %v260_v26 = vpop.f32.mrf.mxu0 }
  0xd3   :  { %v181_v30 = vadd.f32 %v260_v26, %v215_v27 }
  0xd4   :  { %v142_v28 = vpop.f32.mrf.mxu0 }
  0xd5   :  { %v179_v33 = vadd.f32 %v215_v27, %v142_v28 }
  0xd6   :  { %v261_v29 = vpop.f32.mrf.mxu0 }
  0xd7   :  { %v182_v31 = vadd.f32 %v261_v29, %v215_v27 }
  0xd8   :  { %v145_v32 = vpop.f32.mrf.mxu0 }
  0xd9   :  { %v240_v34 = vpack.c.bf16 %v182_v31, %v181_v30  ;;  %v180_v35 = vadd.f32 %v215_v27, %v145_v32 }
  0xdb   :  { %243 = vst [vmem:[%s334_s5 + $0x8] sm:$0xff] %v240_v34   ;;  %v235_v36 = vpack.c.bf16 %v180_v35, %v179_v33 }
  0xdd   :  { %236 = vst [vmem:[%s334_s5] sm:$0xff] %v235_v36  }

// kernel: forward.28
= control target key start
LH: loop header
LB: loop body
LE: loop exit
PB: predicated region body
PF: predicated region fallthrough
CT: control target
= control target key end

     0   :  { %vm75_vm0 = vcmask 519168   ;;  %s189_s0 = inlined_call_operand.vmem [shape: bf16[4,32,64], index: 0, kind: input, shape index: {}]   ;;  %s190_s1 = inlined_call_operand.vmem [shape: bf16[32,64], index: 1, kind: output, shape index: {}]  }
   0x1   :  { %v105_v0 = vld [vmem:[%s189_s0] sm:$0xff]   ;;  %v137_v1 = vld [vmem:[%s189_s0 + $0x10] sm:$0xff]   ;;  %v136_v8 = vld [vmem:[%s189_s0 + $0x8] sm:$0xff]  }
   0x2   :  { %v139_v2 = vld [vmem:[%s189_s0 + $0x20] sm:$0xff]   ;;  %v106_v3 = vunpack.c.l.bf16 %v105_v0  ;;  %v114_v4 = vunpack.c.l.bf16 %v137_v1  ;;  %v141_v6 = vld [vmem:[%s189_s0 + $0x30] sm:$0xff]   ;;  %v107_v7 = vunpack.c.h.bf16 %v105_v0  ;;  %v138_v9 = vld [vmem:[%s189_s0 + $0x18] sm:$0xff]   ;;  %v115_v11 = vunpack.c.h.bf16 %v137_v1 }
   0x3   :  { %v122_v5 = vunpack.c.l.bf16 %v139_v2  ;;  %v130_v10 = vunpack.c.l.bf16 %v141_v6  ;;  %v123_v12 = vunpack.c.h.bf16 %v139_v2  ;;  %v140_v13 = vld [vmem:[%s189_s0 + $0x28] sm:$0xff]   ;;  %v142_v14 = vld [vmem:[%s189_s0 + $0x38] sm:$0xff]   ;;  %v110_v16 = vunpack.c.l.bf16 %v136_v8 }
   0x4   :  { %v25_v15 = vadd.f32 %v114_v4, %v106_v3  ;;  %v118_v17 = vunpack.c.l.bf16 %v138_v9  ;;  %v126_v18 = vunpack.c.l.bf16 %v140_v13  ;;  %v26_v19 = vadd.f32 %v115_v11, %v107_v7 }
   0x5   :  { %v131_v20 = vunpack.c.h.bf16 %v141_v6  ;;  %v111_v21 = vunpack.c.h.bf16 %v136_v8  ;;  %v119_v22 = vunpack.c.h.bf16 %v138_v9  ;;  %v134_v25 = vunpack.c.l.bf16 %v142_v14 }
   0x6   :  { %v38_v23 = vadd.f32 %v122_v5, %v25_v15  ;;  %v27_v24 = vadd.f32 %v118_v17, %v110_v16  ;;  %v127_v26 = vunpack.c.h.bf16 %v140_v13  ;;  %v39_v27 = vadd.f32 %v123_v12, %v26_v19 }
   0x7   :  { %v28_v28 = vadd.f32 %v119_v22, %v111_v21  ;;  %v135_v29 = vunpack.c.h.bf16 %v142_v14 }
   0x8   :  { %v51_v30 = vadd.f32 %v130_v10, %v38_v23  ;;  %v40_v31 = vadd.f32 %v126_v18, %v27_v24  ;;  %v52_v32 = vadd.f32 %v131_v20, %v39_v27 }
   0x9   :  { %v41_v33 = vadd.f32 %v127_v26, %v28_v28 }
   0xa   :  { %v55_v34 = vmul.f32 0.25, %v51_v30  ;;  %v53_v35 = vadd.f32 %v134_v25, %v40_v31  ;;  %v56_v36 = vmul.f32 0.25, %v52_v32 }
   0xb   :  { %v54_v37 = vadd.f32 %v135_v29, %v41_v33 }
   0xc   :  { %v100_v38 = vpack.c.bf16 %v55_v34, %v55_v34  ;;  %v57_v39 = vmul.f32 0.25, %v53_v35  ;;  %v101_v40 = vpack.c.bf16 %v56_v36, %v56_v36 }
   0xd   :  { %v58_v41 = vmul.f32 0.25, %v54_v37 }
   0xe   :  { %76 = vst.msk [vmem:[%s190_s1] sm:$0xf] %vm75_vm0, %v100_v38  ;;  %v102_v42 = vpack.c.bf16 %v57_v39, %v57_v39  ;;  %77 = vst.msk [vmem:[%s190_s1 + $0x4] sm:$0xf] %vm75_vm0, %v101_v40 }
   0xf   :  { %v103_v43 = vpack.c.bf16 %v58_v41, %v58_v41 }
  0x10   :  { %78 = vst.msk [vmem:[%s190_s1 + $0x8] sm:$0xf] %vm75_vm0, %v102_v42 }
  0x11   :  { %79 = vst.msk [vmem:[%s190_s1 + $0xc] sm:$0xf] %vm75_vm0, %v103_v43 }

// kernel: forward.27
= control target key start
LH: loop header
LB: loop body
LE: loop exit
PB: predicated region body
PF: predicated region fallthrough
CT: control target
= control target key end

     0   :  { %vm380_vm0 = vcmask 523264   ;;  %s967_s1 = inlined_call_operand.vmem [shape: bf16[576,128], index: 1, kind: input, shape index: {}]   ;;  %s968_s0 = inlined_call_operand.vmem [shape: bf16[32,576], index: 0, kind: input, shape index: {}]   ;;  %s969_s2 = inlined_call_operand.vmem [shape: f32[1,128], index: 2, kind: input, shape index: {}]   ;;  %s970_s3 = inlined_call_operand.vmem [shape: f32[1,128], index: 3, kind: input, shape index: {}]   ;;  %s971_s4 = inlined_call_operand.vmem [shape: bf16[32,128], index: 4, kind: output, shape index: {}]  }
   0x1   :  { %v742_v0 = vld [vmem:[%s967_s1 + $0x78] sm:$0xff]   ;;  %v746_v4 = vld [vmem:[%s967_s1 + $0x70] sm:$0xff]   ;;  %v750_v8 = vld [vmem:[%s967_s1 + $0x68] sm:$0xff]  }
   0x2   :  { %v743_v1 = vld [vmem:[%s967_s1 + $0xf8] sm:$0xff]   ;;  %668 = vmatprep.subr.bf16.mxu0 %v742_v0  ;;  %v747_v5 = vld [vmem:[%s967_s1 + $0xf0] sm:$0xff]   ;;  %v751_v9 = vld [vmem:[%s967_s1 + $0xe8] sm:$0xff]  }
   0x3   :  { %v744_v2 = vld [vmem:[%s967_s1 + $0x38] sm:$0xff]   ;;  %696 = vmatprep.subr.bf16.mxu1 %v743_v1  ;;  %v748_v6 = vld [vmem:[%s967_s1 + $0x30] sm:$0xff]   ;;  %v752_v10 = vld [vmem:[%s967_s1 + $0x28] sm:$0xff]  }
   0x4   :  { %v745_v3 = vld [vmem:[%s967_s1 + $0xb8] sm:$0xff]   ;;  %669 = vmatpush3.bf16.msra.mxu0 %v744_v2  ;;  %v749_v7 = vld [vmem:[%s967_s1 + $0xb0] sm:$0xff]   ;;  %v753_v11 = vld [vmem:[%s967_s1 + $0xa8] sm:$0xff]  }
   0x5   :  { %697 = vmatpush3.bf16.msra.mxu1 %v745_v3  ;;  %670 = vmatprep.subr.bf16.mxu0 %v746_v4  ;;  %v754_v12 = vld [vmem:[%s967_s1 + $0x60] sm:$0xff]   ;;  %v758_v16 = vld [vmem:[%s967_s1 + $0x58] sm:$0xff]   ;;  %v762_v20 = vld [vmem:[%s967_s1 + $0x50] sm:$0xff]  }
   0x6   :  { %698 = vmatprep.subr.bf16.mxu1 %v747_v5  ;;  %v755_v13 = vld [vmem:[%s967_s1 + $0xe0] sm:$0xff]   ;;  %v759_v17 = vld [vmem:[%s967_s1 + $0xd8] sm:$0xff]   ;;  %v763_v21 = vld [vmem:[%s967_s1 + $0xd0] sm:$0xff]  }
   0x7   :  { %v756_v14 = vld [vmem:[%s967_s1 + $0x20] sm:$0xff]   ;;  %v760_v18 = vld [vmem:[%s967_s1 + $0x18] sm:$0xff]   ;;  %v764_v22 = vld [vmem:[%s967_s1 + $0x10] sm:$0xff]  }
   0x8   :  { %671 = vmatpush3.bf16.msra.mxu0 %v748_v6  ;;  %v757_v15 = vld [vmem:[%s967_s1 + $0xa0] sm:$0xff]   ;;  %v761_v19 = vld [vmem:[%s967_s1 + $0x98] sm:$0xff]   ;;  %v765_v23 = vld [vmem:[%s967_s1 + $0x90] sm:$0xff]  }
   0x9   :  { %699 = vmatpush3.bf16.msra.mxu1 %v749_v7  ;;  %672 = vmatprep.subr.bf16.mxu0 %v750_v8  ;;  %v766_v24 = vld [vmem:[%s967_s1 + $0x48] sm:$0xff]   ;;  %v770_v28 = vld [vmem:[%s967_s1 + $0x40] sm:$0xff]   ;;  %v780_v36 = vld [vmem:[%s967_s1 + $0x118] sm:$0xff]  }
   0xa   :  { %700 = vmatprep.subr.bf16.mxu1 %v751_v9  ;;  %v767_v25 = vld [vmem:[%s967_s1 + $0xc8] sm:$0xff]   ;;  %v771_v29 = vld [vmem:[%s967_s1 + $0xc0] sm:$0xff]   ;;  %v781_v37 = vld [vmem:[%s967_s1 + $0x110] sm:$0xff]  }
   0xb   :  { %v768_v26 = vld [vmem:[%s967_s1 + $0x8] sm:$0xff]   ;;  %v772_v30 = vld [vmem:[%s967_s1] sm:$0xff]  }
   0xc   :  { %673 = vmatpush3.bf16.msra.mxu0 %v752_v10  ;;  %v769_v27 = vld [vmem:[%s967_s1 + $0x88] sm:$0xff]   ;;  %v773_v31 = vld [vmem:[%s967_s1 + $0x80] sm:$0xff]  }
   0xd   :  { %701 = vmatpush3.bf16.msra.mxu1 %v753_v11  ;;  %674 = vmatprep.subr.bf16.mxu0 %v754_v12  ;;  %v774_v32 = vld [vmem:[%s968_s0] ss:$20 sps:$4 sm:$0xff]   ;;  %v776_v33 = vld [vmem:[%s968_s0 + $0x4] ss:$20 sps:$4 sm:$0xff]   ;;  %v777_v34 = vld [vmem:[%s968_s0 + $0x8] ss:$20 sps:$4 sm:$0xff]  }
   0xe   :  { %702 = vmatprep.subr.bf16.mxu1 %v755_v13  ;;  %v779_v35 = vld [vmem:[%s968_s0 + $0xc] ss:$20 sps:$4 sm:$0xff]   ;;  %419 = vmatprep.mubr.bf16.mxu0 %v776_v33  ;;  %v784_v39 = vld [vmem:[%s968_s0 + $0x34] ss:$20 sps:$4 sm:$0xff]   ;;  %v787_v42 = vld [vmem:[%s968_s0 + $0x30] ss:$20 sps:$4 sm:$0xff]  }
   0xf   :  { %468 = vmatprep.mubr.bf16.mxu1 %v779_v35  ;;  %v782_v38 = vld [vmem:[%s968_s0 + $0x2c] ss:$20 sps:$4 sm:$0xff]   ;;  %v786_v40 = vld [vmem:[%s968_s0 + $0x28] ss:$20 sps:$4 sm:$0xff]   ;;  %v790_v43 = vld [vmem:[%s968_s0 + $0x10] ss:$20 sps:$4 sm:$0xff]  }
  0x10   :  { %675 = vmatpush3.bf16.msra.mxu0 %v756_v14  ;;  %v788_v41 = vld [vmem:[%s967_s1 + $0x108] sm:$0xff]   ;;  %v789_v44 = vld [vmem:[%s967_s1 + $0x100] sm:$0xff]  }
  0x11   :  { %703 = vmatpush3.bf16.msra.mxu1 %v757_v15  ;;  %676 = vmatprep.subr.bf16.mxu0 %v758_v16  ;;  %v791_v45 = vld [vmem:[%s968_s0 + $0x38] ss:$20 sps:$4 sm:$0xff]   ;;  %v647_v6 = vld [vmem:[%s969_s2] ss:$0 sm:$0xff] }
  0x12   :  { %704 = vmatprep.subr.bf16.mxu1 %v759_v17  ;;  %v648_v15 = vld [vmem:[%s970_s3] ss:$0 sm:$0xff] }
  0x14   :  { %677 = vmatpush3.bf16.msra.mxu0 %v760_v18 }
  0x15   :  { %705 = vmatpush3.bf16.msra.mxu1 %v761_v19  ;;  %678 = vmatprep.subr.bf16.mxu0 %v762_v20 }
  0x16   :  { %706 = vmatprep.subr.bf16.mxu1 %v763_v21 }
  0x18   :  { %679 = vmatpush3.bf16.msra.mxu0 %v764_v22 }
  0x19   :  { %707 = vmatpush3.bf16.msra.mxu1 %v765_v23  ;;  %680 = vmatprep.subr.bf16.mxu0 %v766_v24 }
  0x1a   :  { %708 = vmatprep.subr.bf16.mxu1 %v767_v25 }
  0x1c   :  { %681 = vmatpush3.bf16.msra.mxu0 %v768_v26 }
  0x1d   :  { %709 = vmatpush3.bf16.msra.mxu1 %v769_v27  ;;  %682 = vmatprep.subr.bf16.mxu0 %v770_v28 }
  0x1e   :  { %710 = vmatprep.subr.bf16.mxu1 %v771_v29 }
  0x20   :  { %683 = vmatpush3.bf16.msra.mxu0 %v772_v30 }
  0x21   :  { %711 = vmatpush3.bf16.msra.mxu1 %v773_v31  ;;  %730 = vmatprep.subr.bf16.mxu0 %v780_v36 }
  0x23   :  { %420 = vmatmul.mubr.bf16.vlgmr.msra.gmra.mxu0 %v774_v32 }
  0x24   :  { %469 = vmatmul.mubr.bf16.vlgmr.msra.gmra.mxu1 %v777_v34  ;;  %731 = vmatpush3.bf16.msra.mxu0 %v780_v36 }
  0x25   :  { %732 = vmatprep.subr.bf16.mxu0 %v781_v37  ;;  %427 = vmatprep.mubr.bf16.mxu0 %v782_v38 }
  0x26   :  { %476 = vmatprep.mubr.bf16.mxu1 %v784_v39 }
  0x28   :  { %733 = vmatpush3.bf16.msra.mxu0 %v781_v37 }
  0x29   :  { %734 = vmatprep.subr.bf16.mxu0 %v788_v41 }
  0x2b   :  { %428 = vmatmul.mubr.bf16.gmra.mxu0 %v786_v40 }
  0x2c   :  { %477 = vmatmul.mubr.bf16.gmra.mxu1 %v787_v42  ;;  %738 = vmatprep.mubr.msk.bf16.mxu0 %vm380_vm0, %v790_v43 }
  0x2d   :  { %735 = vmatpush3.bf16.msra.mxu0 %v788_v41 }
  0x2e   :  { %736 = vmatprep.subr.bf16.mxu0 %v789_v44 }
  0x31   :  { %737 = vmatpush3.bf16.msra.mxu0 %v789_v44 }
  0x34   :  { %739 = vmatmul.mubr.msk.bf16.vlgmr.msra.gmra.mxu0 %vm380_vm0, %v791_v45 }
  0xe3   :  { %v684_v46 = vpop.f32.mrf.mxu0 }
  0xe4   :  { %v712_v47 = vpop.f32.mrf.mxu1 }
  0xe5   :  { %v685_v48 = vpop.f32.mrf.mxu0 }
  0xe6   :  { %v713_v49 = vpop.f32.mrf.mxu1  ;;  %v686_v62 = vadd.f32 %v685_v48, %v684_v46 }
  0xe7   :  { %v687_v50 = vpop.f32.mrf.mxu0  ;;  %v714_v63 = vadd.f32 %v713_v49, %v712_v47 }
  0xe8   :  { %v715_v51 = vpop.f32.mrf.mxu1 }
  0xe9   :  { %v688_v52 = vpop.f32.mrf.mxu0  ;;  %v471_v10 = vadd.f32 %v714_v63, %v686_v62 }
  0xea   :  { %v716_v53 = vpop.f32.mrf.mxu1  ;;  %v689_v7 = vadd.f32 %v688_v52, %v687_v50 }
  0xeb   :  { %v690_v54 = vpop.f32.mrf.mxu0  ;;  %v717_v8 = vadd.f32 %v716_v53, %v715_v51 }
  0xec   :  { %v718_v55 = vpop.f32.mrf.mxu1 }
  0xed   :  { %v691_v56 = vpop.f32.mrf.mxu0  ;;  %v474_v19 = vadd.f32 %v717_v8, %v689_v7 }
  0xee   :  { %v719_v57 = vpop.f32.mrf.mxu1  ;;  %v692_v58 = vadd.f32 %v691_v56, %v690_v54 }
  0xef   :  { %v720_v59 = vadd.f32 %v719_v57, %v718_v55  ;;  %v693_v60 = vpop.f32.mrf.mxu0 }
  0xf0   :  { %v721_v61 = vpop.f32.mrf.mxu1 }
  0xf1   :  { %v694_v0 = vpop.f32.mrf.mxu0  ;;  %v479_v4 = vadd.f32 %v720_v59, %v692_v58 }
  0xf2   :  { %v722_v1 = vpop.f32.mrf.mxu1  ;;  %v695_v2 = vadd.f32 %v694_v0, %v693_v60 }
  0xf3   :  { %v723_v3 = vadd.f32 %v722_v1, %v721_v61 }
  0xf4   :  { %v740_v5 = vpop.f32.mrf.mxu0 }
  0xf5   :  { %v528_v9 = vadd.f32 %v740_v5, %v479_v4  ;;  %v482_v14 = vadd.f32 %v723_v3, %v695_v2 }
  0xf6   :  { %v519_v11 = vpop.f32.mrf.mxu0 }
  0xf7   :  { %v558_v12 = vmul.f32 %v647_v6, %v528_v9  ;;  %v520_v13 = vadd.f32 %v519_v11, %v471_v10 }
  0xf8   :  { %v741_v16 = vpop.f32.mrf.mxu0 }
  0xf9   :  { %v556_v17 = vmul.f32 %v647_v6, %v520_v13  ;;  %v531_v18 = vadd.f32 %v741_v16, %v482_v14  ;;  %v569_v21 = vadd.f32 %v648_v15, %v558_v12 }
  0xfa   :  { %v522_v20 = vpop.f32.mrf.mxu0 }
  0xfb   :  { %v559_v22 = vmul.f32 %v647_v6, %v531_v18  ;;  %v523_v23 = vadd.f32 %v522_v20, %v474_v19  ;;  %v567_v24 = vadd.f32 %v648_v15, %v556_v17  ;;  %v573_v27 = vmax.f32 %v569_v21, 0.0 }
  0xfd   :  { %v570_v25 = vadd.f32 %v648_v15, %v559_v22  ;;  %v557_v26 = vmul.f32 %v647_v6, %v523_v23  ;;  %v571_v30 = vmax.f32 %v567_v24, 0.0 }
  0xff   :  { %v574_v28 = vmax.f32 %v570_v25, 0.0  ;;  %v568_v29 = vadd.f32 %v648_v15, %v557_v26 }
 0x101   :  { %v665_v31 = vpack.c.bf16 %v574_v28, %v573_v27  ;;  %v572_v32 = vmax.f32 %v568_v29, 0.0 }
 0x103   :  { %667 = vst [vmem:[%s971_s4 + $0x8] sm:$0xff] %v665_v31   ;;  %v660_v33 = vpack.c.bf16 %v572_v32, %v571_v30 }
 0x105   :  { %661 = vst [vmem:[%s971_s4] sm:$0xff] %v660_v33  }

// kernel: forward.33
= control target key start
LH: loop header
LB: loop body
LE: loop exit
PB: predicated region body
PF: predicated region fallthrough
CT: control target
= control target key end

     0   :  { %s60_s0 = inlined_call_operand.vmem [shape: bf16[4,8,128], index: 0, kind: input, shape index: {}]   ;;  %s61_s1 = inlined_call_operand.vmem [shape: bf16[8,128], index: 1, kind: output, shape index: {}]  }
   0x1   :  { %v33_v0 = vld [vmem:[%s60_s0] sm:$0xff]   ;;  %v40_v1 = vld [vmem:[%s60_s0 + $0x8] sm:$0xff]  }
   0x2   :  { %v34_v2 = vunpack.c.l.bf16 %v33_v0  ;;  %v35_v3 = vunpack.c.h.bf16 %v33_v0  ;;  %v38_v4 = vunpack.c.l.bf16 %v40_v1  ;;  %v39_v6 = vunpack.c.h.bf16 %v40_v1 }
   0x4   :  { %v13_v5 = vadd.f32 %v35_v3, %v34_v2 }
   0x6   :  { %v17_v7 = vadd.f32 %v38_v4, %v13_v5 }
   0x8   :  { %v21_v8 = vadd.f32 %v39_v6, %v17_v7 }
   0xa   :  { %v22_v9 = vmul.f32 0.25, %v21_v8 }
   0xc   :  { %v23_v10 = vpack.c.bf16 %v22_v9, %v22_v9 }
   0xe   :  { %24 = vst [vmem:[%s61_s1] sm:$0xf] %v23_v10 }

// kernel: forward.31
= control target key start
LH: loop header
LB: loop body
LE: loop exit
PB: predicated region body
PF: predicated region fallthrough
CT: control target
= control target key end

     0   :  { %s140_s0 = inlined_call_operand.vmem [shape: bf16[32,128], index: 0, kind: input, shape index: {}]   ;;  %s141_s1 = inlined_call_operand.vmem [shape: f32[1,128], index: 1, kind: input, shape index: {}]   ;;  %s142_s2 = inlined_call_operand.vmem [shape: f32[1,128], index: 2, kind: input, shape index: {}]   ;;  %s143_s3 = inlined_call_operand.vmem [shape: bf16[32,128], index: 3, kind: output, shape index: {}]  }
   0x1   :  { %v83_v0 = vld [vmem:[%s140_s0] sm:$0xff]   ;;  %v100_v4 = vld [vmem:[%s140_s0 + $0x8] sm:$0xff]  }
   0x2   :  { %v72_v1 = vld [vmem:[%s141_s1] ss:$0 sm:$0xff]  ;;  %v84_v2 = vunpack.c.l.bf16 %v83_v0  ;;  %v85_v3 = vunpack.c.h.bf16 %v83_v0  ;;  %v88_v6 = vunpack.c.l.bf16 %v100_v4  ;;  %v89_v7 = vunpack.c.h.bf16 %v100_v4 }
   0x3   :  { %v73_v5 = vld [vmem:[%s142_s2] ss:$0 sm:$0xff] }
   0x4   :  { %v29_v8 = vmul.f32 %v84_v2, %v72_v1  ;;  %v30_v9 = vmul.f32 %v85_v3, %v72_v1  ;;  %v31_v10 = vmul.f32 %v88_v6, %v72_v1  ;;  %v32_v11 = vmul.f32 %v89_v7, %v72_v1 }
   0x6   :  { %v40_v12 = vadd.f32 %v73_v5, %v29_v8  ;;  %v41_v13 = vadd.f32 %v73_v5, %v30_v9  ;;  %v42_v14 = vadd.f32 %v73_v5, %v31_v10  ;;  %v43_v15 = vadd.f32 %v73_v5, %v32_v11 }
   0x8   :  { %v44_v16 = vmax.f32 %v40_v12, 0.0  ;;  %v45_v17 = vmax.f32 %v41_v13, 0.0  ;;  %v46_v18 = vmax.f32 %v42_v14, 0.0  ;;  %v47_v19 = vmax.f32 %v43_v15, 0.0 }
   0xa   :  { %v93_v20 = vpack.c.bf16 %v45_v17, %v44_v16  ;;  %v98_v21 = vpack.c.bf16 %v47_v19, %v46_v18 }
   0xc   :  { %94 = vst [vmem:[%s143_s3] sm:$0xff] %v93_v20   ;;  %101 = vst [vmem:[%s143_s3 + $0x8] sm:$0xff] %v98_v21  }

// kernel: forward.34
= control target key start
LH: loop header
LB: loop body
LE: loop exit
PB: predicated region body
PF: predicated region fallthrough
CT: control target
= control target key end

     0   :  { %v267_v1 = vmov 0   ;;  %v197_v25 = vlaneseq  ;;  %s361_s3 = inlined_call_operand.vmem [shape: bf16[128,256], index: 3, kind: input, shape index: {}]   ;;  %s362_s0 = inlined_call_operand.vmem [shape: bf16[8,128], index: 0, kind: input, shape index: {}]   ;;  %s363_s1 = inlined_call_operand.vmem [shape: f32[1,128], index: 1, kind: input, shape index: {}]   ;;  %s364_s2 = inlined_call_operand.vmem [shape: f32[1,128], index: 2, kind: input, shape index: {}]   ;;  %s365_s4 = inlined_call_operand.vmem [shape: f32[1,256], index: 4, kind: input, shape index: {}]   ;;  %s366_s5 = inlined_call_operand.vmem [shape: bf16[8,256], index: 5, kind: output, shape index: {}]  }
   0x1   :  { %v243_v0 = vld [vmem:[%s361_s3 + $0x74] ss:$8 sps:$4 sm:$0xff]   ;;  %177 = vmatprep.mubr.bf16.mxu0 %v267_v1  ;;  %v245_v2 = vld [vmem:[%s361_s3 + $0x70] ss:$8 sps:$4 sm:$0xff]   ;;  %v246_v3 = vld [vmem:[%s361_s3 + $0x64] ss:$8 sps:$4 sm:$0xff]  }
   0x2   :  { %145 = vmatprep.subr.bf16.mxu0 %v243_v0  ;;  %v248_v4 = vld [vmem:[%s361_s3 + $0x60] ss:$8 sps:$4 sm:$0xff]   ;;  %v249_v5 = vld [vmem:[%s361_s3 + $0x54] ss:$8 sps:$4 sm:$0xff]   ;;  %v251_v6 = vld [vmem:[%s361_s3 + $0x50] ss:$8 sps:$4 sm:$0xff]  }
   0x3   :  { %146 = vmatpush1.bf16.msra.mxu0 %v245_v2  ;;  %v252_v7 = vld [vmem:[%s361_s3 + $0x44] ss:$8 sps:$4 sm:$0xff]   ;;  %v254_v8 = vld [vmem:[%s361_s3 + $0x40] ss:$8 sps:$4 sm:$0xff]   ;;  %v255_v10 = vld [vmem:[%s361_s3 + $0x34] ss:$8 sps:$4 sm:$0xff]  }
   0x4   :  { %147 = vmatprep.subr.bf16.mxu0 %v246_v3  ;;  %v27_v9 = vld [vmem:[%s362_s0] sm:$0xf]  ;;  %v257_v12 = vld [vmem:[%s361_s3 + $0x30] ss:$8 sps:$4 sm:$0xff]   ;;  %v258_v14 = vld [vmem:[%s361_s3 + $0x24] ss:$8 sps:$4 sm:$0xff]  }
   0x5   :  { %v28_v11 = vunpack.c.l.bf16 %v27_v9  ;;  %v222_v13 = vld [vmem:[%s363_s1] ss:$0 sm:$0xff]  ;;  %v261_v18 = vld [vmem:[%s361_s3 + $0x14] ss:$8 sps:$4 sm:$0xff]   ;;  %v263_v20 = vld [vmem:[%s361_s3 + $0x10] ss:$8 sps:$4 sm:$0xff]  }
   0x6   :  { %v260_v16 = vld [vmem:[%s361_s3 + $0x20] ss:$8 sps:$4 sm:$0xff]   ;;  %v264_v21 = vld [vmem:[%s361_s3 + $0x4] ss:$8 sps:$4 sm:$0xff]   ;;  %v198_v26 = vshrl.u32 %v197_v25, 7 }
   0x7   :  { %148 = vmatpush1.bf16.msra.mxu0 %v248_v4  ;;  %v36_v15 = vmul.f32 %v222_v13, %v28_v11  ;;  %v223_v17 = vld [vmem:[%s364_s2] ss:$0 sm:$0xff] }
   0x8   :  { %149 = vmatprep.subr.bf16.mxu0 %v249_v5  ;;  %v266_v23 = vld [vmem:[%s361_s3] ss:$8 sps:$4 sm:$0xff]   ;;  %v199_v27 = vsub.s32 0, %v198_v26  ;;  %v203_v28 = vsub.s32 1, %v198_v26 }
   0x9   :  { %v44_v19 = vadd.f32 %v223_v17, %v36_v15  ;;  %v195_v29 = vld [vmem:[%s365_s4] sm:$0x3] }
   0xa   :  { %v200_v30 = vrot.slane %v195_v29, %v199_v27  ;;  %v204_v31 = vrot.slane %v195_v29, %v203_v28 }
   0xb   :  { %150 = vmatpush1.bf16.msra.mxu0 %v251_v6  ;;  %v45_v22 = vmax.f32 %v44_v19, 0.0 }
   0xc   :  { %151 = vmatprep.subr.bf16.mxu0 %v252_v7 }
   0xd   :  { %v46_v24 = vpack.c.bf16 %v45_v22, %v45_v22 }
   0xf   :  { %152 = vmatpush1.bf16.msra.mxu0 %v254_v8 }
  0x10   :  { %153 = vmatprep.subr.bf16.mxu0 %v255_v10 }
  0x13   :  { %154 = vmatpush1.bf16.msra.mxu0 %v257_v12 }
  0x14   :  { %155 = vmatprep.subr.bf16.mxu0 %v258_v14 }
  0x17   :  { %156 = vmatpush1.bf16.msra.mxu0 %v260_v16 }
  0x18   :  { %157 = vmatprep.subr.bf16.mxu0 %v261_v18 }
  0x1b   :  { %158 = vmatpush1.bf16.msra.mxu0 %v263_v20 }
  0x1c   :  { %159 = vmatprep.subr.bf16.mxu0 %v264_v21 }
  0x1f   :  { %160 = vmatpush1.bf16.msra.mxu0 %v266_v23 }
  0x22   :  { %178 = vmatmul.mubr.bf16.vlgmr.msra.gmra.mxu0 %v46_v24 }
  0xe2   :  { %v179_v32 = vpop.f32.mrf.mxu0 }
  0xe3   :  { %v207_v34 = vadd.f32 %v200_v30, %v179_v32 }
  0xe4   :  { %v181_v33 = vpop.f32.mrf.mxu0 }
  0xe5   :  { %v208_v35 = vadd.f32 %v204_v31, %v181_v33 }
  0xe6   :  { %v183_v36 = vpop.f32.mrf.mxu0 }
  0xe7   :  { %v241_v37 = vpack.c.bf16 %v208_v35, %v207_v34 }
  0xe8   :  { %v184_v38 = vpop.f32.mrf.mxu0 }
  0xe9   :  { %217 = vst [vmem:[%s366_s5] sm:$0xff] %v241_v37 }

// kernel: forward.30
= control target key start
LH: loop header
LB: loop body
LE: loop exit
PB: predicated region body
PF: predicated region fallthrough
CT: control target
= control target key end

     0   :  { %s1671_s1 = inlined_call_operand.vmem [shape: bf16[1152,128], index: 1, kind: input, shape index: {}]   ;;  %s1672_s0 = inlined_call_operand.vmem [shape: bf16[32,1152], index: 0, kind: input, shape index: {}]   ;;  %s1673_s2 = inlined_call_operand.vmem [shape: bf16[32,128], index: 2, kind: input, shape index: {}]   ;;  %s1674_s3 = inlined_call_operand.vmem [shape: bf16[32,128], index: 3, kind: output, shape index: {}]  }
   0x1   :  { %v1271_v0 = vld [vmem:[%s1671_s1 + $0x78] sm:$0xff]   ;;  %v1275_v4 = vld [vmem:[%s1671_s1 + $0x70] sm:$0xff]   ;;  %v1279_v8 = vld [vmem:[%s1671_s1 + $0x68] sm:$0xff]  }
   0x2   :  { %v1272_v1 = vld [vmem:[%s1671_s1 + $0xf8] sm:$0xff]   ;;  %1129 = vmatprep.subr.bf16.mxu0 %v1271_v0  ;;  %v1276_v5 = vld [vmem:[%s1671_s1 + $0xf0] sm:$0xff]   ;;  %v1280_v9 = vld [vmem:[%s1671_s1 + $0xe8] sm:$0xff]  }
   0x3   :  { %v1273_v2 = vld [vmem:[%s1671_s1 + $0x38] sm:$0xff]   ;;  %1157 = vmatprep.subr.bf16.mxu1 %v1272_v1  ;;  %v1277_v6 = vld [vmem:[%s1671_s1 + $0x30] sm:$0xff]   ;;  %v1281_v10 = vld [vmem:[%s1671_s1 + $0x28] sm:$0xff]  }
   0x4   :  { %v1274_v3 = vld [vmem:[%s1671_s1 + $0xb8] sm:$0xff]   ;;  %1130 = vmatpush3.bf16.msra.mxu0 %v1273_v2  ;;  %v1278_v7 = vld [vmem:[%s1671_s1 + $0xb0] sm:$0xff]   ;;  %v1282_v11 = vld [vmem:[%s1671_s1 + $0xa8] sm:$0xff]  }
   0x5   :  { %1158 = vmatpush3.bf16.msra.mxu1 %v1274_v3  ;;  %1131 = vmatprep.subr.bf16.mxu0 %v1275_v4  ;;  %v1283_v12 = vld [vmem:[%s1671_s1 + $0x60] sm:$0xff]   ;;  %v1287_v16 = vld [vmem:[%s1671_s1 + $0x58] sm:$0xff]   ;;  %v1291_v20 = vld [vmem:[%s1671_s1 + $0x50] sm:$0xff]  }
   0x6   :  { %1159 = vmatprep.subr.bf16.mxu1 %v1276_v5  ;;  %v1284_v13 = vld [vmem:[%s1671_s1 + $0xe0] sm:$0xff]   ;;  %v1288_v17 = vld [vmem:[%s1671_s1 + $0xd8] sm:$0xff]   ;;  %v1292_v21 = vld [vmem:[%s1671_s1 + $0xd0] sm:$0xff]  }
   0x7   :  { %v1285_v14 = vld [vmem:[%s1671_s1 + $0x20] sm:$0xff]   ;;  %v1289_v18 = vld [vmem:[%s1671_s1 + $0x18] sm:$0xff]   ;;  %v1293_v22 = vld [vmem:[%s1671_s1 + $0x10] sm:$0xff]  }
   0x8   :  { %1132 = vmatpush3.bf16.msra.mxu0 %v1277_v6  ;;  %v1286_v15 = vld [vmem:[%s1671_s1 + $0xa0] sm:$0xff]   ;;  %v1290_v19 = vld [vmem:[%s1671_s1 + $0x98] sm:$0xff]   ;;  %v1294_v23 = vld [vmem:[%s1671_s1 + $0x90] sm:$0xff]  }
   0x9   :  { %1160 = vmatpush3.bf16.msra.mxu1 %v1278_v7  ;;  %1133 = vmatprep.subr.bf16.mxu0 %v1279_v8  ;;  %v1295_v24 = vld [vmem:[%s1671_s1 + $0x48] sm:$0xff]   ;;  %v1299_v28 = vld [vmem:[%s1671_s1 + $0x40] sm:$0xff]   ;;  %v1309_v36 = vld [vmem:[%s1671_s1 + $0x178] sm:$0xff]  }
   0xa   :  { %1161 = vmatprep.subr.bf16.mxu1 %v1280_v9  ;;  %v1296_v25 = vld [vmem:[%s1671_s1 + $0xc8] sm:$0xff]   ;;  %v1300_v29 = vld [vmem:[%s1671_s1 + $0xc0] sm:$0xff]   ;;  %v1310_v37 = vld [vmem:[%s1671_s1 + $0x138] sm:$0xff]  }
   0xb   :  { %v1297_v26 = vld [vmem:[%s1671_s1 + $0x8] sm:$0xff]   ;;  %v1301_v30 = vld [vmem:[%s1671_s1] sm:$0xff]   ;;  %v1311_v38 = vld [vmem:[%s1671_s1 + $0x1f8] sm:$0xff]  }
   0xc   :  { %1134 = vmatpush3.bf16.msra.mxu0 %v1281_v10  ;;  %v1298_v27 = vld [vmem:[%s1671_s1 + $0x88] sm:$0xff]   ;;  %v1302_v31 = vld [vmem:[%s1671_s1 + $0x80] sm:$0xff]   ;;  %v1312_v39 = vld [vmem:[%s1671_s1 + $0x1b8] sm:$0xff]  }
   0xd   :  { %1162 = vmatpush3.bf16.msra.mxu1 %v1282_v11  ;;  %1135 = vmatprep.subr.bf16.mxu0 %v1283_v12  ;;  %v1303_v32 = vld [vmem:[%s1672_s0] ss:$36 sps:$4 sm:$0xff]   ;;  %v1306_v34 = vld [vmem:[%s1672_s0 + $0x8] ss:$36 sps:$4 sm:$0xff]   ;;  %v1313_v40 = vld [vmem:[%s1671_s1 + $0x170] sm:$0xff]  }
   0xe   :  { %1163 = vmatprep.subr.bf16.mxu1 %v1284_v13  ;;  %v1305_v33 = vld [vmem:[%s1672_s0 + $0x4] ss:$36 sps:$4 sm:$0xff]   ;;  %v1308_v35 = vld [vmem:[%s1672_s0 + $0xc] ss:$36 sps:$4 sm:$0xff]   ;;  %v1325_v52 = vld [vmem:[%s1671_s1 + $0x158] sm:$0xff]  }
   0xf   :  { %747 = vmatprep.mubr.bf16.mxu0 %v1305_v33  ;;  %796 = vmatprep.mubr.bf16.mxu1 %v1308_v35  ;;  %v1314_v41 = vld [vmem:[%s1671_s1 + $0x130] sm:$0xff]   ;;  %v1317_v44 = vld [vmem:[%s1671_s1 + $0x168] sm:$0xff]   ;;  %v1321_v48 = vld [vmem:[%s1671_s1 + $0x160] sm:$0xff]  }
  0x10   :  { %1136 = vmatpush3.bf16.msra.mxu0 %v1285_v14  ;;  %v1315_v42 = vld [vmem:[%s1671_s1 + $0x1f0] sm:$0xff]   ;;  %v1318_v45 = vld [vmem:[%s1671_s1 + $0x128] sm:$0xff]   ;;  %v1322_v49 = vld [vmem:[%s1671_s1 + $0x120] sm:$0xff]  }
  0x11   :  { %1164 = vmatpush3.bf16.msra.mxu1 %v1286_v15  ;;  %1137 = vmatprep.subr.bf16.mxu0 %v1287_v16  ;;  %v1316_v43 = vld [vmem:[%s1671_s1 + $0x1b0] sm:$0xff]   ;;  %v1319_v46 = vld [vmem:[%s1671_s1 + $0x1e8] sm:$0xff]   ;;  %v1323_v50 = vld [vmem:[%s1671_s1 + $0x1e0] sm:$0xff]  }
  0x12   :  { %1165 = vmatprep.subr.bf16.mxu1 %v1288_v17  ;;  %v1320_v47 = vld [vmem:[%s1671_s1 + $0x1a8] sm:$0xff]   ;;  %v1324_v51 = vld [vmem:[%s1671_s1 + $0x1a0] sm:$0xff]   ;;  %v1326_v53 = vld [vmem:[%s1671_s1 + $0x118] sm:$0xff]  }
  0x13   :  { %v1327_v54 = vld [vmem:[%s1672_s0 + $0x4c] ss:$36 sps:$4 sm:$0xff]   ;;  %v1329_v55 = vld [vmem:[%s1672_s0 + $0x54] ss:$36 sps:$4 sm:$0xff]   ;;  %v1343_v4 = vld [vmem:[%s1671_s1 + $0x140] sm:$0xff]  }
  0x14   :  { %1138 = vmatpush3.bf16.msra.mxu0 %v1289_v18  ;;  %v1331_v56 = vld [vmem:[%s1671_s1 + $0x1d8] sm:$0xff]   ;;  %v1332_v57 = vld [vmem:[%s1672_s0 + $0x48] ss:$36 sps:$4 sm:$0xff]   ;;  %v1333_v58 = vld [vmem:[%s1672_s0 + $0x50] ss:$36 sps:$4 sm:$0xff]  }
  0x15   :  { %1166 = vmatpush3.bf16.msra.mxu1 %v1290_v19  ;;  %1139 = vmatprep.subr.bf16.mxu0 %v1291_v20  ;;  %v1334_v59 = vld [vmem:[%s1671_s1 + $0x198] sm:$0xff]   ;;  %v1335_v60 = vld [vmem:[%s1671_s1 + $0x150] sm:$0xff]   ;;  %v1339_v0 = vld [vmem:[%s1671_s1 + $0x148] sm:$0xff]  }
  0x16   :  { %1167 = vmatprep.subr.bf16.mxu1 %v1292_v21  ;;  %v1336_v61 = vld [vmem:[%s1671_s1 + $0x110] sm:$0xff]   ;;  %v1340_v1 = vld [vmem:[%s1671_s1 + $0x108] sm:$0xff]   ;;  %v1344_v5 = vld [vmem:[%s1671_s1 + $0x100] sm:$0xff]  }
  0x17   :  { %v1337_v62 = vld [vmem:[%s1671_s1 + $0x1d0] sm:$0xff]   ;;  %v1341_v2 = vld [vmem:[%s1671_s1 + $0x1c8] sm:$0xff]   ;;  %v1345_v6 = vld [vmem:[%s1671_s1 + $0x1c0] sm:$0xff]  }
  0x18   :  { %1140 = vmatpush3.bf16.msra.mxu0 %v1293_v22  ;;  %v1338_v63 = vld [vmem:[%s1671_s1 + $0x190] sm:$0xff]   ;;  %v1342_v3 = vld [vmem:[%s1671_s1 + $0x188] sm:$0xff]   ;;  %v1349_v9 = vld [vmem:[%s1671_s1 + $0x180] sm:$0xff]  }
  0x19   :  { %1168 = vmatpush3.bf16.msra.mxu1 %v1294_v23  ;;  %1141 = vmatprep.subr.bf16.mxu0 %v1295_v24  ;;  %v1346_v7 = vld [vmem:[%s1672_s0 + $0x10] ss:$36 sps:$4 sm:$0xff]   ;;  %v1350_v10 = vld [vmem:[%s1671_s1 + $0x238] sm:$0xff]   ;;  %v1358_v16 = vld [vmem:[%s1671_s1 + $0x228] sm:$0xff]  }
  0x1a   :  { %1169 = vmatprep.subr.bf16.mxu1 %v1296_v25  ;;  %v1348_v8 = vld [vmem:[%s1672_s0 + $0x14] ss:$36 sps:$4 sm:$0xff]   ;;  %v1353_v12 = vld [vmem:[%s1672_s0 + $0x1c] ss:$36 sps:$4 sm:$0xff]   ;;  %v1359_v17 = vld [vmem:[%s1672_s0 + $0x64] ss:$36 sps:$4 sm:$0xff]  }
  0x1b   :  { %v1351_v11 = vld [vmem:[%s1672_s0 + $0x18] ss:$36 sps:$4 sm:$0xff]   ;;  %v1354_v13 = vld [vmem:[%s1671_s1 + $0x230] sm:$0xff]   ;;  %v1361_v18 = vld [vmem:[%s1672_s0 + $0x60] ss:$36 sps:$4 sm:$0xff]  }
  0x1c   :  { %1142 = vmatpush3.bf16.msra.mxu0 %v1297_v26  ;;  %v1355_v14 = vld [vmem:[%s1672_s0 + $0x5c] ss:$36 sps:$4 sm:$0xff]   ;;  %v1364_v22 = vld [vmem:[%s1671_s1 + $0x210] sm:$0xff]   ;;  %v1365_v23 = vld [vmem:[%s1671_s1 + $0x208] sm:$0xff]  }
  0x1d   :  { %1170 = vmatpush3.bf16.msra.mxu1 %v1298_v27  ;;  %1143 = vmatprep.subr.bf16.mxu0 %v1299_v28  ;;  %v1357_v15 = vld [vmem:[%s1672_s0 + $0x58] ss:$36 sps:$4 sm:$0xff]   ;;  %v1362_v19 = vld [vmem:[%s1671_s1 + $0x220] sm:$0xff]   ;;  %v1368_v25 = vld [vmem:[%s1672_s0 + $0x68] ss:$36 sps:$4 sm:$0xff]  }
  0x1e   :  { %1171 = vmatprep.subr.bf16.mxu1 %v1300_v29  ;;  %v1363_v20 = vld [vmem:[%s1671_s1 + $0x218] sm:$0xff]   ;;  %v1367_v21 = vld [vmem:[%s1672_s0 + $0x20] ss:$36 sps:$4 sm:$0xff]  }
  0x1f   :  { %v1366_v24 = vld [vmem:[%s1671_s1 + $0x200] sm:$0xff]  }
  0x20   :  { %1144 = vmatpush3.bf16.msra.mxu0 %v1301_v30 }
  0x21   :  { %1172 = vmatpush3.bf16.msra.mxu1 %v1302_v31  ;;  %1185 = vmatprep.subr.bf16.mxu0 %v1309_v36 }
  0x22   :  { %1213 = vmatprep.subr.bf16.mxu1 %v1311_v38 }
  0x23   :  { %748 = vmatmul.mubr.bf16.vlgmr.msra.gmra.mxu0 %v1303_v32 }
  0x24   :  { %797 = vmatmul.mubr.bf16.vlgmr.msra.gmra.mxu1 %v1306_v34  ;;  %1186 = vmatpush3.bf16.msra.mxu0 %v1310_v37 }
  0x25   :  { %1214 = vmatpush3.bf16.msra.mxu1 %v1312_v39  ;;  %1187 = vmatprep.subr.bf16.mxu0 %v1313_v40 }
  0x26   :  { %1215 = vmatprep.subr.bf16.mxu1 %v1315_v42  ;;  %755 = vmatprep.mubr.bf16.mxu0 %v1327_v54 }
  0x27   :  { %804 = vmatprep.mubr.bf16.mxu1 %v1329_v55 }
  0x28   :  { %1188 = vmatpush3.bf16.msra.mxu0 %v1314_v41 }
  0x29   :  { %1216 = vmatpush3.bf16.msra.mxu1 %v1316_v43  ;;  %1189 = vmatprep.subr.bf16.mxu0 %v1317_v44 }
  0x2a   :  { %1217 = vmatprep.subr.bf16.mxu1 %v1319_v46 }
  0x2b   :  { %756 = vmatmul.mubr.bf16.gmra.mxu0 %v1332_v57 }
  0x2c   :  { %1190 = vmatpush3.bf16.msra.mxu0 %v1318_v45  ;;  %805 = vmatmul.mubr.bf16.gmra.mxu1 %v1333_v58 }
  0x2d   :  { %1218 = vmatpush3.bf16.msra.mxu1 %v1320_v47  ;;  %1191 = vmatprep.subr.bf16.mxu0 %v1321_v48 }
  0x2e   :  { %1219 = vmatprep.subr.bf16.mxu1 %v1323_v50  ;;  %845 = vmatprep.mubr.bf16.mxu0 %v1348_v8 }
  0x2f   :  { %894 = vmatprep.mubr.bf16.mxu1 %v1353_v12 }
  0x30   :  { %1192 = vmatpush3.bf16.msra.mxu0 %v1322_v49 }
  0x31   :  { %1220 = vmatpush3.bf16.msra.mxu1 %v1324_v51  ;;  %1193 = vmatprep.subr.bf16.mxu0 %v1325_v52 }
  0x32   :  { %1221 = vmatprep.subr.bf16.mxu1 %v1331_v56 }
  0x34   :  { %1194 = vmatpush3.bf16.msra.mxu0 %v1326_v53 }
  0x35   :  { %1222 = vmatpush3.bf16.msra.mxu1 %v1334_v59  ;;  %1195 = vmatprep.subr.bf16.mxu0 %v1335_v60 }
  0x36   :  { %1223 = vmatprep.subr.bf16.mxu1 %v1337_v62 }
  0x38   :  { %1196 = vmatpush3.bf16.msra.mxu0 %v1336_v61 }
  0x39   :  { %1224 = vmatpush3.bf16.msra.mxu1 %v1338_v63  ;;  %1197 = vmatprep.subr.bf16.mxu0 %v1339_v0 }
  0x3a   :  { %1225 = vmatprep.subr.bf16.mxu1 %v1341_v2 }
  0x3c   :  { %1198 = vmatpush3.bf16.msra.mxu0 %v1340_v1 }
  0x3d   :  { %1226 = vmatpush3.bf16.msra.mxu1 %v1342_v3  ;;  %1199 = vmatprep.subr.bf16.mxu0 %v1343_v4 }
  0x3e   :  { %1227 = vmatprep.subr.bf16.mxu1 %v1345_v6 }
  0x40   :  { %1200 = vmatpush3.bf16.msra.mxu0 %v1344_v5 }
  0x41   :  { %1228 = vmatpush3.bf16.msra.mxu1 %v1349_v9  ;;  %1251 = vmatprep.subr.bf16.mxu0 %v1350_v10 }
  0x43   :  { %846 = vmatmul.mubr.bf16.vlgmr.msra.gmra.mxu0 %v1346_v7 }
  0x44   :  { %1252 = vmatpush3.bf16.msra.mxu0 %v1350_v10  ;;  %895 = vmatmul.mubr.bf16.vlgmr.msra.gmra.mxu1 %v1351_v11 }
  0x45   :  { %1253 = vmatprep.subr.bf16.mxu0 %v1354_v13  ;;  %853 = vmatprep.mubr.bf16.mxu0 %v1355_v14 }
  0x46   :  { %902 = vmatprep.mubr.bf16.mxu1 %v1359_v17 }
  0x48   :  { %1254 = vmatpush3.bf16.msra.mxu0 %v1354_v13 }
  0x49   :  { %1255 = vmatprep.subr.bf16.mxu0 %v1358_v16 }
  0x4b   :  { %854 = vmatmul.mubr.bf16.gmra.mxu0 %v1357_v15 }
  0x4c   :  { %1256 = vmatpush3.bf16.msra.mxu0 %v1358_v16  ;;  %903 = vmatmul.mubr.bf16.gmra.mxu1 %v1361_v18  ;;  %v1127_v16 = vld [vmem:[%s1673_s2 + $0x8] sm:$0xff]  }
  0x4d   :  { %1257 = vmatprep.subr.bf16.mxu0 %v1362_v19  ;;  %1267 = vmatprep.mubr.bf16.mxu0 %v1367_v21  ;;  %v1110_v21 = vld [vmem:[%s1673_s2] sm:$0xff]  }
  0x50   :  { %1258 = vmatpush3.bf16.msra.mxu0 %v1362_v19 }
  0x51   :  { %1259 = vmatprep.subr.bf16.mxu0 %v1363_v20 }
  0x54   :  { %1260 = vmatpush3.bf16.msra.mxu0 %v1363_v20 }
  0x55   :  { %1261 = vmatprep.subr.bf16.mxu0 %v1364_v22 }
  0x58   :  { %1262 = vmatpush3.bf16.msra.mxu0 %v1364_v22  ;;  %v1115_v22 = vunpack.c.l.bf16 %v1127_v16 }
  0x59   :  { %1263 = vmatprep.subr.bf16.mxu0 %v1365_v23 }
  0x5c   :  { %1264 = vmatpush3.bf16.msra.mxu0 %v1365_v23 }
  0x5d   :  { %1265 = vmatprep.subr.bf16.mxu0 %v1366_v24 }
  0x60   :  { %1266 = vmatpush3.bf16.msra.mxu0 %v1366_v24 }
  0x63   :  { %1268 = vmatmul.mubr.bf16.vlgmr.msra.gmra.mxu0 %v1368_v25 }
  0xe3   :  { %v1145_v26 = vpop.f32.mrf.mxu0 }
  0xe4   :  { %v1173_v27 = vpop.f32.mrf.mxu1 }
  0xe5   :  { %v1146_v28 = vpop.f32.mrf.mxu0 }
  0xe6   :  { %v1174_v29 = vpop.f32.mrf.mxu1  ;;  %v1147_v57 = vadd.f32 %v1146_v28, %v1145_v26  ;;  %v1111_v28 = vunpack.c.l.bf16 %v1110_v21 }
  0xe7   :  { %v1148_v30 = vpop.f32.mrf.mxu0  ;;  %v1175_v58 = vadd.f32 %v1174_v29, %v1173_v27  ;;  %v1116_v27 = vunpack.c.h.bf16 %v1127_v16 }
  0xe8   :  { %v1176_v31 = vpop.f32.mrf.mxu1 }
  0xe9   :  { %v1149_v32 = vpop.f32.mrf.mxu0  ;;  %v799_v5 = vadd.f32 %v1175_v58, %v1147_v57 }
  0xea   :  { %v1177_v34 = vpop.f32.mrf.mxu1  ;;  %v1150_v0 = vadd.f32 %v1149_v32, %v1148_v30 }
  0xeb   :  { %v1151_v33 = vpop.f32.mrf.mxu0  ;;  %v1178_v1 = vadd.f32 %v1177_v34, %v1176_v31 }
  0xec   :  { %v1179_v35 = vpop.f32.mrf.mxu1 }
  0xed   :  { %v1152_v36 = vpop.f32.mrf.mxu0  ;;  %v802_v11 = vadd.f32 %v1178_v1, %v1150_v0 }
  0xee   :  { %v1180_v37 = vpop.f32.mrf.mxu1  ;;  %v1153_v55 = vadd.f32 %v1152_v36, %v1151_v33  ;;  %v1112_v33 = vunpack.c.h.bf16 %v1110_v21 }
  0xef   :  { %v1154_v38 = vpop.f32.mrf.mxu0  ;;  %v1181_v56 = vadd.f32 %v1180_v37, %v1179_v35 }
  0xf0   :  { %v1182_v39 = vpop.f32.mrf.mxu1 }
  0xf1   :  { %v1155_v40 = vpop.f32.mrf.mxu0  ;;  %v807_v2 = vadd.f32 %v1181_v56, %v1153_v55 }
  0xf2   :  { %v1183_v42 = vpop.f32.mrf.mxu1  ;;  %v1156_v61 = vadd.f32 %v1155_v40, %v1154_v38 }
  0xf3   :  { %v1184_v62 = vadd.f32 %v1183_v42, %v1182_v39 }
  0xf5   :  { %v810_v7 = vadd.f32 %v1184_v62, %v1156_v61 }
 0x103   :  { %v1201_v41 = vpop.f32.mrf.mxu0 }
 0x104   :  { %v1229_v44 = vpop.f32.mrf.mxu1 }
 0x105   :  { %v1202_v43 = vpop.f32.mrf.mxu0 }
 0x106   :  { %v1230_v46 = vpop.f32.mrf.mxu1  ;;  %v1203_v3 = vadd.f32 %v1202_v43, %v1201_v41 }
 0x107   :  { %v1204_v45 = vpop.f32.mrf.mxu0  ;;  %v1231_v13 = vadd.f32 %v1230_v46, %v1229_v44 }
 0x108   :  { %v1232_v48 = vpop.f32.mrf.mxu1  ;;  %v848_v12 = vadd.f32 %v1203_v3, %v799_v5 }
 0x109   :  { %v1205_v47 = vpop.f32.mrf.mxu0 }
 0x10a   :  { %v1233_v50 = vpop.f32.mrf.mxu1  ;;  %v1206_v8 = vadd.f32 %v1205_v47, %v1204_v45  ;;  %v897_v25 = vadd.f32 %v1231_v13, %v848_v12 }
 0x10b   :  { %v1207_v49 = vpop.f32.mrf.mxu0  ;;  %v1234_v19 = vadd.f32 %v1233_v50, %v1232_v48 }
 0x10c   :  { %v1235_v52 = vpop.f32.mrf.mxu1  ;;  %v851_v18 = vadd.f32 %v1206_v8, %v802_v11 }
 0x10d   :  { %v1208_v51 = vpop.f32.mrf.mxu0 }
 0x10e   :  { %v1236_v54 = vpop.f32.mrf.mxu1  ;;  %v1209_v63 = vadd.f32 %v1208_v51, %v1207_v49  ;;  %v900_v32 = vadd.f32 %v1234_v19, %v851_v18 }
 0x10f   :  { %v1210_v53 = vpop.f32.mrf.mxu0  ;;  %v1237_v10 = vadd.f32 %v1236_v54, %v1235_v52 }
 0x110   :  { %v1238_v60 = vpop.f32.mrf.mxu1  ;;  %v856_v9 = vadd.f32 %v1209_v63, %v807_v2 }
 0x111   :  { %v1211_v59 = vpop.f32.mrf.mxu0 }
 0x112   :  { %v1212_v4 = vadd.f32 %v1211_v59, %v1210_v53  ;;  %v1239_v6 = vpop.f32.mrf.mxu1  ;;  %v905_v20 = vadd.f32 %v1237_v10, %v856_v9 }
 0x113   :  { %v1240_v15 = vadd.f32 %v1239_v6, %v1238_v60 }
 0x114   :  { %v859_v14 = vadd.f32 %v1212_v4, %v810_v7 }
 0x116   :  { %v908_v26 = vadd.f32 %v1240_v15, %v859_v14 }
 0x123   :  { %v1269_v17 = vpop.f32.mrf.mxu0 }
 0x124   :  { %v954_v24 = vadd.f32 %v1269_v17, %v905_v20 }
 0x125   :  { %v945_v23 = vpop.f32.mrf.mxu0 }
 0x126   :  { %v946_v30 = vadd.f32 %v945_v23, %v897_v25  ;;  %v985_v35 = vadd.f32 %v1115_v22, %v954_v24 }
 0x127   :  { %v1270_v29 = vpop.f32.mrf.mxu0 }
 0x128   :  { %v957_v31 = vadd.f32 %v1270_v29, %v908_v26  ;;  %v983_v38 = vadd.f32 %v1111_v28, %v946_v30 }
 0x129   :  { %v948_v34 = vpop.f32.mrf.mxu0 }
 0x12a   :  { %v986_v36 = vadd.f32 %v1116_v27, %v957_v31  ;;  %v949_v37 = vadd.f32 %v948_v34, %v900_v32 }
 0x12c   :  { %v1125_v39 = vpack.c.bf16 %v986_v36, %v985_v35  ;;  %v984_v40 = vadd.f32 %v1112_v33, %v949_v37 }
 0x12e   :  { %1128 = vst [vmem:[%s1674_s3 + $0x8] sm:$0xff] %v1125_v39   ;;  %v1120_v41 = vpack.c.bf16 %v984_v40, %v983_v38 }
 0x130   :  { %1121 = vst [vmem:[%s1674_s3] sm:$0xff] %v1120_v41  }

// kernel: forward.35
= control target key start
LH: loop header
LB: loop body
LE: loop exit
PB: predicated region body
PF: predicated region fallthrough
CT: control target
= control target key end

     0   :  { %s866_s12 = smov 0   ;;  %s868_s13 = smov 0   ;;  %s948_s0 = inlined_call_operand.vmem [shape: bf16[8,2304], index: 0, kind: input, shape index: {}]   ;;  %s949_s1 = inlined_call_operand.vmem [shape: bf16[2304,256], index: 1, kind: input, shape index: {}]   ;;  %s950_s2 = inlined_call_operand.vmem [shape: bf16[8,256], index: 2, kind: input, shape index: {}]   ;;  %s951_s3 = inlined_call_operand.vmem [shape: bf16[8,256], index: 3, kind: output, shape index: {}]  }
   0x1   :  { %s870_s14 = smov 0  }
   0x2 LB: > { %s25_s15 = sadd.s32 1, %s839_s13  ;;  %p697_p0 = scmp.ge.s32.totalorder %s843_s14, 1  ;;  %s843_s14 = sphi %s870_s14, %s13_s14   ;;  %s839_s13 = sphi %s868_s13, %s953_s13   ;;  %s835_s12 = sphi %s866_s12, %s952_s12  }
   0x3   : > { %p26_p1 = scmp.ge.s32.totalorder %s25_s15, 9  ;;  %p201_p2 = scmp.lt.s32.totalorder %s843_s14, 10 }
   0x5   : > { %s955_s15 = smov (%p26_p1, %s25_s15), 0  ;;  %p202_p3 = pnand %p697_p0, %p201_p2 }
   0x6   : > { %s698_s16 = sshll.u32 (!%p202_p3), %s835_s12, 1  ;;  %s700_s17 = sshll.u32 (!%p202_p3), %s835_s12, 5 }
   0x7   : > { %205 = sbr.rel (%p202_p3) target bundleno = 297 (0x129), region = 32  ;;  %p255_p4 = scmp.lt.s32.totalorder (!%p202_p3), %s698_s16, 17 }
   0x8   : > { %p264_p5 = scmp.lt.s32.totalorder (!%p202_p3), %s700_s17, 287  ;;  %p703_p6 = scmp.ne.s32.totalorder (!%p202_p3), %s835_s12, 0 }
   0xc   : > { %s957_s16 = smov (!%p255_p4, %s698_s16), 17  ;;  %s959_s17 = smov (!%p264_p5, %s700_s17), 287 }
   0xd   : > { %s699_s18 = sshll.u32 %s957_s16, 2  ;;  %s744_s22 = sshll.u32 %s959_s17, 3 }
   0xe   : > { %s891_s21 = scalar_lea.vmem %s948_s0, %s699_s18  ;;  %s896_s25 = scalar_lea.vmem %s949_s1, %s744_s22 }
   0xf   : > { %297 = sbr.rel (%p703_p6) target bundleno = 22 (0x16), region = 36 }
  0x14   : > { %v845_v0 = vmov 0.0  }
  0x15   : > { %298 = vst [vmem:[#allocation2] sm:$0xff] %v845_v0  ;;  %299 = vst [vmem:[#allocation2 + $0x8] sm:$0xff] %v845_v0 }
  0x16 PF: > { %v771_v1 = vld [vmem:[%s896_s25 + $0x74] ss:$8 sps:$4 sm:$0xff]   ;;  %v773_v2 = vld [vmem:[%s896_s25 + $0x70] ss:$8 sps:$4 sm:$0xff]   ;;  %v774_v3 = vld [vmem:[%s896_s25 + $0x64] ss:$8 sps:$4 sm:$0xff]  }
  0x17   : > { %502 = vmatprep.subr.bf16.mxu0 %v771_v1  ;;  %v776_v4 = vld [vmem:[%s896_s25 + $0x60] ss:$8 sps:$4 sm:$0xff]   ;;  %v777_v5 = vld [vmem:[%s896_s25 + $0x54] ss:$8 sps:$4 sm:$0xff]   ;;  %v779_v6 = vld [vmem:[%s896_s25 + $0x50] ss:$8 sps:$4 sm:$0xff]  }
  0x18   : > { %503 = vmatpush1.bf16.msra.mxu0 %v773_v2  ;;  %v780_v7 = vld [vmem:[%s896_s25 + $0x44] ss:$8 sps:$4 sm:$0xff]   ;;  %v782_v8 = vld [vmem:[%s896_s25 + $0x40] ss:$8 sps:$4 sm:$0xff]   ;;  %v783_v9 = vld [vmem:[%s896_s25 + $0x34] ss:$8 sps:$4 sm:$0xff]  }
  0x19   : > { %504 = vmatprep.subr.bf16.mxu0 %v774_v3  ;;  %v785_v10 = vld [vmem:[%s896_s25 + $0x30] ss:$8 sps:$4 sm:$0xff]   ;;  %v786_v11 = vld [vmem:[%s896_s25 + $0x24] ss:$8 sps:$4 sm:$0xff]   ;;  %v788_v12 = vld [vmem:[%s896_s25 + $0x20] ss:$8 sps:$4 sm:$0xff]  }
  0x1a   : > { %v789_v13 = vld [vmem:[%s896_s25 + $0x14] ss:$8 sps:$4 sm:$0xff]   ;;  %v302_v14 = vld [vmem:[%s891_s21] sm:$0xff]  ;;  %v791_v16 = vld [vmem:[%s896_s25 + $0x10] ss:$8 sps:$4 sm:$0xff]   ;;  %p738_p7 = scmp.ne.s32.totalorder %s835_s12, 8 }
  0x1b   : > { %v705_v15 = vcombine.high %v302_v14, %v302_v14  ;;  %v792_v17 = vld [vmem:[%s896_s25 + $0x4] ss:$8 sps:$4 sm:$0xff]   ;;  %v794_v18 = vld [vmem:[%s896_s25] ss:$8 sps:$4 sm:$0xff]   ;;  %v795_v19 = vld [vmem:[%s896_s25 + $0xf4] ss:$8 sps:$4 sm:$0xff]   ;;  %v704_v35 = vcombine.low %v302_v14, %v302_v14 }
  0x1c   : > { %505 = vmatpush1.bf16.msra.mxu0 %v776_v4  ;;  %v797_v20 = vld [vmem:[%s896_s25 + $0xf0] ss:$8 sps:$4 sm:$0xff]   ;;  %v798_v21 = vld [vmem:[%s896_s25 + $0xe4] ss:$8 sps:$4 sm:$0xff]   ;;  %v800_v22 = vld [vmem:[%s896_s25 + $0xe0] ss:$8 sps:$4 sm:$0xff]  }
  0x1d   : > { %506 = vmatprep.subr.bf16.mxu0 %v777_v5  ;;  %534 = vmatprep.mubr.bf16.mxu0 %v705_v15  ;;  %v801_v23 = vld [vmem:[%s896_s25 + $0xd4] ss:$8 sps:$4 sm:$0xff]   ;;  %v803_v24 = vld [vmem:[%s896_s25 + $0xd0] ss:$8 sps:$4 sm:$0xff]   ;;  %v804_v25 = vld [vmem:[%s896_s25 + $0xc4] ss:$8 sps:$4 sm:$0xff]  }
  0x1e   : > { %v806_v26 = vld [vmem:[%s896_s25 + $0xc0] ss:$8 sps:$4 sm:$0xff]   ;;  %v807_v27 = vld [vmem:[%s896_s25 + $0xb4] ss:$8 sps:$4 sm:$0xff]   ;;  %v809_v28 = vld [vmem:[%s896_s25 + $0xb0] ss:$8 sps:$4 sm:$0xff]  }
  0x1f   : > { %v810_v29 = vld [vmem:[%s896_s25 + $0xa4] ss:$8 sps:$4 sm:$0xff]   ;;  %v812_v30 = vld [vmem:[%s896_s25 + $0xa0] ss:$8 sps:$4 sm:$0xff]   ;;  %v813_v31 = vld [vmem:[%s896_s25 + $0x94] ss:$8 sps:$4 sm:$0xff]  }
  0x20   : > { %507 = vmatpush1.bf16.msra.mxu0 %v779_v6  ;;  %v815_v32 = vld [vmem:[%s896_s25 + $0x90] ss:$8 sps:$4 sm:$0xff]   ;;  %v816_v33 = vld [vmem:[%s896_s25 + $0x84] ss:$8 sps:$4 sm:$0xff]   ;;  %v818_v34 = vld [vmem:[%s896_s25 + $0x80] ss:$8 sps:$4 sm:$0xff]  }
  0x21   : > { %508 = vmatprep.subr.bf16.mxu0 %v780_v7  ;;  %v300_v36 = vld [vmem:[#allocation2] sm:$0xff]  ;;  %v301_v38 = vld [vmem:[#allocation2 + $0x8] sm:$0xff] }
  0x24   : > { %509 = vmatpush1.bf16.msra.mxu0 %v782_v8 }
  0x25   : > { %510 = vmatprep.subr.bf16.mxu0 %v783_v9 }
  0x28   : > { %511 = vmatpush1.bf16.msra.mxu0 %v785_v10 }
  0x29   : > { %512 = vmatprep.subr.bf16.mxu0 %v786_v11 }
  0x2c   : > { %513 = vmatpush1.bf16.msra.mxu0 %v788_v12 }
  0x2d   : > { %514 = vmatprep.subr.bf16.mxu0 %v789_v13 }
  0x30   : > { %515 = vmatpush1.bf16.msra.mxu0 %v791_v16 }
  0x31   : > { %516 = vmatprep.subr.bf16.mxu0 %v792_v17 }
  0x34   : > { %517 = vmatpush1.bf16.msra.mxu0 %v794_v18 }
  0x35   : > { %518 = vmatprep.subr.bf16.mxu0 %v795_v19 }
  0x38   : > { %519 = vmatpush2.bf16.msra.mxu0 %v797_v20 }
  0x39   : > { %520 = vmatprep.subr.bf16.mxu0 %v798_v21 }
  0x3c   : > { %521 = vmatpush2.bf16.msra.mxu0 %v800_v22 }
  0x3d   : > { %522 = vmatprep.subr.bf16.mxu0 %v801_v23 }
  0x40   : > { %523 = vmatpush2.bf16.msra.mxu0 %v803_v24 }
  0x41   : > { %524 = vmatprep.subr.bf16.mxu0 %v804_v25 }
  0x44   : > { %525 = vmatpush2.bf16.msra.mxu0 %v806_v26 }
  0x45   : > { %526 = vmatprep.subr.bf16.mxu0 %v807_v27 }
  0x48   : > { %527 = vmatpush2.bf16.msra.mxu0 %v809_v28 }
  0x49   : > { %528 = vmatprep.subr.bf16.mxu0 %v810_v29 }
  0x4c   : > { %529 = vmatpush2.bf16.msra.mxu0 %v812_v30 }
  0x4d   : > { %530 = vmatprep.subr.bf16.mxu0 %v813_v31 }
  0x50   : > { %531 = vmatpush2.bf16.msra.mxu0 %v815_v32 }
  0x51   : > { %532 = vmatprep.subr.bf16.mxu0 %v816_v33 }
  0x54   : > { %533 = vmatpush2.bf16.msra.mxu0 %v818_v34 }
  0x57   : > { %535 = vmatmul.mubr.bf16.vlgmr.msra.gmra.mxu0 %v704_v35 }
 0x117   : > { %v536_v37 = vpop.f32.mrf.mxu0 }
 0x118   : > { %v543_v39 = vadd.f32 %v536_v37, %v300_v36 }
 0x119   : > { %v538_v40 = vpop.f32.mrf.mxu0  ;;  %550 = sbr.rel (%p738_p7) target bundleno = 297 (0x129), region = 40 }
 0x11a   : > { %545 = vst [vmem:[#allocation2] sm:$0xff] %v543_v39  ;;  %v544_v41 = vadd.f32 %v538_v40, %v301_v38 }
 0x11b   : > { %v540_v42 = vpop.f32.mrf.mxu0 }
 0x11c   : > { %546 = vst [vmem:[#allocation2 + $0x8] sm:$0xff] %v544_v41 }
 0x11d   : > { %v541_v43 = vpop.f32.mrf.mxu0 }
 0x11e   : > { %v553_v46 = vld [vmem:[%s950_s2] sm:$0xff] }
 0x11f   : > { %v554_v47 = vunpack.c.l.bf16 %v553_v46  ;;  %v555_v48 = vunpack.c.h.bf16 %v553_v46 }
 0x121   : > { %v551_v44 = vld [vmem:[#allocation2] sm:$0xff] }
 0x122   : > { %v556_v49 = vadd.f32 %v554_v47, %v551_v44 }
 0x123   : > { %v552_v45 = vld [vmem:[#allocation2 + $0x8] sm:$0xff] }
 0x124   : > { %v557_v50 = vadd.f32 %v555_v48, %v552_v45 }
 0x126   : > { %v745_v51 = vpack.c.bf16 %v557_v50, %v556_v49 }
 0x128   : > { %566 = vst [vmem:[%s951_s3] sm:$0xff] %v745_v51 }
 0x129 PF: > { %s13_s14 = sadd.s32 1, %s843_s14   ;;  %s952_s12 = smov %s839_s13 }
 0x12a   : > { %p10_p8 = scmp.ge.s32.totalorder %s13_s14, 11   ;;  %s953_s13 = smov %s955_s15 }
 0x12c   :  { %12 = sbr.rel (!%p10_p8) target bundleno = 2 (0x2), region = 76 }

// kernel: forward.38
= control target key start
LH: loop header
LB: loop body
LE: loop exit
PB: predicated region body
PF: predicated region fallthrough
CT: control target
= control target key end

     0   :  { %v27_v0 = vlaneseq  ;;  %v66_v4 = vmov 1983009808   ;;  %v67_v15 = vmov 1966171168   ;;  %s93_s0 = inlined_call_operand.vmem [shape: bf16[4,2,256], index: 0, kind: input, shape index: {}]   ;;  %s94_s1 = inlined_call_operand.vmem [shape: bf16[2,256], index: 1, kind: output, shape index: {}]  }
   0x1   :  { %v8_v1 = vld [vmem:[%s93_s0] sm:$0x3]  ;;  %v59_v2 = vld [vmem:[%s93_s0 + $0x2] sm:$0x3]  ;;  %v60_v3 = vld [vmem:[%s93_s0 + $0x4] sm:$0x3]  ;;  %v25_v5 = vunpack.c.l.s4 %v66_v4  ;;  %v40_v16 = vunpack.c.l.s4 %v67_v15 }
   0x2   :  { %v9_v6 = vunpack.c.l.bf16 %v8_v1  ;;  %v12_v7 = vunpack.c.l.bf16 %v59_v2  ;;  %v16_v8 = vunpack.c.l.bf16 %v60_v3  ;;  %v61_v9 = vld [vmem:[%s93_s0 + $0x6] sm:$0x3]  ;;  %v28_v13 = vshrl.u32 %v27_v0, 7 }
   0x3   :  { %v20_v11 = vunpack.c.l.bf16 %v61_v9  ;;  %v26_v12 = vunpack.c.0.s8 %v25_v5  ;;  %v41_v20 = vunpack.c.0.s8 %v40_v16 }
   0x4   :  { %v13_v10 = vadd.f32 %v12_v7, %v9_v6 }
   0x5   :  { %v29_v18 = vsub.s32 %v26_v12, %v28_v13  ;;  %v44_v23 = vsub.s32 %v41_v20, %v28_v13 }
   0x6   :  { %v17_v14 = vadd.f32 %v16_v8, %v13_v10 }
   0x8   :  { %v21_v17 = vadd.f32 %v20_v11, %v17_v14 }
   0xa   :  { %v22_v19 = vmul.f32 0.25, %v21_v17 }
   0xc   :  { %v30_v21 = vrot.slane %v22_v19, %v29_v18 }
   0xe   :  { %v31_v22 = vcombine.high %v30_v21, %v30_v21 }
  0x10   :  { %v62_v24 = vpack.c.bf16 %v31_v22, %v30_v21 }
  0x12   :  { %v45_v25 = vrot.slane %v62_v24, %v44_v23 }
  0x14   :  { %63 = vst.sshfl [vmem:[%s94_s1] sm:$0x5 pattern:$0x73625140] %v45_v25 }

// kernel: forward.32
= control target key start
LH: loop header
LB: loop body
LE: loop exit
PB: predicated region body
PF: predicated region fallthrough
CT: control target
= control target key end

     0   :  { %s2059_s1 = inlined_call_operand.vmem [shape: bf16[1152,256], index: 1, kind: input, shape index: {}]   ;;  %s2060_s0 = inlined_call_operand.vmem [shape: bf16[8,1152], index: 0, kind: input, shape index: {}]   ;;  %s2061_s2 = inlined_call_operand.vmem [shape: f32[1,256], index: 2, kind: input, shape index: {}]   ;;  %s2062_s3 = inlined_call_operand.vmem [shape: f32[1,256], index: 3, kind: input, shape index: {}]   ;;  %s2063_s4 = inlined_call_operand.vmem [shape: bf16[8,256], index: 4, kind: output, shape index: {}]  }
   0x1   :  { %v1340_v0 = vld [vmem:[%s2059_s1 + $0x74] ss:$8 sps:$4 sm:$0xff]   ;;  %v1344_v2 = vld [vmem:[%s2059_s1 + $0x70] ss:$8 sps:$4 sm:$0xff]   ;;  %v1346_v4 = vld [vmem:[%s2059_s1 + $0x64] ss:$8 sps:$4 sm:$0xff]  }
   0x2   :  { %v1342_v1 = vld [vmem:[%s2059_s1 + $0x174] ss:$8 sps:$4 sm:$0xff]   ;;  %927 = vmatprep.subr.bf16.mxu0 %v1340_v0  ;;  %v1345_v3 = vld [vmem:[%s2059_s1 + $0x170] ss:$8 sps:$4 sm:$0xff]   ;;  %v1348_v5 = vld [vmem:[%s2059_s1 + $0x164] ss:$8 sps:$4 sm:$0xff]  }
   0x3   :  { %968 = vmatprep.subr.bf16.mxu1 %v1342_v1  ;;  %928 = vmatpush1.bf16.msra.mxu0 %v1344_v2  ;;  %v1350_v6 = vld [vmem:[%s2059_s1 + $0x60] ss:$8 sps:$4 sm:$0xff]   ;;  %v1352_v8 = vld [vmem:[%s2059_s1 + $0x54] ss:$8 sps:$4 sm:$0xff]   ;;  %v1356_v10 = vld [vmem:[%s2059_s1 + $0x50] ss:$8 sps:$4 sm:$0xff]  }
   0x4   :  { %969 = vmatpush1.bf16.msra.mxu1 %v1345_v3  ;;  %929 = vmatprep.subr.bf16.mxu0 %v1346_v4  ;;  %v1351_v7 = vld [vmem:[%s2059_s1 + $0x160] ss:$8 sps:$4 sm:$0xff]   ;;  %v1354_v9 = vld [vmem:[%s2059_s1 + $0x154] ss:$8 sps:$4 sm:$0xff]   ;;  %v1357_v11 = vld [vmem:[%s2059_s1 + $0x150] ss:$8 sps:$4 sm:$0xff]  }
   0x5   :  { %970 = vmatprep.subr.bf16.mxu1 %v1348_v5  ;;  %v1358_v12 = vld [vmem:[%s2059_s1 + $0x44] ss:$8 sps:$4 sm:$0xff]   ;;  %v1362_v14 = vld [vmem:[%s2059_s1 + $0x40] ss:$8 sps:$4 sm:$0xff]   ;;  %v1364_v16 = vld [vmem:[%s2059_s1 + $0x34] ss:$8 sps:$4 sm:$0xff]  }
   0x6   :  { %v1360_v13 = vld [vmem:[%s2059_s1 + $0x144] ss:$8 sps:$4 sm:$0xff]   ;;  %v1363_v15 = vld [vmem:[%s2059_s1 + $0x140] ss:$8 sps:$4 sm:$0xff]   ;;  %v1366_v17 = vld [vmem:[%s2059_s1 + $0x134] ss:$8 sps:$4 sm:$0xff]  }
   0x7   :  { %930 = vmatpush1.bf16.msra.mxu0 %v1350_v6  ;;  %v1368_v18 = vld [vmem:[%s2059_s1 + $0x30] ss:$8 sps:$4 sm:$0xff]   ;;  %v1370_v20 = vld [vmem:[%s2059_s1 + $0x24] ss:$8 sps:$4 sm:$0xff]   ;;  %v1374_v22 = vld [vmem:[%s2059_s1 + $0x20] ss:$8 sps:$4 sm:$0xff]  }
   0x8   :  { %971 = vmatpush1.bf16.msra.mxu1 %v1351_v7  ;;  %931 = vmatprep.subr.bf16.mxu0 %v1352_v8  ;;  %v1369_v19 = vld [vmem:[%s2059_s1 + $0x130] ss:$8 sps:$4 sm:$0xff]   ;;  %v1372_v21 = vld [vmem:[%s2059_s1 + $0x124] ss:$8 sps:$4 sm:$0xff]   ;;  %v1375_v23 = vld [vmem:[%s2059_s1 + $0x120] ss:$8 sps:$4 sm:$0xff]  }
   0x9   :  { %972 = vmatprep.subr.bf16.mxu1 %v1354_v9  ;;  %v1376_v24 = vld [vmem:[%s2059_s1 + $0x14] ss:$8 sps:$4 sm:$0xff]   ;;  %v1380_v26 = vld [vmem:[%s2059_s1 + $0x10] ss:$8 sps:$4 sm:$0xff]   ;;  %v1382_v28 = vld [vmem:[%s2059_s1 + $0x4] ss:$8 sps:$4 sm:$0xff]  }
   0xa   :  { %v1378_v25 = vld [vmem:[%s2059_s1 + $0x114] ss:$8 sps:$4 sm:$0xff]   ;;  %v1381_v27 = vld [vmem:[%s2059_s1 + $0x110] ss:$8 sps:$4 sm:$0xff]   ;;  %v1384_v29 = vld [vmem:[%s2059_s1 + $0x104] ss:$8 sps:$4 sm:$0xff]  }
   0xb   :  { %932 = vmatpush1.bf16.msra.mxu0 %v1356_v10  ;;  %v1386_v30 = vld [vmem:[%s2059_s1] ss:$8 sps:$4 sm:$0xff]   ;;  %v1388_v32 = vld [vmem:[%s2059_s1 + $0xf4] ss:$8 sps:$4 sm:$0xff]   ;;  %v1392_v34 = vld [vmem:[%s2059_s1 + $0xf0] ss:$8 sps:$4 sm:$0xff]  }
   0xc   :  { %973 = vmatpush1.bf16.msra.mxu1 %v1357_v11  ;;  %933 = vmatprep.subr.bf16.mxu0 %v1358_v12  ;;  %v1387_v31 = vld [vmem:[%s2059_s1 + $0x100] ss:$8 sps:$4 sm:$0xff]   ;;  %v1390_v33 = vld [vmem:[%s2059_s1 + $0x1f4] ss:$8 sps:$4 sm:$0xff]   ;;  %v1393_v35 = vld [vmem:[%s2059_s1 + $0x1f0] ss:$8 sps:$4 sm:$0xff]  }
   0xd   :  { %974 = vmatprep.subr.bf16.mxu1 %v1360_v13  ;;  %v1394_v36 = vld [vmem:[%s2059_s1 + $0xe4] ss:$8 sps:$4 sm:$0xff]   ;;  %v1398_v38 = vld [vmem:[%s2059_s1 + $0xe0] ss:$8 sps:$4 sm:$0xff]   ;;  %v1400_v40 = vld [vmem:[%s2059_s1 + $0xd4] ss:$8 sps:$4 sm:$0xff]  }
   0xe   :  { %v1396_v37 = vld [vmem:[%s2059_s1 + $0x1e4] ss:$8 sps:$4 sm:$0xff]   ;;  %v1399_v39 = vld [vmem:[%s2059_s1 + $0x1e0] ss:$8 sps:$4 sm:$0xff]   ;;  %v1402_v41 = vld [vmem:[%s2059_s1 + $0x1d4] ss:$8 sps:$4 sm:$0xff]  }
   0xf   :  { %934 = vmatpush1.bf16.msra.mxu0 %v1362_v14  ;;  %v1404_v42 = vld [vmem:[%s2059_s1 + $0xd0] ss:$8 sps:$4 sm:$0xff]   ;;  %v1406_v44 = vld [vmem:[%s2059_s1 + $0xc4] ss:$8 sps:$4 sm:$0xff]   ;;  %v1410_v49 = vld [vmem:[%s2059_s1 + $0xc0] ss:$8 sps:$4 sm:$0xff]  }
  0x10   :  { %975 = vmatpush1.bf16.msra.mxu1 %v1363_v15  ;;  %935 = vmatprep.subr.bf16.mxu0 %v1364_v16  ;;  %v1405_v43 = vld [vmem:[%s2059_s1 + $0x1d0] ss:$8 sps:$4 sm:$0xff]   ;;  %v1408_v45 = vld [vmem:[%s2059_s1 + $0x1c4] ss:$8 sps:$4 sm:$0xff]   ;;  %v1411_v50 = vld [vmem:[%s2059_s1 + $0x1c0] ss:$8 sps:$4 sm:$0xff]  }
  0x11   :  { %976 = vmatprep.subr.bf16.mxu1 %v1366_v17  ;;  %v26_v46 = vld [vmem:[%s2060_s0] sm:$0xff]  ;;  %v27_v48 = vld [vmem:[%s2060_s0 + $0x8] sm:$0xff]  ;;  %v1412_v52 = vld [vmem:[%s2059_s1 + $0xb4] ss:$8 sps:$4 sm:$0xff]  }
  0x12   :  { %v1185_v47 = vcombine.high %v26_v46, %v26_v46  ;;  %v1187_v51 = vcombine.high %v27_v48, %v27_v48  ;;  %v1414_v53 = vld [vmem:[%s2059_s1 + $0x1b4] ss:$8 sps:$4 sm:$0xff]   ;;  %v1416_v54 = vld [vmem:[%s2059_s1 + $0xb0] ss:$8 sps:$4 sm:$0xff]   ;;  %v1418_v56 = vld [vmem:[%s2059_s1 + $0xa4] ss:$8 sps:$4 sm:$0xff]   ;;  %v1184_v6 = vcombine.low %v26_v46, %v26_v46  ;;  %v1186_v7 = vcombine.low %v27_v48, %v27_v48 }
  0x13   :  { %936 = vmatpush1.bf16.msra.mxu0 %v1368_v18  ;;  %v1417_v55 = vld [vmem:[%s2059_s1 + $0x1b0] ss:$8 sps:$4 sm:$0xff]   ;;  %v1420_v57 = vld [vmem:[%s2059_s1 + $0x1a4] ss:$8 sps:$4 sm:$0xff]   ;;  %v1422_v58 = vld [vmem:[%s2059_s1 + $0xa0] ss:$8 sps:$4 sm:$0xff]  }
  0x14   :  { %977 = vmatpush1.bf16.msra.mxu1 %v1369_v19  ;;  %937 = vmatprep.subr.bf16.mxu0 %v1370_v20  ;;  %v1423_v59 = vld [vmem:[%s2059_s1 + $0x1a0] ss:$8 sps:$4 sm:$0xff]   ;;  %v1424_v60 = vld [vmem:[%s2059_s1 + $0x94] ss:$8 sps:$4 sm:$0xff]   ;;  %v1428_v62 = vld [vmem:[%s2059_s1 + $0x90] ss:$8 sps:$4 sm:$0xff]  }
  0x15   :  { %978 = vmatprep.subr.bf16.mxu1 %v1372_v21  ;;  %959 = vmatprep.mubr.bf16.mxu0 %v1185_v47  ;;  %v1426_v61 = vld [vmem:[%s2059_s1 + $0x194] ss:$8 sps:$4 sm:$0xff]   ;;  %v1429_v63 = vld [vmem:[%s2059_s1 + $0x190] ss:$8 sps:$4 sm:$0xff]   ;;  %v1430_v0 = vld [vmem:[%s2059_s1 + $0x84] ss:$8 sps:$4 sm:$0xff]  }
  0x16   :  { %1000 = vmatprep.mubr.bf16.mxu1 %v1187_v51  ;;  %v1432_v1 = vld [vmem:[%s2059_s1 + $0x184] ss:$8 sps:$4 sm:$0xff]   ;;  %v1434_v2 = vld [vmem:[%s2059_s1 + $0x80] ss:$8 sps:$4 sm:$0xff]   ;;  %v1442_v4 = vld [vmem:[%s2059_s1 + $0x274] ss:$8 sps:$4 sm:$0xff]  }
  0x17   :  { %938 = vmatpush1.bf16.msra.mxu0 %v1374_v22  ;;  %v1435_v3 = vld [vmem:[%s2059_s1 + $0x180] ss:$8 sps:$4 sm:$0xff]   ;;  %v1445_v5 = vld [vmem:[%s2059_s1 + $0x374] ss:$8 sps:$4 sm:$0xff]   ;;  %v1440_v8 = vld [vmem:[%s2059_s1 + $0x270] ss:$8 sps:$4 sm:$0xff]  }
  0x18   :  { %979 = vmatpush1.bf16.msra.mxu1 %v1375_v23  ;;  %939 = vmatprep.subr.bf16.mxu0 %v1376_v24  ;;  %v1443_v9 = vld [vmem:[%s2059_s1 + $0x370] ss:$8 sps:$4 sm:$0xff]   ;;  %v1448_v10 = vld [vmem:[%s2059_s1 + $0x264] ss:$8 sps:$4 sm:$0xff]   ;;  %v1446_v12 = vld [vmem:[%s2059_s1 + $0x260] ss:$8 sps:$4 sm:$0xff]  }
  0x19   :  { %980 = vmatprep.subr.bf16.mxu1 %v1378_v25  ;;  %v1451_v11 = vld [vmem:[%s2059_s1 + $0x364] ss:$8 sps:$4 sm:$0xff]   ;;  %v1449_v13 = vld [vmem:[%s2059_s1 + $0x360] ss:$8 sps:$4 sm:$0xff]   ;;  %v1454_v14 = vld [vmem:[%s2059_s1 + $0x254] ss:$8 sps:$4 sm:$0xff]  }
  0x1a   :  { %v1457_v15 = vld [vmem:[%s2059_s1 + $0x354] ss:$8 sps:$4 sm:$0xff]   ;;  %v1452_v16 = vld [vmem:[%s2059_s1 + $0x250] ss:$8 sps:$4 sm:$0xff]   ;;  %v1460_v18 = vld [vmem:[%s2059_s1 + $0x244] ss:$8 sps:$4 sm:$0xff]  }
  0x1b   :  { %940 = vmatpush1.bf16.msra.mxu0 %v1380_v26  ;;  %v1455_v17 = vld [vmem:[%s2059_s1 + $0x350] ss:$8 sps:$4 sm:$0xff]   ;;  %v1463_v19 = vld [vmem:[%s2059_s1 + $0x344] ss:$8 sps:$4 sm:$0xff]   ;;  %v1458_v20 = vld [vmem:[%s2059_s1 + $0x240] ss:$8 sps:$4 sm:$0xff]  }
  0x1c   :  { %981 = vmatpush1.bf16.msra.mxu1 %v1381_v27  ;;  %941 = vmatprep.subr.bf16.mxu0 %v1382_v28  ;;  %v1461_v21 = vld [vmem:[%s2059_s1 + $0x340] ss:$8 sps:$4 sm:$0xff]   ;;  %v1466_v22 = vld [vmem:[%s2059_s1 + $0x234] ss:$8 sps:$4 sm:$0xff]   ;;  %v1464_v24 = vld [vmem:[%s2059_s1 + $0x230] ss:$8 sps:$4 sm:$0xff]  }
  0x1d   :  { %982 = vmatprep.subr.bf16.mxu1 %v1384_v29  ;;  %v1469_v23 = vld [vmem:[%s2059_s1 + $0x334] ss:$8 sps:$4 sm:$0xff]   ;;  %v1467_v25 = vld [vmem:[%s2059_s1 + $0x330] ss:$8 sps:$4 sm:$0xff]   ;;  %v1472_v26 = vld [vmem:[%s2059_s1 + $0x224] ss:$8 sps:$4 sm:$0xff]  }
  0x1e   :  { %v1475_v27 = vld [vmem:[%s2059_s1 + $0x324] ss:$8 sps:$4 sm:$0xff]   ;;  %v1470_v28 = vld [vmem:[%s2059_s1 + $0x220] ss:$8 sps:$4 sm:$0xff]   ;;  %v1505_v51 = vld [vmem:[%s2059_s1 + $0x3d4] ss:$8 sps:$4 sm:$0xff]  }
  0x1f   :  { %942 = vmatpush1.bf16.msra.mxu0 %v1386_v30  ;;  %v1473_v29 = vld [vmem:[%s2059_s1 + $0x320] ss:$8 sps:$4 sm:$0xff]   ;;  %v1478_v30 = vld [vmem:[%s2059_s1 + $0x214] ss:$8 sps:$4 sm:$0xff]   ;;  %v1496_v46 = vld [vmem:[%s2059_s1 + $0x2e4] ss:$8 sps:$4 sm:$0xff]  }
  0x20   :  { %983 = vmatpush1.bf16.msra.mxu1 %v1387_v31  ;;  %943 = vmatprep.subr.bf16.mxu0 %v1388_v32  ;;  %v1481_v31 = vld [vmem:[%s2059_s1 + $0x314] ss:$8 sps:$4 sm:$0xff]   ;;  %v1499_v47 = vld [vmem:[%s2059_s1 + $0x3e4] ss:$8 sps:$4 sm:$0xff]   ;;  %v1494_v48 = vld [vmem:[%s2059_s1 + $0x2e0] ss:$8 sps:$4 sm:$0xff]  }
  0x21   :  { %984 = vmatprep.subr.bf16.mxu1 %v1390_v33  ;;  %v1870_v32 = vld [vmem:[%s2060_s0 + $0x10] sm:$0xff] }
  0x22   :  { %v1476_v33 = vld [vmem:[%s2059_s1 + $0x210] ss:$8 sps:$4 sm:$0xff]  }
  0x23   :  { %944 = vmatpush2.bf16.msra.mxu0 %v1392_v34  ;;  %v1479_v34 = vld [vmem:[%s2059_s1 + $0x310] ss:$8 sps:$4 sm:$0xff]  }
  0x24   :  { %985 = vmatpush2.bf16.msra.mxu1 %v1393_v35  ;;  %945 = vmatprep.subr.bf16.mxu0 %v1394_v36  ;;  %v1189_v35 = vcombine.high %v1870_v32, %v1870_v32  ;;  %v1883_v36 = vld [vmem:[%s2060_s0 + $0x18] sm:$0xff] }
  0x25   :  { %986 = vmatprep.subr.bf16.mxu1 %v1396_v37  ;;  %v1484_v37 = vld [vmem:[%s2059_s1 + $0x204] ss:$8 sps:$4 sm:$0xff]  }
  0x27   :  { %946 = vmatpush2.bf16.msra.mxu0 %v1398_v38  ;;  %v1191_v38 = vcombine.high %v1883_v36, %v1883_v36 }
  0x28   :  { %987 = vmatpush2.bf16.msra.mxu1 %v1399_v39  ;;  %947 = vmatprep.subr.bf16.mxu0 %v1400_v40  ;;  %v1487_v39 = vld [vmem:[%s2059_s1 + $0x304] ss:$8 sps:$4 sm:$0xff]   ;;  %v1482_v40 = vld [vmem:[%s2059_s1 + $0x200] ss:$8 sps:$4 sm:$0xff]  }
  0x29   :  { %988 = vmatprep.subr.bf16.mxu1 %v1402_v41  ;;  %v1485_v41 = vld [vmem:[%s2059_s1 + $0x300] ss:$8 sps:$4 sm:$0xff]  }
  0x2b   :  { %948 = vmatpush2.bf16.msra.mxu0 %v1404_v42  ;;  %v1490_v42 = vld [vmem:[%s2059_s1 + $0x2f4] ss:$8 sps:$4 sm:$0xff]  }
  0x2c   :  { %989 = vmatpush2.bf16.msra.mxu1 %v1405_v43  ;;  %949 = vmatprep.subr.bf16.mxu0 %v1406_v44  ;;  %v1493_v43 = vld [vmem:[%s2059_s1 + $0x3f4] ss:$8 sps:$4 sm:$0xff]   ;;  %v1488_v44 = vld [vmem:[%s2059_s1 + $0x2f0] ss:$8 sps:$4 sm:$0xff]  }
  0x2d   :  { %990 = vmatprep.subr.bf16.mxu1 %v1408_v45  ;;  %v1491_v45 = vld [vmem:[%s2059_s1 + $0x3f0] ss:$8 sps:$4 sm:$0xff]  }
  0x2f   :  { %950 = vmatpush2.bf16.msra.mxu0 %v1410_v49  ;;  %v1497_v49 = vld [vmem:[%s2059_s1 + $0x3e0] ss:$8 sps:$4 sm:$0xff]  }
  0x30   :  { %991 = vmatpush2.bf16.msra.mxu1 %v1411_v50  ;;  %951 = vmatprep.subr.bf16.mxu0 %v1412_v52  ;;  %v1502_v50 = vld [vmem:[%s2059_s1 + $0x2d4] ss:$8 sps:$4 sm:$0xff]   ;;  %v1500_v52 = vld [vmem:[%s2059_s1 + $0x2d0] ss:$8 sps:$4 sm:$0xff]  }
  0x31   :  { %992 = vmatprep.subr.bf16.mxu1 %v1414_v53  ;;  %v1503_v53 = vld [vmem:[%s2059_s1 + $0x3d0] ss:$8 sps:$4 sm:$0xff]  }
  0x33   :  { %952 = vmatpush2.bf16.msra.mxu0 %v1416_v54  ;;  %v1508_v54 = vld [vmem:[%s2059_s1 + $0x2c4] ss:$8 sps:$4 sm:$0xff]  }
  0x34   :  { %993 = vmatpush2.bf16.msra.mxu1 %v1417_v55  ;;  %953 = vmatprep.subr.bf16.mxu0 %v1418_v56  ;;  %v1511_v55 = vld [vmem:[%s2059_s1 + $0x3c4] ss:$8 sps:$4 sm:$0xff]   ;;  %v1506_v56 = vld [vmem:[%s2059_s1 + $0x2c0] ss:$8 sps:$4 sm:$0xff]  }
  0x35   :  { %994 = vmatprep.subr.bf16.mxu1 %v1420_v57  ;;  %v1509_v57 = vld [vmem:[%s2059_s1 + $0x3c0] ss:$8 sps:$4 sm:$0xff]  }
  0x37   :  { %954 = vmatpush2.bf16.msra.mxu0 %v1422_v58  ;;  %v1514_v58 = vld [vmem:[%s2059_s1 + $0x2b4] ss:$8 sps:$4 sm:$0xff]  }
  0x38   :  { %995 = vmatpush2.bf16.msra.mxu1 %v1423_v59  ;;  %955 = vmatprep.subr.bf16.mxu0 %v1424_v60  ;;  %v1517_v59 = vld [vmem:[%s2059_s1 + $0x3b4] ss:$8 sps:$4 sm:$0xff]   ;;  %v1512_v60 = vld [vmem:[%s2059_s1 + $0x2b0] ss:$8 sps:$4 sm:$0xff]  }
  0x39   :  { %996 = vmatprep.subr.bf16.mxu1 %v1426_v61  ;;  %v1515_v61 = vld [vmem:[%s2059_s1 + $0x3b0] ss:$8 sps:$4 sm:$0xff]  }
  0x3b   :  { %956 = vmatpush2.bf16.msra.mxu0 %v1428_v62  ;;  %v1520_v62 = vld [vmem:[%s2059_s1 + $0x2a4] ss:$8 sps:$4 sm:$0xff]  }
  0x3c   :  { %997 = vmatpush2.bf16.msra.mxu1 %v1429_v63  ;;  %957 = vmatprep.subr.bf16.mxu0 %v1430_v0  ;;  %v1523_v63 = vld [vmem:[%s2059_s1 + $0x3a4] ss:$8 sps:$4 sm:$0xff]   ;;  %v1518_v0 = vld [vmem:[%s2059_s1 + $0x2a0] ss:$8 sps:$4 sm:$0xff]  }
  0x3d   :  { %998 = vmatprep.subr.bf16.mxu1 %v1432_v1  ;;  %v1521_v1 = vld [vmem:[%s2059_s1 + $0x3a0] ss:$8 sps:$4 sm:$0xff]  }
  0x3f   :  { %958 = vmatpush2.bf16.msra.mxu0 %v1434_v2  ;;  %v1526_v2 = vld [vmem:[%s2059_s1 + $0x294] ss:$8 sps:$4 sm:$0xff]  }
  0x40   :  { %999 = vmatpush2.bf16.msra.mxu1 %v1435_v3  ;;  %1009 = vmatprep.subr.bf16.mxu0 %v1442_v4  ;;  %v1529_v3 = vld [vmem:[%s2059_s1 + $0x394] ss:$8 sps:$4 sm:$0xff]   ;;  %v1524_v4 = vld [vmem:[%s2059_s1 + $0x290] ss:$8 sps:$4 sm:$0xff]  }
  0x41   :  { %1050 = vmatprep.subr.bf16.mxu1 %v1445_v5  ;;  %v1527_v5 = vld [vmem:[%s2059_s1 + $0x390] ss:$8 sps:$4 sm:$0xff]  }
  0x42   :  { %960 = vmatmul.mubr.bf16.vlgmr.msra.gmra.mxu0 %v1184_v6  ;;  %v1532_v6 = vld [vmem:[%s2059_s1 + $0x284] ss:$8 sps:$4 sm:$0xff]  }
  0x43   :  { %1001 = vmatmul.mubr.bf16.vlgmr.msra.gmra.mxu1 %v1186_v7  ;;  %1010 = vmatpush1.bf16.msra.mxu0 %v1440_v8  ;;  %v1535_v7 = vld [vmem:[%s2059_s1 + $0x384] ss:$8 sps:$4 sm:$0xff]   ;;  %v1530_v8 = vld [vmem:[%s2059_s1 + $0x280] ss:$8 sps:$4 sm:$0xff]  }
  0x44   :  { %1051 = vmatpush1.bf16.msra.mxu1 %v1443_v9  ;;  %1011 = vmatprep.subr.bf16.mxu0 %v1448_v10  ;;  %v1533_v9 = vld [vmem:[%s2059_s1 + $0x380] ss:$8 sps:$4 sm:$0xff]   ;;  %v1540_v10 = vld [vmem:[%s2059_s1 + $0x474] ss:$8 sps:$4 sm:$0xff]  }
  0x45   :  { %1052 = vmatprep.subr.bf16.mxu1 %v1451_v11  ;;  %1041 = vmatprep.mubr.bf16.mxu0 %v1189_v35  ;;  %v1188_v11 = vcombine.low %v1870_v32, %v1870_v32 }
  0x46   :  { %1082 = vmatprep.mubr.bf16.mxu1 %v1191_v38 }
  0x47   :  { %1012 = vmatpush1.bf16.msra.mxu0 %v1446_v12  ;;  %v1190_v12 = vcombine.low %v1883_v36, %v1883_v36 }
  0x48   :  { %1053 = vmatpush1.bf16.msra.mxu1 %v1449_v13  ;;  %1013 = vmatprep.subr.bf16.mxu0 %v1454_v14  ;;  %v1538_v13 = vld [vmem:[%s2059_s1 + $0x470] ss:$8 sps:$4 sm:$0xff]   ;;  %v1545_v14 = vld [vmem:[%s2059_s1 + $0x464] ss:$8 sps:$4 sm:$0xff]  }
  0x49   :  { %1054 = vmatprep.subr.bf16.mxu1 %v1457_v15  ;;  %v1543_v15 = vld [vmem:[%s2059_s1 + $0x460] ss:$8 sps:$4 sm:$0xff]  }
  0x4b   :  { %1014 = vmatpush1.bf16.msra.mxu0 %v1452_v16  ;;  %v1565_v16 = vmov 0  }
  0x4c   :  { %1055 = vmatpush1.bf16.msra.mxu1 %v1455_v17  ;;  %1015 = vmatprep.subr.bf16.mxu0 %v1460_v18  ;;  %v1548_v17 = vld [vmem:[%s2059_s1 + $0x454] ss:$8 sps:$4 sm:$0xff]   ;;  %v1546_v18 = vld [vmem:[%s2059_s1 + $0x450] ss:$8 sps:$4 sm:$0xff]  }
  0x4d   :  { %1056 = vmatprep.subr.bf16.mxu1 %v1463_v19  ;;  %v1551_v19 = vld [vmem:[%s2059_s1 + $0x444] ss:$8 sps:$4 sm:$0xff]  }
  0x4f   :  { %1016 = vmatpush1.bf16.msra.mxu0 %v1458_v20  ;;  %v1549_v20 = vld [vmem:[%s2059_s1 + $0x440] ss:$8 sps:$4 sm:$0xff]  }
  0x50   :  { %1057 = vmatpush1.bf16.msra.mxu1 %v1461_v21  ;;  %1017 = vmatprep.subr.bf16.mxu0 %v1466_v22  ;;  %v1554_v21 = vld [vmem:[%s2059_s1 + $0x434] ss:$8 sps:$4 sm:$0xff]   ;;  %v1552_v22 = vld [vmem:[%s2059_s1 + $0x430] ss:$8 sps:$4 sm:$0xff]  }
  0x51   :  { %1058 = vmatprep.subr.bf16.mxu1 %v1469_v23  ;;  %v1557_v23 = vld [vmem:[%s2059_s1 + $0x424] ss:$8 sps:$4 sm:$0xff]  }
  0x53   :  { %1018 = vmatpush1.bf16.msra.mxu0 %v1464_v24  ;;  %v1555_v24 = vld [vmem:[%s2059_s1 + $0x420] ss:$8 sps:$4 sm:$0xff]  }
  0x54   :  { %1059 = vmatpush1.bf16.msra.mxu1 %v1467_v25  ;;  %1019 = vmatprep.subr.bf16.mxu0 %v1472_v26  ;;  %v1560_v25 = vld [vmem:[%s2059_s1 + $0x414] ss:$8 sps:$4 sm:$0xff]   ;;  %v1558_v26 = vld [vmem:[%s2059_s1 + $0x410] ss:$8 sps:$4 sm:$0xff]  }
  0x55   :  { %1060 = vmatprep.subr.bf16.mxu1 %v1475_v27  ;;  %v1563_v27 = vld [vmem:[%s2059_s1 + $0x404] ss:$8 sps:$4 sm:$0xff]  }
  0x57   :  { %1020 = vmatpush1.bf16.msra.mxu0 %v1470_v28  ;;  %v1561_v28 = vld [vmem:[%s2059_s1 + $0x400] ss:$8 sps:$4 sm:$0xff]  }
  0x58   :  { %1061 = vmatpush1.bf16.msra.mxu1 %v1473_v29  ;;  %1021 = vmatprep.subr.bf16.mxu0 %v1478_v30  ;;  %v1564_v29 = vld [vmem:[%s2060_s0 + $0x20] ss:$0 sps:$4 sm:$0xff]  }
  0x59   :  { %1062 = vmatprep.subr.bf16.mxu1 %v1481_v31 }
  0x5b   :  { %1022 = vmatpush1.bf16.msra.mxu0 %v1476_v33 }
  0x5c   :  { %1063 = vmatpush1.bf16.msra.mxu1 %v1479_v34  ;;  %1023 = vmatprep.subr.bf16.mxu0 %v1484_v37 }
  0x5d   :  { %1064 = vmatprep.subr.bf16.mxu1 %v1487_v39 }
  0x5f   :  { %1024 = vmatpush1.bf16.msra.mxu0 %v1482_v40 }
  0x60   :  { %1065 = vmatpush1.bf16.msra.mxu1 %v1485_v41  ;;  %1025 = vmatprep.subr.bf16.mxu0 %v1490_v42 }
  0x61   :  { %1066 = vmatprep.subr.bf16.mxu1 %v1493_v43 }
  0x63   :  { %1026 = vmatpush2.bf16.msra.mxu0 %v1488_v44 }
  0x64   :  { %1067 = vmatpush2.bf16.msra.mxu1 %v1491_v45  ;;  %1027 = vmatprep.subr.bf16.mxu0 %v1496_v46 }
  0x65   :  { %1068 = vmatprep.subr.bf16.mxu1 %v1499_v47 }
  0x67   :  { %1028 = vmatpush2.bf16.msra.mxu0 %v1494_v48  ;;  %v1143_v48 = vlaneseq }
  0x68   :  { %1069 = vmatpush2.bf16.msra.mxu1 %v1497_v49  ;;  %1029 = vmatprep.subr.bf16.mxu0 %v1502_v50 }
  0x69   :  { %1070 = vmatprep.subr.bf16.mxu1 %v1505_v51  ;;  %v1144_v49 = vshrl.u32 %v1143_v48, 7 }
  0x6b   :  { %1030 = vmatpush2.bf16.msra.mxu0 %v1500_v52  ;;  %v1145_v51 = vsub.s32 0, %v1144_v49  ;;  %v1141_v52 = vld [vmem:[%s2061_s2] sm:$0x3] }
  0x6c   :  { %1071 = vmatpush2.bf16.msra.mxu1 %v1503_v53  ;;  %1031 = vmatprep.subr.bf16.mxu0 %v1508_v54  ;;  %v1149_v54 = vsub.s32 1, %v1144_v49 }
  0x6d   :  { %1072 = vmatprep.subr.bf16.mxu1 %v1511_v55  ;;  %v1155_v55 = vld [vmem:[%s2062_s3] sm:$0x3] }
  0x6f   :  { %1032 = vmatpush2.bf16.msra.mxu0 %v1506_v56 }
  0x70   :  { %1073 = vmatpush2.bf16.msra.mxu1 %v1509_v57  ;;  %1033 = vmatprep.subr.bf16.mxu0 %v1514_v58  ;;  %v1146_v57 = vrot.slane %v1141_v52, %v1145_v51 }
  0x71   :  { %1074 = vmatprep.subr.bf16.mxu1 %v1517_v59 }
  0x73   :  { %1034 = vmatpush2.bf16.msra.mxu0 %v1512_v60 }
  0x74   :  { %1075 = vmatpush2.bf16.msra.mxu1 %v1515_v61  ;;  %1035 = vmatprep.subr.bf16.mxu0 %v1520_v62  ;;  %v1160_v61 = vrot.slane %v1155_v55, %v1145_v51  ;;  %v1150_v62 = vrot.slane %v1141_v52, %v1149_v54 }
  0x75   :  { %1076 = vmatprep.subr.bf16.mxu1 %v1523_v63 }
  0x77   :  { %1036 = vmatpush2.bf16.msra.mxu0 %v1518_v0 }
  0x78   :  { %1077 = vmatpush2.bf16.msra.mxu1 %v1521_v1  ;;  %1037 = vmatprep.subr.bf16.mxu0 %v1526_v2  ;;  %v1164_v2 = vrot.slane %v1155_v55, %v1149_v54 }
  0x79   :  { %1078 = vmatprep.subr.bf16.mxu1 %v1529_v3 }
  0x7b   :  { %1038 = vmatpush2.bf16.msra.mxu0 %v1524_v4 }
  0x7c   :  { %1079 = vmatpush2.bf16.msra.mxu1 %v1527_v5  ;;  %1039 = vmatprep.subr.bf16.mxu0 %v1532_v6 }
  0x7d   :  { %1080 = vmatprep.subr.bf16.mxu1 %v1535_v7 }
  0x7f   :  { %1040 = vmatpush2.bf16.msra.mxu0 %v1530_v8 }
  0x80   :  { %1081 = vmatpush2.bf16.msra.mxu1 %v1533_v9  ;;  %1091 = vmatprep.subr.bf16.mxu0 %v1540_v10 }
  0x82   :  { %1042 = vmatmul.mubr.bf16.vlgmr.msra.gmra.mxu0 %v1188_v11 }
  0x83   :  { %1083 = vmatmul.mubr.bf16.vlgmr.msra.gmra.mxu1 %v1190_v12  ;;  %1092 = vmatpush1.bf16.msra.mxu0 %v1538_v13 }
  0x84   :  { %1123 = vmatprep.mubr.bf16.mxu0 %v1565_v16  ;;  %1093 = vmatprep.subr.bf16.mxu0 %v1545_v14 }
  0x87   :  { %1094 = vmatpush1.bf16.msra.mxu0 %v1543_v15 }
  0x88   :  { %1095 = vmatprep.subr.bf16.mxu0 %v1548_v17 }
  0x8b   :  { %1096 = vmatpush1.bf16.msra.mxu0 %v1546_v18 }
  0x8c   :  { %1097 = vmatprep.subr.bf16.mxu0 %v1551_v19 }
  0x8f   :  { %1098 = vmatpush1.bf16.msra.mxu0 %v1549_v20 }
  0x90   :  { %1099 = vmatprep.subr.bf16.mxu0 %v1554_v21 }
  0x93   :  { %1100 = vmatpush1.bf16.msra.mxu0 %v1552_v22 }
  0x94   :  { %1101 = vmatprep.subr.bf16.mxu0 %v1557_v23 }
  0x97   :  { %1102 = vmatpush1.bf16.msra.mxu0 %v1555_v24 }
  0x98   :  { %1103 = vmatprep.subr.bf16.mxu0 %v1560_v25 }
  0x9b   :  { %1104 = vmatpush1.bf16.msra.mxu0 %v1558_v26 }
  0x9c   :  { %1105 = vmatprep.subr.bf16.mxu0 %v1563_v27 }
  0x9f   :  { %1106 = vmatpush1.bf16.msra.mxu0 %v1561_v28 }
  0xa2   :  { %1124 = vmatmul.mubr.bf16.vlgmr.msra.gmra.mxu0 %v1564_v29 }
 0x102   :  { %v961_v30 = vpop.f32.mrf.mxu0 }
 0x103   :  { %v1002_v31 = vpop.f32.mrf.mxu1 }
 0x104   :  { %v1003_v32 = vadd.f32 %v1002_v31, %v961_v30  ;;  %v963_v33 = vpop.f32.mrf.mxu0 }
 0x105   :  { %v1004_v34 = vpop.f32.mrf.mxu1 }
 0x106   :  { %v1005_v35 = vadd.f32 %v1004_v34, %v963_v33  ;;  %v965_v36 = vpop.f32.mrf.mxu0 }
 0x107   :  { %v1006_v37 = vpop.f32.mrf.mxu1 }
 0x108   :  { %v966_v38 = vpop.f32.mrf.mxu0 }
 0x109   :  { %v1007_v39 = vpop.f32.mrf.mxu1 }
 0x142   :  { %v1043_v40 = vpop.f32.mrf.mxu0 }
 0x143   :  { %v1084_v41 = vpop.f32.mrf.mxu1  ;;  %v1044_v50 = vadd.f32 %v1043_v40, %v1003_v32 }
 0x144   :  { %v1045_v42 = vpop.f32.mrf.mxu0 }
 0x145   :  { %v1086_v43 = vpop.f32.mrf.mxu1  ;;  %v1046_v53 = vadd.f32 %v1045_v42, %v1005_v35  ;;  %v1085_v56 = vadd.f32 %v1084_v41, %v1044_v50 }
 0x146   :  { %v1047_v44 = vpop.f32.mrf.mxu0 }
 0x147   :  { %v1088_v45 = vpop.f32.mrf.mxu1  ;;  %v1087_v59 = vadd.f32 %v1086_v43, %v1046_v53 }
 0x148   :  { %v1048_v46 = vpop.f32.mrf.mxu0 }
 0x149   :  { %v1089_v47 = vpop.f32.mrf.mxu1 }
 0x162   :  { %v1125_v58 = vpop.f32.mrf.mxu0 }
 0x163   :  { %v1126_v60 = vadd.f32 %v1125_v58, %v1085_v56 }
 0x164   :  { %v1127_v63 = vpop.f32.mrf.mxu0 }
 0x165   :  { %v1153_v0 = vmul.f32 %v1146_v57, %v1126_v60  ;;  %v1128_v1 = vadd.f32 %v1127_v63, %v1087_v59 }
 0x166   :  { %v1129_v3 = vpop.f32.mrf.mxu0 }
 0x167   :  { %v1167_v4 = vadd.f32 %v1160_v61, %v1153_v0  ;;  %v1154_v5 = vmul.f32 %v1150_v62, %v1128_v1 }
 0x168   :  { %v1130_v6 = vpop.f32.mrf.mxu0 }
 0x169   :  { %v1168_v7 = vadd.f32 %v1164_v2, %v1154_v5  ;;  %v1169_v8 = vmax.f32 %v1167_v4, 0.0 }
 0x16b   :  { %v1170_v9 = vmax.f32 %v1168_v7, 0.0 }
 0x16d   :  { %v1338_v10 = vpack.c.bf16 %v1170_v9, %v1169_v8 }
 0x16f   :  { %1179 = vst [vmem:[%s2063_s4] sm:$0xff] %v1338_v10 }

// kernel: forward.39
= control target key start
LH: loop header
LB: loop body
LE: loop exit
PB: predicated region body
PF: predicated region fallthrough
CT: control target
= control target key end

     0   :  { %s1227_s18 = smov 0   ;;  %s1229_s19 = smov 0   ;;  %s1424_s0 = inlined_call_operand.vmem [shape: bf16[2,256], index: 0, kind: input, shape index: {}]   ;;  %s1425_s1 = inlined_call_operand.vmem [shape: f32[1,256], index: 1, kind: input, shape index: {}]   ;;  %s1426_s2 = inlined_call_operand.vmem [shape: f32[1,256], index: 2, kind: input, shape index: {}]   ;;  %s1427_s3 = inlined_call_operand.vmem [shape: bf16[256,512], index: 3, kind: input, shape index: {}]   ;;  %s1428_s4 = inlined_call_operand.vmem [shape: f32[1,512], index: 4, kind: input, shape index: {}]   ;;  %s1429_s5 = inlined_call_operand.vmem [shape: bf16[2,512], index: 5, kind: output, shape index: {}]  }
   0x1   :  { %s1231_s20 = smov 0   ;;  %s1233_s21 = smov 0  }
   0x2   :  { %s1235_s22 = smov 0  }
   0x3 LB: > { %s30_s23 = sadd.s32 1, %s1188_s21  ;;  %p130_p1 = scmp.ne.s32.totalorder %s1180_s19, %s1176_s18  ;;  %s1192_s22 = sphi %s1235_s22, %s15_s22   ;;  %s1188_s21 = sphi %s1233_s21, %s1433_s21   ;;  %s1184_s20 = sphi %s1231_s20, %s1432_s20   ;;  %s1180_s19 = sphi %s1229_s19, %s1431_s19   ;;  %s1176_s18 = sphi %s1227_s18, %s1430_s18  }
   0x4   : > { %p32_p0 = scmp.ge.s32.totalorder %s30_s23, 2  ;;  %p131_p2 = scmp.eq.s32.totalorder %s1192_s22, 0 }
   0x5   : > { %s123_s25 = sadd.s32 1, %s1180_s19  ;;  %p1018_p5 = scmp.ge.s32.totalorder %s1192_s22, 2 }
   0x6   : > { %s1435_s23 = smov (%p32_p0, %s30_s23), 0  ;;  %p132_p3 = por %p131_p2, %p130_p1 }
   0x7   : > { %s119_s24 = ssub.s32 %s1188_s21, %s1435_s23  ;;  %238 = sbr.rel (%p1018_p5) target bundleno = 32 (0x20), region = 28 }
   0x8   : > { %p121_p4 = scmp.eq.s32.totalorder %s119_s24, 0 }
   0xa   : > { %s1262_s26 = scalar_select %p121_p4, %s1180_s19, %s123_s25  }
   0xc   : > { %241 = sbr.rel (!%p132_p3) target bundleno = 32 (0x20), region = 32  ;;  %s243_s27 = sand.u32 (%p132_p3), 1, %s1180_s19  }
   0xd   : > { %s1062_s28 = sshll.u32 (%p132_p3), %s1188_s21, 3  ;;  %s1019_s29 = sshll.u32 (%p132_p3), %s243_s27, 8 }
   0xe   : > { %s1270_s7 = scalar_lea.vmem (%p132_p3), %s1427_s3, %s1062_s28  ;;  %s1275_s8 = scalar_lea.vmem (%p132_p3), [#allocation3], %s1019_s29 }
   0xf   : > { %v342_v0 = vld [vmem:[%s1270_s7] sm:$0xff] (%p132_p3)  ;;  %v344_v1 = vld [vmem:[%s1270_s7 + $0x10] sm:$0xff] (%p132_p3) }
  0x10   : > { %v346_v2 = vld [vmem:[%s1270_s7 + $0x20] sm:$0xff] (%p132_p3)  ;;  %343 = vst [vmem:[%s1275_s8] sm:$0xff] (%p132_p3), %v342_v0  ;;  %345 = vst [vmem:[%s1275_s8 + $0x8] sm:$0xff] (%p132_p3), %v344_v1  ;;  %v348_v3 = vld [vmem:[%s1270_s7 + $0x30] sm:$0xff] (%p132_p3) }
  0x11   : > { %347 = vst [vmem:[%s1275_s8 + $0x10] sm:$0xff] %v346_v2  ;;  %v350_v4 = vld [vmem:[%s1270_s7 + $0x40] sm:$0xff]  ;;  %v352_v5 = vld [vmem:[%s1270_s7 + $0x50] sm:$0xff]  ;;  %349 = vst [vmem:[%s1275_s8 + $0x18] sm:$0xff] %v348_v3 }
  0x12   : > { %351 = vst [vmem:[%s1275_s8 + $0x20] sm:$0xff] %v350_v4  ;;  %353 = vst [vmem:[%s1275_s8 + $0x28] sm:$0xff] %v352_v5  ;;  %v354_v6 = vld [vmem:[%s1270_s7 + $0x60] sm:$0xff]  ;;  %v356_v7 = vld [vmem:[%s1270_s7 + $0x70] sm:$0xff] }
  0x13   : > { %v358_v8 = vld [vmem:[%s1270_s7 + $0x80] sm:$0xff]  ;;  %355 = vst [vmem:[%s1275_s8 + $0x30] sm:$0xff] %v354_v6  ;;  %357 = vst [vmem:[%s1275_s8 + $0x38] sm:$0xff] %v356_v7  ;;  %v360_v9 = vld [vmem:[%s1270_s7 + $0x90] sm:$0xff] }
  0x14   : > { %359 = vst [vmem:[%s1275_s8 + $0x40] sm:$0xff] %v358_v8  ;;  %v362_v10 = vld [vmem:[%s1270_s7 + $0xa0] sm:$0xff]  ;;  %v364_v11 = vld [vmem:[%s1270_s7 + $0xb0] sm:$0xff]  ;;  %361 = vst [vmem:[%s1275_s8 + $0x48] sm:$0xff] %v360_v9 }
  0x15   : > { %363 = vst [vmem:[%s1275_s8 + $0x50] sm:$0xff] %v362_v10  ;;  %365 = vst [vmem:[%s1275_s8 + $0x58] sm:$0xff] %v364_v11  ;;  %v366_v12 = vld [vmem:[%s1270_s7 + $0xc0] sm:$0xff]  ;;  %v368_v13 = vld [vmem:[%s1270_s7 + $0xd0] sm:$0xff] }
  0x16   : > { %v370_v14 = vld [vmem:[%s1270_s7 + $0xe0] sm:$0xff]  ;;  %367 = vst [vmem:[%s1275_s8 + $0x60] sm:$0xff] %v366_v12  ;;  %369 = vst [vmem:[%s1275_s8 + $0x68] sm:$0xff] %v368_v13  ;;  %v372_v15 = vld [vmem:[%s1270_s7 + $0xf0] sm:$0xff] }
  0x17   : > { %371 = vst [vmem:[%s1275_s8 + $0x70] sm:$0xff] %v370_v14  ;;  %v374_v16 = vld [vmem:[%s1270_s7 + $0x100] sm:$0xff]  ;;  %v376_v17 = vld [vmem:[%s1270_s7 + $0x110] sm:$0xff]  ;;  %373 = vst [vmem:[%s1275_s8 + $0x78] sm:$0xff] %v372_v15 }
  0x18   : > { %375 = vst [vmem:[%s1275_s8 + $0x80] sm:$0xff] %v374_v16  ;;  %377 = vst [vmem:[%s1275_s8 + $0x88] sm:$0xff] %v376_v17  ;;  %v378_v18 = vld [vmem:[%s1270_s7 + $0x120] sm:$0xff]  ;;  %v380_v19 = vld [vmem:[%s1270_s7 + $0x130] sm:$0xff] }
  0x19   : > { %v382_v20 = vld [vmem:[%s1270_s7 + $0x140] sm:$0xff]  ;;  %379 = vst [vmem:[%s1275_s8 + $0x90] sm:$0xff] %v378_v18  ;;  %381 = vst [vmem:[%s1275_s8 + $0x98] sm:$0xff] %v380_v19  ;;  %v384_v21 = vld [vmem:[%s1270_s7 + $0x150] sm:$0xff] }
  0x1a   : > { %383 = vst [vmem:[%s1275_s8 + $0xa0] sm:$0xff] %v382_v20  ;;  %v386_v22 = vld [vmem:[%s1270_s7 + $0x160] sm:$0xff]  ;;  %v388_v23 = vld [vmem:[%s1270_s7 + $0x170] sm:$0xff]  ;;  %385 = vst [vmem:[%s1275_s8 + $0xa8] sm:$0xff] %v384_v21 }
  0x1b   : > { %387 = vst [vmem:[%s1275_s8 + $0xb0] sm:$0xff] %v386_v22  ;;  %389 = vst [vmem:[%s1275_s8 + $0xb8] sm:$0xff] %v388_v23  ;;  %v390_v24 = vld [vmem:[%s1270_s7 + $0x180] sm:$0xff]  ;;  %v392_v25 = vld [vmem:[%s1270_s7 + $0x190] sm:$0xff] }
  0x1c   : > { %v394_v26 = vld [vmem:[%s1270_s7 + $0x1a0] sm:$0xff]  ;;  %391 = vst [vmem:[%s1275_s8 + $0xc0] sm:$0xff] %v390_v24  ;;  %393 = vst [vmem:[%s1275_s8 + $0xc8] sm:$0xff] %v392_v25  ;;  %v396_v27 = vld [vmem:[%s1270_s7 + $0x1b0] sm:$0xff] }
  0x1d   : > { %395 = vst [vmem:[%s1275_s8 + $0xd0] sm:$0xff] %v394_v26  ;;  %v398_v28 = vld [vmem:[%s1270_s7 + $0x1c0] sm:$0xff]  ;;  %v400_v29 = vld [vmem:[%s1270_s7 + $0x1d0] sm:$0xff]  ;;  %397 = vst [vmem:[%s1275_s8 + $0xd8] sm:$0xff] %v396_v27 }
  0x1e   : > { %399 = vst [vmem:[%s1275_s8 + $0xe0] sm:$0xff] %v398_v28  ;;  %401 = vst [vmem:[%s1275_s8 + $0xe8] sm:$0xff] %v400_v29  ;;  %v402_v30 = vld [vmem:[%s1270_s7 + $0x1e0] sm:$0xff]  ;;  %v404_v31 = vld [vmem:[%s1270_s7 + $0x1f0] sm:$0xff] }
  0x1f   : > { %403 = vst [vmem:[%s1275_s8 + $0xf0] sm:$0xff] %v402_v30  ;;  %405 = vst [vmem:[%s1275_s8 + $0xf8] sm:$0xff] %v404_v31 }
  0x20 PF: > { %p1022_p6 = scmp.ge.s32.totalorder %s1192_s22, 1  ;;  %p418_p7 = scmp.lt.s32.totalorder %s1192_s22, 3 }
  0x22   : > { %p419_p8 = pnand %p1022_p6, %p418_p7 }
  0x23   : > { %s425_s9 = sand.u32 (!%p419_p8), 1, %s1176_s18   ;;  %s1024_s18 = sshll.u32 (!%p419_p8), %s1184_s20, 1 }
  0x24   : > { %422 = sbr.rel (%p419_p8) target bundleno = 328 (0x148), region = 74  ;;  %s1023_s10 = sshll.u32 (!%p419_p8), %s425_s9, 8 }
  0x25   : > { %s1349_s15 = scalar_lea.vmem (!%p419_p8), [#allocation3], %s1023_s10  ;;  %p497_p9 = scmp.lt.s32.totalorder (!%p419_p8), %s1024_s18, 3 }
  0x29   : > { %v519_v32 = vlaneseq  ;;  %v517_v33 = vld [vmem:[%s1425_s1] sm:$0x3]  ;;  %v1194_v35 = vmov 1983009808   ;;  %v1108_v39 = vld [vmem:[%s1349_s15 + $0x70] ss:$8 sps:$4 sm:$0xff]  }
  0x2a   : > { %v529_v36 = vunpack.c.l.s4 %v1194_v35  ;;  %v537_v37 = vld [vmem:[%s1426_s2] sm:$0x3]  ;;  %v1109_v43 = vld [vmem:[%s1349_s15 + $0x64] ss:$8 sps:$4 sm:$0xff]   ;;  %v1111_v45 = vld [vmem:[%s1349_s15 + $0x60] ss:$8 sps:$4 sm:$0xff]  }
  0x2b   : > { %v1344_v34 = vshrl.u32 %v519_v32, 7  ;;  %v1106_v38 = vld [vmem:[%s1349_s15 + $0x74] ss:$8 sps:$4 sm:$0xff]   ;;  %v1114_v55 = vld [vmem:[%s1349_s15 + $0x50] ss:$8 sps:$4 sm:$0xff]   ;;  %s1437_s18 = smov (!%p497_p9, %s1024_s18), 3 }
  0x2c   : > { %v530_v42 = vunpack.c.0.s8 %v529_v36  ;;  %764 = vmatprep.subr.bf16.mxu0 %v1106_v38  ;;  %v515_v44 = vld [vmem:[%s1424_s0] sm:$0x3]  ;;  %v1115_v57 = vld [vmem:[%s1349_s15 + $0x44] ss:$8 sps:$4 sm:$0xff]   ;;  %v1117_v60 = vld [vmem:[%s1349_s15 + $0x40] ss:$8 sps:$4 sm:$0xff]   ;;  %s499_s25 = scalar_lea.vmem %s1428_s4, %s1437_s18  ;;  %s508_s29 = scalar_lea.vmem %s1429_s5, %s1437_s18 }
  0x2d   : > { %v521_v40 = vsub.s32 0, %v1344_v34  ;;  %v525_v41 = vsub.s32 1, %v1344_v34  ;;  %765 = vmatpush1.bf16.msra.mxu0 %v1108_v39  ;;  %v1112_v50 = vld [vmem:[%s1349_s15 + $0x54] ss:$8 sps:$4 sm:$0xff]   ;;  %v516_v52 = vunpack.c.l.bf16 %v515_v44  ;;  %v1120_v0 = vld [vmem:[%s1349_s15 + $0x30] ss:$8 sps:$4 sm:$0xff]  }
  0x2e   : > { %v1361_v48 = vsub.s32 %v530_v42, %v1344_v34  ;;  %766 = vmatprep.subr.bf16.mxu0 %v1109_v43  ;;  %v1118_v62 = vld [vmem:[%s1349_s15 + $0x34] ss:$8 sps:$4 sm:$0xff]   ;;  %v1121_v2 = vld [vmem:[%s1349_s15 + $0x24] ss:$8 sps:$4 sm:$0xff]   ;;  %v1123_v4 = vld [vmem:[%s1349_s15 + $0x20] ss:$8 sps:$4 sm:$0xff]  }
  0x2f   : > { %v522_v46 = vrot.slane %v517_v33, %v521_v40  ;;  %v526_v47 = vrot.slane %v517_v33, %v525_v41  ;;  %v542_v49 = vrot.slane %v537_v37, %v521_v40  ;;  %v546_v51 = vrot.slane %v537_v37, %v525_v41  ;;  %v1124_v6 = vld [vmem:[%s1349_s15 + $0x14] ss:$8 sps:$4 sm:$0xff]   ;;  %v1126_v10 = vld [vmem:[%s1349_s15 + $0x10] ss:$8 sps:$4 sm:$0xff]   ;;  %v1127_v11 = vld [vmem:[%s1349_s15 + $0x4] ss:$8 sps:$4 sm:$0xff]  }
  0x30   : > { %v822_v7 = vld [vmem:[%s499_s25] sm:$0x3]  ;;  %v1129_v13 = vld [vmem:[%s1349_s15] ss:$8 sps:$4 sm:$0xff]   ;;  %v1132_v15 = vld [vmem:[%s1349_s15 + $0xf0] ss:$8 sps:$4 sm:$0xff]  }
  0x31   : > { %v527_v53 = vcombine.low %v522_v46, %v526_v47  ;;  %v547_v54 = vcombine.low %v542_v49, %v546_v51  ;;  %767 = vmatpush1.bf16.msra.mxu0 %v1111_v45  ;;  %v827_v8 = vrot.slane %v822_v7, %v521_v40  ;;  %v831_v9 = vrot.slane %v822_v7, %v525_v41  ;;  %v1130_v14 = vld [vmem:[%s1349_s15 + $0xf4] ss:$8 sps:$4 sm:$0xff]   ;;  %v1133_v16 = vld [vmem:[%s1349_s15 + $0xe4] ss:$8 sps:$4 sm:$0xff]   ;;  %v1135_v17 = vld [vmem:[%s1349_s15 + $0xe0] ss:$8 sps:$4 sm:$0xff]  }
  0x32   : > { %768 = vmatprep.subr.bf16.mxu0 %v1112_v50  ;;  %v1136_v18 = vld [vmem:[%s1349_s15 + $0xd4] ss:$8 sps:$4 sm:$0xff]   ;;  %v1138_v19 = vld [vmem:[%s1349_s15 + $0xd0] ss:$8 sps:$4 sm:$0xff]   ;;  %v1139_v20 = vld [vmem:[%s1349_s15 + $0xc4] ss:$8 sps:$4 sm:$0xff]  }
  0x33   : > { %v534_v56 = vrot.slane %v527_v53, %v1361_v48  ;;  %v554_v58 = vrot.slane %v547_v54, %v1361_v48  ;;  %v832_v12 = vcombine.low %v827_v8, %v831_v9  ;;  %v1141_v21 = vld [vmem:[%s1349_s15 + $0xc0] ss:$8 sps:$4 sm:$0xff]   ;;  %v1142_v22 = vld [vmem:[%s1349_s15 + $0xb4] ss:$8 sps:$4 sm:$0xff]   ;;  %v1144_v23 = vld [vmem:[%s1349_s15 + $0xb0] ss:$8 sps:$4 sm:$0xff]  }
  0x34   : > { %v1145_v24 = vld [vmem:[%s1349_s15 + $0xa4] ss:$8 sps:$4 sm:$0xff]   ;;  %v1147_v25 = vld [vmem:[%s1349_s15 + $0xa0] ss:$8 sps:$4 sm:$0xff]   ;;  %v1148_v26 = vld [vmem:[%s1349_s15 + $0x94] ss:$8 sps:$4 sm:$0xff]  }
  0x35   : > { %v536_v59 = vmul.f32 %v534_v56, %v516_v52  ;;  %769 = vmatpush1.bf16.msra.mxu0 %v1114_v55  ;;  %v1150_v27 = vld [vmem:[%s1349_s15 + $0x90] ss:$8 sps:$4 sm:$0xff]   ;;  %v1151_v28 = vld [vmem:[%s1349_s15 + $0x84] ss:$8 sps:$4 sm:$0xff]   ;;  %v1153_v29 = vld [vmem:[%s1349_s15 + $0x80] ss:$8 sps:$4 sm:$0xff]   ;;  %v839_v41 = vrot.slane %v832_v12, %v1361_v48 }
  0x36   : > { %770 = vmatprep.subr.bf16.mxu0 %v1115_v57  ;;  %v1195_v31 = vmov 0.0   ;;  %v1196_v42 = vmov 1966171168  }
  0x37   : > { %v556_v61 = vadd.f32 %v554_v58, %v536_v59  ;;  %514 = vst [vmem:[#allocation2] sm:$0xf] %v1195_v31  ;;  %v859_v43 = vunpack.c.l.s4 %v1196_v42 }
  0x39   : > { %v557_v63 = vmax.f32 %v556_v61, 0.0  ;;  %771 = vmatpush1.bf16.msra.mxu0 %v1117_v60  ;;  %v860_v45 = vunpack.c.0.s8 %v859_v43 }
  0x3a   : > { %772 = vmatprep.subr.bf16.mxu0 %v1118_v62 }
  0x3b   : > { %v565_v1 = vrot.slane %v557_v63, %v1361_v48  ;;  %v863_v49 = vsub.s32 %v860_v45, %v1344_v34 }
  0x3d   : > { %v566_v3 = vcombine.high %v565_v1, %v565_v1  ;;  %773 = vmatpush1.bf16.msra.mxu0 %v1120_v0  ;;  %v569_v30 = vpack.c.bf16 %v565_v1, %v565_v1 }
  0x3e   : > { %774 = vmatprep.subr.bf16.mxu0 %v1121_v2  ;;  %v571_v36 = vld [vmem:[#allocation2] sm:$0xf] }
  0x3f   : > { %v570_v5 = vpack.c.bf16 %v566_v3, %v566_v3 }
  0x41   : > { %796 = vmatprep.mubr.bf16.mxu0 %v570_v5  ;;  %775 = vmatpush1.bf16.msra.mxu0 %v1123_v4 }
  0x42   : > { %776 = vmatprep.subr.bf16.mxu0 %v1124_v6 }
  0x45   : > { %777 = vmatpush1.bf16.msra.mxu0 %v1126_v10 }
  0x46   : > { %778 = vmatprep.subr.bf16.mxu0 %v1127_v11 }
  0x49   : > { %779 = vmatpush1.bf16.msra.mxu0 %v1129_v13 }
  0x4a   : > { %780 = vmatprep.subr.bf16.mxu0 %v1130_v14 }
  0x4d   : > { %781 = vmatpush2.bf16.msra.mxu0 %v1132_v15 }
  0x4e   : > { %782 = vmatprep.subr.bf16.mxu0 %v1133_v16 }
  0x51   : > { %783 = vmatpush2.bf16.msra.mxu0 %v1135_v17 }
  0x52   : > { %784 = vmatprep.subr.bf16.mxu0 %v1136_v18 }
  0x55   : > { %785 = vmatpush2.bf16.msra.mxu0 %v1138_v19 }
  0x56   : > { %786 = vmatprep.subr.bf16.mxu0 %v1139_v20 }
  0x59   : > { %787 = vmatpush2.bf16.msra.mxu0 %v1141_v21 }
  0x5a   : > { %788 = vmatprep.subr.bf16.mxu0 %v1142_v22 }
  0x5d   : > { %789 = vmatpush2.bf16.msra.mxu0 %v1144_v23 }
  0x5e   : > { %790 = vmatprep.subr.bf16.mxu0 %v1145_v24 }
  0x61   : > { %791 = vmatpush2.bf16.msra.mxu0 %v1147_v25 }
  0x62   : > { %792 = vmatprep.subr.bf16.mxu0 %v1148_v26 }
  0x65   : > { %793 = vmatpush2.bf16.msra.mxu0 %v1150_v27 }
  0x66   : > { %794 = vmatprep.subr.bf16.mxu0 %v1151_v28 }
  0x69   : > { %795 = vmatpush2.bf16.msra.mxu0 %v1153_v29 }
  0x6c   : > { %797 = vmatmul.mubr.bf16.vlgmr.msra.gmra.mxu0 %v569_v30 }
 0x12c   : > { %v798_v32 = vpop.f32.mrf.mxu0 }
 0x12e   : > { %v800_v33 = vpop.f32.mrf.mxu0 }
 0x12f   : > { %v807_v35 = vcombine.low %v798_v32, %v800_v33 }
 0x130   : > { %v802_v37 = vpop.f32.mrf.mxu0 }
 0x131   : > { %v814_v38 = vrot.slane %v807_v35, %v1361_v48 }
 0x132   : > { %v803_v39 = vpop.f32.mrf.mxu0 }
 0x133   : > { %v816_v40 = vadd.f32 %v814_v38, %v571_v36 }
 0x135   : > { %817 = vst [vmem:[#allocation2] sm:$0xf] %v816_v40 }
 0x13c   : > { %v821_v44 = vld [vmem:[#allocation2] sm:$0xf] }
 0x13d   : > { %v841_v46 = vadd.f32 %v839_v41, %v821_v44 }
 0x13f   : > { %v849_v47 = vrot.slane %v841_v46, %v1361_v48 }
 0x141   : > { %v850_v50 = vcombine.high %v849_v47, %v849_v47 }
 0x143   : > { %v1058_v51 = vpack.c.bf16 %v850_v50, %v849_v47 }
 0x145   : > { %v864_v52 = vrot.slane %v1058_v51, %v863_v49 }
 0x147   : > { %1059 = vst.sshfl [vmem:[%s508_s29] sm:$0x5 pattern:$0x73625140] %v864_v52 }
 0x148 PF: > { %s15_s22 = sadd.s32 1, %s1192_s22   ;;  %s1430_s18 = smov %s1180_s19 }
 0x149   : > { %p12_p10 = scmp.ge.s32.totalorder %s15_s22, 4   ;;  %s1431_s19 = smov %s1262_s26 }
 0x14a   : > { %s1432_s20 = smov %s1188_s21  ;;  %s1433_s21 = smov %s1435_s23 }
 0x14b   :  { %14 = sbr.rel (!%p12_p10) target bundleno = 3 (0x3), region = 133 }

// kernel: forward.36
= control target key start
LH: loop header
LB: loop body
LE: loop exit
PB: predicated region body
PF: predicated region fallthrough
CT: control target
= control target key end

     0   :  { %v19_v0 = vlaneseq  ;;  %s94_s0 = inlined_call_operand.vmem [shape: bf16[8,256], index: 0, kind: input, shape index: {}]   ;;  %s95_s1 = inlined_call_operand.vmem [shape: f32[1,256], index: 1, kind: input, shape index: {}]   ;;  %s96_s2 = inlined_call_operand.vmem [shape: f32[1,256], index: 2, kind: input, shape index: {}]   ;;  %s97_s3 = inlined_call_operand.vmem [shape: bf16[8,256], index: 3, kind: output, shape index: {}]  }
   0x1   :  { %v14_v1 = vld [vmem:[%s94_s0] sm:$0xff] }
   0x2   :  { %v20_v2 = vshrl.u32 %v19_v0, 7  ;;  %v17_v3 = vld [vmem:[%s95_s1] sm:$0x3]  ;;  %v15_v5 = vunpack.c.l.bf16 %v14_v1  ;;  %v16_v6 = vunpack.c.h.bf16 %v14_v1 }
   0x3   :  { %v31_v4 = vld [vmem:[%s96_s2] sm:$0x3] }
   0x4   :  { %v21_v7 = vsub.s32 0, %v20_v2  ;;  %v25_v8 = vsub.s32 1, %v20_v2 }
   0x6   :  { %v22_v9 = vrot.slane %v17_v3, %v21_v7  ;;  %v26_v10 = vrot.slane %v17_v3, %v25_v8  ;;  %v36_v11 = vrot.slane %v31_v4, %v21_v7  ;;  %v40_v12 = vrot.slane %v31_v4, %v25_v8 }
   0x8   :  { %v29_v13 = vmul.f32 %v22_v9, %v15_v5  ;;  %v30_v14 = vmul.f32 %v26_v10, %v16_v6 }
   0xa   :  { %v43_v15 = vadd.f32 %v36_v11, %v29_v13  ;;  %v44_v16 = vadd.f32 %v40_v12, %v30_v14 }
   0xc   :  { %v45_v17 = vmax.f32 %v43_v15, 0.0  ;;  %v46_v18 = vmax.f32 %v44_v16, 0.0 }
   0xe   :  { %v61_v19 = vpack.c.bf16 %v46_v18, %v45_v17 }
  0x10   :  { %55 = vst [vmem:[%s97_s3] sm:$0xff] %v61_v19 }

// kernel: forward.37
= control target key start
LH: loop header
LB: loop body
LE: loop exit
PB: predicated region body
PF: predicated region fallthrough
CT: control target
= control target key end

     0   :  { %s1189_s15 = smov 0   ;;  %s1191_s16 = smov 0   ;;  %s1430_s0 = inlined_call_operand.vmem [shape: bf16[2,2304], index: 0, kind: input, shape index: {}]   ;;  %s1431_s1 = inlined_call_operand.vmem [shape: bf16[2304,512], index: 1, kind: input, shape index: {}]   ;;  %s1432_s2 = inlined_call_operand.vmem [shape: f32[1,512], index: 2, kind: input, shape index: {}]   ;;  %s1433_s3 = inlined_call_operand.vmem [shape: f32[1,512], index: 3, kind: input, shape index: {}]   ;;  %s1434_s4 = inlined_call_operand.vmem [shape: bf16[2,512], index: 4, kind: output, shape index: {}]  }
   0x1   :  { %s1193_s17 = smov 0   ;;  %s1195_s18 = smov 0  }
   0x2   :  { %s1197_s19 = smov 0   ;;  %s1199_s20 = smov 0  }
   0x3   :  { %s1201_s21 = smov 0  }
   0x4 LB: > { %s26_s22 = sadd.s32 1, %s1151_s19  ;;  %s29_s23 = sadd.s32 1, %s1155_s20  ;;  %s1159_s21 = sphi %s1201_s21, %s14_s21   ;;  %s1155_s20 = sphi %s1199_s20, %s1440_s20   ;;  %s1151_s19 = sphi %s1197_s19, %s1439_s19   ;;  %s1147_s18 = sphi %s1195_s18, %s1438_s18   ;;  %s1143_s17 = sphi %s1193_s17, %s1437_s17   ;;  %s1139_s16 = sphi %s1191_s16, %s1436_s16   ;;  %s1135_s15 = sphi %s1189_s15, %s1435_s15  }
   0x5   : > { %p27_p0 = scmp.ge.s32.totalorder %s26_s22, 9  ;;  %p77_p1 = scmp.ne.s32.totalorder %s1139_s16, %s1135_s15 }
   0x6   : > { %p78_p2 = scmp.eq.s32.totalorder %s1159_s21, 0  ;;  %s70_s27 = sadd.s32 1, %s1139_s16 }
   0x7   : > { %s1442_s22 = smov (%p27_p0, %s26_s22), 0  ;;  %s1444_s23 = smov (!%p27_p0, %s29_s23), %s1155_s20 }
   0x8   : > { %p79_p3 = por %p78_p2, %p77_p1  ;;  %p31_p4 = scmp.ge.s32.totalorder %s1444_s23, 2 }
   0x9   : > { %s65_s24 = ssub.s32 %s1151_s19, %s1442_s22  ;;  %p946_p6 = scmp.ge.s32.totalorder %s1159_s21, 18 }
   0xa   : > { %s1446_s23 = smov (%p31_p4, %s1444_s23), 0 }
   0xb   : > { %s66_s25 = ssub.s32 %s1155_s20, %s1446_s23  ;;  %183 = sbr.rel (%p946_p6) target bundleno = 39 (0x27), region = 16 }
   0xc   : > { %s67_s26 = sor.u32 %s66_s25, %s65_s24 }
   0xd   : > { %p68_p5 = scmp.eq.s32.totalorder %s67_s26, 0 }
   0xf   : > { %s1240_s28 = scalar_select %p68_p5, %s1139_s16, %s70_s27  }
  0x10   : > { %198 = sbr.rel (!%p79_p3) target bundleno = 39 (0x27), region = 24  ;;  %s200_s29 = sand.u32 (%p79_p3), 1, %s1139_s16  }
  0x11   : > { %s949_s30 = sshll.u32 (%p79_p3), %s1155_s20, 1  ;;  %s947_s5 = sshll.u32 (%p79_p3), %s200_s29, 8 }
  0x12   : > { %s997_s6 = sshll.u32 (%p79_p3), %s1151_s19, 7  ;;  %s1254_s12 = scalar_lea.vmem (%p79_p3), [#allocation3], %s947_s5 }
  0x13   : > { %s206_s7 = sadd.s32 (%p79_p3), %s997_s6, %s949_s30 }
  0x14   : > { %s951_s8 = sshll.u32 (%p79_p3), %s206_s7, 2 }
  0x15   : > { %s1249_s11 = scalar_lea.vmem %s1431_s1, %s951_s8 }
  0x16   : > { %v299_v0 = vld [vmem:[%s1249_s11] sm:$0xff]  ;;  %v301_v1 = vld [vmem:[%s1249_s11 + $0x10] sm:$0xff] }
  0x17   : > { %v303_v2 = vld [vmem:[%s1249_s11 + $0x20] sm:$0xff]  ;;  %300 = vst [vmem:[%s1254_s12] sm:$0xff] %v299_v0  ;;  %302 = vst [vmem:[%s1254_s12 + $0x8] sm:$0xff] %v301_v1  ;;  %v305_v3 = vld [vmem:[%s1249_s11 + $0x30] sm:$0xff] }
  0x18   : > { %304 = vst [vmem:[%s1254_s12 + $0x10] sm:$0xff] %v303_v2  ;;  %v307_v4 = vld [vmem:[%s1249_s11 + $0x40] sm:$0xff]  ;;  %v309_v5 = vld [vmem:[%s1249_s11 + $0x50] sm:$0xff]  ;;  %306 = vst [vmem:[%s1254_s12 + $0x18] sm:$0xff] %v305_v3 }
  0x19   : > { %308 = vst [vmem:[%s1254_s12 + $0x20] sm:$0xff] %v307_v4  ;;  %310 = vst [vmem:[%s1254_s12 + $0x28] sm:$0xff] %v309_v5  ;;  %v311_v6 = vld [vmem:[%s1249_s11 + $0x60] sm:$0xff]  ;;  %v313_v7 = vld [vmem:[%s1249_s11 + $0x70] sm:$0xff] }
  0x1a   : > { %v315_v8 = vld [vmem:[%s1249_s11 + $0x80] sm:$0xff]  ;;  %312 = vst [vmem:[%s1254_s12 + $0x30] sm:$0xff] %v311_v6  ;;  %314 = vst [vmem:[%s1254_s12 + $0x38] sm:$0xff] %v313_v7  ;;  %v317_v9 = vld [vmem:[%s1249_s11 + $0x90] sm:$0xff] }
  0x1b   : > { %316 = vst [vmem:[%s1254_s12 + $0x40] sm:$0xff] %v315_v8  ;;  %v319_v10 = vld [vmem:[%s1249_s11 + $0xa0] sm:$0xff]  ;;  %v321_v11 = vld [vmem:[%s1249_s11 + $0xb0] sm:$0xff]  ;;  %318 = vst [vmem:[%s1254_s12 + $0x48] sm:$0xff] %v317_v9 }
  0x1c   : > { %320 = vst [vmem:[%s1254_s12 + $0x50] sm:$0xff] %v319_v10  ;;  %322 = vst [vmem:[%s1254_s12 + $0x58] sm:$0xff] %v321_v11  ;;  %v323_v12 = vld [vmem:[%s1249_s11 + $0xc0] sm:$0xff]  ;;  %v325_v13 = vld [vmem:[%s1249_s11 + $0xd0] sm:$0xff] }
  0x1d   : > { %v327_v14 = vld [vmem:[%s1249_s11 + $0xe0] sm:$0xff]  ;;  %324 = vst [vmem:[%s1254_s12 + $0x60] sm:$0xff] %v323_v12  ;;  %326 = vst [vmem:[%s1254_s12 + $0x68] sm:$0xff] %v325_v13  ;;  %v329_v15 = vld [vmem:[%s1249_s11 + $0xf0] sm:$0xff] }
  0x1e   : > { %328 = vst [vmem:[%s1254_s12 + $0x70] sm:$0xff] %v327_v14  ;;  %v331_v16 = vld [vmem:[%s1249_s11 + $0x100] sm:$0xff]  ;;  %v333_v17 = vld [vmem:[%s1249_s11 + $0x110] sm:$0xff]  ;;  %330 = vst [vmem:[%s1254_s12 + $0x78] sm:$0xff] %v329_v15 }
  0x1f   : > { %332 = vst [vmem:[%s1254_s12 + $0x80] sm:$0xff] %v331_v16  ;;  %334 = vst [vmem:[%s1254_s12 + $0x88] sm:$0xff] %v333_v17  ;;  %v335_v18 = vld [vmem:[%s1249_s11 + $0x120] sm:$0xff]  ;;  %v337_v19 = vld [vmem:[%s1249_s11 + $0x130] sm:$0xff] }
  0x20   : > { %v339_v20 = vld [vmem:[%s1249_s11 + $0x140] sm:$0xff]  ;;  %336 = vst [vmem:[%s1254_s12 + $0x90] sm:$0xff] %v335_v18  ;;  %338 = vst [vmem:[%s1254_s12 + $0x98] sm:$0xff] %v337_v19  ;;  %v341_v21 = vld [vmem:[%s1249_s11 + $0x150] sm:$0xff] }
  0x21   : > { %340 = vst [vmem:[%s1254_s12 + $0xa0] sm:$0xff] %v339_v20  ;;  %v343_v22 = vld [vmem:[%s1249_s11 + $0x160] sm:$0xff]  ;;  %v345_v23 = vld [vmem:[%s1249_s11 + $0x170] sm:$0xff]  ;;  %342 = vst [vmem:[%s1254_s12 + $0xa8] sm:$0xff] %v341_v21 }
  0x22   : > { %344 = vst [vmem:[%s1254_s12 + $0xb0] sm:$0xff] %v343_v22  ;;  %346 = vst [vmem:[%s1254_s12 + $0xb8] sm:$0xff] %v345_v23  ;;  %v347_v24 = vld [vmem:[%s1249_s11 + $0x180] sm:$0xff]  ;;  %v349_v25 = vld [vmem:[%s1249_s11 + $0x190] sm:$0xff] }
  0x23   : > { %v351_v26 = vld [vmem:[%s1249_s11 + $0x1a0] sm:$0xff]  ;;  %348 = vst [vmem:[%s1254_s12 + $0xc0] sm:$0xff] %v347_v24  ;;  %350 = vst [vmem:[%s1254_s12 + $0xc8] sm:$0xff] %v349_v25  ;;  %v353_v27 = vld [vmem:[%s1249_s11 + $0x1b0] sm:$0xff] }
  0x24   : > { %352 = vst [vmem:[%s1254_s12 + $0xd0] sm:$0xff] %v351_v26  ;;  %v355_v28 = vld [vmem:[%s1249_s11 + $0x1c0] sm:$0xff]  ;;  %v357_v29 = vld [vmem:[%s1249_s11 + $0x1d0] sm:$0xff]  ;;  %354 = vst [vmem:[%s1254_s12 + $0xd8] sm:$0xff] %v353_v27 }
  0x25   : > { %356 = vst [vmem:[%s1254_s12 + $0xe0] sm:$0xff] %v355_v28  ;;  %358 = vst [vmem:[%s1254_s12 + $0xe8] sm:$0xff] %v357_v29  ;;  %v359_v30 = vld [vmem:[%s1249_s11 + $0x1e0] sm:$0xff]  ;;  %v361_v31 = vld [vmem:[%s1249_s11 + $0x1f0] sm:$0xff] }
  0x26   : > { %360 = vst [vmem:[%s1254_s12 + $0xf0] sm:$0xff] %v359_v30  ;;  %362 = vst [vmem:[%s1254_s12 + $0xf8] sm:$0xff] %v361_v31 }
  0x27 PF: > { %p952_p7 = scmp.ge.s32.totalorder %s1159_s21, 1  ;;  %p383_p8 = scmp.lt.s32.totalorder %s1159_s21, 19 }
  0x29   : > { %p384_p9 = pnand %p952_p7, %p383_p8 }
  0x2a   : > { %s390_s13 = sand.u32 (!%p384_p9), 1, %s1135_s15   ;;  %s954_s14 = sshll.u32 (!%p384_p9), %s1143_s17, 1 }
  0x2b   : > { %387 = sbr.rel (%p384_p9) target bundleno = 348 (0x15c), region = 70  ;;  %s953_s24 = sshll.u32 (!%p384_p9), %s390_s13, 8 }
  0x2c   : > { %p437_p10 = scmp.lt.s32.totalorder (!%p384_p9), %s954_s14, 17  ;;  %s955_s25 = sshll.u32 (!%p384_p9), %s1147_s18, 1 }
  0x2d   : > { %p446_p11 = scmp.lt.s32.totalorder (!%p384_p9), %s955_s25, 3  ;;  %s1342_s11 = scalar_lea.vmem (!%p384_p9), [#allocation3], %s953_s24 }
  0x2e   : > { %p958_p12 = scmp.ne.s32.totalorder (!%p384_p9), %s1143_s17, 0 }
  0x30   : > { %s1448_s14 = smov (!%p437_p10, %s954_s14), 17  ;;  %s1450_s25 = smov (!%p446_p11, %s955_s25), 3 }
  0x31   : > { %s441_s29 = scalar_lea.vmem %s1430_s0, %s1448_s14  ;;  %s448_s15 = scalar_lea.vmem %s1432_s2, %s1450_s25 }
  0x32   : > { %s453_s18 = scalar_lea.vmem %s1433_s3, %s1450_s25  ;;  %s462_s10 = scalar_lea.vmem %s1434_s4, %s1450_s25 }
  0x33   : > { %467 = sbr.rel (%p958_p12) target bundleno = 58 (0x3a), region = 78 }
  0x38   : > { %v1161_v32 = vmov 0.0  }
  0x39   : > { %468 = vst [vmem:[#allocation2] sm:$0xf] %v1161_v32 }
  0x3a PF: > { %v1057_v33 = vld [vmem:[%s1342_s11 + $0x74] ss:$8 sps:$4 sm:$0xff]   ;;  %v1059_v34 = vld [vmem:[%s1342_s11 + $0x70] ss:$8 sps:$4 sm:$0xff]   ;;  %v1060_v35 = vld [vmem:[%s1342_s11 + $0x64] ss:$8 sps:$4 sm:$0xff]   ;;  %v515_v44 = vlaneseq }
  0x3b   : > { %688 = vmatprep.subr.bf16.mxu0 %v1057_v33  ;;  %v1062_v36 = vld [vmem:[%s1342_s11 + $0x60] ss:$8 sps:$4 sm:$0xff]   ;;  %v1063_v37 = vld [vmem:[%s1342_s11 + $0x54] ss:$8 sps:$4 sm:$0xff]   ;;  %v1065_v38 = vld [vmem:[%s1342_s11 + $0x50] ss:$8 sps:$4 sm:$0xff]  }
  0x3c   : > { %689 = vmatpush1.bf16.msra.mxu0 %v1059_v34  ;;  %v1066_v39 = vld [vmem:[%s1342_s11 + $0x44] ss:$8 sps:$4 sm:$0xff]   ;;  %v1068_v40 = vld [vmem:[%s1342_s11 + $0x40] ss:$8 sps:$4 sm:$0xff]   ;;  %v1069_v41 = vld [vmem:[%s1342_s11 + $0x34] ss:$8 sps:$4 sm:$0xff]  }
  0x3d   : > { %690 = vmatprep.subr.bf16.mxu0 %v1060_v35  ;;  %v1162_v42 = vmov 1966171168   ;;  %v1071_v45 = vld [vmem:[%s1342_s11 + $0x30] ss:$8 sps:$4 sm:$0xff]   ;;  %v1072_v46 = vld [vmem:[%s1342_s11 + $0x24] ss:$8 sps:$4 sm:$0xff]  }
  0x3e   : > { %v513_v43 = vunpack.c.l.s4 %v1162_v42  ;;  %v1356_v48 = vshrl.u32 %v515_v44, 7  ;;  %v1074_v49 = vld [vmem:[%s1342_s11 + $0x20] ss:$8 sps:$4 sm:$0xff]   ;;  %v1075_v50 = vld [vmem:[%s1342_s11 + $0x14] ss:$8 sps:$4 sm:$0xff]   ;;  %p992_p13 = scmp.ne.s32.totalorder %s1143_s17, 8 }
  0x3f   : > { %v959_v52 = vld.sshfl [vmem:[%s441_s29] sm:$0x11 pattern:$0x75316420]  ;;  %v1077_v54 = vld [vmem:[%s1342_s11 + $0x10] ss:$8 sps:$4 sm:$0xff]  }
  0x40   : > { %691 = vmatpush1.bf16.msra.mxu0 %v1062_v36  ;;  %v514_v47 = vunpack.c.0.s8 %v513_v43  ;;  %v511_v53 = vcombine.high %v959_v52, %v959_v52  ;;  %v1078_v55 = vld [vmem:[%s1342_s11 + $0x4] ss:$8 sps:$4 sm:$0xff]   ;;  %v1080_v57 = vld [vmem:[%s1342_s11] ss:$8 sps:$4 sm:$0xff]   ;;  %v1081_v58 = vld [vmem:[%s1342_s11 + $0xf4] ss:$8 sps:$4 sm:$0xff]  }
  0x41   : > { %692 = vmatprep.subr.bf16.mxu0 %v1063_v37  ;;  %v1083_v59 = vld [vmem:[%s1342_s11 + $0xf0] ss:$8 sps:$4 sm:$0xff]   ;;  %v1084_v60 = vld [vmem:[%s1342_s11 + $0xe4] ss:$8 sps:$4 sm:$0xff]   ;;  %v1086_v61 = vld [vmem:[%s1342_s11 + $0xe0] ss:$8 sps:$4 sm:$0xff]  }
  0x42   : > { %v1361_v51 = vsub.s32 %v514_v47, %v1356_v48  ;;  %v1087_v62 = vld [vmem:[%s1342_s11 + $0xd4] ss:$8 sps:$4 sm:$0xff]   ;;  %v1089_v63 = vld [vmem:[%s1342_s11 + $0xd0] ss:$8 sps:$4 sm:$0xff]   ;;  %v1090_v0 = vld [vmem:[%s1342_s11 + $0xc4] ss:$8 sps:$4 sm:$0xff]  }
  0x43   : > { %v1092_v1 = vld [vmem:[%s1342_s11 + $0xc0] ss:$8 sps:$4 sm:$0xff]   ;;  %v1093_v2 = vld [vmem:[%s1342_s11 + $0xb4] ss:$8 sps:$4 sm:$0xff]   ;;  %v1095_v3 = vld [vmem:[%s1342_s11 + $0xb0] ss:$8 sps:$4 sm:$0xff]  }
  0x44   : > { %693 = vmatpush1.bf16.msra.mxu0 %v1065_v38  ;;  %v525_v56 = vrot.slane %v511_v53, %v1361_v51  ;;  %v1096_v4 = vld [vmem:[%s1342_s11 + $0xa4] ss:$8 sps:$4 sm:$0xff]   ;;  %v1098_v5 = vld [vmem:[%s1342_s11 + $0xa0] ss:$8 sps:$4 sm:$0xff]   ;;  %v1099_v6 = vld [vmem:[%s1342_s11 + $0x94] ss:$8 sps:$4 sm:$0xff]   ;;  %v518_v10 = vrot.slane %v959_v52, %v1361_v51 }
  0x45   : > { %694 = vmatprep.subr.bf16.mxu0 %v1066_v39  ;;  %v1101_v7 = vld [vmem:[%s1342_s11 + $0x90] ss:$8 sps:$4 sm:$0xff]   ;;  %v1102_v8 = vld [vmem:[%s1342_s11 + $0x84] ss:$8 sps:$4 sm:$0xff]   ;;  %v1104_v9 = vld [vmem:[%s1342_s11 + $0x80] ss:$8 sps:$4 sm:$0xff]  }
  0x46   : > { %720 = vmatprep.mubr.bf16.mxu0 %v525_v56  ;;  %v1163_v11 = vmov 1983009808   ;;  %v469_v18 = vld [vmem:[#allocation2] sm:$0xf] }
  0x47   : > { %v733_v12 = vunpack.c.l.s4 %v1163_v11 }
  0x48   : > { %695 = vmatpush1.bf16.msra.mxu0 %v1068_v40 }
  0x49   : > { %696 = vmatprep.subr.bf16.mxu0 %v1069_v41  ;;  %v734_v13 = vunpack.c.0.s8 %v733_v12 }
  0x4b   : > { %v737_v15 = vsub.s32 %v734_v13, %v1356_v48 }
  0x4c   : > { %697 = vmatpush1.bf16.msra.mxu0 %v1071_v45 }
  0x4d   : > { %698 = vmatprep.subr.bf16.mxu0 %v1072_v46 }
  0x50   : > { %699 = vmatpush1.bf16.msra.mxu0 %v1074_v49 }
  0x51   : > { %700 = vmatprep.subr.bf16.mxu0 %v1075_v50 }
  0x54   : > { %701 = vmatpush1.bf16.msra.mxu0 %v1077_v54 }
  0x55   : > { %702 = vmatprep.subr.bf16.mxu0 %v1078_v55 }
  0x58   : > { %703 = vmatpush1.bf16.msra.mxu0 %v1080_v57 }
  0x59   : > { %704 = vmatprep.subr.bf16.mxu0 %v1081_v58 }
  0x5c   : > { %705 = vmatpush2.bf16.msra.mxu0 %v1083_v59 }
  0x5d   : > { %706 = vmatprep.subr.bf16.mxu0 %v1084_v60 }
  0x60   : > { %707 = vmatpush2.bf16.msra.mxu0 %v1086_v61 }
  0x61   : > { %708 = vmatprep.subr.bf16.mxu0 %v1087_v62 }
  0x64   : > { %709 = vmatpush2.bf16.msra.mxu0 %v1089_v63 }
  0x65   : > { %710 = vmatprep.subr.bf16.mxu0 %v1090_v0 }
  0x68   : > { %711 = vmatpush2.bf16.msra.mxu0 %v1092_v1 }
  0x69   : > { %712 = vmatprep.subr.bf16.mxu0 %v1093_v2 }
  0x6c   : > { %713 = vmatpush2.bf16.msra.mxu0 %v1095_v3 }
  0x6d   : > { %714 = vmatprep.subr.bf16.mxu0 %v1096_v4 }
  0x70   : > { %715 = vmatpush2.bf16.msra.mxu0 %v1098_v5 }
  0x71   : > { %716 = vmatprep.subr.bf16.mxu0 %v1099_v6 }
  0x74   : > { %717 = vmatpush2.bf16.msra.mxu0 %v1101_v7 }
  0x75   : > { %718 = vmatprep.subr.bf16.mxu0 %v1102_v8 }
  0x78   : > { %719 = vmatpush2.bf16.msra.mxu0 %v1104_v9 }
  0x7b   : > { %721 = vmatmul.mubr.bf16.vlgmr.msra.gmra.mxu0 %v518_v10 }
 0x13b   : > { %v722_v14 = vpop.f32.mrf.mxu0 }
 0x13d   : > { %v724_v16 = vpop.f32.mrf.mxu0 }
 0x13e   : > { %v731_v17 = vcombine.low %v722_v14, %v724_v16 }
 0x13f   : > { %v726_v19 = vpop.f32.mrf.mxu0 }
 0x140   : > { %v738_v20 = vrot.slane %v731_v17, %v737_v15  ;;  %745 = sbr.rel (%p992_p13) target bundleno = 348 (0x15c), region = 82 }
 0x141   : > { %v727_v21 = vpop.f32.mrf.mxu0 }
 0x142   : > { %v740_v22 = vadd.f32 %v738_v20, %v469_v18 }
 0x144   : > { %741 = vst [vmem:[#allocation2] sm:$0xf] %v740_v22 }
 0x145   : > { %v747_v23 = vld [vmem:[%s448_s15] sm:$0x3]  ;;  %v751_v24 = vsub.s32 0, %v1356_v48  ;;  %v755_v25 = vsub.s32 1, %v1356_v48 }
 0x146   : > { %v767_v26 = vld [vmem:[%s453_s18] sm:$0x3] }
 0x147   : > { %v752_v27 = vrot.slane %v747_v23, %v751_v24  ;;  %v756_v28 = vrot.slane %v747_v23, %v755_v25  ;;  %v772_v29 = vrot.slane %v767_v26, %v751_v24  ;;  %v776_v30 = vrot.slane %v767_v26, %v755_v25 }
 0x149   : > { %v757_v31 = vcombine.low %v752_v27, %v756_v28  ;;  %v777_v32 = vcombine.low %v772_v29, %v776_v30 }
 0x14b   : > { %v746_v33 = vld [vmem:[#allocation2] sm:$0xf]  ;;  %v764_v34 = vrot.slane %v757_v31, %v737_v15  ;;  %v784_v35 = vrot.slane %v777_v32, %v737_v15 }
 0x14d   : > { %v766_v36 = vmul.f32 %v764_v34, %v746_v33 }
 0x14f   : > { %v786_v37 = vadd.f32 %v784_v35, %v766_v36 }
 0x151   : > { %v787_v38 = vmax.f32 %v786_v37, 0.0 }
 0x153   : > { %v795_v39 = vrot.slane %v787_v38, %v737_v15 }
 0x155   : > { %v796_v40 = vcombine.high %v795_v39, %v795_v39 }
 0x157   : > { %v993_v41 = vpack.c.bf16 %v796_v40, %v795_v39 }
 0x159   : > { %v810_v42 = vrot.slane %v993_v41, %v1361_v51 }
 0x15b   : > { %994 = vst.sshfl [vmem:[%s462_s10] sm:$0x5 pattern:$0x73625140] %v810_v42 }
 0x15c PF: > { %s14_s21 = sadd.s32 1, %s1159_s21   ;;  %s1435_s15 = smov %s1139_s16 }
 0x15d   : > { %p11_p0 = scmp.ge.s32.totalorder %s14_s21, 20   ;;  %s1436_s16 = smov %s1240_s28 }
 0x15e   : > { %s1437_s17 = smov %s1151_s19  ;;  %s1438_s18 = smov %s1155_s20 }
 0x15f   : > { %s1439_s19 = smov %s1442_s22  ;;  %s1440_s20 = smov %s1446_s23 }
 0x160   :  { %13 = sbr.rel (!%p11_p0) target bundleno = 4 (0x4), region = 126 }

// kernel: forward.40
= control target key start
LH: loop header
LB: loop body
LE: loop exit
PB: predicated region body
PF: predicated region fallthrough
CT: control target
= control target key end

     0   :  { %s1555_s12 = smov 0   ;;  %s1557_s13 = smov 0   ;;  %s1881_s0 = inlined_call_operand.vmem [shape: bf16[2,4608], index: 0, kind: input, shape index: {}]   ;;  %s1882_s1 = inlined_call_operand.vmem [shape: bf16[4608,512], index: 1, kind: input, shape index: {}]   ;;  %s1883_s2 = inlined_call_operand.vmem [shape: bf16[2,512], index: 2, kind: input, shape index: {}]   ;;  %s1884_s3 = inlined_call_operand.vmem [shape: bf16[2,512], index: 3, kind: output, shape index: {}]  }
   0x1   :  { %s1559_s14 = smov 0   ;;  %s1561_s15 = smov 0  }
   0x2   :  { %s1563_s16 = smov 0   ;;  %s1565_s17 = smov 0  }
   0x3   :  { %s1567_s18 = smov 0  }
   0x4 LB: > { %s25_s19 = sadd.s32 1, %s1522_s16  ;;  %s28_s20 = sadd.s32 1, %s1526_s17  ;;  %s1530_s18 = sphi %s1567_s18, %s13_s18   ;;  %s1526_s17 = sphi %s1565_s17, %s1890_s17   ;;  %s1522_s16 = sphi %s1563_s16, %s1889_s16   ;;  %s1518_s15 = sphi %s1561_s15, %s1888_s15   ;;  %s1514_s14 = sphi %s1559_s14, %s1887_s14   ;;  %s1510_s13 = sphi %s1557_s13, %s1886_s13   ;;  %s1506_s12 = sphi %s1555_s12, %s1885_s12  }
   0x5   : > { %p26_p0 = scmp.ge.s32.totalorder %s25_s19, 9  ;;  %p76_p1 = scmp.ne.s32.totalorder %s1510_s13, %s1506_s12 }
   0x6   : > { %p77_p2 = scmp.eq.s32.totalorder %s1530_s18, 0  ;;  %s69_s24 = sadd.s32 1, %s1510_s13 }
   0x7   : > { %s1892_s19 = smov (%p26_p0, %s25_s19), 0  ;;  %s1894_s20 = smov (!%p26_p0, %s28_s20), %s1526_s17 }
   0x8   : > { %p78_p3 = por %p77_p2, %p76_p1  ;;  %p30_p4 = scmp.ge.s32.totalorder %s1894_s20, 2 }
   0x9   : > { %s64_s21 = ssub.s32 %s1522_s16, %s1892_s19  ;;  %p1238_p6 = scmp.ge.s32.totalorder %s1530_s18, 18 }
   0xa   : > { %s1896_s20 = smov (%p30_p4, %s1894_s20), 0 }
   0xb   : > { %s65_s22 = ssub.s32 %s1526_s17, %s1896_s20  ;;  %158 = sbr.rel (%p1238_p6) target bundleno = 55 (0x37), region = 16 }
   0xc   : > { %s66_s23 = sor.u32 %s65_s22, %s64_s21 }
   0xd   : > { %p67_p5 = scmp.eq.s32.totalorder %s66_s23, 0 }
   0xf   : > { %s1606_s25 = scalar_select %p67_p5, %s1510_s13, %s69_s24  }
  0x10   : > { %173 = sbr.rel (!%p78_p3) target bundleno = 55 (0x37), region = 24  ;;  %s175_s26 = sand.u32 (%p78_p3), 1, %s1510_s13  }
  0x11   : > { %s1241_s27 = sshll.u32 (%p78_p3), %s1526_s17, 1  ;;  %s1239_s28 = sshll.u32 (%p78_p3), %s175_s26, 9 }
  0x12   : > { %s1320_s29 = sshll.u32 (%p78_p3), %s1522_s16, 8  ;;  %s1620_s8 = scalar_lea.vmem (%p78_p3), [#allocation3], %s1239_s28 }
  0x13   : > { %s181_s30 = sadd.s32 (%p78_p3), %s1320_s29, %s1241_s27 }
  0x14   : > { %s1243_s4 = sshll.u32 (%p78_p3), %s181_s30, 2 }
  0x15   : > { %s1615_s7 = scalar_lea.vmem %s1882_s1, %s1243_s4 }
  0x16   : > { %v338_v0 = vld [vmem:[%s1615_s7] sm:$0xff]  ;;  %v340_v1 = vld [vmem:[%s1615_s7 + $0x10] sm:$0xff] }
  0x17   : > { %v342_v2 = vld [vmem:[%s1615_s7 + $0x20] sm:$0xff]  ;;  %339 = vst [vmem:[%s1620_s8] sm:$0xff] %v338_v0  ;;  %341 = vst [vmem:[%s1620_s8 + $0x8] sm:$0xff] %v340_v1  ;;  %v344_v3 = vld [vmem:[%s1615_s7 + $0x30] sm:$0xff] }
  0x18   : > { %343 = vst [vmem:[%s1620_s8 + $0x10] sm:$0xff] %v342_v2  ;;  %v346_v4 = vld [vmem:[%s1615_s7 + $0x40] sm:$0xff]  ;;  %v348_v5 = vld [vmem:[%s1615_s7 + $0x50] sm:$0xff]  ;;  %345 = vst [vmem:[%s1620_s8 + $0x18] sm:$0xff] %v344_v3 }
  0x19   : > { %347 = vst [vmem:[%s1620_s8 + $0x20] sm:$0xff] %v346_v4  ;;  %349 = vst [vmem:[%s1620_s8 + $0x28] sm:$0xff] %v348_v5  ;;  %v350_v6 = vld [vmem:[%s1615_s7 + $0x60] sm:$0xff]  ;;  %v352_v7 = vld [vmem:[%s1615_s7 + $0x70] sm:$0xff] }
  0x1a   : > { %v354_v8 = vld [vmem:[%s1615_s7 + $0x80] sm:$0xff]  ;;  %351 = vst [vmem:[%s1620_s8 + $0x30] sm:$0xff] %v350_v6  ;;  %353 = vst [vmem:[%s1620_s8 + $0x38] sm:$0xff] %v352_v7  ;;  %v356_v9 = vld [vmem:[%s1615_s7 + $0x90] sm:$0xff] }
  0x1b   : > { %355 = vst [vmem:[%s1620_s8 + $0x40] sm:$0xff] %v354_v8  ;;  %v358_v10 = vld [vmem:[%s1615_s7 + $0xa0] sm:$0xff]  ;;  %v360_v11 = vld [vmem:[%s1615_s7 + $0xb0] sm:$0xff]  ;;  %357 = vst [vmem:[%s1620_s8 + $0x48] sm:$0xff] %v356_v9 }
  0x1c   : > { %359 = vst [vmem:[%s1620_s8 + $0x50] sm:$0xff] %v358_v10  ;;  %361 = vst [vmem:[%s1620_s8 + $0x58] sm:$0xff] %v360_v11  ;;  %v362_v12 = vld [vmem:[%s1615_s7 + $0xc0] sm:$0xff]  ;;  %v364_v13 = vld [vmem:[%s1615_s7 + $0xd0] sm:$0xff] }
  0x1d   : > { %v366_v14 = vld [vmem:[%s1615_s7 + $0xe0] sm:$0xff]  ;;  %363 = vst [vmem:[%s1620_s8 + $0x60] sm:$0xff] %v362_v12  ;;  %365 = vst [vmem:[%s1620_s8 + $0x68] sm:$0xff] %v364_v13  ;;  %v368_v15 = vld [vmem:[%s1615_s7 + $0xf0] sm:$0xff] }
  0x1e   : > { %367 = vst [vmem:[%s1620_s8 + $0x70] sm:$0xff] %v366_v14  ;;  %v370_v16 = vld [vmem:[%s1615_s7 + $0x100] sm:$0xff]  ;;  %v372_v17 = vld [vmem:[%s1615_s7 + $0x110] sm:$0xff]  ;;  %369 = vst [vmem:[%s1620_s8 + $0x78] sm:$0xff] %v368_v15 }
  0x1f   : > { %371 = vst [vmem:[%s1620_s8 + $0x80] sm:$0xff] %v370_v16  ;;  %373 = vst [vmem:[%s1620_s8 + $0x88] sm:$0xff] %v372_v17  ;;  %v374_v18 = vld [vmem:[%s1615_s7 + $0x120] sm:$0xff]  ;;  %v376_v19 = vld [vmem:[%s1615_s7 + $0x130] sm:$0xff] }
  0x20   : > { %v378_v20 = vld [vmem:[%s1615_s7 + $0x140] sm:$0xff]  ;;  %375 = vst [vmem:[%s1620_s8 + $0x90] sm:$0xff] %v374_v18  ;;  %377 = vst [vmem:[%s1620_s8 + $0x98] sm:$0xff] %v376_v19  ;;  %v380_v21 = vld [vmem:[%s1615_s7 + $0x150] sm:$0xff] }
  0x21   : > { %379 = vst [vmem:[%s1620_s8 + $0xa0] sm:$0xff] %v378_v20  ;;  %v382_v22 = vld [vmem:[%s1615_s7 + $0x160] sm:$0xff]  ;;  %v384_v23 = vld [vmem:[%s1615_s7 + $0x170] sm:$0xff]  ;;  %381 = vst [vmem:[%s1620_s8 + $0xa8] sm:$0xff] %v380_v21 }
  0x22   : > { %383 = vst [vmem:[%s1620_s8 + $0xb0] sm:$0xff] %v382_v22  ;;  %385 = vst [vmem:[%s1620_s8 + $0xb8] sm:$0xff] %v384_v23  ;;  %v386_v24 = vld [vmem:[%s1615_s7 + $0x180] sm:$0xff]  ;;  %v388_v25 = vld [vmem:[%s1615_s7 + $0x190] sm:$0xff] }
  0x23   : > { %v390_v26 = vld [vmem:[%s1615_s7 + $0x1a0] sm:$0xff]  ;;  %387 = vst [vmem:[%s1620_s8 + $0xc0] sm:$0xff] %v386_v24  ;;  %389 = vst [vmem:[%s1620_s8 + $0xc8] sm:$0xff] %v388_v25  ;;  %v392_v27 = vld [vmem:[%s1615_s7 + $0x1b0] sm:$0xff] }
  0x24   : > { %391 = vst [vmem:[%s1620_s8 + $0xd0] sm:$0xff] %v390_v26  ;;  %v394_v28 = vld [vmem:[%s1615_s7 + $0x1c0] sm:$0xff]  ;;  %v396_v29 = vld [vmem:[%s1615_s7 + $0x1d0] sm:$0xff]  ;;  %393 = vst [vmem:[%s1620_s8 + $0xd8] sm:$0xff] %v392_v27 }
  0x25   : > { %395 = vst [vmem:[%s1620_s8 + $0xe0] sm:$0xff] %v394_v28  ;;  %397 = vst [vmem:[%s1620_s8 + $0xe8] sm:$0xff] %v396_v29  ;;  %v398_v30 = vld [vmem:[%s1615_s7 + $0x1e0] sm:$0xff]  ;;  %v400_v31 = vld [vmem:[%s1615_s7 + $0x1f0] sm:$0xff] }
  0x26   : > { %v402_v32 = vld [vmem:[%s1615_s7 + $0x200] sm:$0xff]  ;;  %399 = vst [vmem:[%s1620_s8 + $0xf0] sm:$0xff] %v398_v30  ;;  %401 = vst [vmem:[%s1620_s8 + $0xf8] sm:$0xff] %v400_v31  ;;  %v404_v33 = vld [vmem:[%s1615_s7 + $0x210] sm:$0xff] }
  0x27   : > { %403 = vst [vmem:[%s1620_s8 + $0x100] sm:$0xff] %v402_v32  ;;  %v406_v34 = vld [vmem:[%s1615_s7 + $0x220] sm:$0xff]  ;;  %v408_v35 = vld [vmem:[%s1615_s7 + $0x230] sm:$0xff]  ;;  %405 = vst [vmem:[%s1620_s8 + $0x108] sm:$0xff] %v404_v33 }
  0x28   : > { %407 = vst [vmem:[%s1620_s8 + $0x110] sm:$0xff] %v406_v34  ;;  %409 = vst [vmem:[%s1620_s8 + $0x118] sm:$0xff] %v408_v35  ;;  %v410_v36 = vld [vmem:[%s1615_s7 + $0x240] sm:$0xff]  ;;  %v412_v37 = vld [vmem:[%s1615_s7 + $0x250] sm:$0xff] }
  0x29   : > { %v414_v38 = vld [vmem:[%s1615_s7 + $0x260] sm:$0xff]  ;;  %411 = vst [vmem:[%s1620_s8 + $0x120] sm:$0xff] %v410_v36  ;;  %413 = vst [vmem:[%s1620_s8 + $0x128] sm:$0xff] %v412_v37  ;;  %v416_v39 = vld [vmem:[%s1615_s7 + $0x270] sm:$0xff] }
  0x2a   : > { %415 = vst [vmem:[%s1620_s8 + $0x130] sm:$0xff] %v414_v38  ;;  %v418_v40 = vld [vmem:[%s1615_s7 + $0x280] sm:$0xff]  ;;  %v420_v41 = vld [vmem:[%s1615_s7 + $0x290] sm:$0xff]  ;;  %417 = vst [vmem:[%s1620_s8 + $0x138] sm:$0xff] %v416_v39 }
  0x2b   : > { %419 = vst [vmem:[%s1620_s8 + $0x140] sm:$0xff] %v418_v40  ;;  %421 = vst [vmem:[%s1620_s8 + $0x148] sm:$0xff] %v420_v41  ;;  %v422_v42 = vld [vmem:[%s1615_s7 + $0x2a0] sm:$0xff]  ;;  %v424_v43 = vld [vmem:[%s1615_s7 + $0x2b0] sm:$0xff] }
  0x2c   : > { %v426_v44 = vld [vmem:[%s1615_s7 + $0x2c0] sm:$0xff]  ;;  %423 = vst [vmem:[%s1620_s8 + $0x150] sm:$0xff] %v422_v42  ;;  %425 = vst [vmem:[%s1620_s8 + $0x158] sm:$0xff] %v424_v43  ;;  %v428_v45 = vld [vmem:[%s1615_s7 + $0x2d0] sm:$0xff] }
  0x2d   : > { %427 = vst [vmem:[%s1620_s8 + $0x160] sm:$0xff] %v426_v44  ;;  %v430_v46 = vld [vmem:[%s1615_s7 + $0x2e0] sm:$0xff]  ;;  %v432_v47 = vld [vmem:[%s1615_s7 + $0x2f0] sm:$0xff]  ;;  %429 = vst [vmem:[%s1620_s8 + $0x168] sm:$0xff] %v428_v45 }
  0x2e   : > { %431 = vst [vmem:[%s1620_s8 + $0x170] sm:$0xff] %v430_v46  ;;  %433 = vst [vmem:[%s1620_s8 + $0x178] sm:$0xff] %v432_v47  ;;  %v434_v48 = vld [vmem:[%s1615_s7 + $0x300] sm:$0xff]  ;;  %v436_v49 = vld [vmem:[%s1615_s7 + $0x310] sm:$0xff] }
  0x2f   : > { %v438_v50 = vld [vmem:[%s1615_s7 + $0x320] sm:$0xff]  ;;  %435 = vst [vmem:[%s1620_s8 + $0x180] sm:$0xff] %v434_v48  ;;  %437 = vst [vmem:[%s1620_s8 + $0x188] sm:$0xff] %v436_v49  ;;  %v440_v51 = vld [vmem:[%s1615_s7 + $0x330] sm:$0xff] }
  0x30   : > { %439 = vst [vmem:[%s1620_s8 + $0x190] sm:$0xff] %v438_v50  ;;  %v442_v52 = vld [vmem:[%s1615_s7 + $0x340] sm:$0xff]  ;;  %v444_v53 = vld [vmem:[%s1615_s7 + $0x350] sm:$0xff]  ;;  %441 = vst [vmem:[%s1620_s8 + $0x198] sm:$0xff] %v440_v51 }
  0x31   : > { %443 = vst [vmem:[%s1620_s8 + $0x1a0] sm:$0xff] %v442_v52  ;;  %445 = vst [vmem:[%s1620_s8 + $0x1a8] sm:$0xff] %v444_v53  ;;  %v446_v54 = vld [vmem:[%s1615_s7 + $0x360] sm:$0xff]  ;;  %v448_v55 = vld [vmem:[%s1615_s7 + $0x370] sm:$0xff] }
  0x32   : > { %v450_v56 = vld [vmem:[%s1615_s7 + $0x380] sm:$0xff]  ;;  %447 = vst [vmem:[%s1620_s8 + $0x1b0] sm:$0xff] %v446_v54  ;;  %449 = vst [vmem:[%s1620_s8 + $0x1b8] sm:$0xff] %v448_v55  ;;  %v452_v57 = vld [vmem:[%s1615_s7 + $0x390] sm:$0xff] }
  0x33   : > { %451 = vst [vmem:[%s1620_s8 + $0x1c0] sm:$0xff] %v450_v56  ;;  %v454_v58 = vld [vmem:[%s1615_s7 + $0x3a0] sm:$0xff]  ;;  %v456_v59 = vld [vmem:[%s1615_s7 + $0x3b0] sm:$0xff]  ;;  %453 = vst [vmem:[%s1620_s8 + $0x1c8] sm:$0xff] %v452_v57 }
  0x34   : > { %455 = vst [vmem:[%s1620_s8 + $0x1d0] sm:$0xff] %v454_v58  ;;  %457 = vst [vmem:[%s1620_s8 + $0x1d8] sm:$0xff] %v456_v59  ;;  %v458_v60 = vld [vmem:[%s1615_s7 + $0x3c0] sm:$0xff]  ;;  %v460_v61 = vld [vmem:[%s1615_s7 + $0x3d0] sm:$0xff] }
  0x35   : > { %v462_v62 = vld [vmem:[%s1615_s7 + $0x3e0] sm:$0xff]  ;;  %459 = vst [vmem:[%s1620_s8 + $0x1e0] sm:$0xff] %v458_v60  ;;  %461 = vst [vmem:[%s1620_s8 + $0x1e8] sm:$0xff] %v460_v61  ;;  %v464_v63 = vld [vmem:[%s1615_s7 + $0x3f0] sm:$0xff] }
  0x36   : > { %463 = vst [vmem:[%s1620_s8 + $0x1f0] sm:$0xff] %v462_v62  ;;  %465 = vst [vmem:[%s1620_s8 + $0x1f8] sm:$0xff] %v464_v63 }
  0x37 PF: > { %p1244_p7 = scmp.ge.s32.totalorder %s1530_s18, 1  ;;  %p482_p8 = scmp.lt.s32.totalorder %s1530_s18, 19 }
  0x39   : > { %p483_p9 = pnand %p1244_p7, %p482_p8 }
  0x3a   : > { %s489_s9 = sand.u32 (!%p483_p9), 1, %s1506_s12   ;;  %s1246_s10 = sshll.u32 (!%p483_p9), %s1514_s14, 2 }
  0x3b   : > { %486 = sbr.rel (%p483_p9) target bundleno = 361 (0x169), region = 66  ;;  %s1245_s11 = sshll.u32 (!%p483_p9), %s489_s9, 9 }
  0x3c   : > { %p534_p10 = scmp.lt.s32.totalorder (!%p483_p9), %s1246_s10, 35  ;;  %s1247_s21 = sshll.u32 (!%p483_p9), %s1518_s15, 1 }
  0x3d   : > { %p545_p11 = scmp.lt.s32.totalorder (!%p483_p9), %s1247_s21, 3  ;;  %s1768_s30 = scalar_lea.vmem (!%p483_p9), [#allocation3], %s1245_s11 }
  0x3e   : > { %p1249_p12 = scmp.ne.s32.totalorder (!%p483_p9), %s1514_s14, 0 }
  0x40   : > { %s1898_s10 = smov (!%p534_p10, %s1246_s10), 35  ;;  %s1900_s21 = smov (!%p545_p11, %s1247_s21), 3 }
  0x41   : > { %s538_s24 = scalar_lea.vmem %s1881_s0, %s1898_s10  ;;  %s549_s12 = scalar_lea.vmem %s1883_s2, %s1900_s21 }
  0x42   : > { %s558_s15 = scalar_lea.vmem %s1884_s3, %s1900_s21  ;;  %563 = sbr.rel (%p1249_p12) target bundleno = 73 (0x49), region = 74 }
  0x47   : > { %v1532_v0 = vmov 0.0  }
  0x48   : > { %564 = vst [vmem:[#allocation2] sm:$0xf] %v1532_v0 }
  0x49 PF: > { %v1380_v1 = vld [vmem:[%s1768_s30 + $0x74] ss:$8 sps:$4 sm:$0xff]   ;;  %v1384_v3 = vld [vmem:[%s1768_s30 + $0x70] ss:$8 sps:$4 sm:$0xff]   ;;  %v1386_v5 = vld [vmem:[%s1768_s30 + $0x64] ss:$8 sps:$4 sm:$0xff]   ;;  %v643_v41 = vlaneseq }
  0x4a   : > { %v1382_v2 = vld [vmem:[%s1768_s30 + $0x174] ss:$8 sps:$4 sm:$0xff]   ;;  %980 = vmatprep.subr.bf16.mxu0 %v1380_v1  ;;  %v1385_v4 = vld [vmem:[%s1768_s30 + $0x170] ss:$8 sps:$4 sm:$0xff]   ;;  %v1388_v6 = vld [vmem:[%s1768_s30 + $0x164] ss:$8 sps:$4 sm:$0xff]  }
  0x4b   : > { %1021 = vmatprep.subr.bf16.mxu1 %v1382_v2  ;;  %981 = vmatpush1.bf16.msra.mxu0 %v1384_v3  ;;  %v1390_v7 = vld [vmem:[%s1768_s30 + $0x60] ss:$8 sps:$4 sm:$0xff]   ;;  %v1392_v9 = vld [vmem:[%s1768_s30 + $0x54] ss:$8 sps:$4 sm:$0xff]   ;;  %v1396_v11 = vld [vmem:[%s1768_s30 + $0x50] ss:$8 sps:$4 sm:$0xff]  }
  0x4c   : > { %1022 = vmatpush1.bf16.msra.mxu1 %v1385_v4  ;;  %982 = vmatprep.subr.bf16.mxu0 %v1386_v5  ;;  %v1391_v8 = vld [vmem:[%s1768_s30 + $0x160] ss:$8 sps:$4 sm:$0xff]   ;;  %v1394_v10 = vld [vmem:[%s1768_s30 + $0x154] ss:$8 sps:$4 sm:$0xff]   ;;  %v1397_v12 = vld [vmem:[%s1768_s30 + $0x150] ss:$8 sps:$4 sm:$0xff]  }
  0x4d   : > { %1023 = vmatprep.subr.bf16.mxu1 %v1388_v6  ;;  %v1398_v13 = vld [vmem:[%s1768_s30 + $0x44] ss:$8 sps:$4 sm:$0xff]   ;;  %v1402_v15 = vld [vmem:[%s1768_s30 + $0x40] ss:$8 sps:$4 sm:$0xff]   ;;  %v1404_v17 = vld [vmem:[%s1768_s30 + $0x34] ss:$8 sps:$4 sm:$0xff]  }
  0x4e   : > { %v1400_v14 = vld [vmem:[%s1768_s30 + $0x144] ss:$8 sps:$4 sm:$0xff]   ;;  %v1403_v16 = vld [vmem:[%s1768_s30 + $0x140] ss:$8 sps:$4 sm:$0xff]   ;;  %v1406_v18 = vld [vmem:[%s1768_s30 + $0x134] ss:$8 sps:$4 sm:$0xff]  }
  0x4f   : > { %983 = vmatpush1.bf16.msra.mxu0 %v1390_v7  ;;  %v1408_v19 = vld [vmem:[%s1768_s30 + $0x30] ss:$8 sps:$4 sm:$0xff]   ;;  %v1410_v21 = vld [vmem:[%s1768_s30 + $0x24] ss:$8 sps:$4 sm:$0xff]   ;;  %v1414_v23 = vld [vmem:[%s1768_s30 + $0x20] ss:$8 sps:$4 sm:$0xff]  }
  0x50   : > { %1024 = vmatpush1.bf16.msra.mxu1 %v1391_v8  ;;  %984 = vmatprep.subr.bf16.mxu0 %v1392_v9  ;;  %v1409_v20 = vld [vmem:[%s1768_s30 + $0x130] ss:$8 sps:$4 sm:$0xff]   ;;  %v1412_v22 = vld [vmem:[%s1768_s30 + $0x124] ss:$8 sps:$4 sm:$0xff]   ;;  %v1415_v24 = vld [vmem:[%s1768_s30 + $0x120] ss:$8 sps:$4 sm:$0xff]  }
  0x51   : > { %1025 = vmatprep.subr.bf16.mxu1 %v1394_v10  ;;  %v1416_v25 = vld [vmem:[%s1768_s30 + $0x14] ss:$8 sps:$4 sm:$0xff]   ;;  %v1420_v27 = vld [vmem:[%s1768_s30 + $0x10] ss:$8 sps:$4 sm:$0xff]   ;;  %v1422_v29 = vld [vmem:[%s1768_s30 + $0x4] ss:$8 sps:$4 sm:$0xff]  }
  0x52   : > { %v1418_v26 = vld [vmem:[%s1768_s30 + $0x114] ss:$8 sps:$4 sm:$0xff]   ;;  %v1421_v28 = vld [vmem:[%s1768_s30 + $0x110] ss:$8 sps:$4 sm:$0xff]   ;;  %v1424_v30 = vld [vmem:[%s1768_s30 + $0x104] ss:$8 sps:$4 sm:$0xff]  }
  0x53   : > { %985 = vmatpush1.bf16.msra.mxu0 %v1396_v11  ;;  %v1426_v31 = vld [vmem:[%s1768_s30] ss:$8 sps:$4 sm:$0xff]   ;;  %v1428_v33 = vld [vmem:[%s1768_s30 + $0xf4] ss:$8 sps:$4 sm:$0xff]   ;;  %v1432_v35 = vld [vmem:[%s1768_s30 + $0xf0] ss:$8 sps:$4 sm:$0xff]  }
  0x54   : > { %1026 = vmatpush1.bf16.msra.mxu1 %v1397_v12  ;;  %986 = vmatprep.subr.bf16.mxu0 %v1398_v13  ;;  %v1427_v32 = vld [vmem:[%s1768_s30 + $0x100] ss:$8 sps:$4 sm:$0xff]   ;;  %v1430_v34 = vld [vmem:[%s1768_s30 + $0x1f4] ss:$8 sps:$4 sm:$0xff]   ;;  %v1433_v36 = vld [vmem:[%s1768_s30 + $0x1f0] ss:$8 sps:$4 sm:$0xff]  }
  0x55   : > { %1027 = vmatprep.subr.bf16.mxu1 %v1400_v14  ;;  %v1434_v37 = vld [vmem:[%s1768_s30 + $0xe4] ss:$8 sps:$4 sm:$0xff]   ;;  %v1533_v39 = vmov 1966171168   ;;  %v1438_v42 = vld [vmem:[%s1768_s30 + $0xe0] ss:$8 sps:$4 sm:$0xff]  }
  0x56   : > { %v1436_v38 = vld [vmem:[%s1768_s30 + $0x1e4] ss:$8 sps:$4 sm:$0xff]   ;;  %v641_v40 = vunpack.c.l.s4 %v1533_v39  ;;  %v1439_v43 = vld [vmem:[%s1768_s30 + $0x1e0] ss:$8 sps:$4 sm:$0xff]   ;;  %v1440_v44 = vld [vmem:[%s1768_s30 + $0xd4] ss:$8 sps:$4 sm:$0xff]  }
  0x57   : > { %987 = vmatpush1.bf16.msra.mxu0 %v1402_v15  ;;  %v1442_v45 = vld [vmem:[%s1768_s30 + $0x1d4] ss:$8 sps:$4 sm:$0xff]   ;;  %v1813_v47 = vshrl.u32 %v643_v41, 7  ;;  %v1444_v48 = vld [vmem:[%s1768_s30 + $0xd0] ss:$8 sps:$4 sm:$0xff]   ;;  %p1315_p13 = scmp.ne.s32.totalorder %s1514_s14, 8 }
  0x58   : > { %1028 = vmatpush1.bf16.msra.mxu1 %v1403_v16  ;;  %988 = vmatprep.subr.bf16.mxu0 %v1404_v17  ;;  %v642_v46 = vunpack.c.0.s8 %v641_v40  ;;  %v1445_v49 = vld [vmem:[%s1768_s30 + $0x1d0] ss:$8 sps:$4 sm:$0xff]   ;;  %v1446_v50 = vld [vmem:[%s1768_s30 + $0xc4] ss:$8 sps:$4 sm:$0xff]   ;;  %v1450_v54 = vld [vmem:[%s1768_s30 + $0xc0] ss:$8 sps:$4 sm:$0xff]  }
  0x59   : > { %1029 = vmatprep.subr.bf16.mxu1 %v1406_v18  ;;  %v1448_v51 = vld [vmem:[%s1768_s30 + $0x1c4] ss:$8 sps:$4 sm:$0xff]   ;;  %v1250_v53 = vld.sshfl [vmem:[%s538_s24] sm:$0x33 pattern:$0x75316420] }
  0x5a   : > { %v1820_v52 = vsub.s32 %v642_v46, %v1813_v47  ;;  %v1451_v55 = vld [vmem:[%s1768_s30 + $0x1c0] ss:$8 sps:$4 sm:$0xff]   ;;  %v639_v56 = vcombine.high %v1250_v53, %v1250_v53  ;;  %v1452_v57 = vld [vmem:[%s1768_s30 + $0xb4] ss:$8 sps:$4 sm:$0xff]   ;;  %v1456_v60 = vld [vmem:[%s1768_s30 + $0xb0] ss:$8 sps:$4 sm:$0xff]  }
  0x5b   : > { %989 = vmatpush1.bf16.msra.mxu0 %v1408_v19  ;;  %v1454_v58 = vld [vmem:[%s1768_s30 + $0x1b4] ss:$8 sps:$4 sm:$0xff]   ;;  %v1457_v61 = vld [vmem:[%s1768_s30 + $0x1b0] ss:$8 sps:$4 sm:$0xff]   ;;  %v1458_v63 = vld [vmem:[%s1768_s30 + $0xa4] ss:$8 sps:$4 sm:$0xff]  }
  0x5c   : > { %1030 = vmatpush1.bf16.msra.mxu1 %v1409_v20  ;;  %990 = vmatprep.subr.bf16.mxu0 %v1410_v21  ;;  %v653_v59 = vrot.slane %v639_v56, %v1820_v52  ;;  %v1460_v0 = vld [vmem:[%s1768_s30 + $0x1a4] ss:$8 sps:$4 sm:$0xff]   ;;  %v1462_v1 = vld [vmem:[%s1768_s30 + $0xa0] ss:$8 sps:$4 sm:$0xff]   ;;  %v1464_v3 = vld [vmem:[%s1768_s30 + $0x94] ss:$8 sps:$4 sm:$0xff]   ;;  %v646_v9 = vrot.slane %v1250_v53, %v1820_v52 }
  0x5d   : > { %1031 = vmatprep.subr.bf16.mxu1 %v1412_v22  ;;  %v1463_v2 = vld [vmem:[%s1768_s30 + $0x1a0] ss:$8 sps:$4 sm:$0xff]   ;;  %v1466_v4 = vld [vmem:[%s1768_s30 + $0x194] ss:$8 sps:$4 sm:$0xff]   ;;  %v1468_v5 = vld [vmem:[%s1768_s30 + $0x90] ss:$8 sps:$4 sm:$0xff]  }
  0x5e   : > { %v655_v62 = vcombine.high %v653_v59, %v653_v59  ;;  %1012 = vmatprep.mubr.bf16.mxu0 %v653_v59  ;;  %v1469_v6 = vld [vmem:[%s1768_s30 + $0x190] ss:$8 sps:$4 sm:$0xff]   ;;  %v1470_v7 = vld [vmem:[%s1768_s30 + $0x84] ss:$8 sps:$4 sm:$0xff]   ;;  %v1474_v10 = vld [vmem:[%s1768_s30 + $0x80] ss:$8 sps:$4 sm:$0xff]   ;;  %v654_v12 = vcombine.high %v646_v9, %v646_v9 }
  0x5f   : > { %991 = vmatpush1.bf16.msra.mxu0 %v1414_v23  ;;  %v1472_v8 = vld [vmem:[%s1768_s30 + $0x184] ss:$8 sps:$4 sm:$0xff]   ;;  %v1475_v11 = vld [vmem:[%s1768_s30 + $0x180] ss:$8 sps:$4 sm:$0xff]   ;;  %v1534_v13 = vmov 1983009808  }
  0x60   : > { %1032 = vmatpush1.bf16.msra.mxu1 %v1415_v24  ;;  %992 = vmatprep.subr.bf16.mxu0 %v1416_v25  ;;  %v1066_v14 = vunpack.c.l.s4 %v1534_v13 }
  0x61   : > { %1033 = vmatprep.subr.bf16.mxu1 %v1418_v26  ;;  %1053 = vmatprep.mubr.bf16.mxu1 %v655_v62  ;;  %v565_v26 = vld [vmem:[#allocation2] sm:$0xf] }
  0x62   : > { %v1067_v15 = vunpack.c.0.s8 %v1066_v14 }
  0x63   : > { %993 = vmatpush1.bf16.msra.mxu0 %v1420_v27 }
  0x64   : > { %1034 = vmatpush1.bf16.msra.mxu1 %v1421_v28  ;;  %994 = vmatprep.subr.bf16.mxu0 %v1422_v29  ;;  %v1070_v22 = vsub.s32 %v1067_v15, %v1813_v47 }
  0x65   : > { %1035 = vmatprep.subr.bf16.mxu1 %v1424_v30 }
  0x67   : > { %995 = vmatpush1.bf16.msra.mxu0 %v1426_v31 }
  0x68   : > { %1036 = vmatpush1.bf16.msra.mxu1 %v1427_v32  ;;  %996 = vmatprep.subr.bf16.mxu0 %v1428_v33 }
  0x69   : > { %1037 = vmatprep.subr.bf16.mxu1 %v1430_v34 }
  0x6b   : > { %997 = vmatpush2.bf16.msra.mxu0 %v1432_v35 }
  0x6c   : > { %1038 = vmatpush2.bf16.msra.mxu1 %v1433_v36  ;;  %998 = vmatprep.subr.bf16.mxu0 %v1434_v37 }
  0x6d   : > { %1039 = vmatprep.subr.bf16.mxu1 %v1436_v38 }
  0x6f   : > { %999 = vmatpush2.bf16.msra.mxu0 %v1438_v42 }
  0x70   : > { %1040 = vmatpush2.bf16.msra.mxu1 %v1439_v43  ;;  %1000 = vmatprep.subr.bf16.mxu0 %v1440_v44 }
  0x71   : > { %1041 = vmatprep.subr.bf16.mxu1 %v1442_v45 }
  0x73   : > { %1001 = vmatpush2.bf16.msra.mxu0 %v1444_v48 }
  0x74   : > { %1042 = vmatpush2.bf16.msra.mxu1 %v1445_v49  ;;  %1002 = vmatprep.subr.bf16.mxu0 %v1446_v50 }
  0x75   : > { %1043 = vmatprep.subr.bf16.mxu1 %v1448_v51 }
  0x77   : > { %1003 = vmatpush2.bf16.msra.mxu0 %v1450_v54 }
  0x78   : > { %1044 = vmatpush2.bf16.msra.mxu1 %v1451_v55  ;;  %1004 = vmatprep.subr.bf16.mxu0 %v1452_v57 }
  0x79   : > { %1045 = vmatprep.subr.bf16.mxu1 %v1454_v58 }
  0x7b   : > { %1005 = vmatpush2.bf16.msra.mxu0 %v1456_v60 }
  0x7c   : > { %1046 = vmatpush2.bf16.msra.mxu1 %v1457_v61  ;;  %1006 = vmatprep.subr.bf16.mxu0 %v1458_v63 }
  0x7d   : > { %1047 = vmatprep.subr.bf16.mxu1 %v1460_v0 }
  0x7f   : > { %1007 = vmatpush2.bf16.msra.mxu0 %v1462_v1 }
  0x80   : > { %1048 = vmatpush2.bf16.msra.mxu1 %v1463_v2  ;;  %1008 = vmatprep.subr.bf16.mxu0 %v1464_v3 }
  0x81   : > { %1049 = vmatprep.subr.bf16.mxu1 %v1466_v4 }
  0x83   : > { %1009 = vmatpush2.bf16.msra.mxu0 %v1468_v5 }
  0x84   : > { %1050 = vmatpush2.bf16.msra.mxu1 %v1469_v6  ;;  %1010 = vmatprep.subr.bf16.mxu0 %v1470_v7 }
  0x85   : > { %1051 = vmatprep.subr.bf16.mxu1 %v1472_v8 }
  0x87   : > { %1011 = vmatpush2.bf16.msra.mxu0 %v1474_v10 }
  0x88   : > { %1052 = vmatpush2.bf16.msra.mxu1 %v1475_v11 }
  0x8a   : > { %1013 = vmatmul.mubr.bf16.vlgmr.msra.gmra.mxu0 %v646_v9 }
  0x8b   : > { %1054 = vmatmul.mubr.bf16.vlgmr.msra.gmra.mxu1 %v654_v12 }
 0x14a   : > { %v1014_v16 = vpop.f32.mrf.mxu0 }
 0x14b   : > { %v1055_v17 = vpop.f32.mrf.mxu1 }
 0x14c   : > { %v1016_v18 = vpop.f32.mrf.mxu0  ;;  %v1056_v20 = vadd.f32 %v1055_v17, %v1014_v16 }
 0x14d   : > { %v1057_v19 = vpop.f32.mrf.mxu1 }
 0x14e   : > { %v1058_v21 = vadd.f32 %v1057_v19, %v1016_v18  ;;  %v1018_v23 = vpop.f32.mrf.mxu0 }
 0x14f   : > { %v1059_v24 = vpop.f32.mrf.mxu1 }
 0x150   : > { %v1064_v25 = vcombine.low %v1056_v20, %v1058_v21  ;;  %v1019_v27 = vpop.f32.mrf.mxu0 }
 0x151   : > { %v1060_v28 = vpop.f32.mrf.mxu1 }
 0x152   : > { %v1071_v29 = vrot.slane %v1064_v25, %v1070_v22  ;;  %1078 = sbr.rel (%p1315_p13) target bundleno = 361 (0x169), region = 78 }
 0x154   : > { %v1073_v30 = vadd.f32 %v1071_v29, %v565_v26 }
 0x156   : > { %1074 = vst [vmem:[#allocation2] sm:$0xf] %v1073_v30 }
 0x157   : > { %v1080_v32 = vld [vmem:[%s549_s12] sm:$0x3] }
 0x158   : > { %v1081_v33 = vunpack.c.l.bf16 %v1080_v32 }
 0x15d   : > { %v1079_v31 = vld [vmem:[#allocation2] sm:$0xf] }
 0x15e   : > { %v1082_v34 = vadd.f32 %v1081_v33, %v1079_v31 }
 0x160   : > { %v1090_v35 = vrot.slane %v1082_v34, %v1070_v22 }
 0x162   : > { %v1091_v36 = vcombine.high %v1090_v35, %v1090_v35 }
 0x164   : > { %v1316_v37 = vpack.c.bf16 %v1091_v36, %v1090_v35 }
 0x166   : > { %v1105_v38 = vrot.slane %v1316_v37, %v1820_v52 }
 0x168   : > { %1317 = vst.sshfl [vmem:[%s558_s15] sm:$0x5 pattern:$0x73625140] %v1105_v38 }
 0x169 PF: > { %s13_s18 = sadd.s32 1, %s1530_s18   ;;  %s1885_s12 = smov %s1510_s13 }
 0x16a   : > { %p10_p0 = scmp.ge.s32.totalorder %s13_s18, 20   ;;  %s1886_s13 = smov %s1606_s25 }
 0x16b   : > { %s1887_s14 = smov %s1522_s16  ;;  %s1888_s15 = smov %s1526_s17 }
 0x16c   : > { %s1889_s16 = smov %s1892_s19  ;;  %s1890_s17 = smov %s1896_s20 }
 0x16d   :  { %12 = sbr.rel (!%p10_p0) target bundleno = 4 (0x4), region = 119 }

// kernel: forward.41
= control target key start
LH: loop header
LB: loop body
LE: loop exit
PB: predicated region body
PF: predicated region fallthrough
CT: control target
= control target key end

     0   :  { %v31_v30 = vlaneseq  ;;  %v633_v33 = vmov 857870592   ;;  %s780_s0 = inlined_call_operand.vmem [shape: bf16[2,1,512], index: 0, kind: input, shape index: {}]   ;;  %s781_s1 = inlined_call_operand.vmem [shape: f32[1,1,512], index: 1, kind: input, shape index: {}]   ;;  %s782_s2 = inlined_call_operand.vmem [shape: f32[1,1,512], index: 2, kind: input, shape index: {}]   ;;  %s783_s3 = inlined_call_operand.vmem [shape: bf16[512,10], index: 3, kind: input, shape index: {}]   ;;  %s784_s4 = inlined_call_operand.vmem [shape: f32[1,10], index: 4, kind: input, shape index: {}]   ;;  %s785_s5 = inlined_call_operand.hbm [shape: f32[2,10], index: 5, kind: output, shape index: {}]  }
   0x1   :  { %v579_v0 = vld [vmem:[%s783_s3 + $0x78] sm:$0xff]   ;;  %v583_v4 = vld [vmem:[%s783_s3 + $0x70] sm:$0xff]   ;;  %v587_v8 = vld [vmem:[%s783_s3 + $0x68] sm:$0xff]   ;;  %v29_v34 = vunpack.c.l.s4 %v633_v33 }
   0x2   :  { %v580_v1 = vld [vmem:[%s783_s3 + $0xf8] sm:$0xff]   ;;  %533 = vmatprep.subr.bf16.mxu0 %v579_v0  ;;  %v584_v5 = vld [vmem:[%s783_s3 + $0xf0] sm:$0xff]   ;;  %v588_v9 = vld [vmem:[%s783_s3 + $0xe8] sm:$0xff]   ;;  %v32_v35 = vshrl.u32 %v31_v30, 7 }
   0x3   :  { %v581_v2 = vld [vmem:[%s783_s3 + $0x38] sm:$0xff]   ;;  %555 = vmatprep.subr.bf16.mxu1 %v580_v1  ;;  %v585_v6 = vld [vmem:[%s783_s3 + $0x30] sm:$0xff]   ;;  %v589_v10 = vld [vmem:[%s783_s3 + $0x28] sm:$0xff]  }
   0x4   :  { %v582_v3 = vld [vmem:[%s783_s3 + $0xb8] sm:$0xff]   ;;  %534 = vmatpush3.bf16.msra.mxu0 %v581_v2  ;;  %v586_v7 = vld [vmem:[%s783_s3 + $0xb0] sm:$0xff]   ;;  %v590_v11 = vld [vmem:[%s783_s3 + $0xa8] sm:$0xff]  }
   0x5   :  { %556 = vmatpush3.bf16.msra.mxu1 %v582_v3  ;;  %535 = vmatprep.subr.bf16.mxu0 %v583_v4  ;;  %v591_v12 = vld [vmem:[%s783_s3 + $0x60] sm:$0xff]   ;;  %v595_v16 = vld [vmem:[%s783_s3 + $0x58] sm:$0xff]   ;;  %v599_v20 = vld [vmem:[%s783_s3 + $0x50] sm:$0xff]  }
   0x6   :  { %557 = vmatprep.subr.bf16.mxu1 %v584_v5  ;;  %v592_v13 = vld [vmem:[%s783_s3 + $0xe0] sm:$0xff]   ;;  %v596_v17 = vld [vmem:[%s783_s3 + $0xd8] sm:$0xff]   ;;  %v600_v21 = vld [vmem:[%s783_s3 + $0xd0] sm:$0xff]  }
   0x7   :  { %v593_v14 = vld [vmem:[%s783_s3 + $0x20] sm:$0xff]   ;;  %v597_v18 = vld [vmem:[%s783_s3 + $0x18] sm:$0xff]   ;;  %v601_v22 = vld [vmem:[%s783_s3 + $0x10] sm:$0xff]  }
   0x8   :  { %536 = vmatpush3.bf16.msra.mxu0 %v585_v6  ;;  %v594_v15 = vld [vmem:[%s783_s3 + $0xa0] sm:$0xff]   ;;  %v598_v19 = vld [vmem:[%s783_s3 + $0x98] sm:$0xff]   ;;  %v602_v23 = vld [vmem:[%s783_s3 + $0x90] sm:$0xff]  }
   0x9   :  { %558 = vmatpush3.bf16.msra.mxu1 %v586_v7  ;;  %537 = vmatprep.subr.bf16.mxu0 %v587_v8  ;;  %v603_v24 = vld [vmem:[%s783_s3 + $0x48] sm:$0xff]   ;;  %v607_v28 = vld [vmem:[%s783_s3 + $0x40] sm:$0xff]  }
   0xa   :  { %559 = vmatprep.subr.bf16.mxu1 %v588_v9  ;;  %v604_v25 = vld [vmem:[%s783_s3 + $0xc8] sm:$0xff]   ;;  %v608_v29 = vld [vmem:[%s783_s3 + $0xc0] sm:$0xff]  }
   0xb   :  { %v605_v26 = vld [vmem:[%s783_s3 + $0x8] sm:$0xff]   ;;  %v609_v31 = vld [vmem:[%s783_s3] sm:$0xff]  }
   0xc   :  { %538 = vmatpush3.bf16.msra.mxu0 %v589_v10  ;;  %v606_v27 = vld [vmem:[%s783_s3 + $0x88] sm:$0xff]   ;;  %v610_v32 = vld [vmem:[%s783_s3 + $0x80] sm:$0xff]  }
   0xd   :  { %560 = vmatpush3.bf16.msra.mxu1 %v590_v11  ;;  %539 = vmatprep.subr.bf16.mxu0 %v591_v12 }
   0xe   :  { %561 = vmatprep.subr.bf16.mxu1 %v592_v13 }
  0x10   :  { %540 = vmatpush3.bf16.msra.mxu0 %v593_v14 }
  0x11   :  { %562 = vmatpush3.bf16.msra.mxu1 %v594_v15  ;;  %541 = vmatprep.subr.bf16.mxu0 %v595_v16 }
  0x12   :  { %563 = vmatprep.subr.bf16.mxu1 %v596_v17 }
  0x14   :  { %542 = vmatpush3.bf16.msra.mxu0 %v597_v18 }
  0x15   :  { %564 = vmatpush3.bf16.msra.mxu1 %v598_v19  ;;  %543 = vmatprep.subr.bf16.mxu0 %v599_v20 }
  0x16   :  { %565 = vmatprep.subr.bf16.mxu1 %v600_v21 }
  0x18   :  { %544 = vmatpush3.bf16.msra.mxu0 %v601_v22 }
  0x19   :  { %566 = vmatpush3.bf16.msra.mxu1 %v602_v23  ;;  %545 = vmatprep.subr.bf16.mxu0 %v603_v24 }
  0x1a   :  { %567 = vmatprep.subr.bf16.mxu1 %v604_v25 }
  0x1c   :  { %546 = vmatpush3.bf16.msra.mxu0 %v605_v26 }
  0x1d   :  { %568 = vmatpush3.bf16.msra.mxu1 %v606_v27  ;;  %547 = vmatprep.subr.bf16.mxu0 %v607_v28 }
  0x1e   :  { %569 = vmatprep.subr.bf16.mxu1 %v608_v29 }
  0x20   :  { %548 = vmatpush3.bf16.msra.mxu0 %v609_v31 }
  0x21   :  { %570 = vmatpush3.bf16.msra.mxu1 %v610_v32 }
  0x22   :  { %10 = vsyncpa [#allocation3], 0  ;;  %v530_v36 = vld [vmem:[%s780_s0] sm:$0xff]   ;;  %v30_v37 = vunpack.c.0.s8 %v29_v34  ;;  %v62_v49 = vsub.s32 2, %v32_v35  ;;  %v70_v50 = vsub.s32 6, %v32_v35  ;;  %v58_v51 = vsub.s32 0, %v32_v35 }
  0x23   :  { %v26_v38 = vld [vmem:[%s781_s1] sm:$0xf]  ;;  %v531_v40 = vunpack.c.l.bf16 %v530_v36  ;;  %v532_v41 = vunpack.c.h.bf16 %v530_v36  ;;  %v66_v52 = vsub.s32 4, %v32_v35  ;;  %vm192_vm0 = vcmask 1041409  }
  0x24   :  { %v38_v39 = vld [vmem:[%s782_s2] sm:$0xf]  ;;  %v33_v42 = vsub.s32 %v30_v37, %v32_v35  ;;  %s634_s2 = smov [#allocation2]   ;;  %vm480_vm1 = vcmask 74752  }
  0x25   :  { %v496_v29 = vld [vmem:[%s784_s4] ss:$0 sm:$0xff]  ;;  %s488_s3 = sshll.u32 %s634_s2, 4  ;;  %s489_s3 = int_to_ptr.vmem [resolvable:$true] %s488_s3 }
  0x26   :  { %v34_v43 = vrot.slane %v26_v38, %v33_v42  ;;  %v46_v44 = vrot.slane %v38_v39, %v33_v42  ;;  %s611_s13 = scalar_lea.vmem %s489_s3, 32  ;;  %p616_p1 = scmp.lt.s32.totalorder %s489_s3, %s489_s3 }
  0x27   :  { %p612_p0 = scmp.ne.s32.totalorder %s489_s3, %s611_s13  ;;  %p617_p2 = scmp.lt.s32.totalorder %s611_s13, %s611_s13 }
  0x28   :  { %v36_v45 = vmul.f32 %v531_v40, %v34_v43  ;;  %v37_v46 = vmul.f32 %v532_v41, %v34_v43 }
  0x29   :  { %p618_p3 = por %p617_p2, %p616_p1 }
  0x2a   :  { %v48_v47 = vadd.f32 %v46_v44, %v36_v45  ;;  %v49_v48 = vadd.f32 %v46_v44, %v37_v46 }
  0x2b   :  { %p619_p4 = pnand %p618_p3, %p612_p0 }
  0x2c   :  { %v50_v53 = vmax.f32 %v48_v47, 0.0  ;;  %v51_v54 = vmax.f32 %v49_v48, 0.0 }
  0x2e   :  { %v63_v55 = vrot.slane %v50_v53, %v62_v49  ;;  %v79_v56 = vrot.slane %v51_v54, %v62_v49  ;;  %v71_v57 = vrot.slane %v50_v53, %v70_v50  ;;  %v87_v58 = vrot.slane %v51_v54, %v70_v50 }
  0x2f   :  { %v59_v59 = vrot.slane %v50_v53, %v58_v51  ;;  %v75_v60 = vrot.slane %v51_v54, %v58_v51  ;;  %v67_v61 = vrot.slane %v50_v53, %v66_v52  ;;  %v83_v62 = vrot.slane %v51_v54, %v66_v52 }
  0x30   :  { %v97_v63 = vpack.c.bf16 %v63_v55, %v63_v55  ;;  %v101_v0 = vpack.c.bf16 %v79_v56, %v79_v56  ;;  %v99_v1 = vpack.c.bf16 %v71_v57, %v71_v57  ;;  %v103_v2 = vpack.c.bf16 %v87_v58, %v87_v58 }
  0x31   :  { %v96_v3 = vpack.c.bf16 %v59_v59, %v59_v59  ;;  %v100_v4 = vpack.c.bf16 %v75_v60, %v75_v60  ;;  %v98_v5 = vpack.c.bf16 %v67_v61, %v67_v61  ;;  %v102_v6 = vpack.c.bf16 %v83_v62, %v83_v62 }
  0x32   :  { %v184_v7 = vunpack.c.l.b16 %v97_v63  ;;  %v188_v8 = vunpack.c.l.b16 %v101_v0  ;;  %v186_v9 = vunpack.c.l.b16 %v99_v1  ;;  %v190_v10 = vunpack.c.l.b16 %v103_v2 }
  0x33   :  { %v183_v11 = vunpack.c.l.b16 %v96_v3  ;;  %v187_v12 = vunpack.c.l.b16 %v100_v4  ;;  %v185_v13 = vunpack.c.l.b16 %v98_v5  ;;  %v189_v14 = vunpack.c.l.b16 %v102_v6 }
  0x34   :  { %v194_v15 = vrot.slane %v188_v8, 7  ;;  %v198_v16 = vrot.slane %v190_v10, 7 }
  0x35   :  { %v191_v17 = vrot.slane %v187_v12, 7  ;;  %v196_v18 = vrot.slane %v189_v14, 7 }
  0x36   :  { %v195_v19 = vsel %vm192_vm0, %v194_v15, %v184_v7  ;;  %v199_v20 = vsel %vm192_vm0, %v198_v16, %v186_v9 }
  0x37   :  { %v201_v21 = vpack.c.b16 %v195_v19, %v195_v19  ;;  %v203_v22 = vpack.c.b16 %v199_v20, %v199_v20  ;;  %v193_v23 = vsel %vm192_vm0, %v191_v17, %v183_v11  ;;  %v197_v24 = vsel %vm192_vm0, %v196_v18, %v185_v13 }
  0x38   :  { %v200_v25 = vpack.c.b16 %v193_v23, %v193_v23  ;;  %v202_v26 = vpack.c.b16 %v197_v24, %v197_v24 }
  0x39   :  { %432 = vmatprep.mubr.bf16.mxu0 %v201_v21  ;;  %472 = vmatprep.mubr.bf16.mxu1 %v203_v22 }
  0x3a   :  { %433 = vmatmul.mubr.bf16.vlgmr.msra.gmra.mxu0 %v200_v25  ;;  %473 = vmatmul.mubr.bf16.vlgmr.msra.gmra.mxu1 %v202_v26 }
  0xfa   :  { %v549_v27 = vpop.f32.mrf.mxu0  ;;  %v571_v28 = vpop.f32.mrf.mxu1 }
  0xfc   :  { %v550_v30 = vpop.f32.mrf.mxu0  ;;  %v572_v31 = vpop.f32.mrf.mxu1 }
  0xfd   :  { %v551_v32 = vadd.f32 %v550_v30, %v549_v27  ;;  %v573_v36 = vadd.f32 %v572_v31, %v571_v28 }
  0xfe   :  { %v552_v33 = vpop.f32.mrf.mxu0  ;;  %v574_v34 = vpop.f32.mrf.mxu1 }
  0xff   :  { %v435_v35 = vadd.f32 %v551_v32, %v496_v29 }
 0x100   :  { %v553_v37 = vpop.f32.mrf.mxu0  ;;  %v575_v38 = vpop.f32.mrf.mxu1 }
 0x101   :  { %v475_v39 = vadd.f32 %v573_v36, %v435_v35 }
 0x103   :  { %481 = vst.msk [vmem:[#allocation2] sm:$0x3] %vm480_vm1, %v475_v39 }
 0x104   :  { %622 = shalt.err (!%p619_p4)
}
 0x105   :  { %491 = dma.vmem_to_hbm [thread:$0]  %s489_s3, 32, %s785_s5, [#allocation3]  }
 0x106   :  { %631 = dma.done.wait [#allocation3], 32  }
 0x107   :  { %632 = vsyncadd [#allocation3], 4294967264 }
 0x108   :  { %495 = vsyncpa [#allocation3], 1 }

</bundles_post_ra>
